<compile_context>
chip_gen: v5e
topology: v5e:2x2
jax: 0.10.0
libtpu: 0.0.40
codegen_flags: <defaults>
</compile_context>

<pallas_src>
import jax
import jax.numpy as jnp
from jax.experimental import pallas as pl
from jax.experimental.pallas import tpu as pltpu

_BN_EPS = 1e-5


def _bn_train(h, gamma, beta):
    """BatchNorm1d (training mode) on (T, B, C): biased per-channel stats over (T, B)."""
    n = h.shape[0] * h.shape[1]
    mean = jnp.sum(jnp.sum(h, axis=0, keepdims=True), axis=1, keepdims=True) / n
    d = h - mean
    var = jnp.sum(jnp.sum(d * d, axis=0, keepdims=True), axis=1, keepdims=True) / n
    return d * jax.lax.rsqrt(var + _BN_EPS) * gamma + beta


def _fused_kernel(*refs):
    (x_ref,
     w1_ref, b1_ref, g1_ref, bt1_ref,
     w2_ref, b2_ref, g2_ref, bt2_ref) = refs[:9]
    mlp = refs[9:25]                                   # 16 refs: (W, b) x 8
    (wt1_ref, bc1_ref, g3_ref, bt3_ref, wt2_ref, bc2_ref) = refs[25:31]
    out_ref = refs[31]                                 # (29, B)
    acc_ref = refs[32]                                 # scratch (26, B, 16)

    f32 = jnp.float32
    bf16 = jnp.bfloat16
    B = x_ref.shape[1]

    # ----------------------------- enconv ----------------------------------
    # Conv1d(1, 16, 4): Cin == 1, so each tap is a broadcast multiply (VPU).
    x = x_ref[...]                                     # (29, B, 1)
    w1 = w1_ref[...]                                   # (4, 1, 16)  hoisted load
    a1 = jnp.zeros((26, B, 16), f32)
    for k in range(4):
        a1 = a1 + x[k:k + 26] * w1[k]                  # (26,B,1)*(1,16) -> (26,B,16)
    h1 = jnp.tanh(_bn_train(a1 + b1_ref[...], g1_ref[...], bt1_ref[...]))

    # Conv1d(16, 32, 4): four time-batched MXU matmuls.
    w2 = w2_ref[...]                                   # (4, 16, 32)
    a2 = jnp.zeros((23, B, 32), f32)
    for k in range(4):
        a2 = a2 + jnp.einsum('tbc,tco->tbo', h1[k:k + 23],
                             jnp.broadcast_to(w2[k], (23, 16, 32)),
                             preferred_element_type=f32)
    h2 = jnp.tanh(_bn_train(a2 + b2_ref[...], g2_ref[...], bt2_ref[...]))   # (23,B,32)

    # ------------------ encoder: 736 -> 64 -> 24 -> 16 -> 8 -----------------
    # Flatten is folded into the pre-permuted (23, 32, 64) weight: one batched
    # contraction over time + a leading-dim sum (bf16 operands, f32 accum).
    z = jnp.einsum('tbc,tcd->tbd', h2.astype(bf16), mlp[0][...],
                   preferred_element_type=f32)         # (23, B, 64)
    h = jnp.maximum(jnp.sum(z, axis=0) + mlp[1][...], 0.0)                  # (B, 64)
    for i in (1, 2):
        h = jnp.maximum(jnp.dot(h, mlp[2 * i][...], preferred_element_type=f32)
                        + mlp[2 * i + 1][...], 0.0)
    h = jnp.dot(h, mlp[6][...], preferred_element_type=f32) + mlp[7][...]   # (B, 8)

    # ------------------ decoder: 8 -> 16 -> 24 -> 64 -> 736 -----------------
    for i in (4, 5, 6):
        h = jnp.maximum(jnp.dot(h, mlp[2 * i][...], preferred_element_type=f32)
                        + mlp[2 * i + 1][...], 0.0)                         # (B, 64)
    # Unflatten folded into the pre-permuted (23, 64, 32) weight / (23,1,32) bias.
    hb = jnp.broadcast_to(h.astype(bf16), (23, B, 64))
    de = jnp.tanh(jnp.einsum('tbd,tdc->tbc', hb, mlp[14][...],
                             preferred_element_type=f32) + mlp[15][...])    # (23,B,32)

    # ----------------------------- deconv -----------------------------------
    # ConvTranspose1d(32, 16, 4): direct scatter, out[i+k] += de[i] @ Wt1[k].
    wt1 = wt1_ref[...]                                 # (4, 32, 16)
    acc_ref[...] = jnp.zeros_like(acc_ref)
    for k in range(4):
        ck = jnp.einsum('tbc,tco->tbo', de,
                        jnp.broadcast_to(wt1[k], (23, 32, 16)),
                        preferred_element_type=f32)    # (23, B, 16)
        acc_ref[pl.ds(k, 23), :, :] = acc_ref[pl.ds(k, 23), :, :] + ck
    h3 = jnp.tanh(_bn_train(acc_ref[...] + bc1_ref[...],
                            g3_ref[...], bt3_ref[...]))                     # (26,B,16)

    # ConvTranspose1d(16, 1, 4) + Sigmoid: out[i+k] += sum_c h3[i,:,c] * Wt2[k,c].
    wt2 = wt2_ref[...]                                 # (4, 1, 16)
    out_ref[...] = jnp.zeros_like(out_ref)             # (29, B), used as accumulator
    for k in range(4):
        dk = jnp.sum(h3 * wt2[k], axis=-1)             # lane reduce -> (26, B)
        out_ref[pl.ds(k, 26), :] = out_ref[pl.ds(k, 26), :] + dk
    out_ref[...] = jax.nn.sigmoid(out_ref[...] + bc2_ref[...])


# -------------------------------- wrapper -----------------------------------
def _vmem():
    return pl.BlockSpec(memory_space=pltpu.MemorySpace.VMEM)


def autoencoder_forward(x, params):
    """x: (B, 1, 29) float32 in PyTorch NCL layout. Returns (B, 1, 29)."""
    B = x.shape[0]
    f32 = jnp.float32
    x_t = jnp.transpose(x, (2, 0, 1)).astype(f32)      # (29, B, 1): time-major

    inputs = (x_t,
              params['w1'], params['b1'], params['g1'], params['bt1'],
              params['w2'], params['b2'], params['g2'], params['bt2'],
              *params['mlp'],
              params['wt1'], params['bc1'], params['g3'], params['bt3'],
              params['wt2'], params['bc2'])

    bytes_accessed = sum(int(a.size) * a.dtype.itemsize for a in inputs) + 29 * B * 4
    flops = 2 * B * (26 * 4 * 16 + 23 * 4 * 16 * 32
                     + 736 * 64 + 64 * 24 + 24 * 16 + 16 * 8
                     + 8 * 16 + 16 * 24 + 24 * 64 + 64 * 736
                     + 23 * 4 * 32 * 16 + 26 * 4 * 16)
    transcendentals = B * (26 * 16 + 23 * 32 + 23 * 32 + 26 * 16 + 29)

    out = pl.pallas_call(
        _fused_kernel,
        out_shape=jax.ShapeDtypeStruct((29, B), f32),
        in_specs=[_vmem() for _ in inputs],
        out_specs=_vmem(),
        scratch_shapes=[pltpu.VMEM((26, B, 16), f32)],
        compiler_params=pltpu.CompilerParams(vmem_limit_bytes=32 * 1024 * 1024),
        cost_estimate=pl.CostEstimate(flops=int(flops),
                                      transcendentals=int(transcendentals),
                                      bytes_accessed=int(bytes_accessed)),
    )(*inputs)

    return jnp.transpose(out, (1, 0)).reshape(B, 1, 29)


# --------------------------- deterministic params ---------------------------
def init_params(key):
    f32 = jnp.float32
    keys = iter(jax.random.split(key, 40))

    def unif(shape, fan_in):
        b = 1.0 / (fan_in ** 0.5)
        return jax.random.uniform(next(keys), shape, f32, -b, b)

    p = {}
    # Conv1d(1, 16, 4): PyTorch weight (16,1,4) -> (k, cin, cout)
    p['w1'] = jnp.transpose(unif((16, 1, 4), 1 * 4), (2, 1, 0))        # (4, 1, 16)
    p['b1'] = unif((1, 16), 1 * 4)
    p['g1'] = jnp.ones((1, 16), f32)
    p['bt1'] = jnp.zeros((1, 16), f32)
    # Conv1d(16, 32, 4)
    p['w2'] = jnp.transpose(unif((32, 16, 4), 16 * 4), (2, 1, 0))      # (4, 16, 32)
    p['b2'] = unif((1, 32), 16 * 4)
    p['g2'] = jnp.ones((1, 32), f32)
    p['bt2'] = jnp.zeros((1, 32), f32)

    # MLP: PyTorch Linear weight is (out, in).  The two 736-sized layers are
    # pre-permuted so the channel-major flatten/unflatten is folded in:
    #   PyTorch flat index = c*23 + t   <->   time-major (t, c) layout.
    mlp = []
    we0 = unif((64, 736), 736).reshape(64, 32, 23)                      # (d, c, t)
    mlp.append(jnp.transpose(we0, (2, 1, 0)).astype(jnp.bfloat16))      # (23, 32, 64)
    mlp.append(unif((1, 64), 736))
    for (din, dout) in ((64, 24), (24, 16), (16, 8), (8, 16), (16, 24), (24, 64)):
        mlp.append(jnp.transpose(unif((dout, din), din), (1, 0)))       # (din, dout)
        mlp.append(unif((1, dout), din))
    wd3 = unif((736, 64), 64).reshape(32, 23, 64)                       # (c, t, d)
    mlp.append(jnp.transpose(wd3, (1, 2, 0)).astype(jnp.bfloat16))      # (23, 64, 32)
    bd3 = unif((736,), 64).reshape(32, 23)                              # (c, t)
    mlp.append(jnp.transpose(bd3, (1, 0)).reshape(23, 1, 32))           # (23, 1, 32)
    p['mlp'] = mlp

    # ConvTranspose1d(32, 16, 4): weight (cin=32, cout=16, k) -> (k, cin, cout), no flip
    p['wt1'] = jnp.transpose(unif((32, 16, 4), 32 * 4), (2, 0, 1))      # (4, 32, 16)
    p['bc1'] = unif((1, 16), 32 * 4)
    p['g3'] = jnp.ones((1, 16), f32)
    p['bt3'] = jnp.zeros((1, 16), f32)
    # ConvTranspose1d(16, 1, 4): weight (cin=16, cout=1, k) -> (k, 1, cin), no flip
    p['wt2'] = jnp.transpose(unif((16, 1, 4), 16 * 4), (2, 1, 0))       # (4, 1, 16)
    p['bc2'] = unif((1, 1), 16 * 4)
    return p


if __name__ == "__main__":
    key = jax.random.PRNGKey(0)
    pkey, xkey = jax.random.split(key)
    params = init_params(pkey)
    # Input consistent with the module: (B, 1, 29) NCL.
    x = jax.random.uniform(xkey, (2, 1, 29), jnp.float32)

    out = jax.jit(autoencoder_forward)(x, params)
    out = jax.block_until_ready(out)

    assert out.shape == (2, 1, 29), out.shape
    assert bool(jnp.all(jnp.isfinite(out)))
    assert bool(jnp.all((out >= 0.0) & (out <= 1.0)))  # final Sigmoid range
    print("KERNEL_OK")
</pallas_src>

<mosaic_0001>
module attributes {stable_mosaic.version = 11 : i64} {
  func.func @_fused_kernel(%arg0: memref<29x2x1xf32, #tpu.memory_space<vmem>>, %arg1: memref<4x1x16xf32, #tpu.memory_space<vmem>>, %arg2: memref<1x16xf32, #tpu.memory_space<vmem>>, %arg3: memref<1x16xf32, #tpu.memory_space<vmem>>, %arg4: memref<1x16xf32, #tpu.memory_space<vmem>>, %arg5: memref<4x16x32xf32, #tpu.memory_space<vmem>>, %arg6: memref<1x32xf32, #tpu.memory_space<vmem>>, %arg7: memref<1x32xf32, #tpu.memory_space<vmem>>, %arg8: memref<1x32xf32, #tpu.memory_space<vmem>>, %arg9: memref<23x32x64xbf16, #tpu.memory_space<vmem>>, %arg10: memref<1x64xf32, #tpu.memory_space<vmem>>, %arg11: memref<64x24xf32, #tpu.memory_space<vmem>>, %arg12: memref<1x24xf32, #tpu.memory_space<vmem>>, %arg13: memref<24x16xf32, #tpu.memory_space<vmem>>, %arg14: memref<1x16xf32, #tpu.memory_space<vmem>>, %arg15: memref<16x8xf32, #tpu.memory_space<vmem>>, %arg16: memref<1x8xf32, #tpu.memory_space<vmem>>, %arg17: memref<8x16xf32, #tpu.memory_space<vmem>>, %arg18: memref<1x16xf32, #tpu.memory_space<vmem>>, %arg19: memref<16x24xf32, #tpu.memory_space<vmem>>, %arg20: memref<1x24xf32, #tpu.memory_space<vmem>>, %arg21: memref<24x64xf32, #tpu.memory_space<vmem>>, %arg22: memref<1x64xf32, #tpu.memory_space<vmem>>, %arg23: memref<23x64x32xbf16, #tpu.memory_space<vmem>>, %arg24: memref<23x1x32xf32, #tpu.memory_space<vmem>>, %arg25: memref<4x32x16xf32, #tpu.memory_space<vmem>>, %arg26: memref<1x16xf32, #tpu.memory_space<vmem>>, %arg27: memref<1x16xf32, #tpu.memory_space<vmem>>, %arg28: memref<1x16xf32, #tpu.memory_space<vmem>>, %arg29: memref<4x1x16xf32, #tpu.memory_space<vmem>>, %arg30: memref<1x1xf32, #tpu.memory_space<vmem>>, %arg31: memref<29x2xf32, #tpu.memory_space<vmem>>, %arg32: memref<26x2x16xf32, #tpu.memory_space<vmem>>) attributes {dimension_semantics = [], scalar_prefetch = 0 : i64, scratch_operands = 1 : i64, tpu.core_type = #tpu.core_type<tc>} {
    %c0 = arith.constant 0 : index
    %c0_0 = arith.constant 0 : index
    %c0_1 = arith.constant 0 : index
    %0 = vector.load %arg0[%c0, %c0_0, %c0_1] : memref<29x2x1xf32, #tpu.memory_space<vmem>>, vector<29x2x1xf32>
    %c0_2 = arith.constant 0 : index
    %c0_3 = arith.constant 0 : index
    %c0_4 = arith.constant 0 : index
    %1 = vector.load %arg1[%c0_2, %c0_3, %c0_4] : memref<4x1x16xf32, #tpu.memory_space<vmem>>, vector<4x1x16xf32>
    %cst = arith.constant 0.000000e+00 : f32
    %2 = vector.broadcast %cst : f32 to vector<26x2x16xf32>
    %3 = vector.extract_strided_slice %0 {offsets = [0, 0, 0], sizes = [26, 2, 1], strides = [1, 1, 1]} : vector<29x2x1xf32> to vector<26x2x1xf32>
    %4 = vector.extract_strided_slice %1 {offsets = [0, 0, 0], sizes = [1, 1, 16], strides = [1, 1, 1]} : vector<4x1x16xf32> to vector<1x1x16xf32>
    %5 = vector.shape_cast %4 : vector<1x1x16xf32> to vector<1x16xf32>
    %6 = vector.shape_cast %5 : vector<1x16xf32> to vector<1x1x16xf32>
    %7 = vector.broadcast %3 : vector<26x2x1xf32> to vector<26x2x16xf32>
    %8 = vector.broadcast %6 : vector<1x1x16xf32> to vector<26x2x16xf32>
    %9 = arith.mulf %7, %8 : vector<26x2x16xf32>
    %10 = arith.addf %2, %9 : vector<26x2x16xf32>
    %11 = vector.extract_strided_slice %0 {offsets = [1, 0, 0], sizes = [26, 2, 1], strides = [1, 1, 1]} : vector<29x2x1xf32> to vector<26x2x1xf32>
    %12 = vector.extract_strided_slice %1 {offsets = [1, 0, 0], sizes = [1, 1, 16], strides = [1, 1, 1]} : vector<4x1x16xf32> to vector<1x1x16xf32>
    %13 = vector.shape_cast %12 : vector<1x1x16xf32> to vector<1x16xf32>
    %14 = vector.shape_cast %13 : vector<1x16xf32> to vector<1x1x16xf32>
    %15 = vector.broadcast %11 : vector<26x2x1xf32> to vector<26x2x16xf32>
    %16 = vector.broadcast %14 : vector<1x1x16xf32> to vector<26x2x16xf32>
    %17 = arith.mulf %15, %16 : vector<26x2x16xf32>
    %18 = arith.addf %10, %17 : vector<26x2x16xf32>
    %19 = vector.extract_strided_slice %0 {offsets = [2, 0, 0], sizes = [26, 2, 1], strides = [1, 1, 1]} : vector<29x2x1xf32> to vector<26x2x1xf32>
    %20 = vector.extract_strided_slice %1 {offsets = [2, 0, 0], sizes = [1, 1, 16], strides = [1, 1, 1]} : vector<4x1x16xf32> to vector<1x1x16xf32>
    %21 = vector.shape_cast %20 : vector<1x1x16xf32> to vector<1x16xf32>
    %22 = vector.shape_cast %21 : vector<1x16xf32> to vector<1x1x16xf32>
    %23 = vector.broadcast %19 : vector<26x2x1xf32> to vector<26x2x16xf32>
    %24 = vector.broadcast %22 : vector<1x1x16xf32> to vector<26x2x16xf32>
    %25 = arith.mulf %23, %24 : vector<26x2x16xf32>
    %26 = arith.addf %18, %25 : vector<26x2x16xf32>
    %27 = vector.extract_strided_slice %0 {offsets = [3, 0, 0], sizes = [26, 2, 1], strides = [1, 1, 1]} : vector<29x2x1xf32> to vector<26x2x1xf32>
    %28 = vector.extract_strided_slice %1 {offsets = [3, 0, 0], sizes = [1, 1, 16], strides = [1, 1, 1]} : vector<4x1x16xf32> to vector<1x1x16xf32>
    %29 = vector.shape_cast %28 : vector<1x1x16xf32> to vector<1x16xf32>
    %30 = vector.shape_cast %29 : vector<1x16xf32> to vector<1x1x16xf32>
    %31 = vector.broadcast %27 : vector<26x2x1xf32> to vector<26x2x16xf32>
    %32 = vector.broadcast %30 : vector<1x1x16xf32> to vector<26x2x16xf32>
    %33 = arith.mulf %31, %32 : vector<26x2x16xf32>
    %34 = arith.addf %26, %33 : vector<26x2x16xf32>
    %c0_5 = arith.constant 0 : index
    %c0_6 = arith.constant 0 : index
    %35 = vector.load %arg2[%c0_5, %c0_6] : memref<1x16xf32, #tpu.memory_space<vmem>>, vector<1x16xf32>
    %36 = vector.shape_cast %35 : vector<1x16xf32> to vector<1x1x16xf32>
    %37 = vector.broadcast %36 : vector<1x1x16xf32> to vector<26x2x16xf32>
    %38 = arith.addf %34, %37 : vector<26x2x16xf32>
    %c0_7 = arith.constant 0 : index
    %c0_8 = arith.constant 0 : index
    %39 = vector.load %arg3[%c0_7, %c0_8] : memref<1x16xf32, #tpu.memory_space<vmem>>, vector<1x16xf32>
    %c0_9 = arith.constant 0 : index
    %c0_10 = arith.constant 0 : index
    %40 = vector.load %arg4[%c0_9, %c0_10] : memref<1x16xf32, #tpu.memory_space<vmem>>, vector<1x16xf32>
    %cst_11 = arith.constant dense<0.000000e+00> : vector<2x16xf32>
    %41 = vector.multi_reduction <add>, %38, %cst_11 [0] : vector<26x2x16xf32> to vector<2x16xf32>
    %42 = vector.shape_cast %41 : vector<2x16xf32> to vector<1x2x16xf32>
    %cst_12 = arith.constant dense<0.000000e+00> : vector<1x16xf32>
    %43 = vector.multi_reduction <add>, %42, %cst_12 [1] : vector<1x2x16xf32> to vector<1x16xf32>
    %44 = vector.shape_cast %43 : vector<1x16xf32> to vector<1x1x16xf32>
    %cst_13 = arith.constant 5.200000e+01 : f32
    %45 = vector.broadcast %cst_13 : f32 to vector<1x1x16xf32>
    %46 = arith.divf %44, %45 : vector<1x1x16xf32>
    %47 = vector.broadcast %46 : vector<1x1x16xf32> to vector<26x2x16xf32>
    %48 = arith.subf %38, %47 : vector<26x2x16xf32>
    %49 = arith.mulf %48, %48 : vector<26x2x16xf32>
    %cst_14 = arith.constant dense<0.000000e+00> : vector<2x16xf32>
    %50 = vector.multi_reduction <add>, %49, %cst_14 [0] : vector<26x2x16xf32> to vector<2x16xf32>
    %51 = vector.shape_cast %50 : vector<2x16xf32> to vector<1x2x16xf32>
    %cst_15 = arith.constant dense<0.000000e+00> : vector<1x16xf32>
    %52 = vector.multi_reduction <add>, %51, %cst_15 [1] : vector<1x2x16xf32> to vector<1x16xf32>
    %53 = vector.shape_cast %52 : vector<1x16xf32> to vector<1x1x16xf32>
    %cst_16 = arith.constant 5.200000e+01 : f32
    %54 = vector.broadcast %cst_16 : f32 to vector<1x1x16xf32>
    %55 = arith.divf %53, %54 : vector<1x1x16xf32>
    %cst_17 = arith.constant 9.99999974E-6 : f32
    %56 = vector.broadcast %cst_17 : f32 to vector<1x1x16xf32>
    %57 = arith.addf %55, %56 : vector<1x1x16xf32>
    %58 = math.rsqrt %57 : vector<1x1x16xf32>
    %59 = vector.broadcast %58 : vector<1x1x16xf32> to vector<26x2x16xf32>
    %60 = arith.mulf %48, %59 : vector<26x2x16xf32>
    %61 = vector.shape_cast %39 : vector<1x16xf32> to vector<1x1x16xf32>
    %62 = vector.broadcast %61 : vector<1x1x16xf32> to vector<26x2x16xf32>
    %63 = arith.mulf %60, %62 : vector<26x2x16xf32>
    %64 = vector.shape_cast %40 : vector<1x16xf32> to vector<1x1x16xf32>
    %65 = vector.broadcast %64 : vector<1x1x16xf32> to vector<26x2x16xf32>
    %66 = arith.addf %63, %65 : vector<26x2x16xf32>
    %67 = math.tanh %66 : vector<26x2x16xf32>
    %c0_18 = arith.constant 0 : index
    %c0_19 = arith.constant 0 : index
    %c0_20 = arith.constant 0 : index
    %68 = vector.load %arg5[%c0_18, %c0_19, %c0_20] : memref<4x16x32xf32, #tpu.memory_space<vmem>>, vector<4x16x32xf32>
    %cst_21 = arith.constant 0.000000e+00 : f32
    %69 = vector.broadcast %cst_21 : f32 to vector<23x2x32xf32>
    %70 = vector.extract_strided_slice %67 {offsets = [0, 0, 0], sizes = [23, 2, 16], strides = [1, 1, 1]} : vector<26x2x16xf32> to vector<23x2x16xf32>
    %71 = vector.extract_strided_slice %68 {offsets = [0, 0, 0], sizes = [1, 16, 32], strides = [1, 1, 1]} : vector<4x16x32xf32> to vector<1x16x32xf32>
    %72 = vector.shape_cast %71 : vector<1x16x32xf32> to vector<16x32xf32>
    %73 = vector.shape_cast %72 : vector<16x32xf32> to vector<1x16x32xf32>
    %74 = vector.broadcast %73 : vector<1x16x32xf32> to vector<23x16x32xf32>
    "tpu.trace_start"() <{level = 10 : i32, message = "tbc,tco->tbo"}> : () -> ()
    %cst_22 = arith.constant dense<0.000000e+00> : vector<23x2x32xf32>
    %75 = tpu.matmul %70, %74, %cst_22 {dimension_numbers = #tpu.dot_dimension_numbers<[2], [1], [1], [2], [0, 0, 0, 1, 1, 2], [0], [0]>} : vector<23x2x16xf32>, vector<23x16x32xf32>, vector<23x2x32xf32> -> vector<23x2x32xf32>
    "tpu.trace_stop"() : () -> ()
    %76 = arith.addf %69, %75 : vector<23x2x32xf32>
    %77 = vector.extract_strided_slice %67 {offsets = [1, 0, 0], sizes = [23, 2, 16], strides = [1, 1, 1]} : vector<26x2x16xf32> to vector<23x2x16xf32>
    %78 = vector.extract_strided_slice %68 {offsets = [1, 0, 0], sizes = [1, 16, 32], strides = [1, 1, 1]} : vector<4x16x32xf32> to vector<1x16x32xf32>
    %79 = vector.shape_cast %78 : vector<1x16x32xf32> to vector<16x32xf32>
    %80 = vector.shape_cast %79 : vector<16x32xf32> to vector<1x16x32xf32>
    %81 = vector.broadcast %80 : vector<1x16x32xf32> to vector<23x16x32xf32>
    "tpu.trace_start"() <{level = 10 : i32, message = "tbc,tco->tbo"}> : () -> ()
    %cst_23 = arith.constant dense<0.000000e+00> : vector<23x2x32xf32>
    %82 = tpu.matmul %77, %81, %cst_23 {dimension_numbers = #tpu.dot_dimension_numbers<[2], [1], [1], [2], [0, 0, 0, 1, 1, 2], [0], [0]>} : vector<23x2x16xf32>, vector<23x16x32xf32>, vector<23x2x32xf32> -> vector<23x2x32xf32>
    "tpu.trace_stop"() : () -> ()
    %83 = arith.addf %76, %82 : vector<23x2x32xf32>
    %84 = vector.extract_strided_slice %67 {offsets = [2, 0, 0], sizes = [23, 2, 16], strides = [1, 1, 1]} : vector<26x2x16xf32> to vector<23x2x16xf32>
    %85 = vector.extract_strided_slice %68 {offsets = [2, 0, 0], sizes = [1, 16, 32], strides = [1, 1, 1]} : vector<4x16x32xf32> to vector<1x16x32xf32>
    %86 = vector.shape_cast %85 : vector<1x16x32xf32> to vector<16x32xf32>
    %87 = vector.shape_cast %86 : vector<16x32xf32> to vector<1x16x32xf32>
    %88 = vector.broadcast %87 : vector<1x16x32xf32> to vector<23x16x32xf32>
    "tpu.trace_start"() <{level = 10 : i32, message = "tbc,tco->tbo"}> : () -> ()
    %cst_24 = arith.constant dense<0.000000e+00> : vector<23x2x32xf32>
    %89 = tpu.matmul %84, %88, %cst_24 {dimension_numbers = #tpu.dot_dimension_numbers<[2], [1], [1], [2], [0, 0, 0, 1, 1, 2], [0], [0]>} : vector<23x2x16xf32>, vector<23x16x32xf32>, vector<23x2x32xf32> -> vector<23x2x32xf32>
    "tpu.trace_stop"() : () -> ()
    %90 = arith.addf %83, %89 : vector<23x2x32xf32>
    %91 = vector.extract_strided_slice %67 {offsets = [3, 0, 0], sizes = [23, 2, 16], strides = [1, 1, 1]} : vector<26x2x16xf32> to vector<23x2x16xf32>
    %92 = vector.extract_strided_slice %68 {offsets = [3, 0, 0], sizes = [1, 16, 32], strides = [1, 1, 1]} : vector<4x16x32xf32> to vector<1x16x32xf32>
    %93 = vector.shape_cast %92 : vector<1x16x32xf32> to vector<16x32xf32>
    %94 = vector.shape_cast %93 : vector<16x32xf32> to vector<1x16x32xf32>
    %95 = vector.broadcast %94 : vector<1x16x32xf32> to vector<23x16x32xf32>
    "tpu.trace_start"() <{level = 10 : i32, message = "tbc,tco->tbo"}> : () -> ()
    %cst_25 = arith.constant dense<0.000000e+00> : vector<23x2x32xf32>
    %96 = tpu.matmul %91, %95, %cst_25 {dimension_numbers = #tpu.dot_dimension_numbers<[2], [1], [1], [2], [0, 0, 0, 1, 1, 2], [0], [0]>} : vector<23x2x16xf32>, vector<23x16x32xf32>, vector<23x2x32xf32> -> vector<23x2x32xf32>
    "tpu.trace_stop"() : () -> ()
    %97 = arith.addf %90, %96 : vector<23x2x32xf32>
    %c0_26 = arith.constant 0 : index
    %c0_27 = arith.constant 0 : index
    %98 = vector.load %arg6[%c0_26, %c0_27] : memref<1x32xf32, #tpu.memory_space<vmem>>, vector<1x32xf32>
    %99 = vector.shape_cast %98 : vector<1x32xf32> to vector<1x1x32xf32>
    %100 = vector.broadcast %99 : vector<1x1x32xf32> to vector<23x2x32xf32>
    %101 = arith.addf %97, %100 : vector<23x2x32xf32>
    %c0_28 = arith.constant 0 : index
    %c0_29 = arith.constant 0 : index
    %102 = vector.load %arg7[%c0_28, %c0_29] : memref<1x32xf32, #tpu.memory_space<vmem>>, vector<1x32xf32>
    %c0_30 = arith.constant 0 : index
    %c0_31 = arith.constant 0 : index
    %103 = vector.load %arg8[%c0_30, %c0_31] : memref<1x32xf32, #tpu.memory_space<vmem>>, vector<1x32xf32>
    %cst_32 = arith.constant dense<0.000000e+00> : vector<2x32xf32>
    %104 = vector.multi_reduction <add>, %101, %cst_32 [0] : vector<23x2x32xf32> to vector<2x32xf32>
    %105 = vector.shape_cast %104 : vector<2x32xf32> to vector<1x2x32xf32>
    %cst_33 = arith.constant dense<0.000000e+00> : vector<1x32xf32>
    %106 = vector.multi_reduction <add>, %105, %cst_33 [1] : vector<1x2x32xf32> to vector<1x32xf32>
    %107 = vector.shape_cast %106 : vector<1x32xf32> to vector<1x1x32xf32>
    %cst_34 = arith.constant 4.600000e+01 : f32
    %108 = vector.broadcast %cst_34 : f32 to vector<1x1x32xf32>
    %109 = arith.divf %107, %108 : vector<1x1x32xf32>
    %110 = vector.broadcast %109 : vector<1x1x32xf32> to vector<23x2x32xf32>
    %111 = arith.subf %101, %110 : vector<23x2x32xf32>
    %112 = arith.mulf %111, %111 : vector<23x2x32xf32>
    %cst_35 = arith.constant dense<0.000000e+00> : vector<2x32xf32>
    %113 = vector.multi_reduction <add>, %112, %cst_35 [0] : vector<23x2x32xf32> to vector<2x32xf32>
    %114 = vector.shape_cast %113 : vector<2x32xf32> to vector<1x2x32xf32>
    %cst_36 = arith.constant dense<0.000000e+00> : vector<1x32xf32>
    %115 = vector.multi_reduction <add>, %114, %cst_36 [1] : vector<1x2x32xf32> to vector<1x32xf32>
    %116 = vector.shape_cast %115 : vector<1x32xf32> to vector<1x1x32xf32>
    %cst_37 = arith.constant 4.600000e+01 : f32
    %117 = vector.broadcast %cst_37 : f32 to vector<1x1x32xf32>
    %118 = arith.divf %116, %117 : vector<1x1x32xf32>
    %cst_38 = arith.constant 9.99999974E-6 : f32
    %119 = vector.broadcast %cst_38 : f32 to vector<1x1x32xf32>
    %120 = arith.addf %118, %119 : vector<1x1x32xf32>
    %121 = math.rsqrt %120 : vector<1x1x32xf32>
    %122 = vector.broadcast %121 : vector<1x1x32xf32> to vector<23x2x32xf32>
    %123 = arith.mulf %111, %122 : vector<23x2x32xf32>
    %124 = vector.shape_cast %102 : vector<1x32xf32> to vector<1x1x32xf32>
    %125 = vector.broadcast %124 : vector<1x1x32xf32> to vector<23x2x32xf32>
    %126 = arith.mulf %123, %125 : vector<23x2x32xf32>
    %127 = vector.shape_cast %103 : vector<1x32xf32> to vector<1x1x32xf32>
    %128 = vector.broadcast %127 : vector<1x1x32xf32> to vector<23x2x32xf32>
    %129 = arith.addf %126, %128 : vector<23x2x32xf32>
    %130 = math.tanh %129 : vector<23x2x32xf32>
    %131 = arith.truncf %130 : vector<23x2x32xf32> to vector<23x2x32xbf16>
    %c0_39 = arith.constant 0 : index
    %c0_40 = arith.constant 0 : index
    %c0_41 = arith.constant 0 : index
    %132 = vector.load %arg9[%c0_39, %c0_40, %c0_41] : memref<23x32x64xbf16, #tpu.memory_space<vmem>>, vector<23x32x64xbf16>
    "tpu.trace_start"() <{level = 10 : i32, message = "tbc,tcd->tbd"}> : () -> ()
    %cst_42 = arith.constant dense<0.000000e+00> : vector<23x2x64xf32>
    %133 = tpu.matmul %131, %132, %cst_42 {dimension_numbers = #tpu.dot_dimension_numbers<[2], [1], [1], [2], [0, 0, 0, 1, 1, 2], [0], [0]>} : vector<23x2x32xbf16>, vector<23x32x64xbf16>, vector<23x2x64xf32> -> vector<23x2x64xf32>
    "tpu.trace_stop"() : () -> ()
    %cst_43 = arith.constant dense<0.000000e+00> : vector<2x64xf32>
    %134 = vector.multi_reduction <add>, %133, %cst_43 [0] : vector<23x2x64xf32> to vector<2x64xf32>
    %c0_44 = arith.constant 0 : index
    %c0_45 = arith.constant 0 : index
    %135 = vector.load %arg10[%c0_44, %c0_45] : memref<1x64xf32, #tpu.memory_space<vmem>>, vector<1x64xf32>
    %136 = vector.broadcast %135 : vector<1x64xf32> to vector<2x64xf32>
    %137 = arith.addf %134, %136 : vector<2x64xf32>
    %cst_46 = arith.constant 0.000000e+00 : f32
    %138 = vector.broadcast %cst_46 : f32 to vector<2x64xf32>
    %139 = arith.maximumf %137, %138 : vector<2x64xf32>
    %c0_47 = arith.constant 0 : index
    %c0_48 = arith.constant 0 : index
    %140 = vector.load %arg11[%c0_47, %c0_48] : memref<64x24xf32, #tpu.memory_space<vmem>>, vector<64x24xf32>
    %cst_49 = arith.constant dense<0.000000e+00> : vector<2x24xf32>
    %141 = tpu.matmul %139, %140, %cst_49 {dimension_numbers = #tpu.dot_dimension_numbers<[1], [0], [0], [1], [0, 0, 1, 1], [], []>} : vector<2x64xf32>, vector<64x24xf32>, vector<2x24xf32> -> vector<2x24xf32>
    %c0_50 = arith.constant 0 : index
    %c0_51 = arith.constant 0 : index
    %142 = vector.load %arg12[%c0_50, %c0_51] : memref<1x24xf32, #tpu.memory_space<vmem>>, vector<1x24xf32>
    %143 = vector.broadcast %142 : vector<1x24xf32> to vector<2x24xf32>
    %144 = arith.addf %141, %143 : vector<2x24xf32>
    %cst_52 = arith.constant 0.000000e+00 : f32
    %145 = vector.broadcast %cst_52 : f32 to vector<2x24xf32>
    %146 = arith.maximumf %144, %145 : vector<2x24xf32>
    %c0_53 = arith.constant 0 : index
    %c0_54 = arith.constant 0 : index
    %147 = vector.load %arg13[%c0_53, %c0_54] : memref<24x16xf32, #tpu.memory_space<vmem>>, vector<24x16xf32>
    %cst_55 = arith.constant dense<0.000000e+00> : vector<2x16xf32>
    %148 = tpu.matmul %146, %147, %cst_55 {dimension_numbers = #tpu.dot_dimension_numbers<[1], [0], [0], [1], [0, 0, 1, 1], [], []>} : vector<2x24xf32>, vector<24x16xf32>, vector<2x16xf32> -> vector<2x16xf32>
    %c0_56 = arith.constant 0 : index
    %c0_57 = arith.constant 0 : index
    %149 = vector.load %arg14[%c0_56, %c0_57] : memref<1x16xf32, #tpu.memory_space<vmem>>, vector<1x16xf32>
    %150 = vector.broadcast %149 : vector<1x16xf32> to vector<2x16xf32>
    %151 = arith.addf %148, %150 : vector<2x16xf32>
    %cst_58 = arith.constant 0.000000e+00 : f32
    %152 = vector.broadcast %cst_58 : f32 to vector<2x16xf32>
    %153 = arith.maximumf %151, %152 : vector<2x16xf32>
    %c0_59 = arith.constant 0 : index
    %c0_60 = arith.constant 0 : index
    %154 = vector.load %arg15[%c0_59, %c0_60] : memref<16x8xf32, #tpu.memory_space<vmem>>, vector<16x8xf32>
    %cst_61 = arith.constant dense<0.000000e+00> : vector<2x8xf32>
    %155 = tpu.matmul %153, %154, %cst_61 {dimension_numbers = #tpu.dot_dimension_numbers<[1], [0], [0], [1], [0, 0, 1, 1], [], []>} : vector<2x16xf32>, vector<16x8xf32>, vector<2x8xf32> -> vector<2x8xf32>
    %c0_62 = arith.constant 0 : index
    %c0_63 = arith.constant 0 : index
    %156 = vector.load %arg16[%c0_62, %c0_63] : memref<1x8xf32, #tpu.memory_space<vmem>>, vector<1x8xf32>
    %157 = vector.broadcast %156 : vector<1x8xf32> to vector<2x8xf32>
    %158 = arith.addf %155, %157 : vector<2x8xf32>
    %c0_64 = arith.constant 0 : index
    %c0_65 = arith.constant 0 : index
    %159 = vector.load %arg17[%c0_64, %c0_65] : memref<8x16xf32, #tpu.memory_space<vmem>>, vector<8x16xf32>
    %cst_66 = arith.constant dense<0.000000e+00> : vector<2x16xf32>
    %160 = tpu.matmul %158, %159, %cst_66 {dimension_numbers = #tpu.dot_dimension_numbers<[1], [0], [0], [1], [0, 0, 1, 1], [], []>} : vector<2x8xf32>, vector<8x16xf32>, vector<2x16xf32> -> vector<2x16xf32>
    %c0_67 = arith.constant 0 : index
    %c0_68 = arith.constant 0 : index
    %161 = vector.load %arg18[%c0_67, %c0_68] : memref<1x16xf32, #tpu.memory_space<vmem>>, vector<1x16xf32>
    %162 = vector.broadcast %161 : vector<1x16xf32> to vector<2x16xf32>
    %163 = arith.addf %160, %162 : vector<2x16xf32>
    %cst_69 = arith.constant 0.000000e+00 : f32
    %164 = vector.broadcast %cst_69 : f32 to vector<2x16xf32>
    %165 = arith.maximumf %163, %164 : vector<2x16xf32>
    %c0_70 = arith.constant 0 : index
    %c0_71 = arith.constant 0 : index
    %166 = vector.load %arg19[%c0_70, %c0_71] : memref<16x24xf32, #tpu.memory_space<vmem>>, vector<16x24xf32>
    %cst_72 = arith.constant dense<0.000000e+00> : vector<2x24xf32>
    %167 = tpu.matmul %165, %166, %cst_72 {dimension_numbers = #tpu.dot_dimension_numbers<[1], [0], [0], [1], [0, 0, 1, 1], [], []>} : vector<2x16xf32>, vector<16x24xf32>, vector<2x24xf32> -> vector<2x24xf32>
    %c0_73 = arith.constant 0 : index
    %c0_74 = arith.constant 0 : index
    %168 = vector.load %arg20[%c0_73, %c0_74] : memref<1x24xf32, #tpu.memory_space<vmem>>, vector<1x24xf32>
    %169 = vector.broadcast %168 : vector<1x24xf32> to vector<2x24xf32>
    %170 = arith.addf %167, %169 : vector<2x24xf32>
    %cst_75 = arith.constant 0.000000e+00 : f32
    %171 = vector.broadcast %cst_75 : f32 to vector<2x24xf32>
    %172 = arith.maximumf %170, %171 : vector<2x24xf32>
    %c0_76 = arith.constant 0 : index
    %c0_77 = arith.constant 0 : index
    %173 = vector.load %arg21[%c0_76, %c0_77] : memref<24x64xf32, #tpu.memory_space<vmem>>, vector<24x64xf32>
    %cst_78 = arith.constant dense<0.000000e+00> : vector<2x64xf32>
    %174 = tpu.matmul %172, %173, %cst_78 {dimension_numbers = #tpu.dot_dimension_numbers<[1], [0], [0], [1], [0, 0, 1, 1], [], []>} : vector<2x24xf32>, vector<24x64xf32>, vector<2x64xf32> -> vector<2x64xf32>
    %c0_79 = arith.constant 0 : index
    %c0_80 = arith.constant 0 : index
    %175 = vector.load %arg22[%c0_79, %c0_80] : memref<1x64xf32, #tpu.memory_space<vmem>>, vector<1x64xf32>
    %176 = vector.broadcast %175 : vector<1x64xf32> to vector<2x64xf32>
    %177 = arith.addf %174, %176 : vector<2x64xf32>
    %cst_81 = arith.constant 0.000000e+00 : f32
    %178 = vector.broadcast %cst_81 : f32 to vector<2x64xf32>
    %179 = arith.maximumf %177, %178 : vector<2x64xf32>
    %180 = arith.truncf %179 : vector<2x64xf32> to vector<2x64xbf16>
    %181 = vector.shape_cast %180 : vector<2x64xbf16> to vector<1x2x64xbf16>
    %182 = vector.broadcast %181 : vector<1x2x64xbf16> to vector<23x2x64xbf16>
    %c0_82 = arith.constant 0 : index
    %c0_83 = arith.constant 0 : index
    %c0_84 = arith.constant 0 : index
    %183 = vector.load %arg23[%c0_82, %c0_83, %c0_84] : memref<23x64x32xbf16, #tpu.memory_space<vmem>>, vector<23x64x32xbf16>
    "tpu.trace_start"() <{level = 10 : i32, message = "tbd,tdc->tbc"}> : () -> ()
    %cst_85 = arith.constant dense<0.000000e+00> : vector<23x2x32xf32>
    %184 = tpu.matmul %182, %183, %cst_85 {dimension_numbers = #tpu.dot_dimension_numbers<[2], [1], [1], [2], [0, 0, 0, 1, 1, 2], [0], [0]>} : vector<23x2x64xbf16>, vector<23x64x32xbf16>, vector<23x2x32xf32> -> vector<23x2x32xf32>
    "tpu.trace_stop"() : () -> ()
    %c0_86 = arith.constant 0 : index
    %c0_87 = arith.constant 0 : index
    %c0_88 = arith.constant 0 : index
    %185 = vector.load %arg24[%c0_86, %c0_87, %c0_88] : memref<23x1x32xf32, #tpu.memory_space<vmem>>, vector<23x1x32xf32>
    %186 = vector.broadcast %185 : vector<23x1x32xf32> to vector<23x2x32xf32>
    %187 = arith.addf %184, %186 : vector<23x2x32xf32>
    %188 = math.tanh %187 : vector<23x2x32xf32>
    %c0_89 = arith.constant 0 : index
    %c0_90 = arith.constant 0 : index
    %c0_91 = arith.constant 0 : index
    %189 = vector.load %arg25[%c0_89, %c0_90, %c0_91] : memref<4x32x16xf32, #tpu.memory_space<vmem>>, vector<4x32x16xf32>
    %cst_92 = arith.constant 0.000000e+00 : f32
    %190 = vector.broadcast %cst_92 : f32 to vector<26x2x16xf32>
    %c0_93 = arith.constant 0 : index
    %c0_94 = arith.constant 0 : index
    %c0_95 = arith.constant 0 : index
    %191 = vector.load %arg32[%c0_93, %c0_94, %c0_95] : memref<26x2x16xf32, #tpu.memory_space<vmem>>, vector<26x2x16xf32>
    tpu.vector_store %arg32[%c0_93, %c0_94, %c0_95], %190 {strides = array<i32>} : memref<26x2x16xf32, #tpu.memory_space<vmem>>, vector<26x2x16xf32>,
    %192 = vector.extract_strided_slice %189 {offsets = [0, 0, 0], sizes = [1, 32, 16], strides = [1, 1, 1]} : vector<4x32x16xf32> to vector<1x32x16xf32>
    %193 = vector.shape_cast %192 : vector<1x32x16xf32> to vector<32x16xf32>
    %194 = vector.shape_cast %193 : vector<32x16xf32> to vector<1x32x16xf32>
    %195 = vector.broadcast %194 : vector<1x32x16xf32> to vector<23x32x16xf32>
    "tpu.trace_start"() <{level = 10 : i32, message = "tbc,tco->tbo"}> : () -> ()
    %cst_96 = arith.constant dense<0.000000e+00> : vector<23x2x16xf32>
    %196 = tpu.matmul %188, %195, %cst_96 {dimension_numbers = #tpu.dot_dimension_numbers<[2], [1], [1], [2], [0, 0, 0, 1, 1, 2], [0], [0]>} : vector<23x2x32xf32>, vector<23x32x16xf32>, vector<23x2x16xf32> -> vector<23x2x16xf32>
    "tpu.trace_stop"() : () -> ()
    %c0_97 = arith.constant 0 : index
    %c0_98 = arith.constant 0 : index
    %c0_99 = arith.constant 0 : index
    %197 = vector.load %arg32[%c0_97, %c0_98, %c0_99] : memref<26x2x16xf32, #tpu.memory_space<vmem>>, vector<23x2x16xf32>
    %198 = arith.addf %197, %196 : vector<23x2x16xf32>
    %c0_100 = arith.constant 0 : index
    %c0_101 = arith.constant 0 : index
    %c0_102 = arith.constant 0 : index
    %199 = vector.load %arg32[%c0_100, %c0_101, %c0_102] : memref<26x2x16xf32, #tpu.memory_space<vmem>>, vector<23x2x16xf32>
    tpu.vector_store %arg32[%c0_100, %c0_101, %c0_102], %198 {strides = array<i32>} : memref<26x2x16xf32, #tpu.memory_space<vmem>>, vector<23x2x16xf32>,
    %200 = vector.extract_strided_slice %189 {offsets = [1, 0, 0], sizes = [1, 32, 16], strides = [1, 1, 1]} : vector<4x32x16xf32> to vector<1x32x16xf32>
    %201 = vector.shape_cast %200 : vector<1x32x16xf32> to vector<32x16xf32>
    %202 = vector.shape_cast %201 : vector<32x16xf32> to vector<1x32x16xf32>
    %203 = vector.broadcast %202 : vector<1x32x16xf32> to vector<23x32x16xf32>
    "tpu.trace_start"() <{level = 10 : i32, message = "tbc,tco->tbo"}> : () -> ()
    %cst_103 = arith.constant dense<0.000000e+00> : vector<23x2x16xf32>
    %204 = tpu.matmul %188, %203, %cst_103 {dimension_numbers = #tpu.dot_dimension_numbers<[2], [1], [1], [2], [0, 0, 0, 1, 1, 2], [0], [0]>} : vector<23x2x32xf32>, vector<23x32x16xf32>, vector<23x2x16xf32> -> vector<23x2x16xf32>
    "tpu.trace_stop"() : () -> ()
    %c1 = arith.constant 1 : index
    %c0_104 = arith.constant 0 : index
    %c0_105 = arith.constant 0 : index
    %205 = vector.load %arg32[%c1, %c0_104, %c0_105] : memref<26x2x16xf32, #tpu.memory_space<vmem>>, vector<23x2x16xf32>
    %206 = arith.addf %205, %204 : vector<23x2x16xf32>
    %c1_106 = arith.constant 1 : index
    %c0_107 = arith.constant 0 : index
    %c0_108 = arith.constant 0 : index
    %207 = vector.load %arg32[%c1_106, %c0_107, %c0_108] : memref<26x2x16xf32, #tpu.memory_space<vmem>>, vector<23x2x16xf32>
    tpu.vector_store %arg32[%c1_106, %c0_107, %c0_108], %206 {strides = array<i32>} : memref<26x2x16xf32, #tpu.memory_space<vmem>>, vector<23x2x16xf32>,
    %208 = vector.extract_strided_slice %189 {offsets = [2, 0, 0], sizes = [1, 32, 16], strides = [1, 1, 1]} : vector<4x32x16xf32> to vector<1x32x16xf32>
    %209 = vector.shape_cast %208 : vector<1x32x16xf32> to vector<32x16xf32>
    %210 = vector.shape_cast %209 : vector<32x16xf32> to vector<1x32x16xf32>
    %211 = vector.broadcast %210 : vector<1x32x16xf32> to vector<23x32x16xf32>
    "tpu.trace_start"() <{level = 10 : i32, message = "tbc,tco->tbo"}> : () -> ()
    %cst_109 = arith.constant dense<0.000000e+00> : vector<23x2x16xf32>
    %212 = tpu.matmul %188, %211, %cst_109 {dimension_numbers = #tpu.dot_dimension_numbers<[2], [1], [1], [2], [0, 0, 0, 1, 1, 2], [0], [0]>} : vector<23x2x32xf32>, vector<23x32x16xf32>, vector<23x2x16xf32> -> vector<23x2x16xf32>
    "tpu.trace_stop"() : () -> ()
    %c2 = arith.constant 2 : index
    %c0_110 = arith.constant 0 : index
    %c0_111 = arith.constant 0 : index
    %213 = vector.load %arg32[%c2, %c0_110, %c0_111] : memref<26x2x16xf32, #tpu.memory_space<vmem>>, vector<23x2x16xf32>
    %214 = arith.addf %213, %212 : vector<23x2x16xf32>
    %c2_112 = arith.constant 2 : index
    %c0_113 = arith.constant 0 : index
    %c0_114 = arith.constant 0 : index
    %215 = vector.load %arg32[%c2_112, %c0_113, %c0_114] : memref<26x2x16xf32, #tpu.memory_space<vmem>>, vector<23x2x16xf32>
    tpu.vector_store %arg32[%c2_112, %c0_113, %c0_114], %214 {strides = array<i32>} : memref<26x2x16xf32, #tpu.memory_space<vmem>>, vector<23x2x16xf32>,
    %216 = vector.extract_strided_slice %189 {offsets = [3, 0, 0], sizes = [1, 32, 16], strides = [1, 1, 1]} : vector<4x32x16xf32> to vector<1x32x16xf32>
    %217 = vector.shape_cast %216 : vector<1x32x16xf32> to vector<32x16xf32>
    %218 = vector.shape_cast %217 : vector<32x16xf32> to vector<1x32x16xf32>
    %219 = vector.broadcast %218 : vector<1x32x16xf32> to vector<23x32x16xf32>
    "tpu.trace_start"() <{level = 10 : i32, message = "tbc,tco->tbo"}> : () -> ()
    %cst_115 = arith.constant dense<0.000000e+00> : vector<23x2x16xf32>
    %220 = tpu.matmul %188, %219, %cst_115 {dimension_numbers = #tpu.dot_dimension_numbers<[2], [1], [1], [2], [0, 0, 0, 1, 1, 2], [0], [0]>} : vector<23x2x32xf32>, vector<23x32x16xf32>, vector<23x2x16xf32> -> vector<23x2x16xf32>
    "tpu.trace_stop"() : () -> ()
    %c3 = arith.constant 3 : index
    %c0_116 = arith.constant 0 : index
    %c0_117 = arith.constant 0 : index
    %221 = vector.load %arg32[%c3, %c0_116, %c0_117] : memref<26x2x16xf32, #tpu.memory_space<vmem>>, vector<23x2x16xf32>
    %222 = arith.addf %221, %220 : vector<23x2x16xf32>
    %c3_118 = arith.constant 3 : index
    %c0_119 = arith.constant 0 : index
    %c0_120 = arith.constant 0 : index
    %223 = vector.load %arg32[%c3_118, %c0_119, %c0_120] : memref<26x2x16xf32, #tpu.memory_space<vmem>>, vector<23x2x16xf32>
    tpu.vector_store %arg32[%c3_118, %c0_119, %c0_120], %222 {strides = array<i32>} : memref<26x2x16xf32, #tpu.memory_space<vmem>>, vector<23x2x16xf32>,
    %c0_121 = arith.constant 0 : index
    %c0_122 = arith.constant 0 : index
    %c0_123 = arith.constant 0 : index
    %224 = vector.load %arg32[%c0_121, %c0_122, %c0_123] : memref<26x2x16xf32, #tpu.memory_space<vmem>>, vector<26x2x16xf32>
    %c0_124 = arith.constant 0 : index
    %c0_125 = arith.constant 0 : index
    %225 = vector.load %arg26[%c0_124, %c0_125] : memref<1x16xf32, #tpu.memory_space<vmem>>, vector<1x16xf32>
    %226 = vector.shape_cast %225 : vector<1x16xf32> to vector<1x1x16xf32>
    %227 = vector.broadcast %226 : vector<1x1x16xf32> to vector<26x2x16xf32>
    %228 = arith.addf %224, %227 : vector<26x2x16xf32>
    %c0_126 = arith.constant 0 : index
    %c0_127 = arith.constant 0 : index
    %229 = vector.load %arg27[%c0_126, %c0_127] : memref<1x16xf32, #tpu.memory_space<vmem>>, vector<1x16xf32>
    %c0_128 = arith.constant 0 : index
    %c0_129 = arith.constant 0 : index
    %230 = vector.load %arg28[%c0_128, %c0_129] : memref<1x16xf32, #tpu.memory_space<vmem>>, vector<1x16xf32>
    %cst_130 = arith.constant dense<0.000000e+00> : vector<2x16xf32>
    %231 = vector.multi_reduction <add>, %228, %cst_130 [0] : vector<26x2x16xf32> to vector<2x16xf32>
    %232 = vector.shape_cast %231 : vector<2x16xf32> to vector<1x2x16xf32>
    %cst_131 = arith.constant dense<0.000000e+00> : vector<1x16xf32>
    %233 = vector.multi_reduction <add>, %232, %cst_131 [1] : vector<1x2x16xf32> to vector<1x16xf32>
    %234 = vector.shape_cast %233 : vector<1x16xf32> to vector<1x1x16xf32>
    %cst_132 = arith.constant 5.200000e+01 : f32
    %235 = vector.broadcast %cst_132 : f32 to vector<1x1x16xf32>
    %236 = arith.divf %234, %235 : vector<1x1x16xf32>
    %237 = vector.broadcast %236 : vector<1x1x16xf32> to vector<26x2x16xf32>
    %238 = arith.subf %228, %237 : vector<26x2x16xf32>
    %239 = arith.mulf %238, %238 : vector<26x2x16xf32>
    %cst_133 = arith.constant dense<0.000000e+00> : vector<2x16xf32>
    %240 = vector.multi_reduction <add>, %239, %cst_133 [0] : vector<26x2x16xf32> to vector<2x16xf32>
    %241 = vector.shape_cast %240 : vector<2x16xf32> to vector<1x2x16xf32>
    %cst_134 = arith.constant dense<0.000000e+00> : vector<1x16xf32>
    %242 = vector.multi_reduction <add>, %241, %cst_134 [1] : vector<1x2x16xf32> to vector<1x16xf32>
    %243 = vector.shape_cast %242 : vector<1x16xf32> to vector<1x1x16xf32>
    %cst_135 = arith.constant 5.200000e+01 : f32
    %244 = vector.broadcast %cst_135 : f32 to vector<1x1x16xf32>
    %245 = arith.divf %243, %244 : vector<1x1x16xf32>
    %cst_136 = arith.constant 9.99999974E-6 : f32
    %246 = vector.broadcast %cst_136 : f32 to vector<1x1x16xf32>
    %247 = arith.addf %245, %246 : vector<1x1x16xf32>
    %248 = math.rsqrt %247 : vector<1x1x16xf32>
    %249 = vector.broadcast %248 : vector<1x1x16xf32> to vector<26x2x16xf32>
    %250 = arith.mulf %238, %249 : vector<26x2x16xf32>
    %251 = vector.shape_cast %229 : vector<1x16xf32> to vector<1x1x16xf32>
    %252 = vector.broadcast %251 : vector<1x1x16xf32> to vector<26x2x16xf32>
    %253 = arith.mulf %250, %252 : vector<26x2x16xf32>
    %254 = vector.shape_cast %230 : vector<1x16xf32> to vector<1x1x16xf32>
    %255 = vector.broadcast %254 : vector<1x1x16xf32> to vector<26x2x16xf32>
    %256 = arith.addf %253, %255 : vector<26x2x16xf32>
    %257 = math.tanh %256 : vector<26x2x16xf32>
    %c0_137 = arith.constant 0 : index
    %c0_138 = arith.constant 0 : index
    %c0_139 = arith.constant 0 : index
    %258 = vector.load %arg29[%c0_137, %c0_138, %c0_139] : memref<4x1x16xf32, #tpu.memory_space<vmem>>, vector<4x1x16xf32>
    %cst_140 = arith.constant 0.000000e+00 : f32
    %259 = vector.broadcast %cst_140 : f32 to vector<29x2xf32>
    %c0_141 = arith.constant 0 : index
    %c0_142 = arith.constant 0 : index
    %260 = vector.load %arg31[%c0_141, %c0_142] : memref<29x2xf32, #tpu.memory_space<vmem>>, vector<29x2xf32>
    tpu.vector_store %arg31[%c0_141, %c0_142], %259 {strides = array<i32>} : memref<29x2xf32, #tpu.memory_space<vmem>>, vector<29x2xf32>,
    %261 = vector.extract_strided_slice %258 {offsets = [0, 0, 0], sizes = [1, 1, 16], strides = [1, 1, 1]} : vector<4x1x16xf32> to vector<1x1x16xf32>
    %262 = vector.shape_cast %261 : vector<1x1x16xf32> to vector<1x16xf32>
    %263 = vector.shape_cast %262 : vector<1x16xf32> to vector<1x1x16xf32>
    %264 = vector.broadcast %263 : vector<1x1x16xf32> to vector<26x2x16xf32>
    %265 = arith.mulf %257, %264 : vector<26x2x16xf32>
    %cst_143 = arith.constant dense<0.000000e+00> : vector<26x2xf32>
    %266 = vector.multi_reduction <add>, %265, %cst_143 [2] : vector<26x2x16xf32> to vector<26x2xf32>
    %c0_144 = arith.constant 0 : index
    %c0_145 = arith.constant 0 : index
    %267 = vector.load %arg31[%c0_144, %c0_145] : memref<29x2xf32, #tpu.memory_space<vmem>>, vector<26x2xf32>
    %268 = arith.addf %267, %266 : vector<26x2xf32>
    %c0_146 = arith.constant 0 : index
    %c0_147 = arith.constant 0 : index
    %269 = vector.load %arg31[%c0_146, %c0_147] : memref<29x2xf32, #tpu.memory_space<vmem>>, vector<26x2xf32>
    tpu.vector_store %arg31[%c0_146, %c0_147], %268 {strides = array<i32>} : memref<29x2xf32, #tpu.memory_space<vmem>>, vector<26x2xf32>,
    %270 = vector.extract_strided_slice %258 {offsets = [1, 0, 0], sizes = [1, 1, 16], strides = [1, 1, 1]} : vector<4x1x16xf32> to vector<1x1x16xf32>
    %271 = vector.shape_cast %270 : vector<1x1x16xf32> to vector<1x16xf32>
    %272 = vector.shape_cast %271 : vector<1x16xf32> to vector<1x1x16xf32>
    %273 = vector.broadcast %272 : vector<1x1x16xf32> to vector<26x2x16xf32>
    %274 = arith.mulf %257, %273 : vector<26x2x16xf32>
    %cst_148 = arith.constant dense<0.000000e+00> : vector<26x2xf32>
    %275 = vector.multi_reduction <add>, %274, %cst_148 [2] : vector<26x2x16xf32> to vector<26x2xf32>
    %c1_149 = arith.constant 1 : index
    %c0_150 = arith.constant 0 : index
    %276 = vector.load %arg31[%c1_149, %c0_150] : memref<29x2xf32, #tpu.memory_space<vmem>>, vector<26x2xf32>
    %277 = arith.addf %276, %275 : vector<26x2xf32>
    %c1_151 = arith.constant 1 : index
    %c0_152 = arith.constant 0 : index
    %278 = vector.load %arg31[%c1_151, %c0_152] : memref<29x2xf32, #tpu.memory_space<vmem>>, vector<26x2xf32>
    tpu.vector_store %arg31[%c1_151, %c0_152], %277 {strides = array<i32>} : memref<29x2xf32, #tpu.memory_space<vmem>>, vector<26x2xf32>,
    %279 = vector.extract_strided_slice %258 {offsets = [2, 0, 0], sizes = [1, 1, 16], strides = [1, 1, 1]} : vector<4x1x16xf32> to vector<1x1x16xf32>
    %280 = vector.shape_cast %279 : vector<1x1x16xf32> to vector<1x16xf32>
    %281 = vector.shape_cast %280 : vector<1x16xf32> to vector<1x1x16xf32>
    %282 = vector.broadcast %281 : vector<1x1x16xf32> to vector<26x2x16xf32>
    %283 = arith.mulf %257, %282 : vector<26x2x16xf32>
    %cst_153 = arith.constant dense<0.000000e+00> : vector<26x2xf32>
    %284 = vector.multi_reduction <add>, %283, %cst_153 [2] : vector<26x2x16xf32> to vector<26x2xf32>
    %c2_154 = arith.constant 2 : index
    %c0_155 = arith.constant 0 : index
    %285 = vector.load %arg31[%c2_154, %c0_155] : memref<29x2xf32, #tpu.memory_space<vmem>>, vector<26x2xf32>
    %286 = arith.addf %285, %284 : vector<26x2xf32>
    %c2_156 = arith.constant 2 : index
    %c0_157 = arith.constant 0 : index
    %287 = vector.load %arg31[%c2_156, %c0_157] : memref<29x2xf32, #tpu.memory_space<vmem>>, vector<26x2xf32>
    tpu.vector_store %arg31[%c2_156, %c0_157], %286 {strides = array<i32>} : memref<29x2xf32, #tpu.memory_space<vmem>>, vector<26x2xf32>,
    %288 = vector.extract_strided_slice %258 {offsets = [3, 0, 0], sizes = [1, 1, 16], strides = [1, 1, 1]} : vector<4x1x16xf32> to vector<1x1x16xf32>
    %289 = vector.shape_cast %288 : vector<1x1x16xf32> to vector<1x16xf32>
    %290 = vector.shape_cast %289 : vector<1x16xf32> to vector<1x1x16xf32>
    %291 = vector.broadcast %290 : vector<1x1x16xf32> to vector<26x2x16xf32>
    %292 = arith.mulf %257, %291 : vector<26x2x16xf32>
    %cst_158 = arith.constant dense<0.000000e+00> : vector<26x2xf32>
    %293 = vector.multi_reduction <add>, %292, %cst_158 [2] : vector<26x2x16xf32> to vector<26x2xf32>
    %c3_159 = arith.constant 3 : index
    %c0_160 = arith.constant 0 : index
    %294 = vector.load %arg31[%c3_159, %c0_160] : memref<29x2xf32, #tpu.memory_space<vmem>>, vector<26x2xf32>
    %295 = arith.addf %294, %293 : vector<26x2xf32>
    %c3_161 = arith.constant 3 : index
    %c0_162 = arith.constant 0 : index
    %296 = vector.load %arg31[%c3_161, %c0_162] : memref<29x2xf32, #tpu.memory_space<vmem>>, vector<26x2xf32>
    tpu.vector_store %arg31[%c3_161, %c0_162], %295 {strides = array<i32>} : memref<29x2xf32, #tpu.memory_space<vmem>>, vector<26x2xf32>,
    %c0_163 = arith.constant 0 : index
    %c0_164 = arith.constant 0 : index
    %297 = vector.load %arg31[%c0_163, %c0_164] : memref<29x2xf32, #tpu.memory_space<vmem>>, vector<29x2xf32>
    %c0_165 = arith.constant 0 : index
    %c0_166 = arith.constant 0 : index
    %298 = vector.load %arg30[%c0_165, %c0_166] : memref<1x1xf32, #tpu.memory_space<vmem>>, vector<1x1xf32>
    %299 = vector.broadcast %298 : vector<1x1xf32> to vector<29x2xf32>
    %300 = arith.addf %297, %299 : vector<29x2xf32>
    %301 = arith.negf %300 : vector<29x2xf32>
    %302 = math.exp %301 : vector<29x2xf32>
    %cst_167 = arith.constant 1.000000e+00 : f32
    %303 = vector.broadcast %cst_167 : f32 to vector<29x2xf32>
    %304 = arith.addf %303, %302 : vector<29x2xf32>
    %305 = arith.divf %303, %304 : vector<29x2xf32>
    %c0_168 = arith.constant 0 : index
    %c0_169 = arith.constant 0 : index
    %306 = vector.load %arg31[%c0_168, %c0_169] : memref<29x2xf32, #tpu.memory_space<vmem>>, vector<29x2xf32>
    tpu.vector_store %arg31[%c0_168, %c0_169], %305 {strides = array<i32>} : memref<29x2xf32, #tpu.memory_space<vmem>>, vector<29x2xf32>,
    return
  }
}

</mosaic_0001>

<bundles_post_ra>
// kernel: autoencoder_forward.1
= control target key start
LH: loop header
LB: loop body
LE: loop exit
PB: predicated region body
PF: predicated region fallthrough
CT: control target
= control target key end

     0   :  { %v10043_v0 = vmov 0   ;;  %s10044_s6 = smov 1   ;;  %s10045_s10 = smov 2   ;;  %vm563_vm0 = vcmask 123904   ;;  %vm870_vm5 = vcmask 130048   ;;  %vm2864_vm6 = vcmask 254976   ;;  %s13958_s0 = inlined_call_operand.smem [shape: u32[32], index: -1, kind: input, shape index: {}] }
   0x1   :  { %9772 = vset.pattern.permute.xlu2 %v10043_v0  ;;  %9771 = vset.pattern.permute.xlu1 %v10043_v0  ;;  %s10086_s5 = sld [smem:[%s13958_s0]]   ;;  %s10046_s14 = smov 3   ;;  %vm3260_vm11 = vcmask 261120   ;;  %vm3893_vm12 = vcmask 517120   ;;  %vm3957_vm13 = vcmask 523264   ;;  %vm3989_vm14 = vcmask 195584  }
   0x2   :  { %9770 = vset.pattern.permute.xlu0 %v10043_v0  ;;  %s10091_s9 = sld [smem:[%s13958_s0 + %s10044_s6]]   ;;  %s10047_s18 = smov 4   ;;  %vm4048_vm15 = vcmask 64512  }
   0x3   :  { %s10099_s13 = sld [smem:[%s13958_s0 + %s10045_s10]]   ;;  %s10049_s22 = smov 5  }
   0x4   :  { %s10128_s17 = sld [smem:[%s13958_s0 + %s10046_s14]]   ;;  %s10050_s26 = smov 6  }
   0x5   :  { %s10133_s21 = sld [smem:[%s13958_s0 + %s10047_s18]]   ;;  %s10051_s30 = smov 7  }
   0x6   :  { %s10537_s25 = sld [smem:[%s13958_s0 + %s10049_s22]]   ;;  %s10052_s4 = smov 8  }
   0x7   :  { %v137_v1 = vld [vmem:[%s10086_s5 + $0x8] sm:$0x3]  ;;  %v135_v2 = vld [vmem:[%s10086_s5 + $0x4] sm:$0x3]  ;;  %v133_v3 = vld [vmem:[%s10086_s5] sm:$0x3]  ;;  %s11032_s29 = sld [smem:[%s13958_s0 + %s10050_s26]]  }
   0x8   :  { %188 = vperm.xlu2 %9772, %v137_v1   ;;  %178 = vperm.xlu1 %9771, %v135_v2   ;;  %v138_v4 = vld [vmem:[%s10086_s5 + $0xa] sm:$0x3]  ;;  %v136_v5 = vld [vmem:[%s10086_s5 + $0x6] sm:$0x3]  ;;  %v134_v6 = vld [vmem:[%s10086_s5 + $0x2] sm:$0x3]  ;;  %s11155_s3 = sld [smem:[%s13958_s0 + %s10051_s30]]  }
   0x9   :  { %168 = vperm.xlu0 %9770, %v133_v3   ;;  %v141_v7 = vld [vmem:[%s10086_s5 + $0x10] sm:$0x3]  ;;  %v140_v8 = vld [vmem:[%s10086_s5 + $0xe] sm:$0x3]  ;;  %v139_v9 = vld [vmem:[%s10086_s5 + $0xc] sm:$0x3]  ;;  %s11162_s7 = sld [smem:[%s13958_s0 + %s10052_s4]]  }
   0xa   :  { %v144_v10 = vld [vmem:[%s10086_s5 + $0x16] sm:$0x3]  ;;  %v143_v11 = vld [vmem:[%s10086_s5 + $0x14] sm:$0x3]  ;;  %v142_v12 = vld [vmem:[%s10086_s5 + $0x12] sm:$0x3] }
   0xb   :  { %v147_v13 = vld [vmem:[%s10086_s5 + $0x1c] sm:$0x3]  ;;  %v146_v14 = vld [vmem:[%s10086_s5 + $0x1a] sm:$0x3]  ;;  %v145_v15 = vld [vmem:[%s10086_s5 + $0x18] sm:$0x3] }
   0xc   :  { %v150_v16 = vld [vmem:[%s10086_s5 + $0x22] sm:$0x3]  ;;  %v149_v17 = vld [vmem:[%s10086_s5 + $0x20] sm:$0x3]  ;;  %v148_v18 = vld [vmem:[%s10086_s5 + $0x1e] sm:$0x3] }
   0xd   :  { %v153_v19 = vld [vmem:[%s10086_s5 + $0x28] sm:$0x3]  ;;  %v152_v20 = vld [vmem:[%s10086_s5 + $0x26] sm:$0x3]  ;;  %v151_v21 = vld [vmem:[%s10086_s5 + $0x24] sm:$0x3] }
   0xe   :  { %v156_v22 = vld [vmem:[%s10086_s5 + $0x2e] sm:$0x3]  ;;  %v155_v23 = vld [vmem:[%s10086_s5 + $0x2c] sm:$0x3]  ;;  %v154_v24 = vld [vmem:[%s10086_s5 + $0x2a] sm:$0x3] }
   0xf   :  { %v159_v25 = vld [vmem:[%s10086_s5 + $0x34] sm:$0x3]  ;;  %v158_v26 = vld [vmem:[%s10086_s5 + $0x32] sm:$0x3]  ;;  %v157_v27 = vld [vmem:[%s10086_s5 + $0x30] sm:$0x3] }
  0x10   :  { %193 = vperm.xlu2 %9772, %v138_v4   ;;  %183 = vperm.xlu1 %9771, %v136_v5   ;;  %v161_v28 = vld [vmem:[%s10086_s5 + $0x38] sm:$0x3]  ;;  %v160_v29 = vld [vmem:[%s10086_s5 + $0x36] sm:$0x3]  ;;  %v10138_v34 = vld [vmem:[%s10091_s9] ss:$0 sm:$0xff] }
  0x11   :  { %173 = vperm.xlu0 %9770, %v134_v6   ;;  %v10141_v35 = vld [vmem:[%s10091_s9 + $0x1] ss:$0 sm:$0xff]  ;;  %v10146_v38 = vld [vmem:[%s10091_s9 + $0x2] ss:$0 sm:$0xff]  ;;  %v10149_v40 = vld [vmem:[%s10091_s9 + $0x3] ss:$0 sm:$0xff] }
  0x12   :  { %v10165_v58 = vld [vmem:[%s10099_s13] ss:$0 sm:$0xff]  ;;  %s10054_s8 = smov 9   ;;  %s10055_s12 = smov 10  }
  0x13   :  { %s11552_s11 = sld [smem:[%s13958_s0 + %s10054_s8]]   ;;  %s10056_s16 = smov 12  }
  0x14   :  { %s11748_s15 = sld [smem:[%s13958_s0 + %s10055_s12]]   ;;  %s10057_s20 = smov 11  }
  0x15   :  { %s11753_s19 = sld [smem:[%s13958_s0 + %s10056_s16]]   ;;  %s10058_s24 = smov 13  }
  0x16   :  { %s11765_s23 = sld [smem:[%s13958_s0 + %s10057_s20]]   ;;  %s10059_s28 = smov 14  }
  0x17   :  { %s11780_s27 = sld [smem:[%s13958_s0 + %s10058_s24]]   ;;  %s10060_s2 = smov 15  }
  0x18   :  { %208 = vperm.xlu2 %9772, %v141_v7   ;;  %203 = vperm.xlu1 %9771, %v140_v8   ;;  %s8787_s1 = sld [smem:[%s13958_s0 + %s10059_s28]]   ;;  %s10061_s6 = smov 16  }
  0x19   :  { %198 = vperm.xlu0 %9770, %v139_v9   ;;  %s8788_s5 = sld [smem:[%s13958_s0 + %s10060_s2]]   ;;  %s10062_s10 = smov 17  }
  0x1a   :  { %s8789_s9 = sld [smem:[%s13958_s0 + %s10061_s6]]   ;;  %s10063_s14 = smov 18  }
  0x1b   :  { %s8790_s13 = sld [smem:[%s13958_s0 + %s10062_s10]]   ;;  %s10064_s18 = smov 19  }
  0x1c   :  { %s10065_s22 = smov 20   ;;  %s10066_s26 = smov 21  }
  0x1d   :  { %s10067_s30 = smov 22   ;;  %s10068_s4 = smov 23  }
  0x1e   :  { %s10069_s8 = smov 24   ;;  %s10070_s12 = smov 25  }
  0x1f   :  { %s10071_s16 = smov 26   ;;  %s10073_s20 = smov 27  }
  0x20   :  { %223 = vperm.xlu2 %9772, %v144_v10   ;;  %218 = vperm.xlu1 %9771, %v143_v11   ;;  %s10074_s24 = smov 28   ;;  %s10075_s28 = smov 29  }
  0x21   :  { %213 = vperm.xlu0 %9770, %v142_v12   ;;  %s10076_s2 = smov 31   ;;  %s10077_s6 = smov 30  }
  0x28   :  { %238 = vperm.xlu2 %9772, %v147_v13   ;;  %233 = vperm.xlu1 %9771, %v146_v14  }
  0x29   :  { %228 = vperm.xlu0 %9770, %v145_v15  }
  0x30   :  { %253 = vperm.xlu2 %9772, %v150_v16   ;;  %248 = vperm.xlu1 %9771, %v149_v17  }
  0x31   :  { %243 = vperm.xlu0 %9770, %v148_v18  }
  0x38   :  { %268 = vperm.xlu2 %9772, %v153_v19   ;;  %263 = vperm.xlu1 %9771, %v152_v20  }
  0x39   :  { %258 = vperm.xlu0 %9770, %v151_v21  }
  0x40   :  { %283 = vperm.xlu2 %9772, %v156_v22   ;;  %278 = vperm.xlu1 %9771, %v155_v23  }
  0x41   :  { %273 = vperm.xlu0 %9770, %v154_v24  }
  0x48   :  { %353 = vperm.xlu2 %9772, %v159_v25   ;;  %293 = vperm.xlu1 %9771, %v158_v26  }
  0x49   :  { %288 = vperm.xlu0 %9770, %v157_v27  }
  0x50   :  { %473 = vperm.xlu1 %9771, %v161_v28  }
  0x51   :  { %413 = vperm.xlu0 %9770, %v160_v29  }
  0x62   :  { %v189_v30 = vpop.permute.xlu2 %188 }
  0x63   :  { %v421_v47 = vmul.f32 %v10146_v38, %v189_v30  ;;  %v362_v54 = vmul.f32 %v10141_v35, %v189_v30  ;;  %v480_v57 = vmul.f32 %v10149_v40, %v189_v30  ;;  %v303_v62 = vmul.f32 %v10138_v34, %v189_v30 }
  0x6a   :  { %v194_v31 = vpop.permute.xlu2 %193 }
  0x6b   :  { %v481_v55 = vmul.f32 %v10149_v40, %v194_v31  ;;  %v363_v63 = vmul.f32 %v10141_v35, %v194_v31  ;;  %v422_v6 = vmul.f32 %v10146_v38, %v194_v31  ;;  %v304_v10 = vmul.f32 %v10138_v34, %v194_v31 }
  0x6d   :  { %v389_v11 = vadd.f32 %v363_v63, %v303_v62 }
  0x72   :  { %v10143_v36 = vpop.permute.xlu2 %208 }
  0x73   :  { %v484_v30 = vmul.f32 %v10149_v40, %v10143_v36 }
  0x7a   :  { %v179_v32 = vpop.permute.xlu1 %178  ;;  %v224_v7 = vpop.permute.xlu2 %223 }
  0x7b   :  { %v169_v33 = vpop.permute.xlu0 %168  ;;  %v301_v41 = vmul.f32 %v10138_v34, %v179_v32  ;;  %v360_v43 = vmul.f32 %v10141_v35, %v179_v32  ;;  %v419_v50 = vmul.f32 %v10146_v38, %v179_v32 }
  0x7c   :  { %v299_v44 = vmul.f32 %v10138_v34, %v169_v33 }
  0x82   :  { %v184_v37 = vpop.permute.xlu1 %183 }
  0x83   :  { %v174_v39 = vpop.permute.xlu0 %173  ;;  %v361_v42 = vmul.f32 %v10141_v35, %v184_v37  ;;  %v302_v48 = vmul.f32 %v10138_v34, %v184_v37  ;;  %v420_v51 = vmul.f32 %v10146_v38, %v184_v37  ;;  %v479_v59 = vmul.f32 %v10149_v40, %v184_v37 }
  0x84   :  { %v300_v45 = vmul.f32 %v10138_v34, %v174_v39  ;;  %v359_v46 = vmul.f32 %v10141_v35, %v174_v39  ;;  %v307_v39 = vmul.f32 %v10138_v34, %v10143_v36 }
  0x85   :  { %v387_v49 = vadd.f32 %v361_v42, %v301_v41  ;;  %v388_v0 = vadd.f32 %v362_v54, %v302_v48  ;;  %v366_v41 = vmul.f32 %v10141_v35, %v10143_v36  ;;  %v239_v48 = vpop.permute.xlu2 %238 }
  0x86   :  { %v385_v52 = vadd.f32 %v359_v46, %v299_v44  ;;  %v386_v53 = vadd.f32 %v360_v43, %v300_v45  ;;  %v425_v44 = vmul.f32 %v10146_v38, %v10143_v36  ;;  %v310_v45 = vmul.f32 %v10138_v34, %v224_v7 }
  0x87   :  { %v447_v56 = vadd.f32 %v421_v47, %v387_v49  ;;  %v448_v13 = vadd.f32 %v422_v6, %v388_v0  ;;  %v369_v6 = vmul.f32 %v10141_v35, %v224_v7 }
  0x88   :  { %v445_v60 = vadd.f32 %v419_v50, %v385_v52  ;;  %v446_v61 = vadd.f32 %v420_v51, %v386_v53 }
  0x89   :  { %v507_v1 = vadd.f32 %v481_v55, %v447_v56 }
  0x8a   :  { %v204_v2 = vpop.permute.xlu1 %203  ;;  %v505_v3 = vadd.f32 %v479_v59, %v445_v60  ;;  %v506_v4 = vadd.f32 %v480_v57, %v446_v61 }
  0x8b   :  { %v199_v5 = vpop.permute.xlu0 %198  ;;  %v10179_v12 = vadd.f32 %v10165_v58, %v507_v1  ;;  %v365_v19 = vmul.f32 %v10141_v35, %v204_v2  ;;  %v424_v22 = vmul.f32 %v10146_v38, %v204_v2  ;;  %v483_v23 = vmul.f32 %v10149_v40, %v204_v2 }
  0x8c   :  { %v10172_v8 = vadd.f32 %v10165_v58, %v505_v3  ;;  %v10175_v9 = vadd.f32 %v10165_v58, %v506_v4  ;;  %v364_v16 = vmul.f32 %v10141_v35, %v199_v5  ;;  %v423_v17 = vmul.f32 %v10146_v38, %v199_v5 }
  0x8d   :  { %v305_v20 = vmul.f32 %v10138_v34, %v199_v5  ;;  %v482_v21 = vmul.f32 %v10149_v40, %v199_v5  ;;  %v306_v26 = vmul.f32 %v10138_v34, %v204_v2  ;;  %v567_v27 = vsel %vm563_vm0, %v10179_v12, 0.0 }
  0x8e   :  { %v564_v14 = vsel %vm563_vm0, %v10172_v8, 0.0  ;;  %v565_v15 = vsel %vm563_vm0, %v10175_v9, 0.0  ;;  %v390_v24 = vadd.f32 %v364_v16, %v304_v10  ;;  %v449_v25 = vadd.f32 %v423_v17, %v389_v11 }
  0x8f   :  { %v566_v18 = vadd.f32 %v565_v15, %v564_v14  ;;  %v508_v28 = vadd.f32 %v482_v21, %v448_v13  ;;  %v391_v42 = vadd.f32 %v365_v19, %v305_v20  ;;  %v392_v49 = vadd.f32 %v366_v41, %v306_v26 }
  0x90   :  { %v450_v32 = vadd.f32 %v424_v22, %v390_v24  ;;  %v509_v33 = vadd.f32 %v483_v23, %v449_v25  ;;  %v428_v10 = vmul.f32 %v10146_v38, %v224_v7  ;;  %v487_v11 = vmul.f32 %v10149_v40, %v224_v7 }
  0x91   :  { %v568_v31 = vadd.f32 %v567_v27, %v566_v18  ;;  %v10202_v43 = vadd.f32 %v10165_v58, %v508_v28  ;;  %v451_v57 = vadd.f32 %v425_v44, %v391_v42  ;;  %v313_v15 = vmul.f32 %v10138_v34, %v239_v48 }
  0x92   :  { %v219_v29 = vpop.permute.xlu1 %218  ;;  %v510_v46 = vadd.f32 %v484_v30, %v450_v32  ;;  %v10208_v47 = vadd.f32 %v10165_v58, %v509_v33  ;;  %v372_v16 = vmul.f32 %v10141_v35, %v239_v48  ;;  %v254_v30 = vpop.permute.xlu2 %253 }
  0x93   :  { %v214_v37 = vpop.permute.xlu0 %213  ;;  %v569_v50 = vsel %vm563_vm0, %v10202_v43, 0.0  ;;  %v368_v51 = vmul.f32 %v10141_v35, %v219_v29  ;;  %v309_v56 = vmul.f32 %v10138_v34, %v219_v29  ;;  %v427_v62 = vmul.f32 %v10146_v38, %v219_v29 }
  0x94   :  { %v308_v52 = vmul.f32 %v10138_v34, %v214_v37  ;;  %v10215_v53 = vadd.f32 %v10165_v58, %v510_v46  ;;  %v570_v54 = vadd.f32 %v569_v50, %v568_v31  ;;  %v571_v36 = vsel %vm563_vm0, %v10208_v47, 0.0 }
  0x95   :  { %v367_v55 = vmul.f32 %v10141_v35, %v214_v37  ;;  %v426_v59 = vmul.f32 %v10146_v38, %v214_v37  ;;  %v485_v60 = vmul.f32 %v10149_v40, %v214_v37  ;;  %v486_v63 = vmul.f32 %v10149_v40, %v219_v29 }
  0x96   :  { %v572_v61 = vadd.f32 %v571_v36, %v570_v54  ;;  %v573_v1 = vsel %vm563_vm0, %v10215_v53, 0.0  ;;  %v394_v2 = vadd.f32 %v368_v51, %v308_v52  ;;  %v395_v19 = vadd.f32 %v369_v6, %v309_v56 }
  0x97   :  { %v393_v0 = vadd.f32 %v367_v55, %v307_v39  ;;  %v452_v3 = vadd.f32 %v426_v59, %v392_v49  ;;  %v511_v4 = vadd.f32 %v485_v60, %v451_v57  ;;  %v431_v39 = vmul.f32 %v10146_v38, %v239_v48 }
  0x98   :  { %v574_v20 = vadd.f32 %v573_v1, %v572_v61  ;;  %v454_v24 = vadd.f32 %v428_v10, %v394_v2  ;;  %v490_v54 = vmul.f32 %v10149_v40, %v239_v48  ;;  %v375_v36 = vmul.f32 %v10141_v35, %v254_v30 }
  0x99   :  { %v453_v13 = vadd.f32 %v427_v62, %v393_v0  ;;  %v512_v17 = vadd.f32 %v486_v63, %v452_v3  ;;  %v10233_v18 = vadd.f32 %v10165_v58, %v511_v4  ;;  %v434_v55 = vmul.f32 %v10146_v38, %v254_v30 }
  0x9a   :  { %v234_v5 = vpop.permute.xlu1 %233 }
  0x9b   :  { %v229_v14 = vpop.permute.xlu0 %228  ;;  %v513_v21 = vadd.f32 %v487_v11, %v453_v13  ;;  %v371_v22 = vmul.f32 %v10141_v35, %v234_v5  ;;  %v10237_v23 = vadd.f32 %v10165_v58, %v512_v17  ;;  %v575_v7 = vsel %vm563_vm0, %v10233_v18, 0.0 }
  0x9c   :  { %v311_v25 = vmul.f32 %v10138_v34, %v229_v14  ;;  %v576_v27 = vadd.f32 %v575_v7, %v574_v20  ;;  %v312_v28 = vmul.f32 %v10138_v34, %v234_v5  ;;  %v370_v29 = vmul.f32 %v10141_v35, %v229_v14 }
  0x9d   :  { %v10243_v26 = vadd.f32 %v10165_v58, %v513_v21  ;;  %v577_v31 = vsel %vm563_vm0, %v10237_v23, 0.0  ;;  %v429_v33 = vmul.f32 %v10146_v38, %v229_v14  ;;  %v488_v37 = vmul.f32 %v10149_v40, %v229_v14 }
  0x9e   :  { %v397_v32 = vadd.f32 %v371_v22, %v311_v25  ;;  %v578_v41 = vadd.f32 %v577_v31, %v576_v27  ;;  %v430_v42 = vmul.f32 %v10146_v38, %v234_v5  ;;  %v396_v44 = vadd.f32 %v370_v29, %v310_v45  ;;  %v269_v25 = vpop.permute.xlu2 %268 }
  0x9f   :  { %v489_v46 = vmul.f32 %v10149_v40, %v234_v5  ;;  %v579_v49 = vsel %vm563_vm0, %v10243_v26, 0.0  ;;  %v455_v50 = vadd.f32 %v429_v33, %v395_v19  ;;  %v514_v51 = vadd.f32 %v488_v37, %v454_v24 }
  0xa0   :  { %v456_v56 = vadd.f32 %v430_v42, %v396_v44  ;;  %v398_v59 = vadd.f32 %v372_v16, %v312_v28  ;;  %v457_v61 = vadd.f32 %v431_v39, %v397_v32  ;;  %v580_v62 = vadd.f32 %v579_v49, %v578_v41 }
  0xa1   :  { %v515_v60 = vadd.f32 %v489_v46, %v455_v50  ;;  %v10260_v45 = vadd.f32 %v10165_v58, %v514_v51  ;;  %v316_v7 = vmul.f32 %v10138_v34, %v254_v30  ;;  %v493_v24 = vmul.f32 %v10149_v40, %v254_v30 }
  0xa2   :  { %v249_v52 = vpop.permute.xlu1 %248  ;;  %v516_v63 = vadd.f32 %v490_v54, %v456_v56 }
  0xa3   :  { %v244_v57 = vpop.permute.xlu0 %243  ;;  %v315_v0 = vmul.f32 %v10138_v34, %v249_v52  ;;  %v374_v1 = vmul.f32 %v10141_v35, %v249_v52  ;;  %v10265_v48 = vadd.f32 %v10165_v58, %v515_v60  ;;  %v581_v2 = vsel %vm563_vm0, %v10260_v45, 0.0 }
  0xa4   :  { %v433_v3 = vmul.f32 %v10146_v38, %v249_v52  ;;  %v314_v4 = vmul.f32 %v10138_v34, %v244_v57  ;;  %v10272_v5 = vadd.f32 %v10165_v58, %v516_v63  ;;  %v582_v6 = vadd.f32 %v581_v2, %v580_v62 }
  0xa5   :  { %v373_v10 = vmul.f32 %v10141_v35, %v244_v57  ;;  %v432_v11 = vmul.f32 %v10146_v38, %v244_v57  ;;  %v583_v13 = vsel %vm563_vm0, %v10265_v48, 0.0  ;;  %v492_v14 = vmul.f32 %v10149_v40, %v249_v52 }
  0xa6   :  { %v400_v16 = vadd.f32 %v374_v1, %v314_v4  ;;  %v491_v17 = vmul.f32 %v10149_v40, %v244_v57  ;;  %v584_v19 = vadd.f32 %v583_v13, %v582_v6  ;;  %v585_v20 = vsel %vm563_vm0, %v10272_v5, 0.0 }
  0xa7   :  { %v399_v21 = vadd.f32 %v373_v10, %v313_v15  ;;  %v458_v22 = vadd.f32 %v432_v11, %v398_v59  ;;  %v401_v29 = vadd.f32 %v375_v36, %v315_v0  ;;  %v378_v63 = vmul.f32 %v10141_v35, %v269_v25 }
  0xa8   :  { %v517_v27 = vadd.f32 %v491_v17, %v457_v61  ;;  %v460_v33 = vadd.f32 %v434_v55, %v400_v16  ;;  %v586_v39 = vadd.f32 %v585_v20, %v584_v19  ;;  %v437_v0 = vmul.f32 %v10146_v38, %v269_v25  ;;  %v284_v20 = vpop.permute.xlu2 %283 }
  0xa9   :  { %v459_v31 = vadd.f32 %v433_v3, %v399_v21  ;;  %v518_v32 = vadd.f32 %v492_v14, %v458_v22  ;;  %v496_v3 = vmul.f32 %v10149_v40, %v269_v25  ;;  %v319_v13 = vmul.f32 %v10138_v34, %v269_v25 }
  0xaa   :  { %v264_v28 = vpop.permute.xlu1 %263  ;;  %v10285_v41 = vadd.f32 %v10165_v58, %v517_v27 }
  0xab   :  { %v259_v37 = vpop.permute.xlu0 %258  ;;  %v318_v42 = vmul.f32 %v10138_v34, %v264_v28  ;;  %v377_v15 = vmul.f32 %v10141_v35, %v264_v28  ;;  %v519_v44 = vadd.f32 %v493_v24, %v459_v31  ;;  %v10290_v46 = vadd.f32 %v10165_v58, %v518_v32 }
  0xac   :  { %v436_v30 = vmul.f32 %v10146_v38, %v264_v28  ;;  %v317_v49 = vmul.f32 %v10138_v34, %v259_v37  ;;  %v587_v50 = vsel %vm563_vm0, %v10285_v41, 0.0  ;;  %v376_v51 = vmul.f32 %v10141_v35, %v259_v37 }
  0xad   :  { %v435_v52 = vmul.f32 %v10146_v38, %v259_v37  ;;  %v494_v54 = vmul.f32 %v10149_v40, %v259_v37  ;;  %v10300_v36 = vadd.f32 %v10165_v58, %v519_v44  ;;  %v588_v55 = vadd.f32 %v587_v50, %v586_v39 }
  0xae   :  { %v589_v56 = vsel %vm563_vm0, %v10290_v46, 0.0  ;;  %v495_v57 = vmul.f32 %v10149_v40, %v264_v28  ;;  %v402_v59 = vadd.f32 %v376_v51, %v316_v7  ;;  %v403_v60 = vadd.f32 %v377_v15, %v317_v49 }
  0xaf   :  { %v461_v61 = vadd.f32 %v435_v52, %v401_v29  ;;  %v520_v62 = vadd.f32 %v494_v54, %v460_v33  ;;  %v590_v1 = vadd.f32 %v589_v56, %v588_v55  ;;  %v591_v2 = vsel %vm563_vm0, %v10300_v36, 0.0 }
  0xb0   :  { %v462_v4 = vadd.f32 %v436_v30, %v402_v59  ;;  %v404_v14 = vadd.f32 %v378_v63, %v318_v42  ;;  %v463_v24 = vadd.f32 %v437_v0, %v403_v60  ;;  %v381_v52 = vmul.f32 %v10141_v35, %v284_v20 }
  0xb1   :  { %v521_v6 = vadd.f32 %v495_v57, %v461_v61  ;;  %v10311_v10 = vadd.f32 %v10165_v58, %v520_v62  ;;  %v592_v16 = vadd.f32 %v591_v2, %v590_v1  ;;  %v440_v54 = vmul.f32 %v10146_v38, %v284_v20 }
  0xb2   :  { %v279_v11 = vpop.permute.xlu1 %278  ;;  %v522_v21 = vadd.f32 %v496_v3, %v462_v4  ;;  %v499_v55 = vmul.f32 %v10149_v40, %v284_v20  ;;  %v322_v57 = vmul.f32 %v10138_v34, %v284_v20 }
  0xb3   :  { %v380_v17 = vmul.f32 %v10141_v35, %v279_v11  ;;  %v274_v19 = vpop.permute.xlu0 %273  ;;  %v10316_v22 = vadd.f32 %v10165_v58, %v521_v6  ;;  %v593_v7 = vsel %vm563_vm0, %v10311_v10, 0.0  ;;  %v321_v28 = vmul.f32 %v10138_v34, %v279_v11 }
  0xb4   :  { %v594_v27 = vadd.f32 %v593_v7, %v592_v16  ;;  %v320_v29 = vmul.f32 %v10138_v34, %v274_v19  ;;  %v379_v25 = vmul.f32 %v10141_v35, %v274_v19  ;;  %v10324_v31 = vadd.f32 %v10165_v58, %v522_v21 }
  0xb5   :  { %v595_v32 = vsel %vm563_vm0, %v10316_v22, 0.0  ;;  %v438_v33 = vmul.f32 %v10146_v38, %v274_v19  ;;  %v497_v37 = vmul.f32 %v10149_v40, %v274_v19  ;;  %v439_v42 = vmul.f32 %v10146_v38, %v279_v11  ;;  %v354_v19 = vpop.permute.xlu2 %353 }
  0xb6   :  { %v596_v39 = vadd.f32 %v595_v32, %v594_v27  ;;  %v405_v15 = vadd.f32 %v379_v25, %v319_v13  ;;  %v406_v44 = vadd.f32 %v380_v17, %v320_v29  ;;  %v498_v30 = vmul.f32 %v10149_v40, %v279_v11 }
  0xb7   :  { %v597_v49 = vsel %vm563_vm0, %v10324_v31, 0.0  ;;  %v464_v50 = vadd.f32 %v438_v33, %v404_v14  ;;  %v523_v51 = vadd.f32 %v497_v37, %v463_v24  ;;  %v407_v62 = vadd.f32 %v381_v52, %v321_v28 }
  0xb8   :  { %v465_v56 = vadd.f32 %v439_v42, %v405_v15  ;;  %v598_v63 = vadd.f32 %v597_v49, %v596_v39  ;;  %v466_v1 = vadd.f32 %v440_v54, %v406_v44  ;;  %v10048_v39 = vmov 52.0  }
  0xb9   :  { %v524_v59 = vadd.f32 %v498_v30, %v464_v50  ;;  %v10339_v60 = vadd.f32 %v10165_v58, %v523_v51  ;;  %9821 = vrcp.f32 %v10048_v39  ;;  %v384_v42 = vmul.f32 %v10141_v35, %v354_v19 }
  0xba   :  { %v294_v61 = vpop.permute.xlu1 %293  ;;  %v525_v0 = vadd.f32 %v499_v55, %v465_v56  ;;  %v443_v30 = vmul.f32 %v10146_v38, %v354_v19 }
  0xbb   :  { %v289_v2 = vpop.permute.xlu0 %288  ;;  %v10342_v3 = vadd.f32 %v10165_v58, %v524_v59  ;;  %v599_v4 = vsel %vm563_vm0, %v10339_v60, 0.0  ;;  %v383_v6 = vmul.f32 %v10141_v35, %v294_v61  ;;  %v324_v21 = vmul.f32 %v10138_v34, %v294_v61 }
  0xbc   :  { %v323_v11 = vmul.f32 %v10138_v34, %v289_v2  ;;  %v10349_v13 = vadd.f32 %v10165_v58, %v525_v0  ;;  %v600_v14 = vadd.f32 %v599_v4, %v598_v63  ;;  %v382_v16 = vmul.f32 %v10141_v35, %v289_v2 }
  0xbd   :  { %v441_v17 = vmul.f32 %v10146_v38, %v289_v2  ;;  %v601_v20 = vsel %vm563_vm0, %v10342_v3, 0.0  ;;  %v442_v7 = vmul.f32 %v10146_v38, %v294_v61  ;;  %v500_v24 = vmul.f32 %v10149_v40, %v289_v2 }
  0xbe   :  { %v602_v27 = vadd.f32 %v601_v20, %v600_v14  ;;  %v501_v28 = vmul.f32 %v10149_v40, %v294_v61  ;;  %v408_v29 = vadd.f32 %v382_v16, %v322_v57  ;;  %v603_v32 = vsel %vm563_vm0, %v10349_v13, 0.0 }
  0xbf   :  { %v467_v25 = vadd.f32 %v441_v17, %v407_v62  ;;  %v526_v33 = vadd.f32 %v500_v24, %v466_v1  ;;  %v409_v37 = vadd.f32 %v383_v6, %v323_v11  ;;  %v502_v34 = vmul.f32 %v10149_v40, %v354_v19  ;;  %v9822_v1 = vpop.eup %9821 }
  0xc0   :  { %v468_v15 = vadd.f32 %v442_v7, %v408_v29  ;;  %v604_v50 = vadd.f32 %v603_v32, %v602_v27  ;;  %v410_v55 = vadd.f32 %v384_v42, %v324_v21  ;;  %vm627_vm1 = vweird.f32 %v9822_v1 }
  0xc1   :  { %v527_v44 = vadd.f32 %v501_v28, %v467_v25  ;;  %v556_v49 = vadd.f32 %v10165_v58, %v526_v33  ;;  %v469_v59 = vadd.f32 %v443_v30, %v409_v37 }
  0xc2   :  { %v528_v51 = vadd.f32 %v502_v34, %v468_v15  ;;  %v474_v54 = vpop.permute.xlu1 %473 }
  0xc3   :  { %v557_v52 = vadd.f32 %v10165_v58, %v527_v44  ;;  %v414_v56 = vpop.permute.xlu0 %413  ;;  %v605_v57 = vsel %vm563_vm0, %v556_v49, 0.0  ;;  %v504_v2 = vmul.f32 %v10149_v40, %v474_v54 }
  0xc4   :  { %v444_v35 = vmul.f32 %v10146_v38, %v414_v56  ;;  %v503_v61 = vmul.f32 %v10149_v40, %v414_v56  ;;  %v606_v62 = vadd.f32 %v605_v57, %v604_v50  ;;  %v558_v63 = vadd.f32 %v10165_v58, %v528_v51 }
  0xc5   :  { %v607_v0 = vsel %vm563_vm0, %v557_v52, 0.0  ;;  %v623_v38 = vmul.f32 52.0, %v9822_v1 }
  0xc6   :  { %v470_v4 = vadd.f32 %v444_v35, %v410_v55  ;;  %v529_v6 = vadd.f32 %v503_v61, %v469_v59  ;;  %v608_v11 = vadd.f32 %v607_v0, %v606_v62  ;;  %v609_v14 = vsel %vm563_vm0, %v558_v63, 0.0 }
  0xc7   :  { %v624_v27 = vsub.f32 1.0, %v623_v38 }
  0xc8   :  { %v530_v16 = vadd.f32 %v504_v2, %v470_v4  ;;  %v559_v17 = vadd.f32 %v10165_v58, %v529_v6  ;;  %v610_v19 = vadd.f32 %v609_v14, %v608_v11 }
  0xc9   :  { %v625_v25 = vmul.f32 %v9822_v1, %v624_v27 }
  0xca   :  { %v560_v20 = vadd.f32 %v10165_v58, %v530_v16  ;;  %v611_v21 = vsel %vm563_vm0, %v559_v17, 0.0 }
  0xcb   :  { %v612_v7 = vadd.f32 %v611_v21, %v610_v19  ;;  %v626_v37 = vadd.f32 %v9822_v1, %v625_v25 }
  0xcc   :  { %v613_v24 = vsel %vm563_vm0, %v560_v20, 0.0 }
  0xcd   :  { %v614_v28 = vadd.f32 %v613_v24, %v612_v7  ;;  %v10378_v34 = vsel %vm627_vm1, %v9822_v1, %v626_v37 }
  0xce   :  { %13961 = vst [vmem:[#allocation4_spill] sm:$0xff] %v10378_v34 }
  0xcf   :  { %v615_v40 = vsel %vm563_vm0, %v614_v28, 0.0 }
  0xd0   :  { %v616_v29 = vrot.slane %v615_v40, 4 }
  0xd2   :  { %v617_v32 = vadd.f32 %v616_v29, %v615_v40 }
  0xd4   :  { %v618_v33 = vrot.slane %v617_v32, 2 }
  0xd6   :  { %v619_v39 = vadd.f32 %v618_v33, %v617_v32 }
  0xd8   :  { %v620_v42 = vrot.slane %v619_v39, 1 }
  0xda   :  { %v621_v58 = vadd.f32 %v620_v42, %v619_v39 }
  0xdc   :  { %v629_v15 = vmul.f32 %v10378_v34, %v621_v58 }
  0xde   :  { %v10382_v44 = vsub.f32 %v10172_v8, %v629_v15  ;;  %v10385_v30 = vsub.f32 %v10175_v9, %v629_v15  ;;  %v10388_v50 = vsub.f32 %v10237_v23, %v629_v15  ;;  %v10391_v51 = vsub.f32 %v10243_v26, %v629_v15 }
  0xdf   :  { %v10394_v54 = vsub.f32 %v10260_v45, %v629_v15  ;;  %v10397_v55 = vsub.f32 %v10265_v48, %v629_v15  ;;  %v10400_v56 = vsub.f32 %v10272_v5, %v629_v15  ;;  %v10403_v8 = vsub.f32 %v10285_v41, %v629_v15 }
  0xe0   :  { %v10406_v9 = vsub.f32 %v10290_v46, %v629_v15  ;;  %v10409_v23 = vsub.f32 %v10300_v36, %v629_v15  ;;  %v10412_v26 = vsub.f32 %v10311_v10, %v629_v15  ;;  %v10415_v45 = vsub.f32 %v10316_v22, %v629_v15 }
  0xe1   :  { %v10418_v48 = vsub.f32 %v10324_v31, %v629_v15  ;;  %v10421_v5 = vsub.f32 %v10339_v60, %v629_v15  ;;  %v10424_v41 = vsub.f32 %v10342_v3, %v629_v15  ;;  %v10427_v46 = vsub.f32 %v10349_v13, %v629_v15 }
  0xe2   :  { %v10429_v36 = vsub.f32 %v556_v49, %v629_v15  ;;  %v10431_v57 = vsub.f32 %v557_v52, %v629_v15  ;;  %v10433_v10 = vsub.f32 %v558_v63, %v629_v15  ;;  %v10435_v22 = vsub.f32 %v559_v17, %v629_v15 }
  0xe3   :  { %v10437_v59 = vsub.f32 %v560_v20, %v629_v15  ;;  %v10440_v31 = vsub.f32 %v10179_v12, %v629_v15  ;;  %v10443_v60 = vsub.f32 %v10202_v43, %v629_v15  ;;  %v656_v3 = vmul.f32 %v10382_v44, %v10382_v44 }
  0xe4   :  { %v657_v13 = vmul.f32 %v10385_v30, %v10385_v30  ;;  %v10450_v49 = vsub.f32 %v10208_v47, %v629_v15  ;;  %v10455_v35 = vsub.f32 %v10215_v53, %v629_v15  ;;  %v10462_v63 = vsub.f32 %v10233_v18, %v629_v15 }
  0xe5   :  { %v658_v52 = vmul.f32 %v10440_v31, %v10440_v31  ;;  %v659_v12 = vmul.f32 %v10443_v60, %v10443_v60  ;;  %v682_v43 = vsel %vm563_vm0, %v656_v3, 0.0  ;;  %v663_v18 = vmul.f32 %v10388_v50, %v10388_v50 }
  0xe6   :  { %v683_v61 = vsel %vm563_vm0, %v657_v13, 0.0  ;;  %v660_v47 = vmul.f32 %v10450_v49, %v10450_v49  ;;  %v661_v53 = vmul.f32 %v10455_v35, %v10455_v35  ;;  %v662_v6 = vmul.f32 %v10462_v63, %v10462_v63 }
  0xe7   :  { %v684_v62 = vadd.f32 %v683_v61, %v682_v43  ;;  %v685_v0 = vsel %vm563_vm0, %v658_v52, 0.0  ;;  %v687_v2 = vsel %vm563_vm0, %v659_v12, 0.0  ;;  %v664_v19 = vmul.f32 %v10391_v51, %v10391_v51 }
  0xe8   :  { %v689_v11 = vsel %vm563_vm0, %v660_v47, 0.0  ;;  %v691_v16 = vsel %vm563_vm0, %v661_v53, 0.0  ;;  %v693_v38 = vsel %vm563_vm0, %v662_v6, 0.0  ;;  %v665_v21 = vmul.f32 %v10394_v54, %v10394_v54 }
  0xe9   :  { %v686_v1 = vadd.f32 %v685_v0, %v684_v62  ;;  %v695_v7 = vsel %vm563_vm0, %v663_v18, 0.0  ;;  %v666_v27 = vmul.f32 %v10397_v55, %v10397_v55  ;;  %v697_v28 = vsel %vm563_vm0, %v664_v19, 0.0 }
  0xea   :  { %v667_v29 = vmul.f32 %v10400_v56, %v10400_v56  ;;  %v699_v25 = vsel %vm563_vm0, %v665_v21, 0.0  ;;  %v668_v33 = vmul.f32 %v10403_v8, %v10403_v8  ;;  %v669_v42 = vmul.f32 %v10406_v9, %v10406_v9 }
  0xeb   :  { %v688_v4 = vadd.f32 %v687_v2, %v686_v1  ;;  %v701_v37 = vsel %vm563_vm0, %v666_v27, 0.0  ;;  %v670_v3 = vmul.f32 %v10409_v23, %v10409_v23  ;;  %v671_v12 = vmul.f32 %v10412_v26, %v10412_v26 }
  0xec   :  { %v703_v58 = vsel %vm563_vm0, %v667_v29, 0.0  ;;  %v705_v13 = vsel %vm563_vm0, %v668_v33, 0.0  ;;  %v707_v43 = vsel %vm563_vm0, %v669_v42, 0.0  ;;  %v672_v62 = vmul.f32 %v10415_v45, %v10415_v45 }
  0xed   :  { %v690_v14 = vadd.f32 %v689_v11, %v688_v4  ;;  %v709_v47 = vsel %vm563_vm0, %v670_v3, 0.0  ;;  %v673_v1 = vmul.f32 %v10418_v48, %v10418_v48  ;;  %v711_v53 = vsel %vm563_vm0, %v671_v12, 0.0 }
  0xee   :  { %v674_v4 = vmul.f32 %v10421_v5, %v10421_v5  ;;  %v713_v6 = vsel %vm563_vm0, %v672_v62, 0.0 }
  0xef   :  { %v692_v17 = vadd.f32 %v691_v16, %v690_v14  ;;  %v675_v14 = vmul.f32 %v10424_v41, %v10424_v41  ;;  %v715_v18 = vsel %vm563_vm0, %v673_v1, 0.0 }
  0xf0   :  { %v717_v19 = vsel %vm563_vm0, %v674_v4, 0.0  ;;  %v10540_v4 = vld [vmem:[%s10537_s25 + $0x18] sm:$0xff] }
  0xf1   :  { %v694_v20 = vadd.f32 %v693_v38, %v692_v17  ;;  %v676_v17 = vmul.f32 %v10427_v46, %v10427_v46  ;;  %v719_v21 = vsel %vm563_vm0, %v675_v14, 0.0  ;;  %888 = vmatpush.msra.mxu0 %v10540_v4  ;;  %911 = vmatpush.msra.mxu1 %v10540_v4 }
  0xf2   :  { %934 = vmatpush.msra.mxu2 %v10540_v4  ;;  %957 = vmatpush.msra.mxu3 %v10540_v4 }
  0xf3   :  { %v696_v24 = vadd.f32 %v695_v7, %v694_v20  ;;  %v677_v20 = vmul.f32 %v10429_v36, %v10429_v36  ;;  %v721_v27 = vsel %vm563_vm0, %v676_v17, 0.0 }
  0xf5   :  { %v698_v40 = vadd.f32 %v697_v28, %v696_v24  ;;  %v678_v24 = vmul.f32 %v10431_v57, %v10431_v57  ;;  %v723_v29 = vsel %vm563_vm0, %v677_v20, 0.0  ;;  %v10564_v20 = vld [vmem:[%s10128_s17] ss:$0 sm:$0xff]  ;;  %s8791_s17 = sld [smem:[%s13958_s0 + %s10063_s14]]  }
  0xf7   :  { %v700_v32 = vadd.f32 %v699_v25, %v698_v40  ;;  %v679_v40 = vmul.f32 %v10433_v10, %v10433_v10  ;;  %v725_v33 = vsel %vm563_vm0, %v678_v24, 0.0  ;;  %v10571_v24 = vld [vmem:[%s10133_s21] ss:$0 sm:$0xff]  ;;  %s8792_s21 = sld [smem:[%s13958_s0 + %s10064_s18]]  }
  0xf9   :  { %v702_v39 = vadd.f32 %v701_v37, %v700_v32  ;;  %v680_v32 = vmul.f32 %v10435_v22, %v10435_v22  ;;  %v727_v42 = vsel %vm563_vm0, %v679_v40, 0.0 }
  0xfb   :  { %v704_v15 = vadd.f32 %v703_v58, %v702_v39  ;;  %v681_v39 = vmul.f32 %v10437_v59, %v10437_v59 }
  0xfd   :  { %v706_v52 = vadd.f32 %v705_v13, %v704_v15  ;;  %v729_v15 = vsel %vm563_vm0, %v680_v32, 0.0  ;;  %v731_v13 = vsel %vm563_vm0, %v681_v39, 0.0 }
  0xff   :  { %v708_v61 = vadd.f32 %v707_v43, %v706_v52 }
 0x101   :  { %v710_v0 = vadd.f32 %v709_v47, %v708_v61 }
 0x103   :  { %v712_v2 = vadd.f32 %v711_v53, %v710_v0 }
 0x105   :  { %v714_v11 = vadd.f32 %v713_v6, %v712_v2  ;;  %v10543_v6 = vld [vmem:[%s10537_s25 + $0x10] sm:$0xff] }
 0x106   :  { %889 = vmatpush.msra.mxu0 %v10543_v6  ;;  %912 = vmatpush.msra.mxu1 %v10543_v6 }
 0x107   :  { %v716_v16 = vadd.f32 %v715_v18, %v714_v11  ;;  %935 = vmatpush.msra.mxu2 %v10543_v6  ;;  %958 = vmatpush.msra.mxu3 %v10543_v6 }
 0x108   :  { %980 = vmatpush.msrb.mxu0 %v10540_v4  ;;  %1003 = vmatpush.msrb.mxu1 %v10540_v4 }
 0x109   :  { %v718_v38 = vadd.f32 %v717_v19, %v716_v16  ;;  %1026 = vmatpush.msrb.mxu2 %v10540_v4  ;;  %1049 = vmatpush.msrb.mxu3 %v10540_v4 }
 0x10a   :  { %981 = vmatpush.msrb.mxu0 %v10543_v6  ;;  %1004 = vmatpush.msrb.mxu1 %v10543_v6 }
 0x10b   :  { %v720_v7 = vadd.f32 %v719_v21, %v718_v38  ;;  %1027 = vmatpush.msrb.mxu2 %v10543_v6  ;;  %1050 = vmatpush.msrb.mxu3 %v10543_v6 }
 0x10d   :  { %v722_v28 = vadd.f32 %v721_v27, %v720_v7 }
 0x10f   :  { %v724_v25 = vadd.f32 %v723_v29, %v722_v28 }
 0x111   :  { %v726_v37 = vadd.f32 %v725_v33, %v724_v25 }
 0x113   :  { %v728_v58 = vadd.f32 %v727_v42, %v726_v37 }
 0x115   :  { %v730_v3 = vadd.f32 %v729_v15, %v728_v58 }
 0x117   :  { %v732_v52 = vadd.f32 %v731_v13, %v730_v3 }
 0x119   :  { %v733_v12 = vsel %vm563_vm0, %v732_v52, 0.0 }
 0x11a   :  { %v734_v43 = vrot.slane %v733_v12, 4 }
 0x11c   :  { %v735_v61 = vadd.f32 %v734_v43, %v733_v12 }
 0x11e   :  { %v736_v62 = vrot.slane %v735_v61, 2 }
 0x120   :  { %v737_v47 = vadd.f32 %v736_v62, %v735_v61 }
 0x122   :  { %v738_v0 = vrot.slane %v737_v47, 1 }
 0x124   :  { %v739_v1 = vadd.f32 %v738_v0, %v737_v47 }
 0x126   :  { %v740_v53 = vmul.f32 %v739_v1, %v10378_v34 }
 0x128   :  { %v741_v2 = vadd.f32 1e-05, %v740_v53 }
 0x12a   :  { %9823 = vrsqrt.f32 %v741_v2  ;;  %vm748_vm3 = vweird.f32 %v741_v2 }
 0x130   :  { %v9824_v11 = vpop.eup %9823 }
 0x131   :  { %v743_v14 = vmul.f32 %v9824_v11, %v741_v2  ;;  %vm749_vm2 = vweird.f32 %v9824_v11 }
 0x132   :  { %vm750_vm4 = vmor %vm748_vm3, %vm749_vm2 }
 0x133   :  { %v744_v18 = vmul.f32 %v9824_v11, %v743_v14 }
 0x135   :  { %v745_v16 = vmul.f32 0.5, %v744_v18 }
 0x137   :  { %v746_v17 = vsub.f32 1.5, %v745_v16 }
 0x139   :  { %v747_v19 = vmul.f32 %v9824_v11, %v746_v17 }
 0x13b   :  { %v10561_v38 = vsel %vm750_vm4, %v9824_v11, %v747_v19  ;;  %vm7871_vm4 = vcmask 15360  }
 0x13c   :  { %v776_v21 = vmul.f32 %v10561_v38, %v10435_v22  ;;  %v777_v7 = vmul.f32 %v10561_v38, %v10437_v59  ;;  %v753_v25 = vmul.f32 %v10561_v38, %v10385_v30  ;;  %v754_v22 = vmul.f32 %v10561_v38, %v10440_v31 }
 0x13d   :  { %v755_v59 = vmul.f32 %v10561_v38, %v10443_v60  ;;  %v756_v32 = vmul.f32 %v10561_v38, %v10450_v49  ;;  %v757_v30 = vmul.f32 %v10561_v38, %v10455_v35  ;;  %v758_v60 = vmul.f32 %v10561_v38, %v10462_v63 }
 0x13e   :  { %v805_v27 = vmul.f32 %v10564_v20, %v776_v21  ;;  %v806_v28 = vmul.f32 %v10564_v20, %v777_v7  ;;  %v782_v33 = vmul.f32 %v10564_v20, %v753_v25  ;;  %v783_v37 = vmul.f32 %v10564_v20, %v754_v22 }
 0x13f   :  { %v784_v39 = vmul.f32 %v10564_v20, %v755_v59  ;;  %v785_v42 = vmul.f32 %v10564_v20, %v756_v32  ;;  %v759_v15 = vmul.f32 %v10561_v38, %v10388_v50  ;;  %v760_v13 = vmul.f32 %v10561_v38, %v10391_v51 }
 0x140   :  { %v10576_v40 = vadd.f32 %v10571_v24, %v805_v27  ;;  %v10579_v29 = vadd.f32 %v10571_v24, %v806_v28  ;;  %v811_v58 = vadd.f32 %v10571_v24, %v782_v33  ;;  %v812_v31 = vadd.f32 %v10571_v24, %v783_v37 }
 0x141   :  { %v813_v49 = vadd.f32 %v10571_v24, %v784_v39  ;;  %v814_v3 = vadd.f32 %v10571_v24, %v785_v42  ;;  %v786_v52 = vmul.f32 %v10564_v20, %v757_v30  ;;  %v787_v35 = vmul.f32 %v10564_v20, %v758_v60 }
 0x142   :  { %9825 = vtanh.f32 %v811_v58  ;;  %v788_v12 = vmul.f32 %v10564_v20, %v759_v15  ;;  %v789_v63 = vmul.f32 %v10564_v20, %v760_v13  ;;  %v761_v43 = vmul.f32 %v10561_v38, %v10394_v54 }
 0x143   :  { %9827 = vtanh.f32 %v812_v31  ;;  %v815_v50 = vadd.f32 %v10571_v24, %v786_v52  ;;  %v816_v51 = vadd.f32 %v10571_v24, %v787_v35  ;;  %v762_v61 = vmul.f32 %v10561_v38, %v10397_v55 }
 0x144   :  { %9829 = vtanh.f32 %v813_v49  ;;  %v763_v47 = vmul.f32 %v10561_v38, %v10400_v56  ;;  %v817_v0 = vadd.f32 %v10571_v24, %v788_v12  ;;  %v764_v53 = vmul.f32 %v10561_v38, %v10403_v8 }
 0x145   :  { %9831 = vtanh.f32 %v814_v3  ;;  %v818_v54 = vadd.f32 %v10571_v24, %v789_v63  ;;  %v790_v55 = vmul.f32 %v10564_v20, %v761_v43  ;;  %v791_v8 = vmul.f32 %v10564_v20, %v762_v61 }
 0x146   :  { %9833 = vtanh.f32 %v815_v50  ;;  %v792_v11 = vmul.f32 %v10564_v20, %v763_v47  ;;  %v793_v14 = vmul.f32 %v10564_v20, %v764_v53  ;;  %v765_v18 = vmul.f32 %v10561_v38, %v10406_v9 }
 0x147   :  { %9835 = vtanh.f32 %v816_v51  ;;  %v819_v16 = vadd.f32 %v10571_v24, %v790_v55  ;;  %v766_v17 = vmul.f32 %v10561_v38, %v10409_v23  ;;  %v820_v19 = vadd.f32 %v10571_v24, %v791_v8 }
 0x148   :  { %v10615_v62 = vpop.eup %9825  ;;  %9837 = vtanh.f32 %v817_v0  ;;  %v767_v7 = vmul.f32 %v10561_v38, %v10412_v26  ;;  %v821_v9 = vadd.f32 %v10571_v24, %v792_v11  ;;  %v768_v28 = vmul.f32 %v10561_v38, %v10415_v45 }
 0x149   :  { %v10620_v1 = vpop.eup %9827  ;;  %8805 = vmatmul.msk.f32.vlgmr.msra.gmra.mxu0 %vm870_vm5, %v10615_v62  ;;  %9839 = vtanh.f32 %v818_v54  ;;  %v822_v23 = vadd.f32 %v10571_v24, %v793_v14  ;;  %v794_v22 = vmul.f32 %v10564_v20, %v765_v18  ;;  %v795_v59 = vmul.f32 %v10564_v20, %v766_v17 }
 0x14a   :  { %v10627_v2 = vpop.eup %9829  ;;  %8806 = vmatmul.msk.f32.vlgmr.msra.gmra.mxu1 %vm870_vm5, %v10620_v1  ;;  %1072 = vmatpush.msra.mxu0 %v10540_v4  ;;  %9841 = vtanh.f32 %v819_v16  ;;  %v796_v45 = vmul.f32 %v10564_v20, %v767_v7  ;;  %v797_v32 = vmul.f32 %v10564_v20, %v768_v28  ;;  %v769_v33 = vmul.f32 %v10561_v38, %v10418_v48  ;;  %v10986_v28 = vld [vmem:[%s10537_s25 + $0x30] sm:$0xff] }
 0x14b   :  { %v10633_v56 = vpop.eup %9831  ;;  %8807 = vmatmul.msk.f32.vlgmr.msra.gmra.mxu2 %vm870_vm5, %v10627_v2  ;;  %1095 = vmatpush.msra.mxu1 %v10540_v4  ;;  %9843 = vtanh.f32 %v820_v19  ;;  %v823_v37 = vadd.f32 %v10571_v24, %v794_v22  ;;  %v770_v39 = vmul.f32 %v10561_v38, %v10421_v5  ;;  %v824_v42 = vadd.f32 %v10571_v24, %v795_v59 }
 0x14c   :  { %8808 = vmatmul.msk.f32.vlgmr.msra.gmra.mxu3 %vm870_vm5, %v10633_v56  ;;  %1118 = vmatpush.msra.mxu2 %v10540_v4  ;;  %v10655_v21 = vpop.eup %9833  ;;  %9845 = vtanh.f32 %v821_v9  ;;  %v771_v30 = vmul.f32 %v10561_v38, %v10424_v41  ;;  %v825_v48 = vadd.f32 %v10571_v24, %v796_v45  ;;  %v772_v60 = vmul.f32 %v10561_v38, %v10427_v46  ;;  %v10884_v9 = vld [vmem:[%s10537_s25 + $0x20] sm:$0xff] }
 0x14d   :  { %1141 = vmatpush.msra.mxu3 %v10540_v4  ;;  %1073 = vmatpush.msra.mxu0 %v10543_v6  ;;  %v10660_v27 = vpop.eup %9835  ;;  %9847 = vtanh.f32 %v822_v23  ;;  %v826_v49 = vadd.f32 %v10571_v24, %v797_v32  ;;  %v798_v15 = vmul.f32 %v10564_v20, %v769_v33  ;;  %v799_v3 = vmul.f32 %v10564_v20, %v770_v39 }
 0x14e   :  { %1119 = vmatpush.msra.mxu2 %v10543_v6  ;;  %1096 = vmatpush.msra.mxu1 %v10543_v6  ;;  %v10667_v25 = vpop.eup %9837  ;;  %9849 = vtanh.f32 %v823_v37  ;;  %v800_v46 = vmul.f32 %v10564_v20, %v771_v30  ;;  %v801_v13 = vmul.f32 %v10564_v20, %v772_v60  ;;  %v773_v52 = vmul.f32 %v10561_v38, %v10429_v36 }
 0x14f   :  { %1142 = vmatpush.msra.mxu3 %v10543_v6  ;;  %v10673_v26 = vpop.eup %9839  ;;  %9851 = vtanh.f32 %v824_v42  ;;  %v827_v35 = vadd.f32 %v10571_v24, %v798_v15  ;;  %v774_v12 = vmul.f32 %v10561_v38, %v10431_v57  ;;  %v828_v63 = vadd.f32 %v10571_v24, %v799_v3 }
 0x150   :  { %v10695_v58 = vpop.eup %9841  ;;  %9853 = vtanh.f32 %v825_v48  ;;  %v775_v43 = vmul.f32 %v10561_v38, %v10433_v10  ;;  %v829_v36 = vadd.f32 %v10571_v24, %v800_v46  ;;  %v830_v61 = vadd.f32 %v10571_v24, %v801_v13  ;;  %v10754_v10 = vld [vmem:[%s10537_s25 + $0x8] sm:$0xff] }
 0x151   :  { %8809 = vmatmul.msk.f32.vlgmr.msrb.gmra.mxu0 %vm870_vm5, %v10655_v21  ;;  %v10700_v31 = vpop.eup %9843  ;;  %9855 = vtanh.f32 %v826_v49  ;;  %v752_v57 = vmul.f32 %v10561_v38, %v10382_v44  ;;  %v802_v0 = vmul.f32 %v10564_v20, %v773_v52  ;;  %v803_v54 = vmul.f32 %v10564_v20, %v774_v12  ;;  %v10767_v38 = vld [vmem:[%s10537_s25] sm:$0xff] }
 0x152   :  { %8810 = vmatmul.msk.f32.vlgmr.msrb.gmra.mxu1 %vm870_vm5, %v10660_v27  ;;  %1164 = vmatpush.msrb.mxu0 %v10540_v4  ;;  %v10707_v5 = vpop.eup %9845  ;;  %9857 = vtanh.f32 %v827_v35  ;;  %v804_v44 = vmul.f32 %v10564_v20, %v775_v43 }
 0x153   :  { %8811 = vmatmul.msk.f32.vlgmr.msrb.gmra.mxu2 %vm870_vm5, %v10667_v25  ;;  %1187 = vmatpush.msrb.mxu1 %v10540_v4  ;;  %v10713_v41 = vpop.eup %9847  ;;  %9859 = vtanh.f32 %v828_v63  ;;  %v781_v55 = vmul.f32 %v10564_v20, %v752_v57  ;;  %v831_v8 = vadd.f32 %v10571_v24, %v802_v0  ;;  %v832_v11 = vadd.f32 %v10571_v24, %v803_v54 }
 0x154   :  { %8812 = vmatmul.msk.f32.vlgmr.msrb.gmra.mxu3 %vm870_vm5, %v10673_v26  ;;  %1210 = vmatpush.msrb.mxu2 %v10540_v4  ;;  %v10735_v50 = vpop.eup %9849  ;;  %9861 = vtanh.f32 %v829_v36  ;;  %v833_v14 = vadd.f32 %v10571_v24, %v804_v44 }
 0x155   :  { %1233 = vmatpush.msrb.mxu3 %v10540_v4  ;;  %1165 = vmatpush.msrb.mxu0 %v10543_v6  ;;  %v10740_v51 = vpop.eup %9851  ;;  %9863 = vtanh.f32 %v830_v61  ;;  %v810_v20 = vadd.f32 %v10571_v24, %v781_v55 }
 0x156   :  { %1211 = vmatpush.msrb.mxu2 %v10543_v6  ;;  %1188 = vmatpush.msrb.mxu1 %v10543_v6  ;;  %v10747_v47 = vpop.eup %9853  ;;  %9865 = vtanh.f32 %v831_v8 }
 0x157   :  { %1234 = vmatpush.msrb.mxu3 %v10543_v6  ;;  %v10756_v53 = vpop.eup %9855  ;;  %9867 = vtanh.f32 %v832_v11 }
 0x158   :  { %9869 = vtanh.f32 %v833_v14 }
 0x159   :  { %8813 = vmatmul.msk.f32.vlgmr.msra.gmra.mxu0 %vm870_vm5, %v10695_v58  ;;  %9871 = vtanh.f32 %v810_v20 }
 0x15a   :  { %8814 = vmatmul.msk.f32.vlgmr.msra.gmra.mxu1 %vm870_vm5, %v10700_v31  ;;  %1256 = vmatpush.msra.mxu0 %v10540_v4  ;;  %9873 = vtanh.f32 %v10576_v40 }
 0x15b   :  { %8815 = vmatmul.msk.f32.vlgmr.msra.gmra.mxu2 %vm870_vm5, %v10707_v5  ;;  %1279 = vmatpush.msra.mxu1 %v10540_v4  ;;  %9875 = vtanh.f32 %v10579_v29 }
 0x15c   :  { %8816 = vmatmul.msk.f32.vlgmr.msra.gmra.mxu3 %vm870_vm5, %v10713_v41  ;;  %1302 = vmatpush.msra.mxu2 %v10540_v4 }
 0x15d   :  { %1325 = vmatpush.msra.mxu3 %v10540_v4  ;;  %1257 = vmatpush.msra.mxu0 %v10543_v6 }
 0x15e   :  { %1303 = vmatpush.msra.mxu2 %v10543_v6  ;;  %1280 = vmatpush.msra.mxu1 %v10543_v6 }
 0x15f   :  { %1326 = vmatpush.msra.mxu3 %v10543_v6 }
 0x161   :  { %8817 = vmatmul.msk.f32.vlgmr.msrb.gmra.mxu0 %vm870_vm5, %v10735_v50 }
 0x162   :  { %8818 = vmatmul.msk.f32.vlgmr.msrb.gmra.mxu1 %vm870_vm5, %v10740_v51  ;;  %1348 = vmatpush.msrb.mxu0 %v10540_v4 }
 0x163   :  { %8819 = vmatmul.msk.f32.vlgmr.msrb.gmra.mxu2 %vm870_vm5, %v10747_v47  ;;  %1371 = vmatpush.msrb.mxu1 %v10540_v4 }
 0x164   :  { %8820 = vmatmul.msk.f32.vlgmr.msrb.gmra.mxu3 %vm870_vm5, %v10756_v53  ;;  %1394 = vmatpush.msrb.mxu2 %v10540_v4  ;;  %v10777_v4 = vpop.eup %9857 }
 0x165   :  { %1417 = vmatpush.msrb.mxu3 %v10754_v10  ;;  %1349 = vmatpush.msrb.mxu0 %v10543_v6  ;;  %v10780_v18 = vpop.eup %9859 }
 0x166   :  { %1395 = vmatpush.msrb.mxu2 %v10543_v6  ;;  %1372 = vmatpush.msrb.mxu1 %v10543_v6  ;;  %v10785_v16 = vpop.eup %9861 }
 0x167   :  { %1418 = vmatpush.msrb.mxu3 %v10767_v38  ;;  %v10790_v6 = vpop.eup %9863 }
 0x168   :  { %v10803_v24 = vpop.eup %9865 }
 0x169   :  { %8821 = vmatmul.msk.f32.vlgmr.msra.gmra.mxu0 %vm870_vm5, %v10777_v4  ;;  %v10805_v17 = vpop.eup %9867 }
 0x16a   :  { %8822 = vmatmul.msk.f32.vlgmr.msra.gmra.mxu1 %vm870_vm5, %v10780_v18  ;;  %1437 = vmatpush.msra.mxu0 %v10754_v10  ;;  %v10809_v19 = vpop.eup %9869 }
 0x16b   :  { %8823 = vmatmul.msk.f32.vlgmr.msra.gmra.mxu2 %vm870_vm5, %v10785_v16  ;;  %1457 = vmatpush.msra.mxu1 %v10754_v10  ;;  %v9872_v7 = vpop.eup %9871 }
 0x16c   :  { %8824 = vmatmul.msk.f32.vlgmr.msra.gmra.mxu3 %vm870_vm5, %v10790_v6  ;;  %1477 = vmatpush.msra.mxu2 %v10754_v10  ;;  %v11025_v33 = vpop.eup %9873 }
 0x16d   :  { %1497 = vmatpush.msra.mxu3 %v10754_v10  ;;  %1438 = vmatpush.msra.mxu0 %v10767_v38  ;;  %v9876_v13 = vpop.eup %9875 }
 0x16e   :  { %1478 = vmatpush.msra.mxu2 %v10767_v38  ;;  %1458 = vmatpush.msra.mxu1 %v10767_v38 }
 0x16f   :  { %1498 = vmatpush.msra.mxu3 %v10767_v38 }
 0x171   :  { %8825 = vmatmul.msk.f32.vlgmr.msrb.gmra.mxu0 %vm870_vm5, %v10803_v24 }
 0x172   :  { %8826 = vmatmul.msk.f32.vlgmr.msrb.gmra.mxu1 %vm870_vm5, %v10805_v17  ;;  %1517 = vmatpush.msrb.mxu0 %v10754_v10 }
 0x173   :  { %8827 = vmatmul.msk.f32.vlgmr.msrb.gmra.mxu2 %vm870_vm5, %v10809_v19  ;;  %1537 = vmatpush.msrb.mxu1 %v10754_v10 }
 0x174   :  { %8828 = vmatmul.msk.f32.vlgmr.msrb.gmra.mxu3 %vm870_vm5, %v9872_v7  ;;  %1557 = vmatpush.msrb.mxu2 %v10754_v10 }
 0x175   :  { %1577 = vmatpush.msrb.mxu3 %v10754_v10  ;;  %1518 = vmatpush.msrb.mxu0 %v10767_v38 }
 0x176   :  { %1558 = vmatpush.msrb.mxu2 %v10767_v38  ;;  %1538 = vmatpush.msrb.mxu1 %v10767_v38 }
 0x177   :  { %1578 = vmatpush.msrb.mxu3 %v10767_v38 }
 0x179   :  { %8829 = vmatmul.msk.f32.vlgmr.msra.gmra.mxu0 %vm870_vm5, %v10615_v62  ;;  %v10875_v62 = vld [vmem:[%s10537_s25 + $0x28] sm:$0xff] }
 0x17a   :  { %8830 = vmatmul.msk.f32.vlgmr.msra.gmra.mxu1 %vm870_vm5, %v10620_v1  ;;  %1597 = vmatpush.msra.mxu0 %v10754_v10 }
 0x17b   :  { %8831 = vmatmul.msk.f32.vlgmr.msra.gmra.mxu2 %vm870_vm5, %v10627_v2  ;;  %1617 = vmatpush.msra.mxu1 %v10754_v10 }
 0x17c   :  { %8832 = vmatmul.msk.f32.vlgmr.msra.gmra.mxu3 %vm870_vm5, %v10633_v56  ;;  %1637 = vmatpush.msra.mxu2 %v10754_v10 }
 0x17d   :  { %1657 = vmatpush.msra.mxu3 %v10754_v10  ;;  %1598 = vmatpush.msra.mxu0 %v10767_v38 }
 0x17e   :  { %1638 = vmatpush.msra.mxu2 %v10767_v38  ;;  %1618 = vmatpush.msra.mxu1 %v10767_v38 }
 0x17f   :  { %1658 = vmatpush.msra.mxu3 %v10767_v38 }
 0x181   :  { %8833 = vmatmul.msk.f32.vlgmr.msrb.gmra.mxu0 %vm870_vm5, %v10655_v21 }
 0x182   :  { %8834 = vmatmul.msk.f32.vlgmr.msrb.gmra.mxu1 %vm870_vm5, %v10660_v27  ;;  %1677 = vmatpush.msrb.mxu0 %v10754_v10 }
 0x183   :  { %8835 = vmatmul.msk.f32.vlgmr.msrb.gmra.mxu2 %vm870_vm5, %v10667_v25  ;;  %1697 = vmatpush.msrb.mxu1 %v10754_v10 }
 0x184   :  { %8836 = vmatmul.msk.f32.vlgmr.msrb.gmra.mxu3 %vm870_vm5, %v10673_v26  ;;  %1717 = vmatpush.msrb.mxu2 %v10754_v10 }
 0x185   :  { %1737 = vmatpush.msrb.mxu3 %v10754_v10  ;;  %1678 = vmatpush.msrb.mxu0 %v10767_v38 }
 0x186   :  { %1718 = vmatpush.msrb.mxu2 %v10767_v38  ;;  %1698 = vmatpush.msrb.mxu1 %v10767_v38 }
 0x187   :  { %1738 = vmatpush.msrb.mxu3 %v10767_v38 }
 0x189   :  { %8837 = vmatmul.msk.f32.vlgmr.msra.gmra.mxu0 %vm870_vm5, %v10695_v58 }
 0x18a   :  { %8838 = vmatmul.msk.f32.vlgmr.msra.gmra.mxu1 %vm870_vm5, %v10700_v31  ;;  %1757 = vmatpush.msra.mxu0 %v10754_v10 }
 0x18b   :  { %8839 = vmatmul.msk.f32.vlgmr.msra.gmra.mxu2 %vm870_vm5, %v10707_v5  ;;  %1777 = vmatpush.msra.mxu1 %v10754_v10 }
 0x18c   :  { %8840 = vmatmul.msk.f32.vlgmr.msra.gmra.mxu3 %vm870_vm5, %v10713_v41  ;;  %1797 = vmatpush.msra.mxu2 %v10754_v10 }
 0x18d   :  { %1817 = vmatpush.msra.mxu3 %v10754_v10  ;;  %1758 = vmatpush.msra.mxu0 %v10767_v38 }
 0x18e   :  { %1798 = vmatpush.msra.mxu2 %v10767_v38  ;;  %1778 = vmatpush.msra.mxu1 %v10767_v38 }
 0x18f   :  { %1818 = vmatpush.msra.mxu3 %v10767_v38 }
 0x191   :  { %8841 = vmatmul.msk.f32.vlgmr.msrb.gmra.mxu0 %vm870_vm5, %v10735_v50 }
 0x192   :  { %8842 = vmatmul.msk.f32.vlgmr.msrb.gmra.mxu1 %vm870_vm5, %v10740_v51  ;;  %1837 = vmatpush.msrb.mxu0 %v10754_v10 }
 0x193   :  { %8843 = vmatmul.msk.f32.vlgmr.msrb.gmra.mxu2 %vm870_vm5, %v10747_v47  ;;  %1857 = vmatpush.msrb.mxu1 %v10754_v10 }
 0x194   :  { %8844 = vmatmul.msk.f32.vlgmr.msrb.gmra.mxu3 %vm870_vm5, %v10756_v53  ;;  %1877 = vmatpush.msrb.mxu2 %v10875_v62 }
 0x195   :  { %1897 = vmatpush.msrb.mxu3 %v10875_v62  ;;  %1838 = vmatpush.msrb.mxu0 %v10767_v38 }
 0x196   :  { %1878 = vmatpush.msrb.mxu2 %v10884_v9  ;;  %1858 = vmatpush.msrb.mxu1 %v10767_v38 }
 0x197   :  { %1898 = vmatpush.msrb.mxu3 %v10884_v9 }
 0x199   :  { %8845 = vmatmul.msk.f32.vlgmr.msra.gmra.mxu0 %vm870_vm5, %v10777_v4 }
 0x19a   :  { %8846 = vmatmul.msk.f32.vlgmr.msra.gmra.mxu1 %vm870_vm5, %v10780_v18  ;;  %1917 = vmatpush.msra.mxu0 %v10875_v62 }
 0x19b   :  { %8847 = vmatmul.msk.f32.vlgmr.msra.gmra.mxu2 %vm870_vm5, %v10785_v16  ;;  %1937 = vmatpush.msra.mxu1 %v10875_v62 }
 0x19c   :  { %8848 = vmatmul.msk.f32.vlgmr.msra.gmra.mxu3 %vm870_vm5, %v10790_v6  ;;  %1957 = vmatpush.msra.mxu2 %v10875_v62 }
 0x19d   :  { %1977 = vmatpush.msra.mxu3 %v10875_v62  ;;  %1918 = vmatpush.msra.mxu0 %v10884_v9 }
 0x19e   :  { %1958 = vmatpush.msra.mxu2 %v10884_v9  ;;  %1938 = vmatpush.msra.mxu1 %v10884_v9 }
 0x19f   :  { %1978 = vmatpush.msra.mxu3 %v10884_v9 }
 0x1a1   :  { %8849 = vmatmul.msk.f32.vlgmr.msrb.gmra.mxu0 %vm870_vm5, %v10803_v24 }
 0x1a2   :  { %8850 = vmatmul.msk.f32.vlgmr.msrb.gmra.mxu1 %vm870_vm5, %v10805_v17  ;;  %1997 = vmatpush.msrb.mxu0 %v10875_v62 }
 0x1a3   :  { %8851 = vmatmul.msk.f32.vlgmr.msrb.gmra.mxu2 %vm870_vm5, %v10620_v1  ;;  %2017 = vmatpush.msrb.mxu1 %v10875_v62  ;;  %v10975_v1 = vld [vmem:[%s10537_s25 + $0x38] sm:$0xff]  ;;  %s11825_s25 = sld [smem:[%s13958_s0 + %s10065_s22]]  }
 0x1a4   :  { %8852 = vmatmul.msk.f32.vlgmr.msrb.gmra.mxu3 %vm870_vm5, %v10627_v2  ;;  %2037 = vmatpush.msrb.mxu2 %v10875_v62 }
 0x1a5   :  { %2057 = vmatpush.msrb.mxu3 %v10875_v62  ;;  %1998 = vmatpush.msrb.mxu0 %v10884_v9 }
 0x1a6   :  { %2038 = vmatpush.msrb.mxu2 %v10884_v9  ;;  %2018 = vmatpush.msrb.mxu1 %v10884_v9 }
 0x1a7   :  { %2058 = vmatpush.msrb.mxu3 %v10884_v9 }
 0x1a9   :  { %8853 = vmatmul.msk.f32.vlgmr.msra.gmra.mxu0 %vm870_vm5, %v10633_v56 }
 0x1aa   :  { %8854 = vmatmul.msk.f32.vlgmr.msra.gmra.mxu1 %vm870_vm5, %v10655_v21  ;;  %2077 = vmatpush.msra.mxu0 %v10875_v62 }
 0x1ab   :  { %8855 = vmatmul.msk.f32.vlgmr.msra.gmra.mxu2 %vm870_vm5, %v10660_v27  ;;  %2097 = vmatpush.msra.mxu1 %v10875_v62 }
 0x1ac   :  { %8856 = vmatmul.msk.f32.vlgmr.msra.gmra.mxu3 %vm870_vm5, %v10667_v25  ;;  %2117 = vmatpush.msra.mxu2 %v10875_v62 }
 0x1ad   :  { %2137 = vmatpush.msra.mxu3 %v10875_v62  ;;  %2078 = vmatpush.msra.mxu0 %v10884_v9 }
 0x1ae   :  { %2118 = vmatpush.msra.mxu2 %v10884_v9  ;;  %2098 = vmatpush.msra.mxu1 %v10884_v9 }
 0x1af   :  { %2138 = vmatpush.msra.mxu3 %v10884_v9 }
 0x1b1   :  { %8857 = vmatmul.msk.f32.vlgmr.msrb.gmra.mxu0 %vm870_vm5, %v10673_v26 }
 0x1b2   :  { %8858 = vmatmul.msk.f32.vlgmr.msrb.gmra.mxu1 %vm870_vm5, %v10695_v58  ;;  %2157 = vmatpush.msrb.mxu0 %v10875_v62 }
 0x1b3   :  { %8859 = vmatmul.msk.f32.vlgmr.msrb.gmra.mxu2 %vm870_vm5, %v10700_v31  ;;  %2177 = vmatpush.msrb.mxu1 %v10875_v62 }
 0x1b4   :  { %8860 = vmatmul.msk.f32.vlgmr.msrb.gmra.mxu3 %vm870_vm5, %v10707_v5  ;;  %2197 = vmatpush.msrb.mxu2 %v10875_v62 }
 0x1b5   :  { %2217 = vmatpush.msrb.mxu3 %v10875_v62  ;;  %2158 = vmatpush.msrb.mxu0 %v10884_v9 }
 0x1b6   :  { %2198 = vmatpush.msrb.mxu2 %v10884_v9  ;;  %2178 = vmatpush.msrb.mxu1 %v10884_v9 }
 0x1b7   :  { %2218 = vmatpush.msrb.mxu3 %v10884_v9 }
 0x1b9   :  { %8861 = vmatmul.msk.f32.vlgmr.msra.gmra.mxu0 %vm870_vm5, %v10713_v41 }
 0x1ba   :  { %8862 = vmatmul.msk.f32.vlgmr.msra.gmra.mxu1 %vm870_vm5, %v10735_v50  ;;  %2237 = vmatpush.msra.mxu0 %v10875_v62 }
 0x1bb   :  { %8863 = vmatmul.msk.f32.vlgmr.msra.gmra.mxu2 %vm870_vm5, %v10740_v51  ;;  %2257 = vmatpush.msra.mxu1 %v10875_v62 }
 0x1bc   :  { %8864 = vmatmul.msk.f32.vlgmr.msra.gmra.mxu3 %vm870_vm5, %v10747_v47  ;;  %2277 = vmatpush.msra.mxu2 %v10875_v62 }
 0x1bd   :  { %2297 = vmatpush.msra.mxu3 %v10875_v62  ;;  %2238 = vmatpush.msra.mxu0 %v10884_v9 }
 0x1be   :  { %2278 = vmatpush.msra.mxu2 %v10884_v9  ;;  %2258 = vmatpush.msra.mxu1 %v10884_v9 }
 0x1bf   :  { %2298 = vmatpush.msra.mxu3 %v10884_v9 }
 0x1c1   :  { %8865 = vmatmul.msk.f32.vlgmr.msrb.gmra.mxu0 %vm870_vm5, %v10756_v53 }
 0x1c2   :  { %8866 = vmatmul.msk.f32.vlgmr.msrb.gmra.mxu1 %vm870_vm5, %v10777_v4  ;;  %2320 = vmatpush.msrb.mxu0 %v10875_v62 }
 0x1c3   :  { %8867 = vmatmul.msk.f32.vlgmr.msrb.gmra.mxu2 %vm870_vm5, %v10780_v18  ;;  %2363 = vmatpush.msrb.mxu1 %v10975_v1 }
 0x1c4   :  { %8868 = vmatmul.msk.f32.vlgmr.msrb.gmra.mxu3 %vm870_vm5, %v10785_v16  ;;  %2383 = vmatpush.msrb.mxu2 %v10975_v1 }
 0x1c5   :  { %2403 = vmatpush.msrb.mxu3 %v10975_v1  ;;  %2321 = vmatpush.msrb.mxu0 %v10884_v9 }
 0x1c6   :  { %v10993_v23 = vpop.f32.mrf.mxu0  ;;  %2384 = vmatpush.msrb.mxu2 %v10986_v28  ;;  %2364 = vmatpush.msrb.mxu1 %v10986_v28 }
 0x1c7   :  { %v10997_v22 = vpop.f32.mrf.mxu1  ;;  %2404 = vmatpush.msrb.mxu3 %v10986_v28 }
 0x1c9   :  { %8869 = vmatmul.msk.f32.vlgmr.msra.gmra.mxu0 %vm870_vm5, %v10790_v6 }
 0x1ca   :  { %8870 = vmatmul.msk.f32.vlgmr.msra.gmra.mxu1 %vm870_vm5, %v10803_v24  ;;  %2423 = vmatpush.msra.mxu0 %v10975_v1 }
 0x1cb   :  { %8871 = vmatmul.msk.f32.vlgmr.msra.gmra.mxu2 %vm870_vm5, %v10805_v17  ;;  %2443 = vmatpush.msra.mxu1 %v10975_v1 }
 0x1cc   :  { %8872 = vmatmul.msk.f32.vlgmr.msra.gmra.mxu3 %vm870_vm5, %v10809_v19  ;;  %2463 = vmatpush.msra.mxu2 %v10975_v1 }
 0x1cd   :  { %2483 = vmatpush.msra.mxu3 %v10975_v1  ;;  %2424 = vmatpush.msra.mxu0 %v10986_v28 }
 0x1ce   :  { %v11014_v40 = vpop.f32.mrf.mxu2  ;;  %v11016_v59 = vpop.f32.mrf.mxu0  ;;  %2464 = vmatpush.msra.mxu2 %v10986_v28  ;;  %2444 = vmatpush.msra.mxu1 %v10986_v28 }
 0x1cf   :  { %v11020_v45 = vpop.f32.mrf.mxu3  ;;  %v11022_v32 = vpop.f32.mrf.mxu1  ;;  %2484 = vmatpush.msra.mxu3 %v10986_v28 }
 0x1d1   :  { %8873 = vmatmul.msk.f32.vlgmr.msrb.gmra.mxu0 %vm870_vm5, %v11025_v33 }
 0x1d2   :  { %8874 = vmatmul.msk.f32.vlgmr.msrb.gmra.mxu1 %vm870_vm5, %v10627_v2  ;;  %2503 = vmatpush.msrb.mxu0 %v10975_v1 }
 0x1d3   :  { %8875 = vmatmul.msk.f32.vlgmr.msrb.gmra.mxu2 %vm870_vm5, %v10633_v56  ;;  %2523 = vmatpush.msrb.mxu1 %v10975_v1 }
 0x1d4   :  { %8876 = vmatmul.msk.f32.vlgmr.msrb.gmra.mxu3 %vm870_vm5, %v10655_v21  ;;  %2543 = vmatpush.msrb.mxu2 %v10975_v1 }
 0x1d5   :  { %2563 = vmatpush.msrb.mxu3 %v10975_v1  ;;  %2504 = vmatpush.msrb.mxu0 %v10986_v28 }
 0x1d6   :  { %v11045_v37 = vpop.f32.mrf.mxu2  ;;  %v11047_v39 = vpop.f32.mrf.mxu0  ;;  %2544 = vmatpush.msrb.mxu2 %v10986_v28  ;;  %2524 = vmatpush.msrb.mxu1 %v10986_v28 }
 0x1d7   :  { %v11051_v2 = vpop.f32.mrf.mxu3  ;;  %v11053_v56 = vpop.f32.mrf.mxu1  ;;  %2564 = vmatpush.msrb.mxu3 %v10986_v28 }
 0x1d9   :  { %8877 = vmatmul.msk.f32.vlgmr.msra.gmra.mxu0 %vm870_vm5, %v10660_v27 }
 0x1da   :  { %8878 = vmatmul.msk.f32.vlgmr.msra.gmra.mxu1 %vm870_vm5, %v10667_v25  ;;  %2583 = vmatpush.msra.mxu0 %v10975_v1 }
 0x1db   :  { %8879 = vmatmul.msk.f32.vlgmr.msra.gmra.mxu2 %vm870_vm5, %v10673_v26  ;;  %2603 = vmatpush.msra.mxu1 %v10975_v1 }
 0x1dc   :  { %8880 = vmatmul.msk.f32.vlgmr.msra.gmra.mxu3 %vm870_vm5, %v10695_v58  ;;  %2623 = vmatpush.msra.mxu2 %v10975_v1 }
 0x1dd   :  { %2643 = vmatpush.msra.mxu3 %v10975_v1  ;;  %2584 = vmatpush.msra.mxu0 %v10986_v28 }
 0x1de   :  { %v11069_v21 = vpop.f32.mrf.mxu2  ;;  %v11071_v27 = vpop.f32.mrf.mxu0  ;;  %2624 = vmatpush.msra.mxu2 %v10986_v28  ;;  %2604 = vmatpush.msra.mxu1 %v10986_v28 }
 0x1df   :  { %v11075_v25 = vpop.f32.mrf.mxu3  ;;  %v11077_v26 = vpop.f32.mrf.mxu1  ;;  %2644 = vmatpush.msra.mxu3 %v10986_v28 }
 0x1e1   :  { %8881 = vmatmul.msk.f32.vlgmr.msrb.gmra.mxu0 %vm870_vm5, %v10700_v31 }
 0x1e2   :  { %8882 = vmatmul.msk.f32.vlgmr.msrb.gmra.mxu1 %vm870_vm5, %v10707_v5  ;;  %2663 = vmatpush.msrb.mxu0 %v10975_v1 }
 0x1e3   :  { %8883 = vmatmul.msk.f32.vlgmr.msrb.gmra.mxu2 %vm870_vm5, %v10713_v41  ;;  %2683 = vmatpush.msrb.mxu1 %v10975_v1 }
 0x1e4   :  { %8884 = vmatmul.msk.f32.vlgmr.msrb.gmra.mxu3 %vm870_vm5, %v10735_v50  ;;  %2703 = vmatpush.msrb.mxu2 %v10975_v1 }
 0x1e5   :  { %2723 = vmatpush.msrb.mxu3 %v10975_v1  ;;  %2664 = vmatpush.msrb.mxu0 %v10986_v28 }
 0x1e6   :  { %v1213_v42 = vpop.f32.mrf.mxu2  ;;  %v11093_v58 = vpop.f32.mrf.mxu0  ;;  %2704 = vmatpush.msrb.mxu2 %v10986_v28  ;;  %2684 = vmatpush.msrb.mxu1 %v10986_v28 }
 0x1e7   :  { %v1236_v30 = vpop.f32.mrf.mxu3  ;;  %v11097_v48 = vpop.f32.mrf.mxu1  ;;  %2724 = vmatpush.msrb.mxu3 %v10986_v28 }
 0x1e9   :  { %8885 = vmatmul.msk.f32.vlgmr.msra.gmra.mxu0 %vm870_vm5, %v10740_v51 }
 0x1ea   :  { %8886 = vmatmul.msk.f32.vlgmr.msra.gmra.mxu1 %vm870_vm5, %v10747_v47  ;;  %2743 = vmatpush.msra.mxu0 %v10975_v1 }
 0x1eb   :  { %8887 = vmatmul.msk.f32.vlgmr.msra.gmra.mxu2 %vm870_vm5, %v10756_v53  ;;  %2763 = vmatpush.msra.mxu1 %v10975_v1 }
 0x1ec   :  { %8888 = vmatmul.msk.f32.vlgmr.msra.gmra.mxu3 %vm870_vm5, %v10777_v4  ;;  %2783 = vmatpush.msra.mxu2 %v10975_v1 }
 0x1ed   :  { %2806 = vmatpush.msra.mxu3 %v10975_v1  ;;  %2744 = vmatpush.msra.mxu0 %v10986_v28 }
 0x1ee   :  { %v11113_v31 = vpop.f32.mrf.mxu2  ;;  %v11115_v60 = vpop.f32.mrf.mxu0  ;;  %2784 = vmatpush.msra.mxu2 %v10986_v28  ;;  %2764 = vmatpush.msra.mxu1 %v10986_v28 }
 0x1ef   :  { %13962 = vst [vmem:[#allocation5_spill] sm:$0xff] %v11115_v60  ;;  %v11119_v49 = vpop.f32.mrf.mxu3  ;;  %v11121_v5 = vpop.f32.mrf.mxu1  ;;  %2807 = vmatpush.msra.mxu3 %v10986_v28 }
 0x1f0   :  { %13963 = vst [vmem:[#allocation6_spill] sm:$0xff] %v11121_v5 }
 0x1f1   :  { %8889 = vmatmul.msk.f32.vlgmr.msrb.gmra.mxu0 %vm870_vm5, %v10780_v18 }
 0x1f2   :  { %8890 = vmatmul.msk.f32.vlgmr.msrb.gmra.mxu1 %vm870_vm5, %v10785_v16 }
 0x1f3   :  { %8891 = vmatmul.msk.f32.vlgmr.msrb.gmra.mxu2 %vm870_vm5, %v10790_v6 }
 0x1f4   :  { %8892 = vmatmul.msk.f32.vlgmr.msrb.gmra.mxu3 %vm870_vm5, %v10803_v24 }
 0x1f6   :  { %v11133_v15 = vpop.f32.mrf.mxu2  ;;  %v11135_v41 = vpop.f32.mrf.mxu0 }
 0x1f7   :  { %13964 = vst [vmem:[#allocation7_spill] sm:$0xff] %v11133_v15  ;;  %v1420_v3 = vpop.f32.mrf.mxu3  ;;  %v11137_v46 = vpop.f32.mrf.mxu1 }
 0x1f9   :  { %8893 = vmatmul.msk.f32.vlgmr.msra.gmra.mxu0 %vm870_vm5, %v10805_v17 }
 0x1fa   :  { %8894 = vmatmul.msk.f32.vlgmr.msra.gmra.mxu1 %vm870_vm5, %v10809_v19 }
 0x1fb   :  { %8895 = vmatmul.msk.f32.vlgmr.msra.gmra.mxu2 %vm870_vm5, %v11025_v33 }
 0x1fc   :  { %8896 = vmatmul.msk.f32.vlgmr.msra.gmra.mxu3 %vm870_vm5, %v9876_v13 }
 0x1fe   :  { %v1480_v29 = vpop.f32.mrf.mxu2  ;;  %v1520_v52 = vpop.f32.mrf.mxu0 }
 0x1ff   :  { %v1500_v35 = vpop.f32.mrf.mxu3  ;;  %v11147_v12 = vadd.f32 %v1520_v52, %v11022_v32  ;;  %v1540_v63 = vpop.f32.mrf.mxu1  ;;  %v1481_v5 = vadd.f32 %v1480_v29, %v11020_v45 }
 0x200   :  { %v11150_v50 = vadd.f32 %v1540_v63, %v11045_v37 }
 0x206   :  { %v1560_v43 = vpop.f32.mrf.mxu2  ;;  %v11157_v36 = vpop.f32.mrf.mxu0 }
 0x207   :  { %v11165_v51 = vadd.f32 %v1560_v43, %v11051_v2  ;;  %v11167_v61 = vpop.f32.mrf.mxu3  ;;  %v11169_v57 = vpop.f32.mrf.mxu1 }
 0x20e   :  { %v11171_v47 = vpop.f32.mrf.mxu2  ;;  %v1680_v0 = vpop.f32.mrf.mxu0 }
 0x20f   :  { %v11173_v10 = vpop.f32.mrf.mxu3  ;;  %v11176_v53 = vadd.f32 %v1680_v0, %v11077_v26  ;;  %v1700_v54 = vpop.f32.mrf.mxu1 }
 0x210   :  { %v11178_v44 = vadd.f32 %v1700_v54, %v1213_v42 }
 0x216   :  { %v1720_v38 = vpop.f32.mrf.mxu2  ;;  %v11180_v55 = vpop.f32.mrf.mxu0 }
 0x217   :  { %v11182_v8 = vadd.f32 %v1720_v38, %v1236_v30  ;;  %v11184_v11 = vpop.f32.mrf.mxu3  ;;  %v11186_v4 = vpop.f32.mrf.mxu1  ;;  %v1421_v38 = vadd.f32 %v1420_v3, %v10993_v23 }
 0x21e   :  { %v11188_v14 = vpop.f32.mrf.mxu2  ;;  %v11190_v18 = vpop.f32.mrf.mxu0 }
 0x21f   :  { %13965 = vst [vmem:[#allocation8_spill] sm:$0xff] %v11190_v18  ;;  %v11192_v20 = vpop.f32.mrf.mxu3  ;;  %v11194_v16 = vpop.f32.mrf.mxu1  ;;  %v1441_v18 = vadd.f32 %v11135_v41, %v10997_v22 }
 0x220   :  { %13966 = vst [vmem:[#allocation9_spill] sm:$0xff] %v11192_v20  ;;  %v11229_v20 = vld [vmem:[%s11032_s29] ss:$0 sm:$0xff]  ;;  %s8794_s29 = sld [smem:[%s13958_s0 + %s10066_s26]]  }
 0x221   :  { %13967 = vst [vmem:[#allocation10_spill] sm:$0xff] %v11194_v16 }
 0x226   :  { %v1880_v6 = vpop.f32.mrf.mxu2  ;;  %v1920_v24 = vpop.f32.mrf.mxu0 }
 0x227   :  { %v1900_v17 = vpop.f32.mrf.mxu3  ;;  %v1940_v19 = vpop.f32.mrf.mxu1  ;;  %v2326_v15 = vadd.f32 %v1880_v6, %v1421_v38 }
 0x22e   :  { %v1960_v7 = vpop.f32.mrf.mxu2  ;;  %v2000_v62 = vpop.f32.mrf.mxu0 }
 0x22f   :  { %v1980_v9 = vpop.f32.mrf.mxu3  ;;  %v2020_v1 = vpop.f32.mrf.mxu1 }
 0x236   :  { %v2040_v28 = vpop.f32.mrf.mxu2  ;;  %v11196_v32 = vpop.f32.mrf.mxu0 }
 0x237   :  { %v11198_v33 = vpop.f32.mrf.mxu3  ;;  %v11200_v37 = vpop.f32.mrf.mxu1 }
 0x23e   :  { %v11202_v2 = vpop.f32.mrf.mxu2  ;;  %v11204_v26 = vpop.f32.mrf.mxu0 }
 0x23f   :  { %v11206_v42 = vpop.f32.mrf.mxu3  ;;  %v11208_v30 = vpop.f32.mrf.mxu1 }
 0x246   :  { %v11210_v13 = vpop.f32.mrf.mxu2  ;;  %v11212_v52 = vpop.f32.mrf.mxu0 }
 0x247   :  { %13968 = vst [vmem:[#allocation11_spill] sm:$0xff] %v11212_v52  ;;  %v11214_v63 = vpop.f32.mrf.mxu3  ;;  %v11216_v43 = vpop.f32.mrf.mxu1 }
 0x248   :  { %13969 = vst [vmem:[#allocation12_spill] sm:$0xff] %v11214_v63  ;;  %v2329_v63 = vadd.f32 %v1940_v19, %v1481_v5 }
 0x249   :  { %13970 = vst [vmem:[#allocation13_spill] sm:$0xff] %v11216_v43  ;;  %v1461_v43 = vadd.f32 %v11137_v46, %v11014_v40 }
 0x24b   :  { %v2328_v23 = vadd.f32 %v1920_v24, %v1461_v43  ;;  %v2331_v24 = vadd.f32 %v1980_v9, %v11147_v12 }
 0x24e   :  { %v11218_v0 = vpop.f32.mrf.mxu2  ;;  %v11220_v54 = vpop.f32.mrf.mxu0 }
 0x24f   :  { %13971 = vst [vmem:[#allocation14_spill] sm:$0xff] %v11218_v0  ;;  %v11223_v34 = vpop.f32.mrf.mxu3  ;;  %v2366_v16 = vpop.f32.mrf.mxu1  ;;  %v1501_v0 = vadd.f32 %v1500_v35, %v11016_v59 }
 0x250   :  { %13972 = vst [vmem:[#allocation15_spill] sm:$0xff] %v11220_v54  ;;  %v2812_v52 = vadd.f32 %v2366_v16, %v2326_v15  ;;  %v2327_v54 = vadd.f32 %v1900_v17, %v1441_v18 }
 0x251   :  { %13973 = vst [vmem:[#allocation16_spill] sm:$0xff] %v11223_v34  ;;  %v2330_v60 = vadd.f32 %v1960_v7, %v1501_v0  ;;  %v2332_v7 = vadd.f32 %v2000_v62, %v11150_v50 }
 0x252   :  { %v11235_v6 = vadd.f32 %v11229_v20, %v2812_v52 }
 0x254   :  { %v2865_v5 = vsel %vm2864_vm6, %v11235_v6, 0.0 }
 0x256   :  { %v2386_v3 = vpop.f32.mrf.mxu2  ;;  %v2426_v34 = vpop.f32.mrf.mxu0 }
 0x257   :  { %v2813_v22 = vadd.f32 %v2386_v3, %v2327_v54  ;;  %v2406_v41 = vpop.f32.mrf.mxu3  ;;  %v2815_v45 = vadd.f32 %v2426_v34, %v2329_v63  ;;  %v2446_v15 = vpop.f32.mrf.mxu1  ;;  %v1581_v34 = vadd.f32 %v11167_v61, %v11047_v39 }
 0x258   :  { %v2814_v29 = vadd.f32 %v2406_v41, %v2328_v23  ;;  %v2816_v40 = vadd.f32 %v2446_v15, %v2330_v60  ;;  %v2333_v60 = vadd.f32 %v2020_v1, %v11165_v51  ;;  %v1621_v15 = vadd.f32 %v11169_v57, %v11069_v21 }
 0x259   :  { %v11238_v16 = vadd.f32 %v11229_v20, %v2813_v22  ;;  %v11248_v35 = vadd.f32 %v11229_v20, %v2815_v45  ;;  %v2334_v0 = vadd.f32 %v2040_v28, %v1581_v34  ;;  %v1601_v28 = vadd.f32 %v11157_v36, %v11053_v56 }
 0x25a   :  { %v11241_v59 = vadd.f32 %v11229_v20, %v2814_v29  ;;  %v11257_v19 = vadd.f32 %v11229_v20, %v2816_v40  ;;  %v1641_v22 = vadd.f32 %v11171_v47, %v11075_v25  ;;  %v1661_v29 = vadd.f32 %v11173_v10, %v11071_v27 }
 0x25b   :  { %v2866_v46 = vsel %vm2864_vm6, %v11238_v16, 0.0  ;;  %v2870_v39 = vsel %vm2864_vm6, %v11248_v35, 0.0  ;;  %v2336_v47 = vadd.f32 %v11196_v32, %v1621_v15 }
 0x25c   :  { %v2867_v18 = vadd.f32 %v2866_v46, %v2865_v5  ;;  %v2868_v17 = vsel %vm2864_vm6, %v11241_v59, 0.0  ;;  %v2872_v38 = vsel %vm2864_vm6, %v11257_v19, 0.0  ;;  %v2335_v5 = vadd.f32 %v11198_v33, %v1601_v28 }
 0x25d   :  { %v2337_v56 = vadd.f32 %v11200_v37, %v1641_v22  ;;  %v2338_v21 = vadd.f32 %v11202_v2, %v1661_v29  ;;  %v1801_v29 = vadd.f32 %v11188_v14, %v11119_v49  ;;  %v13978_v14 = vld [vmem:[#allocation11_spill] sm:$0xff] }
 0x25e   :  { %v2869_v52 = vadd.f32 %v2868_v17, %v2867_v18  ;;  %v2466_v63 = vpop.f32.mrf.mxu2  ;;  %v2506_v43 = vpop.f32.mrf.mxu0 }
 0x25f   :  { %v2817_v61 = vadd.f32 %v2466_v63, %v2331_v24  ;;  %v2486_v54 = vpop.f32.mrf.mxu3  ;;  %v2819_v12 = vadd.f32 %v2506_v43, %v2333_v60  ;;  %v2526_v9 = vpop.f32.mrf.mxu1 }
 0x260   :  { %v2871_v51 = vadd.f32 %v2870_v39, %v2869_v52  ;;  %v2818_v1 = vadd.f32 %v2486_v54, %v2332_v7  ;;  %v2820_v50 = vadd.f32 %v2526_v9, %v2334_v0  ;;  %v1741_v0 = vadd.f32 %v11184_v11, %v11093_v58 }
 0x261   :  { %v11265_v23 = vadd.f32 %v11229_v20, %v2817_v61  ;;  %v11277_v45 = vadd.f32 %v11229_v20, %v2819_v12  ;;  %v2339_v61 = vadd.f32 %v11206_v42, %v11176_v53  ;;  %v2341_v54 = vadd.f32 %v11208_v30, %v11182_v8 }
 0x262   :  { %v2873_v62 = vadd.f32 %v2872_v38, %v2871_v51  ;;  %v11268_v3 = vadd.f32 %v11229_v20, %v2818_v1  ;;  %v11288_v36 = vadd.f32 %v11229_v20, %v2820_v50  ;;  %v2340_v51 = vadd.f32 %v11204_v26, %v11178_v44 }
 0x263   :  { %v2874_v41 = vsel %vm2864_vm6, %v11265_v23, 0.0  ;;  %v2878_v27 = vsel %vm2864_vm6, %v11277_v45, 0.0  ;;  %v2342_v58 = vadd.f32 %v11210_v13, %v1741_v0  ;;  %v1761_v13 = vadd.f32 %v11180_v55, %v11097_v48 }
 0x264   :  { %v2875_v40 = vadd.f32 %v2874_v41, %v2873_v62  ;;  %v2876_v25 = vsel %vm2864_vm6, %v11268_v3, 0.0  ;;  %v2880_v17 = vsel %vm2864_vm6, %v11288_v36, 0.0 }
 0x266   :  { %v2877_v46 = vadd.f32 %v2876_v25, %v2875_v40  ;;  %v2546_v34 = vpop.f32.mrf.mxu2  ;;  %v2586_v18 = vpop.f32.mrf.mxu0  ;;  %v13974_v25 = vld [vmem:[#allocation5_spill] sm:$0xff] }
 0x267   :  { %v2821_v57 = vadd.f32 %v2546_v34, %v2335_v5  ;;  %v2566_v10 = vpop.f32.mrf.mxu3  ;;  %v2823_v33 = vadd.f32 %v2586_v18, %v2337_v56  ;;  %v2606_v37 = vpop.f32.mrf.mxu1  ;;  %v1781_v56 = vadd.f32 %v11186_v4, %v11113_v31  ;;  %v13976_v18 = vld [vmem:[#allocation12_spill] sm:$0xff]  ;;  %v13979_v31 = vld [vmem:[#allocation14_spill] sm:$0xff] }
 0x268   :  { %v2879_v24 = vadd.f32 %v2878_v27, %v2877_v46  ;;  %v2822_v60 = vadd.f32 %v2566_v10, %v2336_v47  ;;  %v2824_v32 = vadd.f32 %v2606_v37, %v2338_v21  ;;  %v13975_v47 = vld [vmem:[#allocation9_spill] sm:$0xff]  ;;  %v2343_v21 = vadd.f32 %v13976_v18, %v1761_v13  ;;  %v13985_v13 = vld [vmem:[#allocation15_spill] sm:$0xff] }
 0x269   :  { %v11297_v7 = vadd.f32 %v11229_v20, %v2821_v57  ;;  %v11305_v43 = vadd.f32 %v11229_v20, %v2823_v33  ;;  %v1821_v46 = vadd.f32 %v13975_v47, %v13974_v25  ;;  %v13977_v27 = vld [vmem:[#allocation13_spill] sm:$0xff]  ;;  %v2344_v57 = vadd.f32 %v13978_v14, %v1781_v56 }
 0x26a   :  { %v2881_v52 = vadd.f32 %v2880_v17, %v2879_v24  ;;  %v11300_v63 = vadd.f32 %v11229_v20, %v2822_v60  ;;  %v11316_v9 = vadd.f32 %v11229_v20, %v2824_v32  ;;  %v2345_v48 = vadd.f32 %v13977_v27, %v1801_v29 }
 0x26b   :  { %v2882_v2 = vsel %vm2864_vm6, %v11297_v7, 0.0  ;;  %v2886_v53 = vsel %vm2864_vm6, %v11305_v43, 0.0  ;;  %v2346_v4 = vadd.f32 %v13979_v31, %v1821_v46 }
 0x26c   :  { %v2883_v39 = vadd.f32 %v2882_v2, %v2881_v52  ;;  %v2884_v12 = vsel %vm2864_vm6, %v11300_v63, 0.0  ;;  %v2888_v22 = vsel %vm2864_vm6, %v11316_v9, 0.0 }
 0x26e   :  { %v2885_v1 = vadd.f32 %v2884_v12, %v2883_v39  ;;  %v2626_v38 = vpop.f32.mrf.mxu2  ;;  %v2666_v50 = vpop.f32.mrf.mxu0  ;;  %v10053_v12 = vmov 46.0  }
 0x26f   :  { %v2825_v11 = vadd.f32 %v2626_v38, %v2339_v61  ;;  %v2646_v42 = vpop.f32.mrf.mxu3  ;;  %v2827_v8 = vadd.f32 %v2666_v50, %v2341_v54  ;;  %v2686_v30 = vpop.f32.mrf.mxu1  ;;  %9877 = vrcp.f32 %v10053_v12  ;;  %v13980_v38 = vld [vmem:[#allocation6_spill] sm:$0xff]  ;;  %v13981_v50 = vld [vmem:[#allocation8_spill] sm:$0xff] }
 0x270   :  { %v2887_v62 = vadd.f32 %v2886_v53, %v2885_v1  ;;  %v2826_v28 = vadd.f32 %v2646_v42, %v2340_v51  ;;  %v2828_v44 = vadd.f32 %v2686_v30, %v2342_v58  ;;  %v1841_v58 = vadd.f32 %v13981_v50, %v13980_v38  ;;  %v13982_v42 = vld [vmem:[#allocation7_spill] sm:$0xff] }
 0x271   :  { %v11326_v41 = vadd.f32 %v11229_v20, %v2825_v11  ;;  %v11338_v5 = vadd.f32 %v11229_v20, %v2827_v8  ;;  %v13983_v8 = vld [vmem:[#allocation10_spill] sm:$0xff] }
 0x272   :  { %v2889_v26 = vadd.f32 %v2888_v22, %v2887_v62  ;;  %v11329_v15 = vadd.f32 %v11229_v20, %v2826_v28  ;;  %v11349_v55 = vadd.f32 %v11229_v20, %v2828_v44  ;;  %v1861_v30 = vadd.f32 %v13983_v8, %v13982_v42  ;;  %v13984_v28 = vld [vmem:[#allocation16_spill] sm:$0xff] }
 0x273   :  { %v2890_v40 = vsel %vm2864_vm6, %v11326_v41, 0.0  ;;  %v2894_v24 = vsel %vm2864_vm6, %v11338_v5, 0.0  ;;  %v2347_v22 = vadd.f32 %v13984_v28, %v1841_v58 }
 0x274   :  { %v2891_v34 = vadd.f32 %v2890_v40, %v2889_v26  ;;  %v2892_v49 = vsel %vm2864_vm6, %v11329_v15, 0.0  ;;  %v2896_v39 = vsel %vm2864_vm6, %v11349_v55, 0.0  ;;  %v2348_v29 = vadd.f32 %v13985_v13, %v1861_v30 }
 0x275   :  { %v9878_v25 = vpop.eup %9877 }
 0x276   :  { %v2893_v10 = vadd.f32 %v2892_v49, %v2891_v34  ;;  %v2706_v33 = vpop.f32.mrf.mxu2  ;;  %v2746_v37 = vpop.f32.mrf.mxu0  ;;  %vm2922_vm7 = vweird.f32 %v9878_v25 }
 0x277   :  { %v2829_v60 = vadd.f32 %v2706_v33, %v2343_v21  ;;  %v2726_v17 = vpop.f32.mrf.mxu3  ;;  %v2831_v32 = vadd.f32 %v2746_v37, %v2345_v48  ;;  %v2766_v52 = vpop.f32.mrf.mxu1 }
 0x278   :  { %v2895_v2 = vadd.f32 %v2894_v24, %v2893_v10  ;;  %v2830_v0 = vadd.f32 %v2726_v17, %v2344_v57  ;;  %v2832_v54 = vadd.f32 %v2766_v52, %v2346_v4  ;;  %v2918_v57 = vmul.f32 46.0, %v9878_v25 }
 0x279   :  { %v11358_v61 = vadd.f32 %v11229_v20, %v2829_v60  ;;  %v11368_v11 = vadd.f32 %v11229_v20, %v2831_v32 }
 0x27a   :  { %v2897_v51 = vadd.f32 %v2896_v39, %v2895_v2  ;;  %v11361_v1 = vadd.f32 %v11229_v20, %v2830_v0  ;;  %v2859_v26 = vadd.f32 %v11229_v20, %v2832_v54  ;;  %v2919_v4 = vsub.f32 1.0, %v2918_v57 }
 0x27b   :  { %v2898_v53 = vsel %vm2864_vm6, %v11358_v61, 0.0  ;;  %v2902_v47 = vsel %vm2864_vm6, %v11368_v11, 0.0 }
 0x27c   :  { %v2899_v62 = vadd.f32 %v2898_v53, %v2897_v51  ;;  %v2900_v44 = vsel %vm2864_vm6, %v11361_v1, 0.0  ;;  %v2904_v27 = vsel %vm2864_vm6, %v2859_v26, 0.0  ;;  %v2920_v17 = vmul.f32 %v9878_v25, %v2919_v4 }
 0x27e   :  { %v2901_v40 = vadd.f32 %v2900_v44, %v2899_v62  ;;  %v2786_v56 = vpop.f32.mrf.mxu2  ;;  %v2921_v2 = vadd.f32 %v9878_v25, %v2920_v17 }
 0x27f   :  { %v2833_v46 = vadd.f32 %v2786_v56, %v2347_v22  ;;  %v2809_v34 = vpop.f32.mrf.mxu3 }
 0x280   :  { %v2903_v18 = vadd.f32 %v2902_v47, %v2901_v40  ;;  %v2834_v21 = vadd.f32 %v2809_v34, %v2348_v29  ;;  %v11385_v54 = vsel %vm2922_vm7, %v9878_v25, %v2921_v2  ;;  %vm8046_vm7 = vcmask 1043459  }
 0x281   :  { %v2860_v48 = vadd.f32 %v11229_v20, %v2833_v46 }
 0x282   :  { %v2905_v49 = vadd.f32 %v2904_v27, %v2903_v18  ;;  %v2861_v14 = vadd.f32 %v11229_v20, %v2834_v21 }
 0x283   :  { %v2906_v10 = vsel %vm2864_vm6, %v2860_v48, 0.0 }
 0x284   :  { %v2907_v33 = vadd.f32 %v2906_v10, %v2905_v49  ;;  %v2908_v37 = vsel %vm2864_vm6, %v2861_v14, 0.0 }
 0x286   :  { %v2909_v31 = vadd.f32 %v2908_v37, %v2907_v33 }
 0x288   :  { %v2910_v24 = vsel %vm2864_vm6, %v2909_v31, 0.0 }
 0x289   :  { %v2911_v60 = vrot.slane %v2910_v24, 4 }
 0x28b   :  { %v2912_v32 = vadd.f32 %v2911_v60, %v2910_v24 }
 0x28d   :  { %v2913_v52 = vrot.slane %v2912_v32, 2 }
 0x28f   :  { %v2914_v0 = vadd.f32 %v2913_v52, %v2912_v32 }
 0x291   :  { %v2915_v39 = vrot.slane %v2914_v0, 1 }
 0x293   :  { %v2916_v20 = vadd.f32 %v2915_v39, %v2914_v0 }
 0x295   :  { %v11388_v12 = vmul.f32 %v11385_v54, %v2916_v20 }
 0x297   :  { %v11392_v51 = vsub.f32 %v11235_v6, %v11388_v12  ;;  %v11396_v38 = vsub.f32 %v11257_v19, %v11388_v12  ;;  %v11400_v50 = vsub.f32 %v11265_v23, %v11388_v12  ;;  %v11404_v58 = vsub.f32 %v11268_v3, %v11388_v12 }
 0x298   :  { %v11408_v53 = vsub.f32 %v11277_v45, %v11388_v12  ;;  %v11412_v6 = vsub.f32 %v11238_v16, %v11388_v12  ;;  %v11416_v19 = vsub.f32 %v11288_v36, %v11388_v12  ;;  %v11420_v23 = vsub.f32 %v11316_v9, %v11388_v12 }
 0x299   :  { %v11424_v3 = vsub.f32 %v11326_v41, %v11388_v12  ;;  %v11428_v45 = vsub.f32 %v11329_v15, %v11388_v12  ;;  %v11432_v16 = vsub.f32 %v11338_v5, %v11388_v12  ;;  %v11436_v36 = vsub.f32 %v11241_v59, %v11388_v12 }
 0x29a   :  { %v11439_v42 = vsub.f32 %v2859_v26, %v11388_v12  ;;  %v11442_v9 = vsub.f32 %v2860_v48, %v11388_v12  ;;  %v11445_v41 = vsub.f32 %v2861_v14, %v11388_v12  ;;  %v11449_v15 = vsub.f32 %v11248_v35, %v11388_v12 }
 0x29b   :  { %v2948_v5 = vmul.f32 %v11392_v51, %v11392_v51  ;;  %v2949_v59 = vmul.f32 %v11412_v6, %v11412_v6  ;;  %v2950_v8 = vmul.f32 %v11436_v36, %v11436_v36  ;;  %v2952_v35 = vmul.f32 %v11396_v38, %v11396_v38 }
 0x29c   :  { %v2951_v30 = vmul.f32 %v11449_v15, %v11449_v15  ;;  %v2953_v13 = vmul.f32 %v11400_v50, %v11400_v50  ;;  %v2954_v56 = vmul.f32 %v11404_v58, %v11404_v58  ;;  %v11472_v46 = vsub.f32 %v11297_v7, %v11388_v12 }
 0x29d   :  { %v2971_v62 = vsel %vm2864_vm6, %v2948_v5, 0.0  ;;  %v2972_v28 = vsel %vm2864_vm6, %v2949_v59, 0.0  ;;  %v2974_v44 = vsel %vm2864_vm6, %v2950_v8, 0.0  ;;  %v2978_v25 = vsel %vm2864_vm6, %v2952_v35, 0.0 }
 0x29e   :  { %v2973_v22 = vadd.f32 %v2972_v28, %v2971_v62  ;;  %v2976_v29 = vsel %vm2864_vm6, %v2951_v30, 0.0  ;;  %v2955_v34 = vmul.f32 %v11408_v53, %v11408_v53  ;;  %v2980_v18 = vsel %vm2864_vm6, %v2953_v13, 0.0 }
 0x29f   :  { %v11479_v27 = vsub.f32 %v11300_v63, %v11388_v12  ;;  %v2956_v48 = vmul.f32 %v11416_v19, %v11416_v19  ;;  %v2982_v49 = vsel %vm2864_vm6, %v2954_v56, 0.0  ;;  %v11486_v7 = vsub.f32 %v11305_v43, %v11388_v12 }
 0x2a0   :  { %v2975_v26 = vadd.f32 %v2974_v44, %v2973_v22  ;;  %v2957_v57 = vmul.f32 %v11472_v46, %v11472_v46  ;;  %v2984_v10 = vsel %vm2864_vm6, %v2955_v34, 0.0  ;;  %v2960_v43 = vmul.f32 %v11420_v23, %v11420_v23 }
 0x2a1   :  { %v2958_v63 = vmul.f32 %v11479_v27, %v11479_v27  ;;  %v2986_v37 = vsel %vm2864_vm6, %v2956_v48, 0.0  ;;  %v2959_v4 = vmul.f32 %v11486_v7, %v11486_v7  ;;  %v2961_v52 = vmul.f32 %v11424_v3, %v11424_v3 }
 0x2a2   :  { %v2977_v40 = vadd.f32 %v2976_v29, %v2975_v26  ;;  %v2988_v24 = vsel %vm2864_vm6, %v2957_v57, 0.0  ;;  %v11505_v39 = vsub.f32 %v11349_v55, %v11388_v12  ;;  %v2962_v20 = vmul.f32 %v11428_v45, %v11428_v45 }
 0x2a3   :  { %v2990_v17 = vsel %vm2864_vm6, %v2958_v63, 0.0  ;;  %v2992_v2 = vsel %vm2864_vm6, %v2959_v4, 0.0  ;;  %v2994_v5 = vsel %vm2864_vm6, %v2960_v43, 0.0  ;;  %v11512_v8 = vsub.f32 %v11358_v61, %v11388_v12 }
 0x2a4   :  { %v2979_v47 = vadd.f32 %v2978_v25, %v2977_v40  ;;  %v2963_v30 = vmul.f32 %v11432_v16, %v11432_v16  ;;  %v2996_v62 = vsel %vm2864_vm6, %v2961_v52, 0.0  ;;  %v11519_v55 = vsub.f32 %v11361_v1, %v11388_v12 }
 0x2a5   :  { %v2964_v22 = vmul.f32 %v11505_v39, %v11505_v39  ;;  %v2998_v35 = vsel %vm2864_vm6, %v2962_v20, 0.0  ;;  %v11526_v61 = vsub.f32 %v11368_v11, %v11388_v12  ;;  %v2965_v26 = vmul.f32 %v11512_v8, %v11512_v8  ;;  %v9602_v20 = vld [vmem:[%s11552_s11 + $0x28] sm:$0xff] }
 0x2a6   :  { %v2981_v21 = vadd.f32 %v2980_v18, %v2979_v47  ;;  %v3000_v13 = vsel %vm2864_vm6, %v2963_v30, 0.0  ;;  %v2966_v1 = vmul.f32 %v11519_v55, %v11519_v55  ;;  %v2968_v11 = vmul.f32 %v11439_v42, %v11439_v42  ;;  %v9604_v30 = vld [vmem:[%s11552_s11 + $0x38] sm:$0xff]  ;;  %3326 = vmatpush.bf16.msrb.mxu2 %v9602_v20  ;;  %v9614_v20 = vld [vmem:[%s11552_s11 + $0x88] sm:$0xff] }
 0x2a7   :  { %v3002_v40 = vsel %vm2864_vm6, %v2964_v22, 0.0  ;;  %v2967_v25 = vmul.f32 %v11526_v61, %v11526_v61  ;;  %v3004_v47 = vsel %vm2864_vm6, %v2965_v26, 0.0  ;;  %3354 = vmatpush.bf16.msrb.mxu3 %v9604_v30  ;;  %v9599_v22 = vld [vmem:[%s11552_s11 + $0x10] sm:$0xff]  ;;  %v9608_v26 = vld [vmem:[%s11552_s11 + $0x58] sm:$0xff] }
 0x2a8   :  { %v2983_v14 = vadd.f32 %v2982_v49, %v2981_v21  ;;  %v3006_v12 = vsel %vm2864_vm6, %v2966_v1, 0.0  ;;  %v2969_v21 = vmul.f32 %v11442_v9, %v11442_v9  ;;  %v3010_v57 = vsel %vm2864_vm6, %v2968_v11, 0.0  ;;  %v9616_v30 = vld [vmem:[%s11552_s11 + $0x98] sm:$0xff] }
 0x2a9   :  { %v3008_v48 = vsel %vm2864_vm6, %v2967_v25, 0.0  ;;  %v9607_v25 = vld [vmem:[%s11552_s11 + $0x50] sm:$0xff] }
 0x2aa   :  { %v2985_v33 = vadd.f32 %v2984_v10, %v2983_v14  ;;  %v2970_v14 = vmul.f32 %v11445_v41, %v11445_v41 }
 0x2ac   :  { %v2987_v31 = vadd.f32 %v2986_v37, %v2985_v33  ;;  %v3012_v33 = vsel %vm2864_vm6, %v2969_v21, 0.0  ;;  %v3014_v37 = vsel %vm2864_vm6, %v2970_v14, 0.0  ;;  %v11572_v21 = vld [vmem:[%s11155_s3] ss:$0 sm:$0xff]  ;;  %s11834_s3 = sld [smem:[%s13958_s0 + %s10067_s30]]  }
 0x2ad   :  { %v11579_v14 = vld [vmem:[%s11162_s7] ss:$0 sm:$0xff]  ;;  %s11839_s7 = sld [smem:[%s13958_s0 + %s10068_s4]]  }
 0x2ae   :  { %v2989_v60 = vadd.f32 %v2988_v24, %v2987_v31 }
 0x2b0   :  { %v2991_v32 = vadd.f32 %v2990_v17, %v2989_v60 }
 0x2b2   :  { %v2993_v0 = vadd.f32 %v2992_v2, %v2991_v32 }
 0x2b4   :  { %v2995_v59 = vadd.f32 %v2994_v5, %v2993_v0  ;;  %v9598_v5 = vld [vmem:[%s11552_s11 + $0x8] sm:$0xff] }
 0x2b5   :  { %3270 = vmatpush.bf16.msrb.mxu0 %v9598_v5 }
 0x2b6   :  { %v2997_v28 = vadd.f32 %v2996_v62, %v2995_v59  ;;  %v9600_v59 = vld [vmem:[%s11552_s11 + $0x18] sm:$0xff]  ;;  %v9601_v62 = vld [vmem:[%s11552_s11 + $0x20] sm:$0xff] }
 0x2b7   :  { %3298 = vmatpush.bf16.msrb.mxu1 %v9600_v59  ;;  %3327 = vmatpush.bf16.msrb.mxu2 %v9601_v62 }
 0x2b8   :  { %v2999_v44 = vadd.f32 %v2998_v35, %v2997_v28  ;;  %v9597_v28 = vld [vmem:[%s11552_s11] sm:$0xff]  ;;  %v9610_v35 = vld [vmem:[%s11552_s11 + $0x68] sm:$0xff] }
 0x2b9   :  { %3271 = vmatpush.bf16.msrb.mxu0 %v9597_v28 }
 0x2ba   :  { %v3001_v29 = vadd.f32 %v3000_v13, %v2999_v44  ;;  %v9606_v44 = vld [vmem:[%s11552_s11 + $0x48] sm:$0xff] }
 0x2bb   :  { %3299 = vmatpush.bf16.msrb.mxu1 %v9599_v22  ;;  %3438 = vmatpush.bf16.msra.mxu2 %v9610_v35 }
 0x2bc   :  { %v3003_v56 = vadd.f32 %v3002_v40, %v3001_v29  ;;  %v9612_v29 = vld [vmem:[%s11552_s11 + $0x78] sm:$0xff]  ;;  %v9609_v40 = vld [vmem:[%s11552_s11 + $0x60] sm:$0xff] }
 0x2bd   :  { %3382 = vmatpush.bf16.msra.mxu0 %v9606_v44 }
 0x2be   :  { %v3005_v34 = vadd.f32 %v3004_v47, %v3003_v56  ;;  %v9605_v56 = vld [vmem:[%s11552_s11 + $0x40] sm:$0xff]  ;;  %v9611_v47 = vld [vmem:[%s11552_s11 + $0x70] sm:$0xff] }
 0x2bf   :  { %3410 = vmatpush.bf16.msra.mxu1 %v9608_v26  ;;  %3439 = vmatpush.bf16.msra.mxu2 %v9609_v40  ;;  %v9620_v26 = vld [vmem:[%s11552_s11 + $0xb8] sm:$0xff]  ;;  %v9615_v40 = vld [vmem:[%s11552_s11 + $0x90] sm:$0xff] }
 0x2c0   :  { %v3007_v18 = vadd.f32 %v3006_v12, %v3005_v34 }
 0x2c1   :  { %3383 = vmatpush.bf16.msra.mxu0 %v9605_v56 }
 0x2c2   :  { %v3009_v49 = vadd.f32 %v3008_v48, %v3007_v18 }
 0x2c3   :  { %3411 = vmatpush.bf16.msra.mxu1 %v9607_v25 }
 0x2c4   :  { %v3011_v10 = vadd.f32 %v3010_v57, %v3009_v49 }
 0x2c6   :  { %v3013_v63 = vadd.f32 %v3012_v33, %v3011_v10 }
 0x2c8   :  { %v3015_v31 = vadd.f32 %v3014_v37, %v3013_v63 }
 0x2ca   :  { %v3016_v4 = vsel %vm2864_vm6, %v3015_v31, 0.0  ;;  %vm8044_vm6 = vcmask 1042434  }
 0x2cb   :  { %v3017_v24 = vrot.slane %v3016_v4, 4 }
 0x2cd   :  { %v3018_v60 = vadd.f32 %v3017_v24, %v3016_v4 }
 0x2cf   :  { %v3019_v43 = vrot.slane %v3018_v60, 2 }
 0x2d1   :  { %v3020_v17 = vadd.f32 %v3019_v43, %v3018_v60 }
 0x2d3   :  { %v3021_v32 = vrot.slane %v3020_v17, 1 }
 0x2d5   :  { %v3022_v52 = vadd.f32 %v3021_v32, %v3020_v17 }
 0x2d7   :  { %v3023_v2 = vmul.f32 %v3022_v52, %v11385_v54  ;;  %v9603_v54 = vld [vmem:[%s11552_s11 + $0x30] sm:$0xff] }
 0x2d8   :  { %3355 = vmatpush.bf16.msrb.mxu3 %v9603_v54 }
 0x2d9   :  { %v3024_v0 = vadd.f32 1e-05, %v3023_v2 }
 0x2db   :  { %9879 = vrsqrt.f32 %v3024_v0  ;;  %vm3031_vm9 = vweird.f32 %v3024_v0 }
 0x2dc   :  { %3466 = vmatpush.bf16.msra.mxu3 %v9612_v29 }
 0x2e0   :  { %3467 = vmatpush.bf16.msra.mxu3 %v9611_v47 }
 0x2e1   :  { %v9880_v13 = vpop.eup %9879 }
 0x2e2   :  { %v3026_v1 = vmul.f32 %v9880_v13, %v3024_v0  ;;  %vm3032_vm8 = vweird.f32 %v9880_v13 }
 0x2e3   :  { %vm3033_vm10 = vmor %vm3031_vm9, %vm3032_vm8  ;;  %vm8048_vm8 = vcmask 1044484   ;;  %vm8050_vm9 = vcmask 1045509  }
 0x2e4   :  { %v3027_v34 = vmul.f32 %v9880_v13, %v3026_v1  ;;  %v9613_v1 = vld [vmem:[%s11552_s11 + $0x80] sm:$0xff] }
 0x2e6   :  { %v3028_v11 = vmul.f32 0.5, %v3027_v34  ;;  %v9617_v34 = vld [vmem:[%s11552_s11 + $0xa0] sm:$0xff] }
 0x2e8   :  { %v3029_v12 = vsub.f32 1.5, %v3028_v11 }
 0x2ea   :  { %v3030_v18 = vmul.f32 %v9880_v13, %v3029_v12 }
 0x2ec   :  { %v11574_v48 = vsel %vm3033_vm10, %v9880_v13, %v3030_v18  ;;  %vm8052_vm10 = vcmask 1046534  }
 0x2ed   :  { %v3057_v49 = vmul.f32 %v11574_v48, %v11445_v41  ;;  %v3035_v57 = vmul.f32 %v11574_v48, %v11392_v51  ;;  %v3036_v10 = vmul.f32 %v11574_v48, %v11412_v6  ;;  %v3037_v33 = vmul.f32 %v11574_v48, %v11436_v36 }
 0x2ee   :  { %v3038_v63 = vmul.f32 %v11574_v48, %v11449_v15  ;;  %v3039_v43 = vmul.f32 %v11574_v48, %v11396_v38  ;;  %v3040_v17 = vmul.f32 %v11574_v48, %v11400_v50  ;;  %v3041_v32 = vmul.f32 %v11574_v48, %v11404_v58 }
 0x2ef   :  { %v3083_v37 = vmul.f32 %v11572_v21, %v3057_v49  ;;  %v3061_v31 = vmul.f32 %v11572_v21, %v3035_v57  ;;  %v3062_v41 = vmul.f32 %v11572_v21, %v3036_v10  ;;  %v3063_v4 = vmul.f32 %v11572_v21, %v3037_v33  ;;  %v9619_v57 = vld [vmem:[%s11552_s11 + $0xb0] sm:$0xff] }
 0x2f0   :  { %v3064_v24 = vmul.f32 %v11572_v21, %v3038_v63  ;;  %v3042_v52 = vmul.f32 %v11574_v48, %v11408_v53  ;;  %v3065_v0 = vmul.f32 %v11572_v21, %v3039_v43  ;;  %v3066_v38 = vmul.f32 %v11572_v21, %v3040_v17  ;;  %v9618_v53 = vld [vmem:[%s11552_s11 + $0xa8] sm:$0xff] }
 0x2f1   :  { %v11595_v51 = vadd.f32 %v11579_v14, %v3083_v37  ;;  %v3087_v6 = vadd.f32 %v11579_v14, %v3061_v31  ;;  %v3088_v36 = vadd.f32 %v11579_v14, %v3062_v41  ;;  %v3089_v15 = vadd.f32 %v11579_v14, %v3063_v4 }
 0x2f2   :  { %v3090_v60 = vadd.f32 %v11579_v14, %v3064_v24  ;;  %v3051_v50 = vmul.f32 %v11574_v48, %v11505_v39  ;;  %v3067_v28 = vmul.f32 %v11572_v21, %v3041_v32  ;;  %v3055_v54 = vmul.f32 %v11574_v48, %v11439_v42 }
 0x2f3   :  { %9881 = vtanh.f32 %v3087_v6  ;;  %v3068_v44 = vmul.f32 %v11572_v21, %v3042_v52  ;;  %v3091_v29 = vadd.f32 %v11579_v14, %v3065_v0  ;;  %v3092_v42 = vadd.f32 %v11579_v14, %v3066_v38 }
 0x2f4   :  { %9883 = vtanh.f32 %v3088_v36  ;;  %v3077_v39 = vmul.f32 %v11572_v21, %v3051_v50  ;;  %v3052_v25 = vmul.f32 %v11574_v48, %v11512_v8  ;;  %v3093_v47 = vadd.f32 %v11579_v14, %v3067_v28  ;;  %v9621_v50 = vld [vmem:[%s11552_s11 + $0xc0] sm:$0xff] }
 0x2f5   :  { %9885 = vtanh.f32 %v3089_v15  ;;  %v3053_v11 = vmul.f32 %v11574_v48, %v11519_v55  ;;  %v3054_v12 = vmul.f32 %v11574_v48, %v11526_v61  ;;  %v3056_v18 = vmul.f32 %v11574_v48, %v11442_v9 }
 0x2f6   :  { %9887 = vtanh.f32 %v3090_v60  ;;  %v11630_v56 = vadd.f32 %v11579_v14, %v3077_v39  ;;  %v3094_v49 = vadd.f32 %v11579_v14, %v3068_v44  ;;  %v3078_v8 = vmul.f32 %v11572_v21, %v3052_v25 }
 0x2f7   :  { %v3081_v10 = vmul.f32 %v11572_v21, %v3055_v54  ;;  %9889 = vtanh.f32 %v3091_v29  ;;  %v3079_v33 = vmul.f32 %v11572_v21, %v3053_v11  ;;  %v3080_v55 = vmul.f32 %v11572_v21, %v3054_v12  ;;  %v9627_v54 = vld [vmem:[%s11552_s11 + $0xf0] sm:$0xff] }
 0x2f8   :  { %9891 = vtanh.f32 %v3092_v42  ;;  %v11650_v61 = vadd.f32 %v11579_v14, %v3078_v8  ;;  %v3082_v31 = vmul.f32 %v11572_v21, %v3056_v18  ;;  %v3043_v41 = vmul.f32 %v11574_v48, %v11416_v19  ;;  %v9622_v19 = vld [vmem:[%s11552_s11 + $0xc8] sm:$0xff] }
 0x2f9   :  { %v9882_v2 = vpop.eup %9881  ;;  %v11653_v9 = vadd.f32 %v11579_v14, %v3081_v10  ;;  %9893 = vtanh.f32 %v3093_v47  ;;  %v11656_v63 = vadd.f32 %v11579_v14, %v3079_v33  ;;  %v11659_v37 = vadd.f32 %v11579_v14, %v3080_v55  ;;  %v9631_v10 = vld [vmem:[%s11552_s11 + $0x110] sm:$0xff] }
 0x2fa   :  { %v9884_v5 = vpop.eup %9883  ;;  %v3133_v59 = vpack.c.bf16 %v9882_v2, %v9882_v2  ;;  %9895 = vtanh.f32 %v3094_v49  ;;  %v3044_v4 = vmul.f32 %v11574_v48, %v11472_v46  ;;  %v11667_v24 = vadd.f32 %v11579_v14, %v3082_v31  ;;  %v9624_v2 = vld [vmem:[%s11552_s11 + $0xd8] sm:$0xff]  ;;  %v9635_v31 = vld [vmem:[%s11552_s11 + $0x130] sm:$0xff] }
 0x2fb   :  { %v9886_v62 = vpop.eup %9885  ;;  %v3134_v58 = vpack.c.bf16 %v9884_v5, %v9884_v5  ;;  %v3045_v36 = vmul.f32 %v11574_v48, %v11479_v27  ;;  %v3046_v60 = vmul.f32 %v11574_v48, %v11486_v7  ;;  %v3069_v17 = vmul.f32 %v11572_v21, %v3043_v41  ;;  %v9626_v27 = vld [vmem:[%s11552_s11 + $0xe8] sm:$0xff] }
 0x2fc   :  { %v9888_v22 = vpop.eup %9887  ;;  %8905 = vmatmul.msk.bf16.vlgmr.msrb.gmra.mxu0 %vm3260_vm11, %v3133_v59  ;;  %v3135_v35 = vpack.c.bf16 %v9886_v62, %v9886_v62  ;;  %v3070_v46 = vmul.f32 %v11572_v21, %v3044_v4  ;;  %v9628_v59 = vld [vmem:[%s11552_s11 + $0xf8] sm:$0xff]  ;;  %v3048_v44 = vmul.f32 %v11574_v48, %v11424_v3  ;;  %v3049_v39 = vmul.f32 %v11574_v48, %v11428_v45  ;;  %v9634_v45 = vld [vmem:[%s11552_s11 + $0x128] sm:$0xff] }
 0x2fd   :  { %8914 = vmatmul.msk.bf16.vlgmr.msrb.gmra.mxu1 %vm3260_vm11, %v3134_v58  ;;  %v3136_v13 = vpack.c.bf16 %v9888_v22, %v9888_v22  ;;  %3494 = vmatpush.bf16.msrb.mxu0 %v9614_v20  ;;  %v9890_v6 = vpop.eup %9889  ;;  %v3071_v20 = vmul.f32 %v11572_v21, %v3045_v36  ;;  %v3072_v7 = vmul.f32 %v11572_v21, %v3046_v60  ;;  %v9623_v58 = vld [vmem:[%s11552_s11 + $0xd0] sm:$0xff]  ;;  %v9638_v36 = vld [vmem:[%s11552_s11 + $0x148] sm:$0xff]  ;;  %v9640_v60 = vld [vmem:[%s11552_s11 + $0x158] sm:$0xff] }
 0x2fe   :  { %8923 = vmatmul.msk.bf16.vlgmr.msrb.gmra.mxu2 %vm3260_vm11, %v3135_v35  ;;  %3522 = vmatpush.bf16.msrb.mxu1 %v9616_v30  ;;  %v9892_v15 = vpop.eup %9891  ;;  %v3137_v52 = vpack.c.bf16 %v9890_v6, %v9890_v6  ;;  %v3095_v30 = vadd.f32 %v11579_v14, %v3069_v17  ;;  %v3096_v62 = vadd.f32 %v11579_v14, %v3070_v46  ;;  %v9642_v17 = vld [vmem:[%s11552_s11 + $0x168] sm:$0xff]  ;;  %v9639_v46 = vld [vmem:[%s11552_s11 + $0x150] sm:$0xff] }
 0x2ff   :  { %8932 = vmatmul.msk.bf16.vlgmr.msrb.gmra.mxu3 %vm3260_vm11, %v3136_v13  ;;  %3550 = vmatpush.bf16.msrb.mxu2 %v9618_v53  ;;  %v9894_v43 = vpop.eup %9893  ;;  %v3138_v0 = vpack.c.bf16 %v9892_v15, %v9892_v15  ;;  %v3097_v28 = vadd.f32 %v11579_v14, %v3071_v20  ;;  %v9625_v53 = vld [vmem:[%s11552_s11 + $0xe0] sm:$0xff]  ;;  %v3098_v22 = vadd.f32 %v11579_v14, %v3072_v7 }
 0x300   :  { %3578 = vmatpush.bf16.msrb.mxu3 %v9620_v26  ;;  %v9896_v32 = vpop.eup %9895  ;;  %v3139_v5 = vpack.c.bf16 %v9894_v43, %v9894_v43  ;;  %9897 = vtanh.f32 %v3095_v30  ;;  %v3047_v35 = vmul.f32 %v11574_v48, %v11420_v23  ;;  %v3050_v29 = vmul.f32 %v11574_v48, %v11432_v16  ;;  %v9636_v48 = vld [vmem:[%s11552_s11 + $0x138] sm:$0xff] }
 0x301   :  { %3495 = vmatpush.bf16.msrb.mxu0 %v9613_v1  ;;  %v3140_v38 = vpack.c.bf16 %v9896_v32, %v9896_v32  ;;  %9899 = vtanh.f32 %v3096_v62  ;;  %v3074_v23 = vmul.f32 %v11572_v21, %v3048_v44  ;;  %v3075_v11 = vmul.f32 %v11572_v21, %v3049_v39 }
 0x302   :  { %3523 = vmatpush.bf16.msrb.mxu1 %v9615_v40  ;;  %9901 = vtanh.f32 %v3097_v28  ;;  %v3073_v42 = vmul.f32 %v11572_v21, %v3047_v35  ;;  %v9630_v40 = vld [vmem:[%s11552_s11 + $0x108] sm:$0xff]  ;;  %v3076_v16 = vmul.f32 %v11572_v21, %v3050_v29  ;;  %v9633_v21 = vld [vmem:[%s11552_s11 + $0x120] sm:$0xff] }
 0x303   :  { %3551 = vmatpush.bf16.msrb.mxu2 %v9617_v34  ;;  %9903 = vtanh.f32 %v3098_v22  ;;  %v9632_v34 = vld [vmem:[%s11552_s11 + $0x118] sm:$0xff]  ;;  %v3100_v8 = vadd.f32 %v11579_v14, %v3074_v23  ;;  %v3101_v33 = vadd.f32 %v11579_v14, %v3075_v11 }
 0x304   :  { %3579 = vmatpush.bf16.msrb.mxu3 %v9619_v57  ;;  %v3099_v49 = vadd.f32 %v11579_v14, %v3073_v42  ;;  %v9629_v57 = vld [vmem:[%s11552_s11 + $0x100] sm:$0xff]  ;;  %v3102_v55 = vadd.f32 %v11579_v14, %v3076_v16 }
 0x306   :  { %v9898_v26 = vpop.eup %9897  ;;  %9905 = vtanh.f32 %v3099_v49 }
 0x307   :  { %v9900_v13 = vpop.eup %9899  ;;  %v3141_v47 = vpack.c.bf16 %v9898_v26, %v9898_v26  ;;  %9907 = vtanh.f32 %v3100_v8 }
 0x308   :  { %v9902_v1 = vpop.eup %9901  ;;  %v3142_v3 = vpack.c.bf16 %v9900_v13, %v9900_v13  ;;  %9909 = vtanh.f32 %v3101_v33 }
 0x309   :  { %v9904_v25 = vpop.eup %9903  ;;  %v3143_v12 = vpack.c.bf16 %v9902_v1, %v9902_v1  ;;  %9911 = vtanh.f32 %v3102_v55 }
 0x30a   :  { %v3144_v18 = vpack.c.bf16 %v9904_v25, %v9904_v25  ;;  %9913 = vtanh.f32 %v11630_v56 }
 0x30b   :  { %9915 = vtanh.f32 %v11650_v61 }
 0x30c   :  { %8941 = vmatmul.msk.bf16.vlgmr.msra.gmra.mxu0 %vm3260_vm11, %v3137_v52  ;;  %v9906_v41 = vpop.eup %9905  ;;  %v9637_v52 = vld [vmem:[%s11552_s11 + $0x140] sm:$0xff]  ;;  %9917 = vtanh.f32 %v11656_v63 }
 0x30d   :  { %8950 = vmatmul.msk.bf16.vlgmr.msra.gmra.mxu1 %vm3260_vm11, %v3138_v0  ;;  %3606 = vmatpush.bf16.msra.mxu0 %v9622_v19  ;;  %v9908_v4 = vpop.eup %9907  ;;  %v3145_v14 = vpack.c.bf16 %v9906_v41, %v9906_v41  ;;  %9919 = vtanh.f32 %v11659_v37 }
 0x30e   :  { %8959 = vmatmul.msk.bf16.vlgmr.msra.gmra.mxu2 %vm3260_vm11, %v3139_v5  ;;  %3634 = vmatpush.bf16.msra.mxu1 %v9624_v2  ;;  %v9910_v6 = vpop.eup %9909  ;;  %v3146_v43 = vpack.c.bf16 %v9908_v4, %v9908_v4  ;;  %v9641_v2 = vld [vmem:[%s11552_s11 + $0x160] sm:$0xff]  ;;  %9921 = vtanh.f32 %v11653_v9  ;;  %s11854_s11 = sld [smem:[%s13958_s0 + %s10069_s8]]  }
 0x30f   :  { %8968 = vmatmul.msk.bf16.vlgmr.msra.gmra.mxu3 %vm3260_vm11, %v3140_v38  ;;  %3662 = vmatpush.bf16.msra.mxu2 %v9626_v27  ;;  %v9912_v15 = vpop.eup %9911  ;;  %v3147_v19 = vpack.c.bf16 %v9910_v6, %v9910_v6  ;;  %9923 = vtanh.f32 %v11667_v24 }
 0x310   :  { %3690 = vmatpush.bf16.msra.mxu3 %v9628_v59  ;;  %v3148_v32 = vpack.c.bf16 %v9912_v15, %v9912_v15  ;;  %v9914_v0 = vpop.eup %9913  ;;  %9925 = vtanh.f32 %v11595_v51 }
 0x311   :  { %3607 = vmatpush.bf16.msra.mxu0 %v9621_v50  ;;  %v9916_v20 = vpop.eup %9915  ;;  %v3149_v7 = vpack.c.bf16 %v9914_v0, %v9914_v0  ;;  %v3949_v0 = vld [vmem:[%s11765_s23 + $0x20] sm:$0xff] }
 0x312   :  { %3635 = vmatpush.bf16.msra.mxu1 %v9623_v58  ;;  %v9918_v27 = vpop.eup %9917  ;;  %v3150_v59 = vpack.c.bf16 %v9916_v20, %v9916_v20 }
 0x313   :  { %3663 = vmatpush.bf16.msra.mxu2 %v9625_v53  ;;  %v9920_v5 = vpop.eup %9919  ;;  %v3151_v38 = vpack.c.bf16 %v9918_v27, %v9918_v27 }
 0x314   :  { %3691 = vmatpush.bf16.msra.mxu3 %v9627_v54  ;;  %v3152_v56 = vpack.c.bf16 %v9920_v5, %v9920_v5  ;;  %v9922_v61 = vpop.eup %9921 }
 0x315   :  { %v9924_v63 = vpop.eup %9923  ;;  %v3153_v30 = vpack.c.bf16 %v9922_v61, %v9922_v61 }
 0x316   :  { %v9926_v37 = vpop.eup %9925  ;;  %v3154_v50 = vpack.c.bf16 %v9924_v63, %v9924_v63  ;;  %v3948_v63 = vld [vmem:[%s11765_s23 + $0x18] sm:$0xff] }
 0x317   :  { %v3155_v62 = vpack.c.bf16 %v9926_v37, %v9926_v37  ;;  %v3947_v37 = vld [vmem:[%s11765_s23 + $0x10] sm:$0xff] }
 0x31c   :  { %8977 = vmatmul.msk.bf16.vlgmr.msrb.gmra.mxu0 %vm3260_vm11, %v3141_v47 }
 0x31d   :  { %8986 = vmatmul.msk.bf16.vlgmr.msrb.gmra.mxu1 %vm3260_vm11, %v3142_v3  ;;  %3718 = vmatpush.bf16.msrb.mxu0 %v9630_v40 }
 0x31e   :  { %8995 = vmatmul.msk.bf16.vlgmr.msrb.gmra.mxu2 %vm3260_vm11, %v3143_v12  ;;  %3746 = vmatpush.bf16.msrb.mxu1 %v9632_v34 }
 0x31f   :  { %9004 = vmatmul.msk.bf16.vlgmr.msrb.gmra.mxu3 %vm3260_vm11, %v3144_v18  ;;  %3774 = vmatpush.bf16.msrb.mxu2 %v9634_v45 }
 0x320   :  { %3802 = vmatpush.bf16.msrb.mxu3 %v9636_v48 }
 0x321   :  { %3719 = vmatpush.bf16.msrb.mxu0 %v9629_v57 }
 0x322   :  { %3747 = vmatpush.bf16.msrb.mxu1 %v9631_v10 }
 0x323   :  { %3775 = vmatpush.bf16.msrb.mxu2 %v9633_v21 }
 0x324   :  { %3803 = vmatpush.bf16.msrb.mxu3 %v9635_v31 }
 0x32c   :  { %9013 = vmatmul.msk.bf16.vlgmr.msra.gmra.mxu0 %vm3260_vm11, %v3145_v14 }
 0x32d   :  { %9022 = vmatmul.msk.bf16.vlgmr.msra.gmra.mxu1 %vm3260_vm11, %v3146_v43  ;;  %3830 = vmatpush.bf16.msra.mxu0 %v9638_v36  ;;  %v3952_v43 = vld [vmem:[%s11765_s23 + $0x38] sm:$0xff] }
 0x32e   :  { %9031 = vmatmul.msk.bf16.vlgmr.msra.gmra.mxu2 %vm3260_vm11, %v3147_v19  ;;  %3858 = vmatpush.bf16.msra.mxu1 %v9640_v60 }
 0x32f   :  { %9040 = vmatmul.msk.bf16.vlgmr.msra.gmra.mxu3 %vm3260_vm11, %v3148_v32  ;;  %3886 = vmatpush.bf16.msra.mxu2 %v9642_v17 }
 0x330   :  { %3969 = vmatpush.msra.mxu3 %v3952_v43  ;;  %v9784_v43 = vld [vmem:[%s11753_s19] ss:$0 sm:$0xff]  ;;  %s12067_s19 = sld [smem:[%s13958_s0 + %s10071_s16]]  }
 0x331   :  { %3831 = vmatpush.bf16.msra.mxu0 %v9637_v52  ;;  %v3951_v52 = vld [vmem:[%s11765_s23 + $0x30] sm:$0xff] }
 0x332   :  { %3859 = vmatpush.bf16.msra.mxu1 %v9639_v46  ;;  %v3950_v46 = vld [vmem:[%s11765_s23 + $0x28] sm:$0xff]  ;;  %3970 = vmatpush.msra.mxu3 %v3951_v52  ;;  %v4043_v52 = vld [vmem:[%s8790_s13] sm:$0xff] }
 0x333   :  { %3887 = vmatpush.bf16.msra.mxu2 %v9641_v2 }
 0x334   :  { %3971 = vmatpush.msra.mxu3 %v3950_v46  ;;  %v9785_v46 = vld [vmem:[%s8787_s1] ss:$0 sm:$0xff]  ;;  %s12778_s1 = sld [smem:[%s13958_s0 + %s10075_s28]]  }
 0x336   :  { %3972 = vmatpush.msra.mxu3 %v3949_v0 }
 0x338   :  { %3973 = vmatpush.msra.mxu3 %v3948_v63 }
 0x33a   :  { %3974 = vmatpush.msra.mxu3 %v3947_v37 }
 0x33c   :  { %9049 = vmatmul.msk.bf16.vlgmr.msrb.gmra.mxu0 %vm3260_vm11, %v3149_v7 }
 0x33d   :  { %9058 = vmatmul.msk.bf16.vlgmr.msrb.gmra.mxu1 %vm3260_vm11, %v3150_v59 }
 0x33e   :  { %9067 = vmatmul.msk.bf16.vlgmr.msrb.gmra.mxu2 %vm3260_vm11, %v3151_v38  ;;  %4067 = vmatpush.msrb.mxu1 %v4043_v52  ;;  %v9685_v52 = vld [vmem:[%s11839_s7 + $0x150] sm:$0xff] }
 0x33f   :  { %9076 = vmatmul.msk.bf16.vlgmr.msrb.gmra.mxu3 %vm3260_vm11, %v3152_v56 }
 0x34c   :  { %9085 = vmatmul.msk.bf16.vlgmr.msra.gmra.mxu0 %vm3260_vm11, %v3153_v30 }
 0x34d   :  { %9094 = vmatmul.msk.bf16.vlgmr.msra.gmra.mxu1 %vm3260_vm11, %v3154_v50 }
 0x34e   :  { %9103 = vmatmul.msk.bf16.vlgmr.msra.gmra.mxu2 %vm3260_vm11, %v3155_v62 }
 0x379   :  { %v3273_v51 = vpop.f32.mrf.mxu0 }
 0x37a   :  { %v3301_v9 = vpop.f32.mrf.mxu1  ;;  %v3894_v13 = vsel %vm3893_vm12, %v3273_v51, 0.0 }
 0x37b   :  { %v3895_v29 = vsel %vm3893_vm12, %v3301_v9, 0.0 }
 0x37c   :  { %v3896_v25 = vadd.f32 %v3895_v29, %v3894_v13 }
 0x381   :  { %v3329_v24 = vpop.f32.mrf.mxu2  ;;  %v3275_v58 = vpop.f32.mrf.mxu0 }
 0x382   :  { %v3357_v28 = vpop.f32.mrf.mxu3  ;;  %v3303_v53 = vpop.f32.mrf.mxu1  ;;  %v3897_v40 = vsel %vm3893_vm12, %v3329_v24, 0.0  ;;  %v3946_v24 = vld [vmem:[%s11765_s23 + $0x8] sm:$0xff] }
 0x383   :  { %v3898_v47 = vadd.f32 %v3897_v40, %v3896_v25  ;;  %v3899_v3 = vsel %vm3893_vm12, %v3357_v28, 0.0  ;;  %3975 = vmatpush.msra.mxu3 %v3946_v24  ;;  %v9654_v24 = vld [vmem:[%s11839_s7 + $0x58] sm:$0xff] }
 0x385   :  { %v3900_v16 = vadd.f32 %v3899_v3, %v3898_v47 }
 0x389   :  { %v3331_v22 = vpop.f32.mrf.mxu2  ;;  %v3385_v54 = vpop.f32.mrf.mxu0 }
 0x38a   :  { %v3359_v35 = vpop.f32.mrf.mxu3  ;;  %v3413_v44 = vpop.f32.mrf.mxu1  ;;  %v3901_v11 = vsel %vm3893_vm12, %v3385_v54, 0.0  ;;  %v3945_v22 = vld [vmem:[%s11765_s23] sm:$0xff]  ;;  %v3984_v54 = vld [vmem:[%s11780_s27 + $0x10] sm:$0xff]  ;;  %s12768_s23 = sld [smem:[%s13958_s0 + %s10073_s20]]  }
 0x38b   :  { %v3902_v48 = vadd.f32 %v3901_v11, %v3900_v16  ;;  %v3903_v18 = vsel %vm3893_vm12, %v3413_v44, 0.0  ;;  %3976 = vmatpush.msra.mxu3 %v3945_v22  ;;  %v9653_v22 = vld [vmem:[%s11839_s7 + $0x50] sm:$0xff] }
 0x38d   :  { %v3904_v57 = vadd.f32 %v3903_v18, %v3902_v48  ;;  %4006 = vmatpush.msrb.mxu3 %v3984_v54  ;;  %v9657_v54 = vld [vmem:[%s11839_s7 + $0x70] sm:$0xff] }
 0x391   :  { %v3441_v26 = vpop.f32.mrf.mxu2  ;;  %v3387_v39 = vpop.f32.mrf.mxu0 }
 0x392   :  { %v3469_v1 = vpop.f32.mrf.mxu3  ;;  %v3415_v42 = vpop.f32.mrf.mxu1  ;;  %v3905_v49 = vsel %vm3893_vm12, %v3441_v26, 0.0 }
 0x393   :  { %v3906_v55 = vadd.f32 %v3905_v49, %v3904_v57  ;;  %v3907_v31 = vsel %vm3893_vm12, %v3469_v1, 0.0 }
 0x395   :  { %v3908_v4 = vadd.f32 %v3907_v31, %v3906_v55 }
 0x399   :  { %v3443_v23 = vpop.f32.mrf.mxu2  ;;  %v3497_v34 = vpop.f32.mrf.mxu0 }
 0x39a   :  { %v3471_v45 = vpop.f32.mrf.mxu3  ;;  %v3525_v12 = vpop.f32.mrf.mxu1  ;;  %v3909_v41 = vsel %vm3893_vm12, %v3497_v34, 0.0 }
 0x39b   :  { %v3910_v6 = vadd.f32 %v3909_v41, %v3908_v4  ;;  %v3911_v17 = vsel %vm3893_vm12, %v3525_v12, 0.0 }
 0x39d   :  { %v3912_v32 = vadd.f32 %v3911_v17, %v3910_v6 }
 0x3a1   :  { %v3553_v8 = vpop.f32.mrf.mxu2  ;;  %v3499_v10 = vpop.f32.mrf.mxu0 }
 0x3a2   :  { %v3581_v33 = vpop.f32.mrf.mxu3  ;;  %v3527_v21 = vpop.f32.mrf.mxu1  ;;  %v3913_v19 = vsel %vm3893_vm12, %v3553_v8, 0.0  ;;  %v9783_v10 = vld [vmem:[%s11748_s15] ss:$0 sm:$0xff]  ;;  %s11992_s15 = sld [smem:[%s13958_s0 + %s10070_s12]]  }
 0x3a3   :  { %v3914_v2 = vadd.f32 %v3913_v19, %v3912_v32  ;;  %v3915_v5 = vsel %vm3893_vm12, %v3581_v33, 0.0 }
 0x3a5   :  { %v3916_v56 = vadd.f32 %v3915_v5, %v3914_v2  ;;  %v4073_v5 = vld [vmem:[%s8792_s21] sm:$0xff] }
 0x3a9   :  { %v3555_v36 = vpop.f32.mrf.mxu2  ;;  %v3609_v15 = vpop.f32.mrf.mxu0 }
 0x3aa   :  { %v3583_v14 = vpop.f32.mrf.mxu3  ;;  %v3637_v60 = vpop.f32.mrf.mxu1  ;;  %v3917_v7 = vsel %vm3893_vm12, %v3609_v15, 0.0  ;;  %v3983_v36 = vld [vmem:[%s11780_s27 + $0x8] sm:$0xff]  ;;  %v3982_v15 = vld [vmem:[%s11780_s27] sm:$0xff]  ;;  %s12773_s27 = sld [smem:[%s13958_s0 + %s10074_s24]]  }
 0x3ab   :  { %v3918_v61 = vadd.f32 %v3917_v7, %v3916_v56  ;;  %v3919_v30 = vsel %vm3893_vm12, %v3637_v60, 0.0  ;;  %4007 = vmatpush.msrb.mxu3 %v3983_v36  ;;  %v4015_v14 = vld [vmem:[%s8788_s5 + $0x8] sm:$0xff]  ;;  %v4014_v60 = vld [vmem:[%s8788_s5] sm:$0xff]  ;;  %v4105_v56 = vld [vmem:[%s8794_s29 + $0x10] sm:$0xff]  ;;  %s13504_s5 = sld [smem:[%s13958_s0 + %s10076_s2]]  }
 0x3ac   :  { %4037 = vmatpush.msrb.mxu0 %v4015_v14  ;;  %v9786_v7 = vld [vmem:[%s8789_s9] ss:$0 sm:$0xff]  ;;  %v9678_v14 = vld [vmem:[%s11839_s7 + $0x118] sm:$0xff]  ;;  %s8803_s9 = sld [smem:[%s13958_s0 + %s10077_s6]]  }
 0x3ad   :  { %v3920_v62 = vadd.f32 %v3919_v30, %v3918_v61  ;;  %4008 = vmatpush.msrb.mxu3 %v3982_v15  ;;  %v9787_v61 = vld [vmem:[%s8791_s17] ss:$0 sm:$0xff] }
 0x3ae   :  { %4038 = vmatpush.msrb.mxu0 %v4014_v60  ;;  %v9682_v60 = vld [vmem:[%s11839_s7 + $0x138] sm:$0xff] }
 0x3b1   :  { %v3665_v20 = vpop.f32.mrf.mxu2  ;;  %v3611_v27 = vpop.f32.mrf.mxu0 }
 0x3b2   :  { %v3693_v59 = vpop.f32.mrf.mxu3  ;;  %v3639_v38 = vpop.f32.mrf.mxu1  ;;  %v3921_v50 = vsel %vm3893_vm12, %v3665_v20, 0.0  ;;  %v4074_v27 = vld [vmem:[%s8792_s21 + $0x8] sm:$0xff] }
 0x3b3   :  { %v3922_v53 = vadd.f32 %v3921_v50, %v3920_v62  ;;  %v3923_v35 = vsel %vm3893_vm12, %v3693_v59, 0.0  ;;  %4096 = vmatpush.msrb.mxu2 %v4074_v27  ;;  %v4104_v50 = vld [vmem:[%s8794_s29 + $0x8] sm:$0xff]  ;;  %v4103_v62 = vld [vmem:[%s8794_s29] sm:$0xff] }
 0x3b4   :  { %v9688_v27 = vld [vmem:[%s11839_s7 + $0x168] sm:$0xff] }
 0x3b5   :  { %v3924_v26 = vadd.f32 %v3923_v35, %v3922_v53  ;;  %4097 = vmatpush.msrb.mxu2 %v4073_v5  ;;  %v9649_v53 = vld [vmem:[%s11839_s7 + $0x30] sm:$0xff]  ;;  %v9788_v35 = vld [vmem:[%s11825_s25] ss:$0 sm:$0xff] }
 0x3b6   :  { %v9675_v5 = vld [vmem:[%s11839_s7 + $0x100] sm:$0xff] }
 0x3b7   :  { %4516 = vmatpush.bf16.msra.mxu2 %v9654_v24  ;;  %v9696_v24 = vld [vmem:[%s11839_s7 + $0x1a8] sm:$0xff] }
 0x3b9   :  { %v3667_v51 = vpop.f32.mrf.mxu2  ;;  %v3721_v9 = vpop.f32.mrf.mxu0 }
 0x3ba   :  { %v3695_v58 = vpop.f32.mrf.mxu3  ;;  %v3749_v28 = vpop.f32.mrf.mxu1  ;;  %v3925_v44 = vsel %vm3893_vm12, %v3721_v9, 0.0  ;;  %v9646_v51 = vld [vmem:[%s11839_s7 + $0x18] sm:$0xff] }
 0x3bb   :  { %v3926_v39 = vadd.f32 %v3925_v44, %v3924_v26  ;;  %v3927_v40 = vsel %vm3893_vm12, %v3749_v28, 0.0  ;;  %v9650_v9 = vld [vmem:[%s11839_s7 + $0x38] sm:$0xff]  ;;  %4442 = vmatpush.bf16.msra.mxu0 %v9646_v51  ;;  %v9645_v28 = vld [vmem:[%s11839_s7 + $0x10] sm:$0xff]  ;;  %4517 = vmatpush.bf16.msra.mxu2 %v9653_v22  ;;  %v9695_v22 = vld [vmem:[%s11839_s7 + $0x1a0] sm:$0xff] }
 0x3bc   :  { %v9658_v58 = vld [vmem:[%s11839_s7 + $0x78] sm:$0xff]  ;;  %4479 = vmatpush.bf16.msra.mxu1 %v9650_v9  ;;  %v9705_v51 = vld [vmem:[%s11839_s7 + $0x1f0] sm:$0xff]  ;;  %v9692_v9 = vld [vmem:[%s11839_s7 + $0x188] sm:$0xff] }
 0x3bd   :  { %v3928_v47 = vadd.f32 %v3927_v40, %v3926_v39  ;;  %v9643_v40 = vld [vmem:[%s11839_s7] sm:$0xff] }
 0x3bf   :  { %4443 = vmatpush.bf16.msra.mxu0 %v9645_v28  ;;  %v9704_v28 = vld [vmem:[%s11839_s7 + $0x1e8] sm:$0xff] }
 0x3c0   :  { %4480 = vmatpush.bf16.msra.mxu1 %v9649_v53  ;;  %v9691_v53 = vld [vmem:[%s11839_s7 + $0x180] sm:$0xff] }
 0x3c1   :  { %v3777_v13 = vpop.f32.mrf.mxu2  ;;  %v3723_v29 = vpop.f32.mrf.mxu0 }
 0x3c2   :  { %v3805_v1 = vpop.f32.mrf.mxu3  ;;  %v3751_v42 = vpop.f32.mrf.mxu1  ;;  %v3929_v25 = vsel %vm3893_vm12, %v3777_v13, 0.0  ;;  %v9644_v13 = vld [vmem:[%s11839_s7 + $0x8] sm:$0xff] }
 0x3c3   :  { %v3930_v23 = vadd.f32 %v3929_v25, %v3928_v47  ;;  %v3931_v11 = vsel %vm3893_vm12, %v3805_v1, 0.0  ;;  %v9648_v29 = vld [vmem:[%s11839_s7 + $0x28] sm:$0xff]  ;;  %4444 = vmatpush.bf16.msra.mxu0 %v9644_v13  ;;  %v9647_v25 = vld [vmem:[%s11839_s7 + $0x20] sm:$0xff]  ;;  %v9722_v13 = vld [vmem:[%s11839_s7 + $0x278] sm:$0xff] }
 0x3c4   :  { %v9652_v1 = vld [vmem:[%s11839_s7 + $0x48] sm:$0xff]  ;;  %4481 = vmatpush.bf16.msra.mxu1 %v9648_v29  ;;  %v9651_v47 = vld [vmem:[%s11839_s7 + $0x40] sm:$0xff]  ;;  %v9709_v29 = vld [vmem:[%s11839_s7 + $0x210] sm:$0xff] }
 0x3c5   :  { %v3932_v48 = vadd.f32 %v3931_v11, %v3930_v23  ;;  %v9656_v42 = vld [vmem:[%s11839_s7 + $0x68] sm:$0xff]  ;;  %4518 = vmatpush.bf16.msra.mxu2 %v9652_v1  ;;  %v9655_v23 = vld [vmem:[%s11839_s7 + $0x60] sm:$0xff]  ;;  %v9670_v11 = vld [vmem:[%s11839_s7 + $0xd8] sm:$0xff] }
 0x3c6   :  { %v9713_v1 = vld [vmem:[%s11839_s7 + $0x230] sm:$0xff] }
 0x3c7   :  { %4445 = vmatpush.bf16.msra.mxu0 %v9643_v40  ;;  %v9721_v40 = vld [vmem:[%s11839_s7 + $0x270] sm:$0xff] }
 0x3c8   :  { %4482 = vmatpush.bf16.msra.mxu1 %v9647_v25  ;;  %v9708_v25 = vld [vmem:[%s11839_s7 + $0x208] sm:$0xff] }
 0x3c9   :  { %v3779_v34 = vpop.f32.mrf.mxu2  ;;  %v3833_v3 = vpop.f32.mrf.mxu0  ;;  %4519 = vmatpush.bf16.msra.mxu2 %v9651_v47  ;;  %v9712_v47 = vld [vmem:[%s11839_s7 + $0x228] sm:$0xff] }
 0x3ca   :  { %v3807_v45 = vpop.f32.mrf.mxu3  ;;  %v3933_v12 = vsel %vm3893_vm12, %v3833_v3, 0.0  ;;  %v3861_v16 = vpop.f32.mrf.mxu1  ;;  %v9662_v34 = vld [vmem:[%s11839_s7 + $0x98] sm:$0xff] }
 0x3cb   :  { %v3934_v18 = vadd.f32 %v3933_v12, %v3932_v48  ;;  %v3935_v49 = vsel %vm3893_vm12, %v3861_v16, 0.0  ;;  %v9666_v3 = vld [vmem:[%s11839_s7 + $0xb8] sm:$0xff]  ;;  %v9661_v12 = vld [vmem:[%s11839_s7 + $0x90] sm:$0xff] }
 0x3cc   :  { %v9674_v45 = vld [vmem:[%s11839_s7 + $0xf8] sm:$0xff]  ;;  %v9665_v16 = vld [vmem:[%s11839_s7 + $0xb0] sm:$0xff] }
 0x3cd   :  { %v3936_v57 = vadd.f32 %v3935_v49, %v3934_v18  ;;  %v9669_v48 = vld [vmem:[%s11839_s7 + $0xd0] sm:$0xff]  ;;  %v9660_v49 = vld [vmem:[%s11839_s7 + $0x88] sm:$0xff] }
 0x3ce   :  { %v9673_v18 = vld [vmem:[%s11839_s7 + $0xf0] sm:$0xff] }
 0x3d1   :  { %v3889_v8 = vpop.f32.mrf.mxu2  ;;  %v3835_v33 = vpop.f32.mrf.mxu0 }
 0x3d2   :  { %v3937_v21 = vsel %vm3893_vm12, %v3889_v8, 0.0  ;;  %v3863_v55 = vpop.f32.mrf.mxu1  ;;  %v9668_v8 = vld [vmem:[%s11839_s7 + $0xc8] sm:$0xff]  ;;  %v9659_v33 = vld [vmem:[%s11839_s7 + $0x80] sm:$0xff]  ;;  %vm7875_vm12 = vcmask 12288  }
 0x3d3   :  { %v3938_v31 = vadd.f32 %v3937_v21, %v3936_v57  ;;  %v9664_v57 = vld [vmem:[%s11839_s7 + $0xa8] sm:$0xff]  ;;  %v9663_v21 = vld [vmem:[%s11839_s7 + $0xa0] sm:$0xff] }
 0x3d4   :  { %v9667_v55 = vld [vmem:[%s11839_s7 + $0xc0] sm:$0xff] }
 0x3d5   :  { %v3943_v41 = vadd.f32 %v9783_v10, %v3938_v31  ;;  %v9672_v10 = vld [vmem:[%s11839_s7 + $0xe8] sm:$0xff]  ;;  %v9671_v31 = vld [vmem:[%s11839_s7 + $0xe0] sm:$0xff] }
 0x3d7   :  { %v3944_v4 = vmax.f32 %v3943_v41, 0.0  ;;  %v9789_v41 = vld [vmem:[%s11834_s3] ss:$0 sm:$0xff] }
 0x3d9   :  { %v3891_v6 = vpop.f32.mrf.mxu2  ;;  %9104 = vmatmul.msk.f32.vlgmr.msra.gmra.mxu3 %vm3957_vm13, %v3944_v4 }
 0x3da   :  { %4126 = vmatpush.msra.mxu3 %v4105_v56  ;;  %v9694_v56 = vld [vmem:[%s11839_s7 + $0x198] sm:$0xff] }
 0x3dc   :  { %4127 = vmatpush.msra.mxu3 %v4104_v50  ;;  %v9697_v50 = vld [vmem:[%s11839_s7 + $0x1b0] sm:$0xff] }
 0x3de   :  { %4128 = vmatpush.msra.mxu3 %v4103_v62  ;;  %v9701_v62 = vld [vmem:[%s11839_s7 + $0x1d0] sm:$0xff] }
 0x45c   :  { %v3978_v17 = vpop.f32.mrf.mxu3 }
 0x45d   :  { %v3979_v19 = vadd.f32 %v9784_v43, %v3978_v17  ;;  %v9686_v43 = vld [vmem:[%s11839_s7 + $0x158] sm:$0xff] }
 0x45e   :  { %v9690_v17 = vld [vmem:[%s11839_s7 + $0x178] sm:$0xff] }
 0x45f   :  { %v3981_v32 = vmax.f32 %v3979_v19, 0.0  ;;  %v9677_v19 = vld [vmem:[%s11839_s7 + $0x110] sm:$0xff] }
 0x461   :  { %9105 = vmatmul.msk.f32.vlgmr.msrb.gmra.mxu3 %vm3989_vm14, %v3981_v32  ;;  %v9681_v32 = vld [vmem:[%s11839_s7 + $0x130] sm:$0xff] }
 0x462   :  { %4553 = vmatpush.bf16.msrb.mxu3 %v9658_v58  ;;  %v9700_v58 = vld [vmem:[%s11839_s7 + $0x1c8] sm:$0xff] }
 0x466   :  { %4554 = vmatpush.bf16.msrb.mxu3 %v9657_v54  ;;  %v9699_v54 = vld [vmem:[%s11839_s7 + $0x1c0] sm:$0xff] }
 0x46a   :  { %4555 = vmatpush.bf16.msrb.mxu3 %v9656_v42  ;;  %v9717_v42 = vld [vmem:[%s11839_s7 + $0x250] sm:$0xff] }
 0x46e   :  { %4556 = vmatpush.bf16.msrb.mxu3 %v9655_v23  ;;  %v9716_v23 = vld [vmem:[%s11839_s7 + $0x248] sm:$0xff] }
 0x4e4   :  { %v4010_v2 = vpop.f32.mrf.mxu3 }
 0x4e5   :  { %v4011_v0 = vadd.f32 %v9785_v46, %v4010_v2  ;;  %v9689_v46 = vld [vmem:[%s11839_s7 + $0x170] sm:$0xff]  ;;  %v9676_v2 = vld [vmem:[%s11839_s7 + $0x108] sm:$0xff] }
 0x4e7   :  { %v4013_v20 = vmax.f32 %v4011_v0, 0.0  ;;  %v9680_v0 = vld [vmem:[%s11839_s7 + $0x128] sm:$0xff] }
 0x4e9   :  { %9106 = vmatmul.msk.f32.vlgmr.msrb.gmra.mxu0 %vm870_vm5, %v4013_v20  ;;  %v9684_v20 = vld [vmem:[%s11839_s7 + $0x148] sm:$0xff] }
 0x4ea   :  { %4590 = vmatpush.bf16.msrb.mxu0 %v9662_v34  ;;  %v9720_v34 = vld [vmem:[%s11839_s7 + $0x268] sm:$0xff] }
 0x4ee   :  { %4591 = vmatpush.bf16.msrb.mxu0 %v9661_v12  ;;  %v9719_v12 = vld [vmem:[%s11839_s7 + $0x260] sm:$0xff] }
 0x4f2   :  { %4592 = vmatpush.bf16.msrb.mxu0 %v9660_v49  ;;  %v9725_v49 = vld [vmem:[%s11839_s7 + $0x290] sm:$0xff] }
 0x4f6   :  { %4593 = vmatpush.bf16.msrb.mxu0 %v9659_v33  ;;  %v9728_v33 = vld [vmem:[%s11839_s7 + $0x2a8] sm:$0xff] }
 0x566   :  { %v4040_v59 = vpop.f32.mrf.mxu0 }
 0x567   :  { %v4041_v38 = vadd.f32 %v9786_v7, %v4040_v59  ;;  %v9679_v7 = vld [vmem:[%s11839_s7 + $0x120] sm:$0xff] }
 0x568   :  { %v9683_v59 = vld [vmem:[%s11839_s7 + $0x140] sm:$0xff] }
 0x569   :  { %9107 = vmatmul.msk.f32.vlgmr.msrb.gmra.mxu1 %vm4048_vm15, %v4041_v38  ;;  %v9687_v38 = vld [vmem:[%s11839_s7 + $0x160] sm:$0xff] }
 0x56a   :  { %4627 = vmatpush.bf16.msrb.mxu1 %v9666_v3  ;;  %v9707_v3 = vld [vmem:[%s11839_s7 + $0x200] sm:$0xff] }
 0x56e   :  { %4628 = vmatpush.bf16.msrb.mxu1 %v9665_v16  ;;  %v9726_v16 = vld [vmem:[%s11839_s7 + $0x298] sm:$0xff] }
 0x572   :  { %4629 = vmatpush.bf16.msrb.mxu1 %v9664_v57  ;;  %v9729_v57 = vld [vmem:[%s11839_s7 + $0x2b0] sm:$0xff] }
 0x576   :  { %4630 = vmatpush.bf16.msrb.mxu1 %v9663_v21  ;;  %v9732_v21 = vld [vmem:[%s11839_s7 + $0x2c8] sm:$0xff] }
 0x5e6   :  { %v4069_v63 = vpop.f32.mrf.mxu1 }
 0x5e7   :  { %v4070_v37 = vadd.f32 %v9787_v61, %v4069_v63  ;;  %v9698_v61 = vld [vmem:[%s11839_s7 + $0x1b8] sm:$0xff] }
 0x5e8   :  { %v9702_v63 = vld [vmem:[%s11839_s7 + $0x1d8] sm:$0xff] }
 0x5e9   :  { %v4072_v30 = vmax.f32 %v4070_v37, 0.0  ;;  %v9706_v37 = vld [vmem:[%s11839_s7 + $0x1f8] sm:$0xff] }
 0x5eb   :  { %9108 = vmatmul.msk.f32.vlgmr.msrb.gmra.mxu2 %vm870_vm5, %v4072_v30  ;;  %v9693_v30 = vld [vmem:[%s11839_s7 + $0x190] sm:$0xff]  ;;  %vm8042_vm5 = vcmask 1041409  }
 0x5ec   :  { %4664 = vmatpush.bf16.msrb.mxu2 %v9670_v11  ;;  %v9711_v11 = vld [vmem:[%s11839_s7 + $0x220] sm:$0xff] }
 0x5f0   :  { %4665 = vmatpush.bf16.msrb.mxu2 %v9669_v48  ;;  %v9730_v48 = vld [vmem:[%s11839_s7 + $0x2b8] sm:$0xff] }
 0x5f4   :  { %4666 = vmatpush.bf16.msrb.mxu2 %v9668_v8  ;;  %v9733_v8 = vld [vmem:[%s11839_s7 + $0x2d0] sm:$0xff] }
 0x5f8   :  { %4667 = vmatpush.bf16.msrb.mxu2 %v9667_v55  ;;  %v9723_v55 = vld [vmem:[%s11839_s7 + $0x280] sm:$0xff] }
 0x66e   :  { %v4099_v44 = vpop.f32.mrf.mxu2 }
 0x66f   :  { %v4100_v26 = vadd.f32 %v9788_v35, %v4099_v44  ;;  %v9703_v35 = vld [vmem:[%s11839_s7 + $0x1e0] sm:$0xff]  ;;  %v9710_v44 = vld [vmem:[%s11839_s7 + $0x218] sm:$0xff] }
 0x671   :  { %v4102_v39 = vmax.f32 %v4100_v26, 0.0  ;;  %v9714_v26 = vld [vmem:[%s11839_s7 + $0x238] sm:$0xff] }
 0x673   :  { %9109 = vmatmul.msk.f32.vlgmr.msra.gmra.mxu3 %vm3989_vm14, %v4102_v39  ;;  %v9718_v39 = vld [vmem:[%s11839_s7 + $0x258] sm:$0xff] }
 0x674   :  { %4701 = vmatpush.bf16.msra.mxu3 %v9674_v45  ;;  %v9715_v45 = vld [vmem:[%s11839_s7 + $0x240] sm:$0xff] }
 0x678   :  { %4702 = vmatpush.bf16.msra.mxu3 %v9673_v18  ;;  %v9734_v18 = vld [vmem:[%s11839_s7 + $0x2d8] sm:$0xff] }
 0x67c   :  { %4703 = vmatpush.bf16.msra.mxu3 %v9672_v10  ;;  %v9724_v10 = vld [vmem:[%s11839_s7 + $0x288] sm:$0xff] }
 0x680   :  { %4704 = vmatpush.bf16.msra.mxu3 %v9671_v31  ;;  %v9727_v31 = vld [vmem:[%s11839_s7 + $0x2a0] sm:$0xff] }
 0x6f6   :  { %v4130_v4 = vpop.f32.mrf.mxu3 }
 0x6f7   :  { %v4131_v6 = vadd.f32 %v9789_v41, %v4130_v4  ;;  %v9731_v41 = vld [vmem:[%s11839_s7 + $0x2c0] sm:$0xff]  ;;  %v11995_v4 = vld [vmem:[%s11992_s15 + $0x18] sm:$0xff] }
 0x6f9   :  { %v4133_v36 = vmax.f32 %v4131_v6, 0.0  ;;  %v11998_v6 = vld [vmem:[%s11992_s15 + $0x10] sm:$0xff] }
 0x6fb   :  { %v11881_v15 = vpack.c.bf16 %v4133_v36, %v4133_v36  ;;  %v12009_v36 = vld [vmem:[%s11992_s15 + $0x8] sm:$0xff] }
 0x6fd   :  { %9126 = vmatmul.msk.bf16.vlgmr.msra.gmra.mxu0 %vm3957_vm13, %v11881_v15  ;;  %9143 = vmatmul.msk.bf16.vlgmr.msra.gmra.mxu1 %vm3957_vm13, %v11881_v15 }
 0x6fe   :  { %9160 = vmatmul.msk.bf16.vlgmr.msra.gmra.mxu2 %vm3957_vm13, %v11881_v15  ;;  %9177 = vmatmul.msk.bf16.vlgmr.msrb.gmra.mxu3 %vm3957_vm13, %v11881_v15 }
 0x6ff   :  { %4738 = vmatpush.bf16.msra.mxu0 %v9678_v14  ;;  %4775 = vmatpush.bf16.msra.mxu1 %v9682_v60  ;;  %v9790_v14 = vld [vmem:[%s11854_s11] ss:$0 sm:$0xff] }
 0x700   :  { %4812 = vmatpush.bf16.msra.mxu2 %v9686_v43  ;;  %4849 = vmatpush.bf16.msrb.mxu3 %v9690_v17 }
 0x703   :  { %4739 = vmatpush.bf16.msra.mxu0 %v9677_v19  ;;  %4776 = vmatpush.bf16.msra.mxu1 %v9681_v32  ;;  %v9791_v19 = vld [vmem:[%s11854_s11 + $0x1] ss:$0 sm:$0xff]  ;;  %v9792_v32 = vld [vmem:[%s11854_s11 + $0x2] ss:$0 sm:$0xff] }
 0x704   :  { %4813 = vmatpush.bf16.msra.mxu2 %v9685_v52  ;;  %4850 = vmatpush.bf16.msrb.mxu3 %v9689_v46  ;;  %v9793_v52 = vld [vmem:[%s11854_s11 + $0x3] ss:$0 sm:$0xff] }
 0x707   :  { %4740 = vmatpush.bf16.msra.mxu0 %v9676_v2  ;;  %4777 = vmatpush.bf16.msra.mxu1 %v9680_v0 }
 0x708   :  { %4814 = vmatpush.bf16.msra.mxu2 %v9684_v20  ;;  %4851 = vmatpush.bf16.msrb.mxu3 %v9688_v27 }
 0x70b   :  { %4741 = vmatpush.bf16.msra.mxu0 %v9675_v5  ;;  %4778 = vmatpush.bf16.msra.mxu1 %v9679_v7 }
 0x70c   :  { %4815 = vmatpush.bf16.msra.mxu2 %v9683_v59  ;;  %4852 = vmatpush.bf16.msrb.mxu3 %v9687_v38  ;;  %v9794_v38 = vld [vmem:[%s11854_s11 + $0x4] ss:$0 sm:$0xff] }
 0x70d   :  { %9194 = vmatmul.msk.bf16.vlgmr.msrb.gmra.mxu0 %vm3957_vm13, %v11881_v15  ;;  %9211 = vmatmul.msk.bf16.vlgmr.msrb.gmra.mxu1 %vm3957_vm13, %v11881_v15 }
 0x70e   :  { %9228 = vmatmul.msk.bf16.vlgmr.msrb.gmra.mxu2 %vm3957_vm13, %v11881_v15  ;;  %9245 = vmatmul.msk.bf16.vlgmr.msra.gmra.mxu3 %vm3957_vm13, %v11881_v15 }
 0x70f   :  { %4886 = vmatpush.bf16.msrb.mxu0 %v9694_v56  ;;  %4923 = vmatpush.bf16.msrb.mxu1 %v9698_v61  ;;  %v9795_v56 = vld [vmem:[%s11854_s11 + $0x5] ss:$0 sm:$0xff] }
 0x710   :  { %4960 = vmatpush.bf16.msrb.mxu2 %v9702_v63  ;;  %4997 = vmatpush.bf16.msra.mxu3 %v9706_v37 }
 0x713   :  { %4887 = vmatpush.bf16.msrb.mxu0 %v9693_v30  ;;  %4924 = vmatpush.bf16.msrb.mxu1 %v9697_v50 }
 0x714   :  { %4961 = vmatpush.bf16.msrb.mxu2 %v9701_v62  ;;  %4998 = vmatpush.bf16.msra.mxu3 %v9705_v51 }
 0x717   :  { %4888 = vmatpush.bf16.msrb.mxu0 %v9692_v9  ;;  %4925 = vmatpush.bf16.msrb.mxu1 %v9696_v24 }
 0x718   :  { %4962 = vmatpush.bf16.msrb.mxu2 %v9700_v58  ;;  %4999 = vmatpush.bf16.msra.mxu3 %v9704_v28  ;;  %v9796_v58 = vld [vmem:[%s11854_s11 + $0x6] ss:$0 sm:$0xff]  ;;  %v9797_v28 = vld [vmem:[%s11854_s11 + $0x7] ss:$0 sm:$0xff] }
 0x71b   :  { %4889 = vmatpush.bf16.msrb.mxu0 %v9691_v53  ;;  %4926 = vmatpush.bf16.msrb.mxu1 %v9695_v22 }
 0x71c   :  { %4963 = vmatpush.bf16.msrb.mxu2 %v9699_v54  ;;  %5000 = vmatpush.bf16.msra.mxu3 %v9703_v35 }
 0x71d   :  { %9262 = vmatmul.msk.bf16.vlgmr.msra.gmra.mxu0 %vm3957_vm13, %v11881_v15  ;;  %9279 = vmatmul.msk.bf16.vlgmr.msra.gmra.mxu1 %vm3957_vm13, %v11881_v15 }
 0x71e   :  { %9296 = vmatmul.msk.bf16.vlgmr.msra.gmra.mxu2 %vm3957_vm13, %v11881_v15  ;;  %9313 = vmatmul.msk.bf16.vlgmr.msrb.gmra.mxu3 %vm3957_vm13, %v11881_v15 }
 0x71f   :  { %5034 = vmatpush.bf16.msra.mxu0 %v9710_v44  ;;  %5071 = vmatpush.bf16.msra.mxu1 %v9714_v26 }
 0x720   :  { %5108 = vmatpush.bf16.msra.mxu2 %v9718_v39  ;;  %5145 = vmatpush.bf16.msrb.mxu3 %v9722_v13 }
 0x723   :  { %5035 = vmatpush.bf16.msra.mxu0 %v9709_v29  ;;  %5072 = vmatpush.bf16.msra.mxu1 %v9713_v1  ;;  %v9798_v29 = vld [vmem:[%s11854_s11 + $0x8] ss:$0 sm:$0xff]  ;;  %v9799_v1 = vld [vmem:[%s11854_s11 + $0x9] ss:$0 sm:$0xff] }
 0x724   :  { %5109 = vmatpush.bf16.msra.mxu2 %v9717_v42  ;;  %5146 = vmatpush.bf16.msrb.mxu3 %v9721_v40 }
 0x727   :  { %5036 = vmatpush.bf16.msra.mxu0 %v9708_v25  ;;  %5073 = vmatpush.bf16.msra.mxu1 %v9712_v47 }
 0x728   :  { %5110 = vmatpush.bf16.msra.mxu2 %v9716_v23  ;;  %5147 = vmatpush.bf16.msrb.mxu3 %v9720_v34 }
 0x72b   :  { %5037 = vmatpush.bf16.msra.mxu0 %v9707_v3  ;;  %5074 = vmatpush.bf16.msra.mxu1 %v9711_v11 }
 0x72c   :  { %5111 = vmatpush.bf16.msra.mxu2 %v9715_v45  ;;  %5148 = vmatpush.bf16.msrb.mxu3 %v9719_v12  ;;  %v9800_v45 = vld [vmem:[%s11854_s11 + $0xa] ss:$0 sm:$0xff]  ;;  %v9801_v12 = vld [vmem:[%s11854_s11 + $0xb] ss:$0 sm:$0xff] }
 0x72d   :  { %9330 = vmatmul.msk.bf16.vlgmr.msrb.gmra.mxu0 %vm3957_vm13, %v11881_v15  ;;  %9347 = vmatmul.msk.bf16.vlgmr.msrb.gmra.mxu1 %vm3957_vm13, %v11881_v15 }
 0x72e   :  { %9364 = vmatmul.msk.bf16.vlgmr.msrb.gmra.mxu2 %vm3957_vm13, %v11881_v15  ;;  %9381 = vmatmul.msk.bf16.vlgmr.msra.gmra.mxu3 %vm3957_vm13, %v11881_v15 }
 0x72f   :  { %5182 = vmatpush.bf16.msrb.mxu0 %v9726_v16  ;;  %5219 = vmatpush.bf16.msrb.mxu1 %v9730_v48 }
 0x730   :  { %5256 = vmatpush.bf16.msrb.mxu2 %v9734_v18  ;;  %5345 = vmatpush.msra.mxu3 %v11995_v4 }
 0x732   :  { %5346 = vmatpush.msra.mxu3 %v11998_v6 }
 0x733   :  { %5183 = vmatpush.bf16.msrb.mxu0 %v9725_v49  ;;  %5220 = vmatpush.bf16.msrb.mxu1 %v9729_v57 }
 0x734   :  { %5257 = vmatpush.bf16.msrb.mxu2 %v9733_v8  ;;  %5347 = vmatpush.msra.mxu3 %v12009_v36 }
 0x737   :  { %5184 = vmatpush.bf16.msrb.mxu0 %v9724_v10  ;;  %5221 = vmatpush.bf16.msrb.mxu1 %v9728_v33 }
 0x738   :  { %5258 = vmatpush.bf16.msrb.mxu2 %v9732_v21  ;;  %v9802_v21 = vld [vmem:[%s11854_s11 + $0xc] ss:$0 sm:$0xff] }
 0x73b   :  { %5185 = vmatpush.bf16.msrb.mxu0 %v9723_v55  ;;  %5222 = vmatpush.bf16.msrb.mxu1 %v9727_v31  ;;  %v9803_v55 = vld [vmem:[%s11854_s11 + $0xd] ss:$0 sm:$0xff] }
 0x73c   :  { %5259 = vmatpush.bf16.msrb.mxu2 %v9731_v41 }
 0x73d   :  { %9398 = vmatmul.msk.bf16.vlgmr.msra.gmra.mxu0 %vm3957_vm13, %v11881_v15  ;;  %9415 = vmatmul.msk.bf16.vlgmr.msra.gmra.mxu1 %vm3957_vm13, %v11881_v15 }
 0x73e   :  { %9432 = vmatmul.msk.bf16.vlgmr.msra.gmra.mxu2 %vm3957_vm13, %v11881_v15  ;;  %9449 = vmatmul.msk.bf16.vlgmr.msrb.gmra.mxu3 %vm3957_vm13, %v11881_v15 }
 0x73f   :  { %5391 = vmatpush.msra.mxu0 %v11995_v4  ;;  %5414 = vmatpush.msra.mxu1 %v11995_v4 }
 0x740   :  { %5437 = vmatpush.msra.mxu2 %v11995_v4 }
 0x741   :  { %5392 = vmatpush.msra.mxu0 %v11998_v6  ;;  %5415 = vmatpush.msra.mxu1 %v11998_v6 }
 0x742   :  { %5438 = vmatpush.msra.mxu2 %v11998_v6 }
 0x743   :  { %5393 = vmatpush.msra.mxu0 %v12009_v36  ;;  %5416 = vmatpush.msra.mxu1 %v12009_v36 }
 0x744   :  { %5439 = vmatpush.msra.mxu2 %v12009_v36 }
 0x74d   :  { %9466 = vmatmul.msk.bf16.vlgmr.msrb.gmra.mxu0 %vm3957_vm13, %v11881_v15  ;;  %9483 = vmatmul.msk.bf16.vlgmr.msrb.gmra.mxu1 %vm3957_vm13, %v11881_v15 }
 0x74e   :  { %9500 = vmatmul.msk.bf16.vlgmr.msrb.gmra.mxu2 %vm3957_vm13, %v11881_v15  ;;  %v12012_v15 = vld [vmem:[%s11992_s15] sm:$0xff]  ;;  %vm8082_vm13 = vcmask 9216  }
 0x74f   :  { %5348 = vmatpush.msra.mxu3 %v12012_v15  ;;  %5394 = vmatpush.msra.mxu0 %v12012_v15 }
 0x750   :  { %5417 = vmatpush.msra.mxu1 %v12012_v15  ;;  %5440 = vmatpush.msra.mxu2 %v12012_v15 }
 0x751   :  { %5368 = vmatpush.msrb.mxu3 %v11995_v4  ;;  %5483 = vmatpush.msrb.mxu0 %v11995_v4 }
 0x752   :  { %5506 = vmatpush.msrb.mxu1 %v11995_v4  ;;  %5529 = vmatpush.msrb.mxu2 %v11995_v4 }
 0x753   :  { %5369 = vmatpush.msrb.mxu3 %v11998_v6  ;;  %5484 = vmatpush.msrb.mxu0 %v11998_v6 }
 0x754   :  { %5507 = vmatpush.msrb.mxu1 %v11998_v6  ;;  %5530 = vmatpush.msrb.mxu2 %v11998_v6 }
 0x755   :  { %5370 = vmatpush.msrb.mxu3 %v12009_v36  ;;  %5485 = vmatpush.msrb.mxu0 %v12009_v36 }
 0x756   :  { %5508 = vmatpush.msrb.mxu1 %v12009_v36  ;;  %5531 = vmatpush.msrb.mxu2 %v12009_v36 }
 0x757   :  { %5371 = vmatpush.msrb.mxu3 %v12012_v15  ;;  %5486 = vmatpush.msrb.mxu0 %v12012_v15 }
 0x758   :  { %5509 = vmatpush.msrb.mxu1 %v12012_v15  ;;  %5532 = vmatpush.msrb.mxu2 %v12012_v15 }
 0x77a   :  { %v4447_v60 = vpop.f32.mrf.mxu0  ;;  %v4484_v43 = vpop.f32.mrf.mxu1 }
 0x77b   :  { %v4448_v17 = vadd.f32 %v9790_v14, %v4447_v60  ;;  %v4485_v46 = vadd.f32 %v9791_v19, %v4484_v43 }
 0x77d   :  { %9927 = vtanh.f32 %v4448_v17 }
 0x77e   :  { %9929 = vtanh.f32 %v4485_v46  ;;  %v9805_v46 = vld [vmem:[%s11854_s11 + $0xf] ss:$0 sm:$0xff] }
 0x781   :  { %v4521_v2 = vpop.f32.mrf.mxu2  ;;  %v4558_v0 = vpop.f32.mrf.mxu3 }
 0x782   :  { %v4522_v20 = vadd.f32 %v9792_v32, %v4521_v2  ;;  %v4559_v27 = vadd.f32 %v9793_v52, %v4558_v0  ;;  %v4449_v5 = vpop.f32.mrf.mxu0  ;;  %v4486_v7 = vpop.f32.mrf.mxu1  ;;  %v9804_v52 = vld [vmem:[%s11854_s11 + $0xe] ss:$0 sm:$0xff] }
 0x783   :  { %v12042_v59 = vpop.eup %9927 }
 0x784   :  { %9931 = vtanh.f32 %v4522_v20  ;;  %9501 = vmatmul.msk.f32.vlgmr.msra.gmra.mxu3 %vm3260_vm11, %v12042_v59  ;;  %v12050_v61 = vpop.eup %9929 }
 0x785   :  { %9933 = vtanh.f32 %v4559_v27  ;;  %5460 = vmatpush.msra.mxu3 %v11995_v4 }
 0x787   :  { %5461 = vmatpush.msra.mxu3 %v11998_v6 }
 0x789   :  { %v4523_v63 = vpop.f32.mrf.mxu2  ;;  %v4560_v37 = vpop.f32.mrf.mxu3  ;;  %5462 = vmatpush.msra.mxu3 %v12009_v36 }
 0x78a   :  { %v12053_v30 = vpop.eup %9931  ;;  %v4595_v50 = vpop.f32.mrf.mxu0  ;;  %v9806_v63 = vld [vmem:[%s11854_s11 + $0x10] ss:$0 sm:$0xff]  ;;  %v9807_v37 = vld [vmem:[%s11854_s11 + $0x11] ss:$0 sm:$0xff] }
 0x78b   :  { %v4632_v62 = vpop.f32.mrf.mxu1  ;;  %v12055_v51 = vpop.eup %9933  ;;  %v4596_v9 = vadd.f32 %v9794_v38, %v4595_v50  ;;  %9503 = vmatmul.msk.f32.vlgmr.msra.gmra.mxu0 %vm3260_vm11, %v12053_v30  ;;  %5463 = vmatpush.msra.mxu3 %v12012_v15 }
 0x78c   :  { %v4633_v24 = vadd.f32 %v9795_v56, %v4632_v62  ;;  %9504 = vmatmul.msk.f32.vlgmr.msra.gmra.mxu1 %vm3260_vm11, %v12055_v51  ;;  %9502 = vmatmul.msk.f32.vlgmr.msrb.gmra.mxu3 %vm3260_vm11, %v12050_v61 }
 0x78d   :  { %9935 = vtanh.f32 %v4596_v9  ;;  %5552 = vmatpush.msrb.mxu3 %v11995_v4  ;;  %5575 = vmatpush.msra.mxu0 %v11995_v4 }
 0x78e   :  { %9937 = vtanh.f32 %v4633_v24  ;;  %5598 = vmatpush.msra.mxu1 %v11995_v4 }
 0x78f   :  { %5553 = vmatpush.msrb.mxu3 %v11998_v6  ;;  %5576 = vmatpush.msra.mxu0 %v11998_v6 }
 0x790   :  { %5599 = vmatpush.msra.mxu1 %v11998_v6 }
 0x791   :  { %v4669_v53 = vpop.f32.mrf.mxu2  ;;  %v4706_v22 = vpop.f32.mrf.mxu3  ;;  %5554 = vmatpush.msrb.mxu3 %v12009_v36  ;;  %5577 = vmatpush.msra.mxu0 %v12009_v36 }
 0x792   :  { %v4670_v54 = vadd.f32 %v9796_v58, %v4669_v53  ;;  %v4707_v35 = vadd.f32 %v9797_v28, %v4706_v22  ;;  %v4597_v44 = vpop.f32.mrf.mxu0  ;;  %5600 = vmatpush.msra.mxu1 %v12009_v36  ;;  %v12173_v28 = vld [vmem:[%s11992_s15 + $0x38] sm:$0xff] }
 0x793   :  { %v4634_v26 = vpop.f32.mrf.mxu1  ;;  %v12080_v39 = vpop.eup %9935  ;;  %5555 = vmatpush.msrb.mxu3 %v12012_v15  ;;  %5578 = vmatpush.msra.mxu0 %v12012_v15  ;;  %v9808_v44 = vld [vmem:[%s11854_s11 + $0x12] ss:$0 sm:$0xff] }
 0x794   :  { %v12084_v13 = vpop.eup %9937  ;;  %9939 = vtanh.f32 %v4670_v54  ;;  %9505 = vmatmul.msk.f32.vlgmr.msra.gmra.mxu2 %vm3260_vm11, %v12080_v39  ;;  %5601 = vmatpush.msra.mxu1 %v12012_v15  ;;  %v9809_v26 = vld [vmem:[%s11854_s11 + $0x13] ss:$0 sm:$0xff] }
 0x795   :  { %9941 = vtanh.f32 %v4707_v35  ;;  %9506 = vmatmul.msk.f32.vlgmr.msra.gmra.mxu3 %vm3260_vm11, %v12084_v13  ;;  %5621 = vmatpush.msra.mxu2 %v11995_v4  ;;  %v12184_v35 = vld [vmem:[%s11992_s15 + $0x30] sm:$0xff] }
 0x796   :  { %5644 = vmatpush.msra.mxu3 %v11995_v4 }
 0x797   :  { %5622 = vmatpush.msra.mxu2 %v11998_v6 }
 0x798   :  { %5645 = vmatpush.msra.mxu3 %v11998_v6 }
 0x799   :  { %v4671_v42 = vpop.f32.mrf.mxu2  ;;  %v4708_v40 = vpop.f32.mrf.mxu3  ;;  %5623 = vmatpush.msra.mxu2 %v12009_v36 }
 0x79a   :  { %v12098_v25 = vpop.eup %9939  ;;  %v4743_v47 = vpop.f32.mrf.mxu0  ;;  %5646 = vmatpush.msra.mxu3 %v12009_v36 }
 0x79b   :  { %v4780_v23 = vpop.f32.mrf.mxu1  ;;  %v12101_v34 = vpop.eup %9941  ;;  %v4744_v3 = vadd.f32 %v9798_v29, %v4743_v47  ;;  %9507 = vmatmul.msk.f32.vlgmr.msrb.gmra.mxu0 %vm3260_vm11, %v12098_v25  ;;  %5624 = vmatpush.msra.mxu2 %v12012_v15  ;;  %v12192_v29 = vld [vmem:[%s11992_s15 + $0x28] sm:$0xff] }
 0x79c   :  { %v4781_v11 = vadd.f32 %v9799_v1, %v4780_v23  ;;  %9508 = vmatmul.msk.f32.vlgmr.msrb.gmra.mxu1 %vm3260_vm11, %v12101_v34  ;;  %5647 = vmatpush.msra.mxu3 %v12012_v15  ;;  %v12197_v1 = vld [vmem:[%s11992_s15 + $0x20] sm:$0xff] }
 0x79d   :  { %9943 = vtanh.f32 %v4744_v3  ;;  %5667 = vmatpush.msrb.mxu0 %v11995_v4  ;;  %5690 = vmatpush.msrb.mxu1 %v11995_v4 }
 0x79e   :  { %9945 = vtanh.f32 %v4781_v11 }
 0x79f   :  { %5668 = vmatpush.msrb.mxu0 %v11998_v6  ;;  %5691 = vmatpush.msrb.mxu1 %v11998_v6 }
 0x7a1   :  { %v4817_v16 = vpop.f32.mrf.mxu2  ;;  %v4854_v48 = vpop.f32.mrf.mxu3  ;;  %5669 = vmatpush.msrb.mxu0 %v12009_v36  ;;  %5692 = vmatpush.msrb.mxu1 %v12009_v36 }
 0x7a2   :  { %v4818_v18 = vadd.f32 %v9800_v45, %v4817_v16  ;;  %v4855_v49 = vadd.f32 %v9801_v12, %v4854_v48  ;;  %v4745_v57 = vpop.f32.mrf.mxu0  ;;  %v9811_v45 = vld [vmem:[%s11854_s11 + $0x15] ss:$0 sm:$0xff] }
 0x7a3   :  { %v4782_v8 = vpop.f32.mrf.mxu1  ;;  %v12117_v10 = vpop.eup %9943  ;;  %5670 = vmatpush.msrb.mxu0 %v12012_v15  ;;  %5693 = vmatpush.msrb.mxu1 %v12012_v15 }
 0x7a4   :  { %v12121_v33 = vpop.eup %9945  ;;  %9947 = vtanh.f32 %v4818_v18  ;;  %9509 = vmatmul.msk.f32.vlgmr.msrb.gmra.mxu2 %vm3260_vm11, %v12117_v10 }
 0x7a5   :  { %9949 = vtanh.f32 %v4855_v49  ;;  %9510 = vmatmul.msk.f32.vlgmr.msrb.gmra.mxu3 %vm3260_vm11, %v12121_v33  ;;  %5713 = vmatpush.msrb.mxu2 %v11995_v4 }
 0x7a6   :  { %5736 = vmatpush.msrb.mxu3 %v11995_v4 }
 0x7a7   :  { %5714 = vmatpush.msrb.mxu2 %v11998_v6 }
 0x7a8   :  { %5737 = vmatpush.msrb.mxu3 %v11998_v6 }
 0x7a9   :  { %v4819_v31 = vpop.f32.mrf.mxu2  ;;  %v4856_v41 = vpop.f32.mrf.mxu3  ;;  %5715 = vmatpush.msrb.mxu2 %v12009_v36 }
 0x7aa   :  { %v12134_v14 = vpop.eup %9947  ;;  %v4891_v60 = vpop.f32.mrf.mxu0  ;;  %5738 = vmatpush.msrb.mxu3 %v12009_v36 }
 0x7ab   :  { %v4928_v43 = vpop.f32.mrf.mxu1  ;;  %v12137_v17 = vpop.eup %9949  ;;  %v4892_v19 = vadd.f32 %v9802_v21, %v4891_v60  ;;  %9511 = vmatmul.msk.f32.vlgmr.msra.gmra.mxu0 %vm3260_vm11, %v12134_v14  ;;  %5716 = vmatpush.msrb.mxu2 %v12012_v15  ;;  %v9812_v21 = vld [vmem:[%s11854_s11 + $0x16] ss:$0 sm:$0xff] }
 0x7ac   :  { %v4929_v32 = vadd.f32 %v9803_v55, %v4928_v43  ;;  %9512 = vmatmul.msk.f32.vlgmr.msra.gmra.mxu1 %vm3260_vm11, %v12137_v17  ;;  %5739 = vmatpush.msrb.mxu3 %v12012_v15 }
 0x7ad   :  { %9951 = vtanh.f32 %v4892_v19  ;;  %5759 = vmatpush.msra.mxu0 %v11995_v4  ;;  %5782 = vmatpush.msra.mxu1 %v11995_v4 }
 0x7ae   :  { %9953 = vtanh.f32 %v4929_v32 }
 0x7af   :  { %5760 = vmatpush.msra.mxu0 %v11998_v6  ;;  %5783 = vmatpush.msra.mxu1 %v11998_v6 }
 0x7b1   :  { %v4965_v2 = vpop.f32.mrf.mxu2  ;;  %v5002_v0 = vpop.f32.mrf.mxu3  ;;  %5761 = vmatpush.msra.mxu0 %v12009_v36  ;;  %5784 = vmatpush.msra.mxu1 %v12009_v36 }
 0x7b2   :  { %v4966_v20 = vadd.f32 %v9804_v52, %v4965_v2  ;;  %v5003_v27 = vadd.f32 %v9805_v46, %v5002_v0  ;;  %v4893_v5 = vpop.f32.mrf.mxu0  ;;  %v10072_v46 = vmov 0.0   ;;  %v12373_v2 = vld [vmem:[%s11992_s15 + $0x58] sm:$0xff]  ;;  %v12390_v0 = vld [vmem:[%s11992_s15 + $0x50] sm:$0xff] }
 0x7b3   :  { %v4930_v7 = vpop.f32.mrf.mxu1  ;;  %v12153_v38 = vpop.eup %9951  ;;  %5762 = vmatpush.msra.mxu0 %v12012_v15  ;;  %5785 = vmatpush.msra.mxu1 %v12012_v15  ;;  %5304 = vst.msk [vmem:[#allocation2] sm:$0x3] %vm563_vm0, %v10072_v46 }
 0x7b4   :  { %v12157_v56 = vpop.eup %9953  ;;  %9955 = vtanh.f32 %v4966_v20  ;;  %9513 = vmatmul.msk.f32.vlgmr.msra.gmra.mxu2 %vm3260_vm11, %v12153_v38  ;;  %5305 = vst.msk [vmem:[#allocation2 + $0x2] sm:$0x3] %vm563_vm0, %v10072_v46  ;;  %v12402_v20 = vld [vmem:[%s11992_s15 + $0x48] sm:$0xff] }
 0x7b5   :  { %9957 = vtanh.f32 %v5003_v27  ;;  %9514 = vmatmul.msk.f32.vlgmr.msra.gmra.mxu3 %vm3260_vm11, %v12157_v56  ;;  %5805 = vmatpush.msra.mxu2 %v11995_v4  ;;  %5306 = vst.msk [vmem:[#allocation2 + $0x4] sm:$0x3] %vm563_vm0, %v10072_v46  ;;  %v12413_v27 = vld [vmem:[%s11992_s15 + $0x40] sm:$0xff] }
 0x7b6   :  { %5828 = vmatpush.msra.mxu3 %v11995_v4  ;;  %5307 = vst.msk [vmem:[#allocation2 + $0x6] sm:$0x3] %vm563_vm0, %v10072_v46 }
 0x7b7   :  { %5806 = vmatpush.msra.mxu2 %v11998_v6  ;;  %5308 = vst.msk [vmem:[#allocation2 + $0x8] sm:$0x3] %vm563_vm0, %v10072_v46 }
 0x7b8   :  { %5829 = vmatpush.msra.mxu3 %v11998_v6  ;;  %5309 = vst.msk [vmem:[#allocation2 + $0xa] sm:$0x3] %vm563_vm0, %v10072_v46 }
 0x7b9   :  { %v4967_v50 = vpop.f32.mrf.mxu2  ;;  %v5004_v62 = vpop.f32.mrf.mxu3  ;;  %5807 = vmatpush.msra.mxu2 %v12009_v36  ;;  %5310 = vst.msk [vmem:[#allocation2 + $0xc] sm:$0x3] %vm563_vm0, %v10072_v46 }
 0x7ba   :  { %v12170_v9 = vpop.eup %9955  ;;  %v5039_v24 = vpop.f32.mrf.mxu0  ;;  %5830 = vmatpush.msra.mxu3 %v12009_v36  ;;  %5311 = vst.msk [vmem:[#allocation2 + $0xe] sm:$0x3] %vm563_vm0, %v10072_v46  ;;  %v5859_v5 = vld [vmem:[#allocation2] sm:$0x3] }
 0x7bb   :  { %v5076_v58 = vpop.f32.mrf.mxu1  ;;  %v12176_v53 = vpop.eup %9957  ;;  %v5040_v22 = vadd.f32 %v9806_v63, %v5039_v24  ;;  %9515 = vmatmul.msk.f32.vlgmr.msrb.gmra.mxu0 %vm3260_vm11, %v12170_v9  ;;  %5808 = vmatpush.msra.mxu2 %v12012_v15  ;;  %5312 = vst.msk [vmem:[#allocation2 + $0x10] sm:$0x3] %vm563_vm0, %v10072_v46 }
 0x7bc   :  { %v5077_v54 = vadd.f32 %v9807_v37, %v5076_v58  ;;  %9516 = vmatmul.msk.f32.vlgmr.msrb.gmra.mxu1 %vm3260_vm11, %v12176_v53  ;;  %5831 = vmatpush.msra.mxu3 %v12012_v15  ;;  %5313 = vst.msk [vmem:[#allocation2 + $0x12] sm:$0x3] %vm563_vm0, %v10072_v46  ;;  %v5861_v7 = vld [vmem:[#allocation2 + $0x4] sm:$0x3] }
 0x7bd   :  { %9959 = vtanh.f32 %v5040_v22  ;;  %5940 = vmatpush.msrb.mxu1 %v12173_v28  ;;  %5851 = vmatpush.msrb.mxu0 %v11995_v4  ;;  %5314 = vst.msk [vmem:[#allocation2 + $0x14] sm:$0x3] %vm563_vm0, %v10072_v46  ;;  %v5862_v37 = vld [vmem:[#allocation2 + $0x6] sm:$0x3]  ;;  %v5860_v22 = vld [vmem:[#allocation2 + $0x2] sm:$0x3] }
 0x7be   :  { %9961 = vtanh.f32 %v5077_v54  ;;  %5315 = vst.msk [vmem:[#allocation2 + $0x16] sm:$0x3] %vm563_vm0, %v10072_v46 }
 0x7bf   :  { %5941 = vmatpush.msrb.mxu1 %v12184_v35  ;;  %5852 = vmatpush.msrb.mxu0 %v11998_v6  ;;  %5316 = vst.msk [vmem:[#allocation2 + $0x18] sm:$0x3] %vm563_vm0, %v10072_v46 }
 0x7c0   :  { %5317 = vst.msk [vmem:[#allocation2 + $0x1a] sm:$0x3] %vm563_vm0, %v10072_v46 }
 0x7c1   :  { %v5113_v42 = vpop.f32.mrf.mxu2  ;;  %v5150_v40 = vpop.f32.mrf.mxu3  ;;  %5942 = vmatpush.msrb.mxu1 %v12192_v29  ;;  %5853 = vmatpush.msrb.mxu0 %v12009_v36  ;;  %v9810_v36 = vld [vmem:[%s11854_s11 + $0x14] ss:$0 sm:$0xff]  ;;  %5318 = vst.msk [vmem:[#allocation2 + $0x1c] sm:$0x3] %vm563_vm0, %v10072_v46 }
 0x7c2   :  { %v5114_v4 = vadd.f32 %v9808_v44, %v5113_v42  ;;  %v5151_v47 = vadd.f32 %v9809_v26, %v5150_v40  ;;  %v5041_v23 = vpop.f32.mrf.mxu0  ;;  %5319 = vst.msk [vmem:[#allocation2 + $0x1e] sm:$0x3] %vm563_vm0, %v10072_v46  ;;  %v5863_v44 = vld [vmem:[#allocation2 + $0x8] sm:$0x3]  ;;  %v5864_v26 = vld [vmem:[#allocation2 + $0xa] sm:$0x3] }
 0x7c3   :  { %v5078_v3 = vpop.f32.mrf.mxu1  ;;  %v12201_v11 = vpop.eup %9959  ;;  %5943 = vmatpush.msrb.mxu1 %v12197_v1  ;;  %5854 = vmatpush.msrb.mxu0 %v12012_v15  ;;  %5320 = vst.msk [vmem:[#allocation2 + $0x20] sm:$0x3] %vm563_vm0, %v10072_v46  ;;  %v5866_v42 = vld [vmem:[#allocation2 + $0xe] sm:$0x3] }
 0x7c4   :  { %v12205_v6 = vpop.eup %9961  ;;  %9963 = vtanh.f32 %v5114_v4  ;;  %9517 = vmatmul.msk.f32.vlgmr.msrb.gmra.mxu2 %vm3260_vm11, %v12201_v11  ;;  %5321 = vst.msk [vmem:[#allocation2 + $0x22] sm:$0x3] %vm563_vm0, %v10072_v46 }
 0x7c5   :  { %9965 = vtanh.f32 %v5151_v47  ;;  %9518 = vmatmul.msk.f32.vlgmr.msrb.gmra.mxu3 %vm3260_vm11, %v12205_v6  ;;  %5960 = vmatpush.msrb.mxu2 %v12173_v28  ;;  %5322 = vst.msk [vmem:[#allocation2 + $0x24] sm:$0x3] %vm563_vm0, %v10072_v46 }
 0x7c6   :  { %5980 = vmatpush.msrb.mxu3 %v12173_v28  ;;  %5323 = vst.msk [vmem:[#allocation2 + $0x26] sm:$0x3] %vm563_vm0, %v10072_v46 }
 0x7c7   :  { %5961 = vmatpush.msrb.mxu2 %v12184_v35  ;;  %5324 = vst.msk [vmem:[#allocation2 + $0x28] sm:$0x3] %vm563_vm0, %v10072_v46 }
 0x7c8   :  { %5981 = vmatpush.msrb.mxu3 %v12184_v35  ;;  %5325 = vst.msk [vmem:[#allocation2 + $0x2a] sm:$0x3] %vm563_vm0, %v10072_v46 }
 0x7c9   :  { %v5115_v15 = vpop.f32.mrf.mxu2  ;;  %v5152_v12 = vpop.f32.mrf.mxu3  ;;  %5962 = vmatpush.msrb.mxu2 %v12192_v29  ;;  %5326 = vst.msk [vmem:[#allocation2 + $0x2c] sm:$0x3] %vm563_vm0, %v10072_v46 }
 0x7ca   :  { %v12218_v16 = vpop.eup %9963  ;;  %v5187_v48 = vpop.f32.mrf.mxu0  ;;  %5982 = vmatpush.msrb.mxu3 %v12192_v29  ;;  %5327 = vst.msk [vmem:[#allocation2 + $0x2e] sm:$0x3] %vm563_vm0, %v10072_v46  ;;  %v5867_v15 = vld [vmem:[#allocation2 + $0x10] sm:$0x3]  ;;  %v5868_v12 = vld [vmem:[#allocation2 + $0x12] sm:$0x3] }
 0x7cb   :  { %v5224_v18 = vpop.f32.mrf.mxu1  ;;  %v12221_v49 = vpop.eup %9965  ;;  %v5188_v57 = vadd.f32 %v9810_v36, %v5187_v48  ;;  %9519 = vmatmul.msk.f32.vlgmr.msra.gmra.mxu0 %vm3260_vm11, %v12218_v16  ;;  %5963 = vmatpush.msrb.mxu2 %v12197_v1  ;;  %5328 = vst.msk [vmem:[#allocation2 + $0x30] sm:$0x3] %vm563_vm0, %v10072_v46  ;;  %v5869_v48 = vld [vmem:[#allocation2 + $0x14] sm:$0x3] }
 0x7cc   :  { %v5225_v8 = vadd.f32 %v9811_v45, %v5224_v18  ;;  %9520 = vmatmul.msk.f32.vlgmr.msra.gmra.mxu1 %vm3260_vm11, %v12221_v49  ;;  %5983 = vmatpush.msrb.mxu3 %v12197_v1  ;;  %5329 = vst.msk [vmem:[#allocation2 + $0x32] sm:$0x3] %vm563_vm0, %v10072_v46 }
 0x7cd   :  { %9967 = vtanh.f32 %v5188_v57  ;;  %6020 = vmatpush.msra.mxu1 %v12173_v28  ;;  %6000 = vmatpush.msra.mxu0 %v12173_v28  ;;  %v5870_v57 = vld [vmem:[#allocation2 + $0x16] sm:$0x3]  ;;  %7872 = vst.msk [vmem:[%s13504_s5] sm:$0xff] %vm7871_vm4, %v10072_v46 }
 0x7ce   :  { %9969 = vtanh.f32 %v5225_v8  ;;  %7873 = vst.msk [vmem:[%s13504_s5 + $0x8] sm:$0xff] %vm7871_vm4, %v10072_v46 }
 0x7cf   :  { %6021 = vmatpush.msra.mxu1 %v12184_v35  ;;  %6001 = vmatpush.msra.mxu0 %v12184_v35  ;;  %7874 = vst.msk [vmem:[%s13504_s5 + $0x10] sm:$0xff] %vm7871_vm4, %v10072_v46 }
 0x7d0   :  { %7876 = vst.msk [vmem:[%s13504_s5 + $0x18] sm:$0x1f] %vm7875_vm12, %v10072_v46 }
 0x7d1   :  { %v5261_v55 = vpop.f32.mrf.mxu2  ;;  %6022 = vmatpush.msra.mxu1 %v12192_v29  ;;  %6002 = vmatpush.msra.mxu0 %v12192_v29 }
 0x7d2   :  { %v5262_v31 = vadd.f32 %v9812_v21, %v5261_v55  ;;  %v5189_v41 = vpop.f32.mrf.mxu0 }
 0x7d3   :  { %v5226_v60 = vpop.f32.mrf.mxu1  ;;  %v12236_v43 = vpop.eup %9967  ;;  %6023 = vmatpush.msra.mxu1 %v12197_v1  ;;  %6003 = vmatpush.msra.mxu0 %v12197_v1 }
 0x7d4   :  { %v12240_v19 = vpop.eup %9969  ;;  %9971 = vtanh.f32 %v5262_v31  ;;  %9524 = vmatmul.msk.f32.vlgmr.msrb.gmra.mxu1 %vm3260_vm11, %v12042_v59  ;;  %9521 = vmatmul.msk.f32.vlgmr.msra.gmra.mxu2 %vm3260_vm11, %v12236_v43 }
 0x7d5   :  { %9522 = vmatmul.msk.f32.vlgmr.msra.gmra.mxu3 %vm3260_vm11, %v12240_v19  ;;  %6100 = vmatpush.msrb.mxu1 %v12173_v28 }
 0x7d6   :  { %6040 = vmatpush.msra.mxu2 %v12173_v28  ;;  %6060 = vmatpush.msra.mxu3 %v12173_v28 }
 0x7d7   :  { %6101 = vmatpush.msrb.mxu1 %v12184_v35 }
 0x7d8   :  { %6041 = vmatpush.msra.mxu2 %v12184_v35  ;;  %6061 = vmatpush.msra.mxu3 %v12184_v35 }
 0x7d9   :  { %v5263_v32 = vpop.f32.mrf.mxu2  ;;  %6102 = vmatpush.msrb.mxu1 %v12192_v29 }
 0x7da   :  { %v12255_v52 = vpop.eup %9971  ;;  %6042 = vmatpush.msra.mxu2 %v12192_v29  ;;  %6062 = vmatpush.msra.mxu3 %v12192_v29 }
 0x7db   :  { %9523 = vmatmul.msk.f32.vlgmr.msrb.gmra.mxu0 %vm3260_vm11, %v12255_v52  ;;  %6103 = vmatpush.msrb.mxu1 %v12197_v1 }
 0x7dc   :  { %9528 = vmatmul.msk.f32.vlgmr.msra.gmra.mxu1 %vm3260_vm11, %v12080_v39  ;;  %9525 = vmatmul.msk.f32.vlgmr.msrb.gmra.mxu2 %vm3260_vm11, %v12050_v61 }
 0x7dd   :  { %9526 = vmatmul.msk.f32.vlgmr.msrb.gmra.mxu3 %vm3260_vm11, %v12053_v30  ;;  %6043 = vmatpush.msra.mxu2 %v12197_v1 }
 0x7de   :  { %6063 = vmatpush.msra.mxu3 %v12197_v1  ;;  %6080 = vmatpush.msrb.mxu0 %v12173_v28 }
 0x7df   :  { %6180 = vmatpush.msra.mxu1 %v12173_v28  ;;  %6120 = vmatpush.msrb.mxu2 %v12173_v28 }
 0x7e0   :  { %6081 = vmatpush.msrb.mxu0 %v12184_v35  ;;  %6140 = vmatpush.msrb.mxu3 %v12173_v28 }
 0x7e1   :  { %6181 = vmatpush.msra.mxu1 %v12184_v35  ;;  %6121 = vmatpush.msrb.mxu2 %v12184_v35 }
 0x7e2   :  { %6082 = vmatpush.msrb.mxu0 %v12192_v29  ;;  %6141 = vmatpush.msrb.mxu3 %v12184_v35 }
 0x7e3   :  { %9527 = vmatmul.msk.f32.vlgmr.msra.gmra.mxu0 %vm3260_vm11, %v12055_v51  ;;  %6182 = vmatpush.msra.mxu1 %v12192_v29 }
 0x7e4   :  { %9532 = vmatmul.msk.f32.vlgmr.msrb.gmra.mxu1 %vm3260_vm11, %v12117_v10  ;;  %9529 = vmatmul.msk.f32.vlgmr.msra.gmra.mxu2 %vm3260_vm11, %v12084_v13 }
 0x7e5   :  { %9530 = vmatmul.msk.f32.vlgmr.msra.gmra.mxu3 %vm3260_vm11, %v12098_v25  ;;  %6122 = vmatpush.msrb.mxu2 %v12192_v29 }
 0x7e6   :  { %6083 = vmatpush.msrb.mxu0 %v12197_v1  ;;  %6142 = vmatpush.msrb.mxu3 %v12192_v29 }
 0x7e7   :  { %6183 = vmatpush.msra.mxu1 %v12197_v1  ;;  %6123 = vmatpush.msrb.mxu2 %v12197_v1 }
 0x7e8   :  { %6143 = vmatpush.msrb.mxu3 %v12197_v1  ;;  %6160 = vmatpush.msra.mxu0 %v12173_v28 }
 0x7e9   :  { %6260 = vmatpush.msrb.mxu1 %v12173_v28  ;;  %6200 = vmatpush.msra.mxu2 %v12173_v28 }
 0x7ea   :  { %6161 = vmatpush.msra.mxu0 %v12184_v35  ;;  %6220 = vmatpush.msra.mxu3 %v12173_v28 }
 0x7eb   :  { %9531 = vmatmul.msk.f32.vlgmr.msrb.gmra.mxu0 %vm3260_vm11, %v12101_v34  ;;  %6261 = vmatpush.msrb.mxu1 %v12184_v35 }
 0x7ec   :  { %9536 = vmatmul.msk.f32.vlgmr.msra.gmra.mxu1 %vm3260_vm11, %v12153_v38  ;;  %9533 = vmatmul.msk.f32.vlgmr.msrb.gmra.mxu2 %vm3260_vm11, %v12121_v33 }
 0x7ed   :  { %9534 = vmatmul.msk.f32.vlgmr.msrb.gmra.mxu3 %vm3260_vm11, %v12134_v14  ;;  %6201 = vmatpush.msra.mxu2 %v12184_v35 }
 0x7ee   :  { %6162 = vmatpush.msra.mxu0 %v12192_v29  ;;  %6221 = vmatpush.msra.mxu3 %v12184_v35 }
 0x7ef   :  { %6262 = vmatpush.msrb.mxu1 %v12192_v29  ;;  %6202 = vmatpush.msra.mxu2 %v12192_v29 }
 0x7f0   :  { %6163 = vmatpush.msra.mxu0 %v12197_v1  ;;  %6222 = vmatpush.msra.mxu3 %v12192_v29 }
 0x7f1   :  { %6263 = vmatpush.msrb.mxu1 %v12197_v1  ;;  %6203 = vmatpush.msra.mxu2 %v12197_v1 }
 0x7f2   :  { %6223 = vmatpush.msra.mxu3 %v12197_v1  ;;  %6240 = vmatpush.msrb.mxu0 %v12173_v28 }
 0x7f3   :  { %9535 = vmatmul.msk.f32.vlgmr.msra.gmra.mxu0 %vm3260_vm11, %v12137_v17  ;;  %6340 = vmatpush.msra.mxu1 %v12173_v28 }
 0x7f4   :  { %9540 = vmatmul.msk.f32.vlgmr.msrb.gmra.mxu1 %vm3260_vm11, %v12201_v11  ;;  %9537 = vmatmul.msk.f32.vlgmr.msra.gmra.mxu2 %vm3260_vm11, %v12157_v56 }
 0x7f5   :  { %9538 = vmatmul.msk.f32.vlgmr.msra.gmra.mxu3 %vm3260_vm11, %v12170_v9  ;;  %6280 = vmatpush.msrb.mxu2 %v12173_v28 }
 0x7f6   :  { %6241 = vmatpush.msrb.mxu0 %v12184_v35  ;;  %6300 = vmatpush.msrb.mxu3 %v12173_v28 }
 0x7f7   :  { %6341 = vmatpush.msra.mxu1 %v12184_v35  ;;  %6281 = vmatpush.msrb.mxu2 %v12184_v35 }
 0x7f8   :  { %6242 = vmatpush.msrb.mxu0 %v12192_v29  ;;  %6301 = vmatpush.msrb.mxu3 %v12184_v35 }
 0x7f9   :  { %6342 = vmatpush.msra.mxu1 %v12192_v29  ;;  %6282 = vmatpush.msrb.mxu2 %v12192_v29 }
 0x7fa   :  { %6243 = vmatpush.msrb.mxu0 %v12197_v1  ;;  %6302 = vmatpush.msrb.mxu3 %v12192_v29 }
 0x7fb   :  { %6343 = vmatpush.msra.mxu1 %v12197_v1  ;;  %9539 = vmatmul.msk.f32.vlgmr.msrb.gmra.mxu0 %vm3260_vm11, %v12176_v53 }
 0x7fc   :  { %6283 = vmatpush.msrb.mxu2 %v12197_v1  ;;  %9544 = vmatmul.msk.f32.vlgmr.msra.gmra.mxu1 %vm3260_vm11, %v12236_v43 }
 0x7fd   :  { %6303 = vmatpush.msrb.mxu3 %v12197_v1  ;;  %6320 = vmatpush.msra.mxu0 %v12173_v28 }
 0x7fe   :  { %6490 = vmatpush.msrb.mxu1 %v12373_v2  ;;  %9541 = vmatmul.msk.f32.vlgmr.msrb.gmra.mxu2 %vm3260_vm11, %v12205_v6 }
 0x7ff   :  { %9542 = vmatmul.msk.f32.vlgmr.msrb.gmra.mxu3 %vm3260_vm11, %v12218_v16  ;;  %6360 = vmatpush.msra.mxu2 %v12173_v28 }
 0x800   :  { %6321 = vmatpush.msra.mxu0 %v12184_v35  ;;  %6380 = vmatpush.msra.mxu3 %v12173_v28 }
 0x801   :  { %6491 = vmatpush.msrb.mxu1 %v12390_v0  ;;  %6361 = vmatpush.msra.mxu2 %v12184_v35 }
 0x802   :  { %6322 = vmatpush.msra.mxu0 %v12192_v29  ;;  %6381 = vmatpush.msra.mxu3 %v12184_v35 }
 0x803   :  { %6492 = vmatpush.msrb.mxu1 %v12402_v20  ;;  %6362 = vmatpush.msra.mxu2 %v12192_v29 }
 0x804   :  { %6323 = vmatpush.msra.mxu0 %v12197_v1  ;;  %6382 = vmatpush.msra.mxu3 %v12192_v29  ;;  %v5865_v29 = vld [vmem:[#allocation2 + $0xc] sm:$0x3] }
 0x805   :  { %6493 = vmatpush.msrb.mxu1 %v12413_v27  ;;  %9543 = vmatmul.msk.f32.vlgmr.msra.gmra.mxu0 %vm3260_vm11, %v12221_v49 }
 0x806   :  { %6363 = vmatpush.msra.mxu2 %v12197_v1  ;;  %9548 = vmatmul.msk.f32.vlgmr.msrb.gmra.mxu1 %vm3260_vm11, %v12050_v61 }
 0x807   :  { %6383 = vmatpush.msra.mxu3 %v12197_v1  ;;  %6470 = vmatpush.msrb.mxu0 %v12373_v2  ;;  %v5350_v63 = vpop.f32.mrf.mxu3 }
 0x808   :  { %6570 = vmatpush.msra.mxu1 %v12373_v2  ;;  %9545 = vmatmul.msk.f32.vlgmr.msra.gmra.mxu2 %vm3260_vm11, %v12240_v19  ;;  %v5882_v50 = vadd.f32 %v5859_v5, %v5350_v63  ;;  %v5396_v62 = vpop.f32.mrf.mxu0  ;;  %v5871_v5 = vld [vmem:[#allocation2 + $0x18] sm:$0x3]  ;;  %v5873_v63 = vld [vmem:[#allocation2 + $0x1c] sm:$0x3] }
 0x809   :  { %9546 = vmatmul.msk.f32.vlgmr.msra.gmra.mxu3 %vm3260_vm11, %v12255_v52  ;;  %6510 = vmatpush.msrb.mxu2 %v12373_v2  ;;  %v5884_v24 = vadd.f32 %v5861_v7, %v5396_v62  ;;  %v5419_v58 = vpop.f32.mrf.mxu1  ;;  %v5872_v7 = vld [vmem:[#allocation2 + $0x1a] sm:$0x3]  ;;  %v5874_v62 = vld [vmem:[#allocation2 + $0x1e] sm:$0x3] }
 0x80a   :  { %6471 = vmatpush.msrb.mxu0 %v12390_v0  ;;  %6530 = vmatpush.msrb.mxu3 %v12373_v2  ;;  %5905 = vst.msk [vmem:[#allocation2] sm:$0x3] %vm563_vm0, %v5882_v50  ;;  %v5885_v28 = vadd.f32 %v5862_v37, %v5419_v58  ;;  %v12563_v37 = vld [vmem:[%s11992_s15 + $0x78] sm:$0xff] }
 0x80b   :  { %6571 = vmatpush.msra.mxu1 %v12390_v0  ;;  %6511 = vmatpush.msrb.mxu2 %v12390_v0  ;;  %5907 = vst.msk [vmem:[#allocation2 + $0x4] sm:$0x3] %vm563_vm0, %v5884_v24 }
 0x80c   :  { %5908 = vst.msk [vmem:[#allocation2 + $0x6] sm:$0x3] %vm563_vm0, %v5885_v28  ;;  %6472 = vmatpush.msrb.mxu0 %v12402_v20  ;;  %6531 = vmatpush.msrb.mxu3 %v12390_v0 }
 0x80d   :  { %6572 = vmatpush.msra.mxu1 %v12402_v20  ;;  %6512 = vmatpush.msrb.mxu2 %v12402_v20 }
 0x80e   :  { %6473 = vmatpush.msrb.mxu0 %v12413_v27  ;;  %6532 = vmatpush.msrb.mxu3 %v12402_v20 }
 0x80f   :  { %6573 = vmatpush.msra.mxu1 %v12413_v27  ;;  %9547 = vmatmul.msk.f32.vlgmr.msrb.gmra.mxu0 %vm3260_vm11, %v12042_v59  ;;  %v5373_v54 = vpop.f32.mrf.mxu3 }
 0x810   :  { %6513 = vmatpush.msrb.mxu2 %v12413_v27  ;;  %9552 = vmatmul.msk.f32.vlgmr.msra.gmra.mxu1 %vm3260_vm11, %v12084_v13  ;;  %v5883_v35 = vadd.f32 %v5860_v22, %v5373_v54 }
 0x811   :  { %6533 = vmatpush.msrb.mxu3 %v12413_v27  ;;  %6550 = vmatpush.msra.mxu0 %v12373_v2 }
 0x812   :  { %6650 = vmatpush.msrb.mxu1 %v12373_v2  ;;  %9549 = vmatmul.msk.f32.vlgmr.msrb.gmra.mxu2 %vm3260_vm11, %v12053_v30  ;;  %5906 = vst.msk [vmem:[#allocation2 + $0x2] sm:$0x3] %vm563_vm0, %v5883_v35 }
 0x813   :  { %9550 = vmatmul.msk.f32.vlgmr.msrb.gmra.mxu3 %vm3260_vm11, %v12055_v51  ;;  %6590 = vmatpush.msra.mxu2 %v12373_v2 }
 0x814   :  { %6551 = vmatpush.msra.mxu0 %v12390_v0  ;;  %6610 = vmatpush.msra.mxu3 %v12373_v2 }
 0x815   :  { %6651 = vmatpush.msrb.mxu1 %v12390_v0  ;;  %6591 = vmatpush.msra.mxu2 %v12390_v0 }
 0x816   :  { %6552 = vmatpush.msra.mxu0 %v12402_v20  ;;  %6611 = vmatpush.msra.mxu3 %v12390_v0 }
 0x817   :  { %6652 = vmatpush.msrb.mxu1 %v12402_v20  ;;  %6592 = vmatpush.msra.mxu2 %v12402_v20  ;;  %v5442_v1 = vpop.f32.mrf.mxu2 }
 0x818   :  { %6553 = vmatpush.msra.mxu0 %v12413_v27  ;;  %6612 = vmatpush.msra.mxu3 %v12402_v20  ;;  %v5886_v40 = vadd.f32 %v5863_v44, %v5442_v1  ;;  %v5465_v4 = vpop.f32.mrf.mxu3  ;;  %v5488_v47 = vpop.f32.mrf.mxu0  ;;  %v12574_v44 = vld [vmem:[%s11992_s15 + $0x70] sm:$0xff]  ;;  %v5878_v1 = vld [vmem:[#allocation2 + $0x26] sm:$0x3] }
 0x819   :  { %6653 = vmatpush.msrb.mxu1 %v12413_v27  ;;  %9551 = vmatmul.msk.f32.vlgmr.msra.gmra.mxu0 %vm3260_vm11, %v12080_v39  ;;  %v5887_v23 = vadd.f32 %v5864_v26, %v5465_v4  ;;  %v5888_v3 = vadd.f32 %v5865_v29, %v5488_v47  ;;  %v5511_v36 = vpop.f32.mrf.mxu1  ;;  %v12584_v29 = vld [vmem:[%s11992_s15 + $0x68] sm:$0xff] }
 0x81a   :  { %6593 = vmatpush.msra.mxu2 %v12413_v27  ;;  %9556 = vmatmul.msk.f32.vlgmr.msrb.gmra.mxu1 %vm3260_vm11, %v12121_v33  ;;  %5909 = vst.msk [vmem:[#allocation2 + $0x8] sm:$0x3] %vm563_vm0, %v5886_v40  ;;  %v5889_v45 = vadd.f32 %v5866_v42, %v5511_v36  ;;  %v5880_v36 = vld [vmem:[#allocation2 + $0x2a] sm:$0x3] }
 0x81b   :  { %6613 = vmatpush.msra.mxu3 %v12413_v27  ;;  %6630 = vmatpush.msrb.mxu0 %v12373_v2  ;;  %5910 = vst.msk [vmem:[#allocation2 + $0xa] sm:$0x3] %vm563_vm0, %v5887_v23 }
 0x81c   :  { %6730 = vmatpush.msra.mxu1 %v12373_v2  ;;  %9553 = vmatmul.msk.f32.vlgmr.msra.gmra.mxu2 %vm3260_vm11, %v12098_v25  ;;  %5911 = vst.msk [vmem:[#allocation2 + $0xc] sm:$0x3] %vm563_vm0, %v5888_v3 }
 0x81d   :  { %9554 = vmatmul.msk.f32.vlgmr.msra.gmra.mxu3 %vm3260_vm11, %v12101_v34  ;;  %6670 = vmatpush.msrb.mxu2 %v12373_v2  ;;  %5912 = vst.msk [vmem:[#allocation2 + $0xe] sm:$0x3] %vm563_vm0, %v5889_v45  ;;  %v5881_v45 = vld [vmem:[#allocation2 + $0x2c] sm:$0x3] }
 0x81e   :  { %6631 = vmatpush.msrb.mxu0 %v12390_v0  ;;  %6690 = vmatpush.msrb.mxu3 %v12373_v2 }
 0x81f   :  { %6731 = vmatpush.msra.mxu1 %v12390_v0  ;;  %6671 = vmatpush.msrb.mxu2 %v12390_v0 }
 0x820   :  { %6632 = vmatpush.msrb.mxu0 %v12402_v20  ;;  %6691 = vmatpush.msrb.mxu3 %v12390_v0 }
 0x821   :  { %6732 = vmatpush.msra.mxu1 %v12402_v20  ;;  %6672 = vmatpush.msrb.mxu2 %v12402_v20 }
 0x822   :  { %6633 = vmatpush.msrb.mxu0 %v12413_v27  ;;  %6692 = vmatpush.msrb.mxu3 %v12402_v20 }
 0x823   :  { %6733 = vmatpush.msra.mxu1 %v12413_v27  ;;  %9555 = vmatmul.msk.f32.vlgmr.msrb.gmra.mxu0 %vm3260_vm11, %v12117_v10 }
 0x824   :  { %6673 = vmatpush.msrb.mxu2 %v12413_v27  ;;  %9560 = vmatmul.msk.f32.vlgmr.msra.gmra.mxu1 %vm3260_vm11, %v12157_v56 }
 0x825   :  { %6693 = vmatpush.msrb.mxu3 %v12413_v27  ;;  %6710 = vmatpush.msra.mxu0 %v12373_v2 }
 0x826   :  { %6810 = vmatpush.msrb.mxu1 %v12373_v2  ;;  %9557 = vmatmul.msk.f32.vlgmr.msrb.gmra.mxu2 %vm3260_vm11, %v12134_v14 }
 0x827   :  { %9558 = vmatmul.msk.f32.vlgmr.msrb.gmra.mxu3 %vm3260_vm11, %v12137_v17  ;;  %6750 = vmatpush.msra.mxu2 %v12373_v2  ;;  %v5534_v18 = vpop.f32.mrf.mxu2 }
 0x828   :  { %6711 = vmatpush.msra.mxu0 %v12390_v0  ;;  %6770 = vmatpush.msra.mxu3 %v12373_v2  ;;  %v5890_v8 = vadd.f32 %v5867_v15, %v5534_v18  ;;  %v5557_v21 = vpop.f32.mrf.mxu3  ;;  %v5580_v55 = vpop.f32.mrf.mxu0 }
 0x829   :  { %6811 = vmatpush.msrb.mxu1 %v12390_v0  ;;  %6751 = vmatpush.msra.mxu2 %v12390_v0  ;;  %v5891_v31 = vadd.f32 %v5868_v12, %v5557_v21  ;;  %v5892_v41 = vadd.f32 %v5869_v48, %v5580_v55  ;;  %v5603_v60 = vpop.f32.mrf.mxu1 }
 0x82a   :  { %6712 = vmatpush.msra.mxu0 %v12402_v20  ;;  %6771 = vmatpush.msra.mxu3 %v12390_v0  ;;  %5913 = vst.msk [vmem:[#allocation2 + $0x10] sm:$0x3] %vm563_vm0, %v5890_v8  ;;  %v5893_v32 = vadd.f32 %v5870_v57, %v5603_v60  ;;  %v6393_v8 = vld [vmem:[#allocation2 + $0xa] sm:$0x3] }
 0x82b   :  { %6812 = vmatpush.msrb.mxu1 %v12402_v20  ;;  %6752 = vmatpush.msra.mxu2 %v12402_v20  ;;  %5914 = vst.msk [vmem:[#allocation2 + $0x12] sm:$0x3] %vm563_vm0, %v5891_v31 }
 0x82c   :  { %6713 = vmatpush.msra.mxu0 %v12413_v27  ;;  %6772 = vmatpush.msra.mxu3 %v12402_v20  ;;  %5915 = vst.msk [vmem:[#allocation2 + $0x14] sm:$0x3] %vm563_vm0, %v5892_v41  ;;  %v6391_v41 = vld [vmem:[#allocation2 + $0x6] sm:$0x3] }
 0x82d   :  { %6813 = vmatpush.msrb.mxu1 %v12413_v27  ;;  %9559 = vmatmul.msk.f32.vlgmr.msra.gmra.mxu0 %vm3260_vm11, %v12153_v38  ;;  %5916 = vst.msk [vmem:[#allocation2 + $0x16] sm:$0x3] %vm563_vm0, %v5893_v32  ;;  %v6392_v32 = vld [vmem:[#allocation2 + $0x8] sm:$0x3] }
 0x82e   :  { %6753 = vmatpush.msra.mxu2 %v12413_v27  ;;  %9564 = vmatmul.msk.f32.vlgmr.msrb.gmra.mxu1 %vm3260_vm11, %v12205_v6 }
 0x82f   :  { %6773 = vmatpush.msra.mxu3 %v12413_v27  ;;  %6790 = vmatpush.msrb.mxu0 %v12373_v2 }
 0x830   :  { %6890 = vmatpush.msra.mxu1 %v12373_v2  ;;  %9561 = vmatmul.msk.f32.vlgmr.msra.gmra.mxu2 %vm3260_vm11, %v12170_v9 }
 0x831   :  { %9562 = vmatmul.msk.f32.vlgmr.msra.gmra.mxu3 %vm3260_vm11, %v12176_v53  ;;  %6830 = vmatpush.msrb.mxu2 %v12373_v2 }
 0x832   :  { %6791 = vmatpush.msrb.mxu0 %v12390_v0  ;;  %6850 = vmatpush.msrb.mxu3 %v12373_v2 }
 0x833   :  { %6891 = vmatpush.msra.mxu1 %v12390_v0  ;;  %6831 = vmatpush.msrb.mxu2 %v12390_v0 }
 0x834   :  { %6792 = vmatpush.msrb.mxu0 %v12402_v20  ;;  %6851 = vmatpush.msrb.mxu3 %v12390_v0 }
 0x835   :  { %6892 = vmatpush.msra.mxu1 %v12402_v20  ;;  %6832 = vmatpush.msrb.mxu2 %v12402_v20 }
 0x836   :  { %6793 = vmatpush.msrb.mxu0 %v12413_v27  ;;  %6852 = vmatpush.msrb.mxu3 %v12402_v20 }
 0x837   :  { %6893 = vmatpush.msra.mxu1 %v12413_v27  ;;  %9563 = vmatmul.msk.f32.vlgmr.msrb.gmra.mxu0 %vm3260_vm11, %v12201_v11  ;;  %v5626_v50 = vpop.f32.mrf.mxu2 }
 0x838   :  { %6833 = vmatpush.msrb.mxu2 %v12413_v27  ;;  %9568 = vmatmul.msk.f32.vlgmr.msra.gmra.mxu1 %vm3260_vm11, %v12240_v19  ;;  %v5894_v24 = vadd.f32 %v5871_v5, %v5626_v50  ;;  %v5649_v58 = vpop.f32.mrf.mxu3  ;;  %v5672_v28 = vpop.f32.mrf.mxu0 }
 0x839   :  { %6853 = vmatpush.msrb.mxu3 %v12413_v27  ;;  %6870 = vmatpush.msra.mxu0 %v12373_v2  ;;  %v5895_v22 = vadd.f32 %v5872_v7, %v5649_v58  ;;  %v5896_v54 = vadd.f32 %v5873_v63, %v5672_v28  ;;  %v5695_v35 = vpop.f32.mrf.mxu1  ;;  %v6396_v28 = vld [vmem:[#allocation2 + $0x10] sm:$0x3] }
 0x83a   :  { %7040 = vmatpush.msrb.mxu1 %v12563_v37  ;;  %9565 = vmatmul.msk.f32.vlgmr.msrb.gmra.mxu2 %vm3260_vm11, %v12218_v16  ;;  %5917 = vst.msk [vmem:[#allocation2 + $0x18] sm:$0x3] %vm563_vm0, %v5894_v24  ;;  %v5897_v26 = vadd.f32 %v5874_v62, %v5695_v35  ;;  %v6395_v24 = vld [vmem:[#allocation2 + $0xe] sm:$0x3] }
 0x83b   :  { %9566 = vmatmul.msk.f32.vlgmr.msrb.gmra.mxu3 %vm3260_vm11, %v12221_v49  ;;  %6910 = vmatpush.msra.mxu2 %v12373_v2  ;;  %5918 = vst.msk [vmem:[#allocation2 + $0x1a] sm:$0x3] %vm563_vm0, %v5895_v22  ;;  %v12593_v2 = vld [vmem:[%s11992_s15 + $0x60] sm:$0xff] }
 0x83c   :  { %6871 = vmatpush.msra.mxu0 %v12390_v0  ;;  %7000 = vmatpush.msra.mxu3 %v12563_v37  ;;  %5919 = vst.msk [vmem:[#allocation2 + $0x1c] sm:$0x3] %vm563_vm0, %v5896_v54 }
 0x83d   :  { %7041 = vmatpush.msrb.mxu1 %v12574_v44  ;;  %6911 = vmatpush.msra.mxu2 %v12390_v0  ;;  %5920 = vst.msk [vmem:[#allocation2 + $0x1e] sm:$0x3] %vm563_vm0, %v5897_v26  ;;  %v5875_v0 = vld [vmem:[#allocation2 + $0x20] sm:$0x3] }
 0x83e   :  { %6872 = vmatpush.msra.mxu0 %v12402_v20  ;;  %7001 = vmatpush.msra.mxu3 %v12574_v44 }
 0x83f   :  { %7042 = vmatpush.msrb.mxu1 %v12584_v29  ;;  %6912 = vmatpush.msra.mxu2 %v12402_v20  ;;  %v5877_v20 = vld [vmem:[#allocation2 + $0x24] sm:$0x3] }
 0x840   :  { %6873 = vmatpush.msra.mxu0 %v12413_v27  ;;  %7002 = vmatpush.msra.mxu3 %v12584_v29 }
 0x841   :  { %7043 = vmatpush.msrb.mxu1 %v12593_v2  ;;  %9567 = vmatmul.msk.f32.vlgmr.msra.gmra.mxu0 %vm3260_vm11, %v12236_v43 }
 0x842   :  { %6913 = vmatpush.msra.mxu2 %v12413_v27  ;;  %9572 = vmatmul.msk.f32.vlgmr.msrb.gmra.mxu1 %vm3260_vm11, %v12053_v30  ;;  %v5876_v30 = vld [vmem:[#allocation2 + $0x22] sm:$0x3]  ;;  %v6401_v26 = vld [vmem:[#allocation2 + $0x1a] sm:$0x3] }
 0x843   :  { %7003 = vmatpush.msra.mxu3 %v12593_v2  ;;  %7020 = vmatpush.msrb.mxu0 %v12563_v37 }
 0x844   :  { %7120 = vmatpush.msra.mxu1 %v12563_v37  ;;  %9569 = vmatmul.msk.f32.vlgmr.msra.gmra.mxu2 %vm3260_vm11, %v12255_v52 }
 0x845   :  { %9570 = vmatmul.msk.f32.vlgmr.msra.gmra.mxu3 %vm3260_vm11, %v12042_v59  ;;  %7060 = vmatpush.msrb.mxu2 %v12563_v37 }
 0x846   :  { %7021 = vmatpush.msrb.mxu0 %v12574_v44  ;;  %7080 = vmatpush.msrb.mxu3 %v12563_v37 }
 0x847   :  { %7121 = vmatpush.msra.mxu1 %v12574_v44  ;;  %7061 = vmatpush.msrb.mxu2 %v12574_v44  ;;  %v5718_v27 = vpop.f32.mrf.mxu2 }
 0x848   :  { %7022 = vmatpush.msrb.mxu0 %v12584_v29  ;;  %7081 = vmatpush.msrb.mxu3 %v12574_v44  ;;  %v5898_v59 = vadd.f32 %v5875_v0, %v5718_v27  ;;  %v5741_v42 = vpop.f32.mrf.mxu3  ;;  %v5764_v40 = vpop.f32.mrf.mxu0  ;;  %v6400_v27 = vld [vmem:[#allocation2 + $0x18] sm:$0x3] }
 0x849   :  { %7122 = vmatpush.msra.mxu1 %v12584_v29  ;;  %7062 = vmatpush.msrb.mxu2 %v12584_v29  ;;  %v5899_v4 = vadd.f32 %v5876_v30, %v5741_v42  ;;  %v5900_v47 = vadd.f32 %v5877_v20, %v5764_v40  ;;  %v5787_v23 = vpop.f32.mrf.mxu1  ;;  %v6399_v30 = vld [vmem:[#allocation2 + $0x16] sm:$0x3] }
 0x84a   :  { %7023 = vmatpush.msrb.mxu0 %v12593_v2  ;;  %7082 = vmatpush.msrb.mxu3 %v12584_v29  ;;  %5921 = vst.msk [vmem:[#allocation2 + $0x20] sm:$0x3] %vm563_vm0, %v5898_v59  ;;  %v5901_v3 = vadd.f32 %v5878_v1, %v5787_v23 }
 0x84b   :  { %7123 = vmatpush.msra.mxu1 %v12593_v2  ;;  %9571 = vmatmul.msk.f32.vlgmr.msrb.gmra.mxu0 %vm3260_vm11, %v12050_v61  ;;  %5922 = vst.msk [vmem:[#allocation2 + $0x22] sm:$0x3] %vm563_vm0, %v5899_v4 }
 0x84c   :  { %7063 = vmatpush.msrb.mxu2 %v12593_v2  ;;  %9576 = vmatmul.msk.f32.vlgmr.msra.gmra.mxu1 %vm3260_vm11, %v12098_v25  ;;  %5923 = vst.msk [vmem:[#allocation2 + $0x24] sm:$0x3] %vm563_vm0, %v5900_v47  ;;  %v6389_v25 = vld [vmem:[#allocation2 + $0x2] sm:$0x3]  ;;  %v6402_v47 = vld [vmem:[#allocation2 + $0x1c] sm:$0x3] }
 0x84d   :  { %7083 = vmatpush.msrb.mxu3 %v12593_v2  ;;  %7100 = vmatpush.msra.mxu0 %v12563_v37  ;;  %5924 = vst.msk [vmem:[#allocation2 + $0x26] sm:$0x3] %vm563_vm0, %v5901_v3  ;;  %v6403_v3 = vld [vmem:[#allocation2 + $0x1e] sm:$0x3] }
 0x84e   :  { %7200 = vmatpush.msrb.mxu1 %v12563_v37  ;;  %9573 = vmatmul.msk.f32.vlgmr.msrb.gmra.mxu2 %vm3260_vm11, %v12055_v51 }
 0x84f   :  { %9574 = vmatmul.msk.f32.vlgmr.msrb.gmra.mxu3 %vm3260_vm11, %v12080_v39  ;;  %7140 = vmatpush.msra.mxu2 %v12563_v37  ;;  %v5879_v39 = vld [vmem:[#allocation2 + $0x28] sm:$0x3] }
 0x850   :  { %7101 = vmatpush.msra.mxu0 %v12574_v44  ;;  %7160 = vmatpush.msra.mxu3 %v12563_v37 }
 0x851   :  { %7201 = vmatpush.msrb.mxu1 %v12574_v44  ;;  %7141 = vmatpush.msra.mxu2 %v12574_v44  ;;  %v5945_v61 = vpop.f32.mrf.mxu1 }
 0x852   :  { %7102 = vmatpush.msra.mxu0 %v12584_v29  ;;  %7161 = vmatpush.msra.mxu3 %v12574_v44  ;;  %v6412_v51 = vadd.f32 %v6389_v25, %v5945_v61  ;;  %v6405_v40 = vld [vmem:[#allocation2 + $0x22] sm:$0x3]  ;;  %v6404_v25 = vld [vmem:[#allocation2 + $0x20] sm:$0x3] }
 0x853   :  { %7202 = vmatpush.msrb.mxu1 %v12584_v29  ;;  %7142 = vmatpush.msra.mxu2 %v12584_v29 }
 0x854   :  { %7103 = vmatpush.msra.mxu0 %v12593_v2  ;;  %7162 = vmatpush.msra.mxu3 %v12584_v29  ;;  %6435 = vst.msk [vmem:[#allocation2 + $0x2] sm:$0x3] %vm563_vm0, %v6412_v51 }
 0x855   :  { %7203 = vmatpush.msrb.mxu1 %v12593_v2  ;;  %9575 = vmatmul.msk.f32.vlgmr.msra.gmra.mxu0 %vm3260_vm11, %v12084_v13 }
 0x856   :  { %7143 = vmatpush.msra.mxu2 %v12593_v2  ;;  %9580 = vmatmul.msk.f32.vlgmr.msrb.gmra.mxu1 %vm3260_vm11, %v12134_v14 }
 0x857   :  { %7163 = vmatpush.msra.mxu3 %v12593_v2  ;;  %7180 = vmatpush.msrb.mxu0 %v12563_v37  ;;  %v5810_v15 = vpop.f32.mrf.mxu2 }
 0x858   :  { %7280 = vmatpush.msra.mxu1 %v12563_v37  ;;  %9577 = vmatmul.msk.f32.vlgmr.msra.gmra.mxu2 %vm3260_vm11, %v12101_v34  ;;  %v5902_v12 = vadd.f32 %v5879_v39, %v5810_v15  ;;  %v5833_v13 = vpop.f32.mrf.mxu3  ;;  %v5856_v48 = vpop.f32.mrf.mxu0  ;;  %v6407_v15 = vld [vmem:[#allocation2 + $0x26] sm:$0x3] }
 0x859   :  { %9578 = vmatmul.msk.f32.vlgmr.msra.gmra.mxu3 %vm3260_vm11, %v12117_v10  ;;  %7220 = vmatpush.msrb.mxu2 %v12563_v37  ;;  %v5903_v14 = vadd.f32 %v5880_v36, %v5833_v13  ;;  %v5904_v18 = vadd.f32 %v5881_v45, %v5856_v48  ;;  %v6025_v57 = vpop.f32.mrf.mxu1  ;;  %v6390_v10 = vld [vmem:[#allocation2 + $0x4] sm:$0x3] }
 0x85a   :  { %7181 = vmatpush.msrb.mxu0 %v12574_v44  ;;  %7240 = vmatpush.msrb.mxu3 %v12563_v37  ;;  %5925 = vst.msk [vmem:[#allocation2 + $0x28] sm:$0x3] %vm563_vm0, %v5902_v12  ;;  %v6416_v21 = vadd.f32 %v6393_v8, %v6025_v57 }
 0x85b   :  { %7281 = vmatpush.msra.mxu1 %v12574_v44  ;;  %7221 = vmatpush.msrb.mxu2 %v12574_v44  ;;  %5926 = vst.msk [vmem:[#allocation2 + $0x2a] sm:$0x3] %vm563_vm0, %v5903_v14 }
 0x85c   :  { %7182 = vmatpush.msrb.mxu0 %v12584_v29  ;;  %7241 = vmatpush.msrb.mxu3 %v12574_v44  ;;  %5927 = vst.msk [vmem:[#allocation2 + $0x2c] sm:$0x3] %vm563_vm0, %v5904_v18 }
 0x85d   :  { %7282 = vmatpush.msra.mxu1 %v12584_v29  ;;  %7222 = vmatpush.msrb.mxu2 %v12584_v29  ;;  %6439 = vst.msk [vmem:[#allocation2 + $0xa] sm:$0x3] %vm563_vm0, %v6416_v21 }
 0x85e   :  { %7183 = vmatpush.msrb.mxu0 %v12593_v2  ;;  %7242 = vmatpush.msrb.mxu3 %v12584_v29 }
 0x85f   :  { %7283 = vmatpush.msra.mxu1 %v12593_v2  ;;  %9579 = vmatmul.msk.f32.vlgmr.msrb.gmra.mxu0 %vm3260_vm11, %v12121_v33  ;;  %v5965_v34 = vpop.f32.mrf.mxu2  ;;  %v6397_v33 = vld [vmem:[#allocation2 + $0x12] sm:$0x3] }
 0x860   :  { %7223 = vmatpush.msrb.mxu2 %v12593_v2  ;;  %9584 = vmatmul.msk.f32.vlgmr.msra.gmra.mxu1 %vm3260_vm11, %v12170_v9  ;;  %v6413_v55 = vadd.f32 %v6390_v10, %v5965_v34  ;;  %v5985_v31 = vpop.f32.mrf.mxu3  ;;  %v6005_v60 = vpop.f32.mrf.mxu0 }
 0x861   :  { %7243 = vmatpush.msrb.mxu3 %v12593_v2  ;;  %7260 = vmatpush.msra.mxu0 %v12563_v37  ;;  %v6414_v5 = vadd.f32 %v6391_v41, %v5985_v31  ;;  %v6415_v7 = vadd.f32 %v6392_v32, %v6005_v60  ;;  %v6105_v63 = vpop.f32.mrf.mxu1  ;;  %v6408_v13 = vld [vmem:[#allocation2 + $0x28] sm:$0x3] }
 0x862   :  { %7360 = vmatpush.msrb.mxu1 %v12563_v37  ;;  %9581 = vmatmul.msk.f32.vlgmr.msrb.gmra.mxu2 %vm3260_vm11, %v12137_v17  ;;  %6436 = vst.msk [vmem:[#allocation2 + $0x4] sm:$0x3] %vm563_vm0, %v6413_v55  ;;  %v6420_v9 = vadd.f32 %v6397_v33, %v6105_v63  ;;  %v6409_v36 = vld [vmem:[#allocation2 + $0x2a] sm:$0x3] }
 0x863   :  { %9582 = vmatmul.msk.f32.vlgmr.msrb.gmra.mxu3 %vm3260_vm11, %v12153_v38  ;;  %7300 = vmatpush.msra.mxu2 %v12563_v37  ;;  %6437 = vst.msk [vmem:[#allocation2 + $0x6] sm:$0x3] %vm563_vm0, %v6414_v5  ;;  %v6394_v38 = vld [vmem:[#allocation2 + $0xc] sm:$0x3] }
 0x864   :  { %7261 = vmatpush.msra.mxu0 %v12574_v44  ;;  %7320 = vmatpush.msra.mxu3 %v12563_v37  ;;  %6438 = vst.msk [vmem:[#allocation2 + $0x8] sm:$0x3] %vm563_vm0, %v6415_v7  ;;  %v6410_v21 = vld [vmem:[#allocation2 + $0x2c] sm:$0x3] }
 0x865   :  { %7361 = vmatpush.msrb.mxu1 %v12574_v44  ;;  %7301 = vmatpush.msra.mxu2 %v12574_v44  ;;  %6443 = vst.msk [vmem:[#allocation2 + $0x12] sm:$0x3] %vm563_vm0, %v6420_v9 }
 0x866   :  { %7262 = vmatpush.msra.mxu0 %v12584_v29  ;;  %7321 = vmatpush.msra.mxu3 %v12574_v44 }
 0x867   :  { %7362 = vmatpush.msrb.mxu1 %v12584_v29  ;;  %7302 = vmatpush.msra.mxu2 %v12584_v29  ;;  %v6045_v17 = vpop.f32.mrf.mxu2 }
 0x868   :  { %7263 = vmatpush.msra.mxu0 %v12593_v2  ;;  %7322 = vmatpush.msra.mxu3 %v12584_v29  ;;  %v6417_v50 = vadd.f32 %v6394_v38, %v6045_v17  ;;  %v6065_v62 = vpop.f32.mrf.mxu3  ;;  %v6085_v58 = vpop.f32.mrf.mxu0  ;;  %v6922_v38 = vld [vmem:[#allocation2 + $0xa] sm:$0x3] }
 0x869   :  { %7363 = vmatpush.msrb.mxu1 %v12593_v2  ;;  %9583 = vmatmul.msk.f32.vlgmr.msra.gmra.mxu0 %vm3260_vm11, %v12157_v56  ;;  %v6418_v22 = vadd.f32 %v6395_v24, %v6065_v62  ;;  %v6419_v54 = vadd.f32 %v6396_v28, %v6085_v58  ;;  %v6185_v35 = vpop.f32.mrf.mxu1  ;;  %v6919_v31 = vld [vmem:[#allocation2 + $0x4] sm:$0x3] }
 0x86a   :  { %7303 = vmatpush.msra.mxu2 %v12593_v2  ;;  %9588 = vmatmul.msk.f32.vlgmr.msrb.gmra.mxu1 %vm3260_vm11, %v12218_v16  ;;  %6440 = vst.msk [vmem:[#allocation2 + $0xc] sm:$0x3] %vm563_vm0, %v6417_v50  ;;  %v6424_v0 = vadd.f32 %v6401_v26, %v6185_v35  ;;  %v6398_v16 = vld [vmem:[#allocation2 + $0x14] sm:$0x3] }
 0x86b   :  { %7323 = vmatpush.msra.mxu3 %v12593_v2  ;;  %7340 = vmatpush.msrb.mxu0 %v12563_v37  ;;  %6441 = vst.msk [vmem:[#allocation2 + $0xe] sm:$0x3] %vm563_vm0, %v6418_v22  ;;  %v6921_v33 = vld [vmem:[#allocation2 + $0x8] sm:$0x3] }
 0x86c   :  { %7440 = vmatpush.msra.mxu1 %v12563_v37  ;;  %9585 = vmatmul.msk.f32.vlgmr.msra.gmra.mxu2 %vm3260_vm11, %v12176_v53  ;;  %6442 = vst.msk [vmem:[#allocation2 + $0x10] sm:$0x3] %vm563_vm0, %v6419_v54 }
 0x86d   :  { %9586 = vmatmul.msk.f32.vlgmr.msra.gmra.mxu3 %vm3260_vm11, %v12201_v11  ;;  %7380 = vmatpush.msrb.mxu2 %v12563_v37  ;;  %6447 = vst.msk [vmem:[#allocation2 + $0x1a] sm:$0x3] %vm563_vm0, %v6424_v0 }
 0x86e   :  { %7341 = vmatpush.msrb.mxu0 %v12574_v44  ;;  %7400 = vmatpush.msrb.mxu3 %v12563_v37 }
 0x86f   :  { %7441 = vmatpush.msra.mxu1 %v12574_v44  ;;  %7381 = vmatpush.msrb.mxu2 %v12574_v44  ;;  %v6125_v56 = vpop.f32.mrf.mxu2 }
 0x870   :  { %7342 = vmatpush.msrb.mxu0 %v12584_v29  ;;  %7401 = vmatpush.msrb.mxu3 %v12574_v44  ;;  %v6421_v53 = vadd.f32 %v6398_v16, %v6125_v56  ;;  %v6145_v11 = vpop.f32.mrf.mxu3  ;;  %v6165_v20 = vpop.f32.mrf.mxu0  ;;  %v6926_v16 = vld [vmem:[#allocation2 + $0x12] sm:$0x3] }
 0x871   :  { %7442 = vmatpush.msra.mxu1 %v12584_v29  ;;  %7382 = vmatpush.msrb.mxu2 %v12584_v29  ;;  %v6422_v1 = vadd.f32 %v6399_v30, %v6145_v11  ;;  %v6423_v59 = vadd.f32 %v6400_v27, %v6165_v20  ;;  %v6265_v42 = vpop.f32.mrf.mxu1  ;;  %v6923_v62 = vld [vmem:[#allocation2 + $0xc] sm:$0x3] }
 0x872   :  { %7343 = vmatpush.msrb.mxu0 %v12593_v2  ;;  %7402 = vmatpush.msrb.mxu3 %v12584_v29  ;;  %6444 = vst.msk [vmem:[#allocation2 + $0x14] sm:$0x3] %vm563_vm0, %v6421_v53  ;;  %v6428_v4 = vadd.f32 %v6405_v40, %v6265_v42  ;;  %v6924_v5 = vld [vmem:[#allocation2 + $0xe] sm:$0x3] }
 0x873   :  { %7443 = vmatpush.msra.mxu1 %v12593_v2  ;;  %9587 = vmatmul.msk.f32.vlgmr.msrb.gmra.mxu0 %vm3260_vm11, %v12205_v6  ;;  %6445 = vst.msk [vmem:[#allocation2 + $0x16] sm:$0x3] %vm563_vm0, %v6422_v1  ;;  %v6925_v26 = vld [vmem:[#allocation2 + $0x10] sm:$0x3] }
 0x874   :  { %7383 = vmatpush.msrb.mxu2 %v12593_v2  ;;  %9592 = vmatmul.msk.f32.vlgmr.msra.gmra.mxu1 %vm3260_vm11, %v12255_v52  ;;  %6446 = vst.msk [vmem:[#allocation2 + $0x18] sm:$0x3] %vm563_vm0, %v6423_v59 }
 0x875   :  { %7403 = vmatpush.msrb.mxu3 %v12593_v2  ;;  %7420 = vmatpush.msra.mxu0 %v12563_v37  ;;  %6451 = vst.msk [vmem:[#allocation2 + $0x22] sm:$0x3] %vm563_vm0, %v6428_v4 }
 0x876   :  { %9589 = vmatmul.msk.f32.vlgmr.msrb.gmra.mxu2 %vm3260_vm11, %v12221_v49  ;;  %9590 = vmatmul.msk.f32.vlgmr.msrb.gmra.mxu3 %vm3260_vm11, %v12236_v43 }
 0x877   :  { %7421 = vmatpush.msra.mxu0 %v12574_v44  ;;  %v6205_v6 = vpop.f32.mrf.mxu2  ;;  %v6406_v44 = vld [vmem:[#allocation2 + $0x24] sm:$0x3] }
 0x878   :  { %v6425_v23 = vadd.f32 %v6402_v47, %v6205_v6  ;;  %v6225_v52 = vpop.f32.mrf.mxu3  ;;  %v6245_v61 = vpop.f32.mrf.mxu0  ;;  %v6930_v47 = vld [vmem:[#allocation2 + $0x1a] sm:$0x3] }
 0x879   :  { %7422 = vmatpush.msra.mxu0 %v12584_v29  ;;  %v6426_v37 = vadd.f32 %v6403_v3, %v6225_v52  ;;  %v6427_v51 = vadd.f32 %v6404_v25, %v6245_v61  ;;  %v6345_v39 = vpop.f32.mrf.mxu1  ;;  %v6927_v11 = vld [vmem:[#allocation2 + $0x14] sm:$0x3] }
 0x87a   :  { %6448 = vst.msk [vmem:[#allocation2 + $0x1c] sm:$0x3] %vm563_vm0, %v6425_v23  ;;  %v6432_v49 = vadd.f32 %v6409_v36, %v6345_v39  ;;  %v6928_v22 = vld [vmem:[#allocation2 + $0x16] sm:$0x3] }
 0x87b   :  { %7423 = vmatpush.msra.mxu0 %v12593_v2  ;;  %6449 = vst.msk [vmem:[#allocation2 + $0x1e] sm:$0x3] %vm563_vm0, %v6426_v37  ;;  %v6920_v2 = vld [vmem:[#allocation2 + $0x6] sm:$0x3]  ;;  %v6929_v40 = vld [vmem:[#allocation2 + $0x18] sm:$0x3] }
 0x87c   :  { %9591 = vmatmul.msk.f32.vlgmr.msra.gmra.mxu0 %vm3260_vm11, %v12240_v19  ;;  %6450 = vst.msk [vmem:[#allocation2 + $0x20] sm:$0x3] %vm563_vm0, %v6427_v51  ;;  %v6411_v19 = vld [vmem:[#allocation2 + $0x2e] sm:$0x3]  ;;  %vm8054_vm11 = vcmask 1047559  }
 0x87d   :  { %6455 = vst.msk [vmem:[#allocation2 + $0x2a] sm:$0x3] %vm563_vm0, %v6432_v49 }
 0x881   :  { %v6285_v43 = vpop.f32.mrf.mxu2  ;;  %v6931_v52 = vld [vmem:[#allocation2 + $0x1c] sm:$0x3] }
 0x882   :  { %v6429_v29 = vadd.f32 %v6406_v44, %v6285_v43  ;;  %v6305_v45 = vpop.f32.mrf.mxu3  ;;  %v6325_v12 = vpop.f32.mrf.mxu0  ;;  %v6932_v1 = vld [vmem:[#allocation2 + $0x1e] sm:$0x3]  ;;  %v6934_v44 = vld [vmem:[#allocation2 + $0x22] sm:$0x3] }
 0x883   :  { %v6430_v48 = vadd.f32 %v6407_v15, %v6305_v45  ;;  %v6431_v14 = vadd.f32 %v6408_v13, %v6325_v12  ;;  %v6495_v18 = vpop.f32.mrf.mxu1  ;;  %v6933_v36 = vld [vmem:[#allocation2 + $0x20] sm:$0x3] }
 0x884   :  { %6452 = vst.msk [vmem:[#allocation2 + $0x24] sm:$0x3] %vm563_vm0, %v6429_v29  ;;  %v6943_v57 = vadd.f32 %v6920_v2, %v6495_v18 }
 0x885   :  { %6453 = vst.msk [vmem:[#allocation2 + $0x26] sm:$0x3] %vm563_vm0, %v6430_v48 }
 0x886   :  { %6454 = vst.msk [vmem:[#allocation2 + $0x28] sm:$0x3] %vm563_vm0, %v6431_v14 }
 0x887   :  { %6966 = vst.msk [vmem:[#allocation2 + $0x6] sm:$0x3] %vm563_vm0, %v6943_v57 }
 0x88b   :  { %v6365_v8 = vpop.f32.mrf.mxu2  ;;  %v6935_v45 = vld [vmem:[#allocation2 + $0x24] sm:$0x3] }
 0x88c   :  { %v6433_v34 = vadd.f32 %v6410_v21, %v6365_v8  ;;  %v6385_v10 = vpop.f32.mrf.mxu3  ;;  %v6475_v55 = vpop.f32.mrf.mxu0  ;;  %v6936_v37 = vld [vmem:[#allocation2 + $0x26] sm:$0x3]  ;;  %v6938_v8 = vld [vmem:[#allocation2 + $0x2a] sm:$0x3] }
 0x88d   :  { %v6434_v41 = vadd.f32 %v6411_v19, %v6385_v10  ;;  %v6942_v60 = vadd.f32 %v6919_v31, %v6475_v55  ;;  %v6575_v32 = vpop.f32.mrf.mxu1  ;;  %v6937_v2 = vld [vmem:[#allocation2 + $0x28] sm:$0x3] }
 0x88e   :  { %6456 = vst.msk [vmem:[#allocation2 + $0x2c] sm:$0x3] %vm563_vm0, %v6433_v34  ;;  %v6947_v7 = vadd.f32 %v6924_v5, %v6575_v32  ;;  %v6941_v32 = vld [vmem:[#allocation2 + $0x30] sm:$0x3] }
 0x88f   :  { %6457 = vst.msk [vmem:[#allocation2 + $0x2e] sm:$0x3] %vm563_vm0, %v6434_v41 }
 0x890   :  { %6965 = vst.msk [vmem:[#allocation2 + $0x4] sm:$0x3] %vm563_vm0, %v6942_v60 }
 0x891   :  { %6970 = vst.msk [vmem:[#allocation2 + $0xe] sm:$0x3] %vm563_vm0, %v6947_v7  ;;  %v7519_v7 = vld [vmem:[#allocation2 + $0x2] sm:$0x3] }
 0x895   :  { %v6515_v63 = vpop.f32.mrf.mxu2  ;;  %v6939_v34 = vld [vmem:[#allocation2 + $0x2c] sm:$0x3] }
 0x896   :  { %v6944_v9 = vadd.f32 %v6921_v33, %v6515_v63  ;;  %v6535_v17 = vpop.f32.mrf.mxu3  ;;  %v6555_v50 = vpop.f32.mrf.mxu0  ;;  %v6940_v48 = vld [vmem:[#allocation2 + $0x2e] sm:$0x3] }
 0x897   :  { %v6945_v24 = vadd.f32 %v6922_v38, %v6535_v17  ;;  %v6946_v58 = vadd.f32 %v6923_v62, %v6555_v50  ;;  %v6655_v28 = vpop.f32.mrf.mxu1  ;;  %v12805_v50 = vld [vmem:[%s12067_s19] ss:$0 sm:$0xff] }
 0x898   :  { %6967 = vst.msk [vmem:[#allocation2 + $0x8] sm:$0x3] %vm563_vm0, %v6944_v9  ;;  %v6951_v54 = vadd.f32 %v6928_v22, %v6655_v28  ;;  %v7449_v9 = vld [vmem:[#allocation2 + $0x6] sm:$0x3]  ;;  %v7518_v22 = vld [vmem:[#allocation2] sm:$0x3] }
 0x899   :  { %6968 = vst.msk [vmem:[#allocation2 + $0xa] sm:$0x3] %vm563_vm0, %v6945_v24 }
 0x89a   :  { %6969 = vst.msk [vmem:[#allocation2 + $0xc] sm:$0x3] %vm563_vm0, %v6946_v58 }
 0x89b   :  { %6974 = vst.msk [vmem:[#allocation2 + $0x16] sm:$0x3] %vm563_vm0, %v6951_v54 }
 0x89f   :  { %v6595_v35 = vpop.f32.mrf.mxu2  ;;  %v7450_v38 = vld [vmem:[#allocation2 + $0x8] sm:$0x3] }
 0x8a0   :  { %v6948_v0 = vadd.f32 %v6925_v26, %v6595_v35  ;;  %v6615_v56 = vpop.f32.mrf.mxu3  ;;  %v6635_v53 = vpop.f32.mrf.mxu0  ;;  %v7451_v41 = vld [vmem:[#allocation2 + $0xa] sm:$0x3]  ;;  %v7520_v35 = vld [vmem:[#allocation2 + $0x4] sm:$0x3]  ;;  %v12809_v26 = vadd.f32 %v12805_v50, %v7519_v7 }
 0x8a1   :  { %v6949_v30 = vadd.f32 %v6926_v16, %v6615_v56  ;;  %v6950_v20 = vadd.f32 %v6927_v11, %v6635_v53  ;;  %v6735_v27 = vpop.f32.mrf.mxu1  ;;  %v12818_v56 = vadd.f32 %v12805_v50, %v7520_v35 }
 0x8a2   :  { %6971 = vst.msk [vmem:[#allocation2 + $0x10] sm:$0x3] %vm563_vm0, %v6948_v0  ;;  %v6955_v59 = vadd.f32 %v6932_v1, %v6735_v27  ;;  %v12814_v0 = vadd.f32 %v12805_v50, %v7518_v22  ;;  %v7577_v16 = vsel %vm563_vm0, %v12809_v26, 0.0 }
 0x8a3   :  { %6972 = vst.msk [vmem:[#allocation2 + $0x12] sm:$0x3] %vm563_vm0, %v6949_v30  ;;  %v7452_v30 = vld [vmem:[#allocation2 + $0xc] sm:$0x3] }
 0x8a4   :  { %6973 = vst.msk [vmem:[#allocation2 + $0x14] sm:$0x3] %vm563_vm0, %v6950_v20  ;;  %v7576_v53 = vsel %vm563_vm0, %v12814_v0, 0.0  ;;  %v7579_v20 = vsel %vm563_vm0, %v12818_v56, 0.0 }
 0x8a5   :  { %6978 = vst.msk [vmem:[#allocation2 + $0x1e] sm:$0x3] %vm563_vm0, %v6955_v59  ;;  %v7578_v27 = vadd.f32 %v7577_v16, %v7576_v53 }
 0x8a9   :  { %v6675_v42 = vpop.f32.mrf.mxu2 }
 0x8aa   :  { %v6952_v4 = vadd.f32 %v6929_v40, %v6675_v42  ;;  %v6695_v6 = vpop.f32.mrf.mxu3  ;;  %v6715_v23 = vpop.f32.mrf.mxu0  ;;  %v7455_v28 = vld [vmem:[#allocation2 + $0x12] sm:$0x3]  ;;  %v7453_v40 = vld [vmem:[#allocation2 + $0xe] sm:$0x3] }
 0x8ab   :  { %v6953_v3 = vadd.f32 %v6930_v47, %v6695_v6  ;;  %v6954_v61 = vadd.f32 %v6931_v52, %v6715_v23  ;;  %v6815_v25 = vpop.f32.mrf.mxu1  ;;  %v7454_v6 = vld [vmem:[#allocation2 + $0x10] sm:$0x3] }
 0x8ac   :  { %6975 = vst.msk [vmem:[#allocation2 + $0x18] sm:$0x3] %vm563_vm0, %v6952_v4  ;;  %v6959_v51 = vadd.f32 %v6936_v37, %v6815_v25 }
 0x8ad   :  { %6976 = vst.msk [vmem:[#allocation2 + $0x1a] sm:$0x3] %vm563_vm0, %v6953_v3 }
 0x8ae   :  { %6977 = vst.msk [vmem:[#allocation2 + $0x1c] sm:$0x3] %vm563_vm0, %v6954_v61 }
 0x8af   :  { %6982 = vst.msk [vmem:[#allocation2 + $0x26] sm:$0x3] %vm563_vm0, %v6959_v51 }
 0x8b3   :  { %v6755_v39 = vpop.f32.mrf.mxu2 }
 0x8b4   :  { %v6956_v49 = vadd.f32 %v6933_v36, %v6755_v39  ;;  %v6775_v43 = vpop.f32.mrf.mxu3  ;;  %v6795_v29 = vpop.f32.mrf.mxu0  ;;  %v7459_v25 = vld [vmem:[#allocation2 + $0x1a] sm:$0x3]  ;;  %v7580_v39 = vadd.f32 %v7579_v20, %v7578_v27  ;;  %v7461_v27 = vld [vmem:[#allocation2 + $0x1e] sm:$0x3] }
 0x8b5   :  { %v6957_v15 = vadd.f32 %v6934_v44, %v6775_v43  ;;  %v6958_v12 = vadd.f32 %v6935_v45, %v6795_v29  ;;  %v6895_v13 = vpop.f32.mrf.mxu1  ;;  %v7460_v35 = vld [vmem:[#allocation2 + $0x1c] sm:$0x3] }
 0x8b6   :  { %6979 = vst.msk [vmem:[#allocation2 + $0x20] sm:$0x3] %vm563_vm0, %v6956_v49  ;;  %v6963_v14 = vadd.f32 %v6940_v48, %v6895_v13  ;;  %v7456_v13 = vld [vmem:[#allocation2 + $0x14] sm:$0x3]  ;;  %v7457_v48 = vld [vmem:[#allocation2 + $0x16] sm:$0x3] }
 0x8b7   :  { %6980 = vst.msk [vmem:[#allocation2 + $0x22] sm:$0x3] %vm563_vm0, %v6957_v15 }
 0x8b8   :  { %6981 = vst.msk [vmem:[#allocation2 + $0x24] sm:$0x3] %vm563_vm0, %v6958_v12 }
 0x8b9   :  { %6986 = vst.msk [vmem:[#allocation2 + $0x2e] sm:$0x3] %vm563_vm0, %v6963_v14 }
 0x8bd   :  { %v6835_v18 = vpop.f32.mrf.mxu2 }
 0x8be   :  { %v6960_v57 = vadd.f32 %v6937_v2, %v6835_v18  ;;  %v6855_v19 = vpop.f32.mrf.mxu3  ;;  %v6875_v21 = vpop.f32.mrf.mxu0 }
 0x8bf   :  { %v6961_v10 = vadd.f32 %v6938_v8, %v6855_v19  ;;  %v6962_v55 = vadd.f32 %v6939_v34, %v6875_v21  ;;  %v7045_v31 = vpop.f32.mrf.mxu1  ;;  %v7458_v21 = vld [vmem:[#allocation2 + $0x18] sm:$0x3] }
 0x8c0   :  { %6983 = vst.msk [vmem:[#allocation2 + $0x28] sm:$0x3] %vm563_vm0, %v6960_v57  ;;  %v7474_v60 = vadd.f32 %v7451_v41, %v7045_v31 }
 0x8c1   :  { %6984 = vst.msk [vmem:[#allocation2 + $0x2a] sm:$0x3] %vm563_vm0, %v6961_v10 }
 0x8c2   :  { %6985 = vst.msk [vmem:[#allocation2 + $0x2c] sm:$0x3] %vm563_vm0, %v6962_v55 }
 0x8c3   :  { %7497 = vst.msk [vmem:[#allocation2 + $0xa] sm:$0x3] %vm563_vm0, %v7474_v60 }
 0x8c7   :  { %v6915_v5 = vpop.f32.mrf.mxu2 }
 0x8c8   :  { %v6964_v63 = vadd.f32 %v6941_v32, %v6915_v5  ;;  %v7005_v33 = vpop.f32.mrf.mxu3  ;;  %v7025_v17 = vpop.f32.mrf.mxu0  ;;  %v7463_v32 = vld [vmem:[#allocation2 + $0x22] sm:$0x3] }
 0x8c9   :  { %v7472_v62 = vadd.f32 %v7449_v9, %v7005_v33  ;;  %v7473_v24 = vadd.f32 %v7450_v38, %v7025_v17  ;;  %v7125_v58 = vpop.f32.mrf.mxu1 }
 0x8ca   :  { %6987 = vst.msk [vmem:[#allocation2 + $0x30] sm:$0x3] %vm563_vm0, %v6964_v63  ;;  %v7478_v54 = vadd.f32 %v7455_v28, %v7125_v58  ;;  %v7523_v36 = vld [vmem:[#allocation2 + $0xa] sm:$0x3] }
 0x8cb   :  { %7495 = vst.msk [vmem:[#allocation2 + $0x6] sm:$0x3] %vm563_vm0, %v7472_v62  ;;  %v12839_v44 = vadd.f32 %v12805_v50, %v7523_v36 }
 0x8cc   :  { %7496 = vst.msk [vmem:[#allocation2 + $0x8] sm:$0x3] %vm563_vm0, %v7473_v24 }
 0x8cd   :  { %7501 = vst.msk [vmem:[#allocation2 + $0x12] sm:$0x3] %vm563_vm0, %v7478_v54  ;;  %v7585_v14 = vsel %vm563_vm0, %v12839_v44, 0.0 }
 0x8d1   :  { %v7065_v11 = vpop.f32.mrf.mxu2 }
 0x8d2   :  { %v7521_v1 = vld [vmem:[#allocation2 + $0x6] sm:$0x3]  ;;  %v7475_v59 = vadd.f32 %v7452_v30, %v7065_v11  ;;  %v7085_v42 = vpop.f32.mrf.mxu3  ;;  %v7105_v4 = vpop.f32.mrf.mxu0 }
 0x8d3   :  { %v12827_v47 = vadd.f32 %v12805_v50, %v7521_v1  ;;  %v7522_v23 = vld [vmem:[#allocation2 + $0x8] sm:$0x3]  ;;  %v7476_v52 = vadd.f32 %v7453_v40, %v7085_v42  ;;  %v7477_v3 = vadd.f32 %v7454_v6, %v7105_v4  ;;  %v7205_v61 = vpop.f32.mrf.mxu1 }
 0x8d4   :  { %v12830_v37 = vadd.f32 %v12805_v50, %v7522_v23  ;;  %7498 = vst.msk [vmem:[#allocation2 + $0xc] sm:$0x3] %vm563_vm0, %v7475_v59  ;;  %v7482_v51 = vadd.f32 %v7459_v25, %v7205_v61  ;;  %v7527_v34 = vld [vmem:[#allocation2 + $0x12] sm:$0x3]  ;;  %v7462_v59 = vld [vmem:[#allocation2 + $0x20] sm:$0x3] }
 0x8d5   :  { %7499 = vst.msk [vmem:[#allocation2 + $0xe] sm:$0x3] %vm563_vm0, %v7476_v52  ;;  %v7581_v49 = vsel %vm563_vm0, %v12827_v47, 0.0  ;;  %v12859_v17 = vadd.f32 %v12805_v50, %v7527_v34  ;;  %v7465_v34 = vld [vmem:[#allocation2 + $0x26] sm:$0x3] }
 0x8d6   :  { %7500 = vst.msk [vmem:[#allocation2 + $0x10] sm:$0x3] %vm563_vm0, %v7477_v3  ;;  %v7582_v43 = vadd.f32 %v7581_v49, %v7580_v39  ;;  %v7583_v29 = vsel %vm563_vm0, %v12830_v37, 0.0  ;;  %v7467_v3 = vld [vmem:[#allocation2 + $0x2a] sm:$0x3] }
 0x8d7   :  { %7505 = vst.msk [vmem:[#allocation2 + $0x1a] sm:$0x3] %vm563_vm0, %v7482_v51  ;;  %v7593_v28 = vsel %vm563_vm0, %v12859_v17, 0.0 }
 0x8d8   :  { %v7584_v45 = vadd.f32 %v7583_v29, %v7582_v43 }
 0x8da   :  { %v7586_v5 = vadd.f32 %v7585_v14, %v7584_v45  ;;  %v7471_v14 = vld [vmem:[#allocation2 + $0x32] sm:$0x3] }
 0x8db   :  { %v7524_v15 = vld [vmem:[#allocation2 + $0xc] sm:$0x3]  ;;  %v7145_v12 = vpop.f32.mrf.mxu2 }
 0x8dc   :  { %v12846_v18 = vadd.f32 %v12805_v50, %v7524_v15  ;;  %v7525_v2 = vld [vmem:[#allocation2 + $0xe] sm:$0x3]  ;;  %v7479_v57 = vadd.f32 %v7456_v13, %v7145_v12  ;;  %v7165_v19 = vpop.f32.mrf.mxu3  ;;  %v7185_v8 = vpop.f32.mrf.mxu0 }
 0x8dd   :  { %v12849_v10 = vadd.f32 %v12805_v50, %v7525_v2  ;;  %v7526_v55 = vld [vmem:[#allocation2 + $0x10] sm:$0x3]  ;;  %v7480_v31 = vadd.f32 %v7457_v48, %v7165_v19  ;;  %v7481_v41 = vadd.f32 %v7458_v21, %v7185_v8  ;;  %v7285_v60 = vpop.f32.mrf.mxu1  ;;  %v7464_v48 = vld [vmem:[#allocation2 + $0x24] sm:$0x3] }
 0x8de   :  { %v7587_v7 = vsel %vm563_vm0, %v12846_v18, 0.0  ;;  %v12854_v63 = vadd.f32 %v12805_v50, %v7526_v55  ;;  %7502 = vst.msk [vmem:[#allocation2 + $0x14] sm:$0x3] %vm563_vm0, %v7479_v57  ;;  %v7486_v33 = vadd.f32 %v7463_v32, %v7285_v60  ;;  %v7531_v42 = vld [vmem:[#allocation2 + $0x1a] sm:$0x3] }
 0x8df   :  { %7503 = vst.msk [vmem:[#allocation2 + $0x16] sm:$0x3] %vm563_vm0, %v7480_v31  ;;  %v7588_v9 = vadd.f32 %v7587_v7, %v7586_v5  ;;  %v7589_v38 = vsel %vm563_vm0, %v12849_v10, 0.0  ;;  %v12883_v36 = vadd.f32 %v12805_v50, %v7531_v42  ;;  %v7466_v31 = vld [vmem:[#allocation2 + $0x28] sm:$0x3] }
 0x8e0   :  { %7504 = vst.msk [vmem:[#allocation2 + $0x18] sm:$0x3] %vm563_vm0, %v7481_v41  ;;  %v7591_v24 = vsel %vm563_vm0, %v12854_v63, 0.0 }
 0x8e1   :  { %7509 = vst.msk [vmem:[#allocation2 + $0x22] sm:$0x3] %vm563_vm0, %v7486_v33  ;;  %v7590_v62 = vadd.f32 %v7589_v38, %v7588_v9  ;;  %v7601_v15 = vsel %vm563_vm0, %v12883_v36, 0.0 }
 0x8e3   :  { %v7592_v58 = vadd.f32 %v7591_v24, %v7590_v62 }
 0x8e5   :  { %v7528_v22 = vld [vmem:[#allocation2 + $0x14] sm:$0x3]  ;;  %v7225_v54 = vpop.f32.mrf.mxu2  ;;  %v7594_v16 = vadd.f32 %v7593_v28, %v7592_v58 }
 0x8e6   :  { %v12870_v53 = vadd.f32 %v12805_v50, %v7528_v22  ;;  %v7529_v11 = vld [vmem:[#allocation2 + $0x16] sm:$0x3]  ;;  %v7483_v30 = vadd.f32 %v7460_v35, %v7225_v54  ;;  %v7245_v20 = vpop.f32.mrf.mxu3  ;;  %v7265_v1 = vpop.f32.mrf.mxu0 }
 0x8e7   :  { %v12873_v40 = vadd.f32 %v12805_v50, %v7529_v11  ;;  %v7530_v4 = vld [vmem:[#allocation2 + $0x18] sm:$0x3]  ;;  %v7484_v6 = vadd.f32 %v7461_v27, %v7245_v20  ;;  %v7485_v23 = vadd.f32 %v7462_v59, %v7265_v1  ;;  %v7365_v52 = vpop.f32.mrf.mxu1  ;;  %v7468_v20 = vld [vmem:[#allocation2 + $0x2c] sm:$0x3]  ;;  %v7469_v1 = vld [vmem:[#allocation2 + $0x2e] sm:$0x3] }
 0x8e8   :  { %v7595_v61 = vsel %vm563_vm0, %v12870_v53, 0.0  ;;  %v12878_v25 = vadd.f32 %v12805_v50, %v7530_v4  ;;  %7506 = vst.msk [vmem:[#allocation2 + $0x1c] sm:$0x3] %vm563_vm0, %v7483_v30  ;;  %v7490_v51 = vadd.f32 %v7467_v3, %v7365_v52  ;;  %v7535_v41 = vld [vmem:[#allocation2 + $0x22] sm:$0x3] }
 0x8e9   :  { %7507 = vst.msk [vmem:[#allocation2 + $0x1e] sm:$0x3] %vm563_vm0, %v7484_v6  ;;  %v7596_v39 = vadd.f32 %v7595_v61, %v7594_v16  ;;  %v7597_v49 = vsel %vm563_vm0, %v12873_v40, 0.0  ;;  %v12907_v58 = vadd.f32 %v12805_v50, %v7535_v41  ;;  %v7470_v3 = vld [vmem:[#allocation2 + $0x30] sm:$0x3] }
 0x8ea   :  { %7508 = vst.msk [vmem:[#allocation2 + $0x20] sm:$0x3] %vm563_vm0, %v7485_v23  ;;  %v7599_v29 = vsel %vm563_vm0, %v12878_v25, 0.0 }
 0x8eb   :  { %7513 = vst.msk [vmem:[#allocation2 + $0x2a] sm:$0x3] %vm563_vm0, %v7490_v51  ;;  %v7598_v43 = vadd.f32 %v7597_v49, %v7596_v39  ;;  %v7609_v16 = vsel %vm563_vm0, %v12907_v58, 0.0 }
 0x8ed   :  { %v7600_v45 = vadd.f32 %v7599_v29, %v7598_v43 }
 0x8ef   :  { %v7532_v12 = vld [vmem:[#allocation2 + $0x1c] sm:$0x3]  ;;  %v7305_v13 = vpop.f32.mrf.mxu2  ;;  %v7602_v2 = vadd.f32 %v7601_v15, %v7600_v45 }
 0x8f0   :  { %v12894_v57 = vadd.f32 %v12805_v50, %v7532_v12  ;;  %v7533_v19 = vld [vmem:[#allocation2 + $0x1e] sm:$0x3]  ;;  %v7487_v8 = vadd.f32 %v7464_v48, %v7305_v13  ;;  %v7325_v21 = vpop.f32.mrf.mxu3  ;;  %v7345_v55 = vpop.f32.mrf.mxu0 }
 0x8f1   :  { %v12897_v60 = vadd.f32 %v12805_v50, %v7533_v19  ;;  %v7534_v32 = vld [vmem:[#allocation2 + $0x20] sm:$0x3]  ;;  %v7488_v5 = vadd.f32 %v7465_v34, %v7325_v21  ;;  %v7489_v7 = vadd.f32 %v7466_v31, %v7345_v55  ;;  %v7445_v33 = vpop.f32.mrf.mxu1 }
 0x8f2   :  { %v7603_v9 = vsel %vm563_vm0, %v12894_v57, 0.0  ;;  %v12902_v38 = vadd.f32 %v12805_v50, %v7534_v32  ;;  %7510 = vst.msk [vmem:[#allocation2 + $0x24] sm:$0x3] %vm563_vm0, %v7487_v8  ;;  %v7494_v62 = vadd.f32 %v7471_v14, %v7445_v33  ;;  %v7539_v61 = vld [vmem:[#allocation2 + $0x2a] sm:$0x3] }
 0x8f3   :  { %7511 = vst.msk [vmem:[#allocation2 + $0x26] sm:$0x3] %vm563_vm0, %v7488_v5  ;;  %v7604_v24 = vadd.f32 %v7603_v9, %v7602_v2  ;;  %v7605_v28 = vsel %vm563_vm0, %v12897_v60, 0.0  ;;  %v12931_v15 = vadd.f32 %v12805_v50, %v7539_v61 }
 0x8f4   :  { %7512 = vst.msk [vmem:[#allocation2 + $0x28] sm:$0x3] %vm563_vm0, %v7489_v7  ;;  %v7607_v54 = vsel %vm563_vm0, %v12902_v38, 0.0 }
 0x8f5   :  { %7517 = vst.msk [vmem:[#allocation2 + $0x32] sm:$0x3] %vm563_vm0, %v7494_v62  ;;  %v7606_v22 = vadd.f32 %v7605_v28, %v7604_v24  ;;  %v7617_v2 = vsel %vm563_vm0, %v12931_v15, 0.0 }
 0x8f7   :  { %v7608_v35 = vadd.f32 %v7607_v54, %v7606_v22 }
 0x8f9   :  { %v7536_v11 = vld [vmem:[#allocation2 + $0x24] sm:$0x3]  ;;  %v7385_v30 = vpop.f32.mrf.mxu2  ;;  %v7405_v27 = vpop.f32.mrf.mxu3  ;;  %v7610_v59 = vadd.f32 %v7609_v16, %v7608_v35 }
 0x8fa   :  { %v12918_v42 = vadd.f32 %v12805_v50, %v7536_v11  ;;  %v7537_v4 = vld [vmem:[#allocation2 + $0x26] sm:$0x3]  ;;  %v7491_v6 = vadd.f32 %v7468_v20, %v7385_v30  ;;  %v7492_v23 = vadd.f32 %v7469_v1, %v7405_v27  ;;  %v7425_v52 = vpop.f32.mrf.mxu0  ;;  %v13986_v1 = vld [vmem:[#allocation4_spill] sm:$0xff] }
 0x8fb   :  { %v12921_v51 = vadd.f32 %v12805_v50, %v7537_v4  ;;  %v7538_v39 = vld [vmem:[#allocation2 + $0x28] sm:$0x3]  ;;  %v7493_v49 = vadd.f32 %v7470_v3, %v7425_v52 }
 0x8fc   :  { %v7611_v43 = vsel %vm563_vm0, %v12918_v42, 0.0  ;;  %v12926_v29 = vadd.f32 %v12805_v50, %v7538_v39  ;;  %7514 = vst.msk [vmem:[#allocation2 + $0x2c] sm:$0x3] %vm563_vm0, %v7491_v6  ;;  %v7543_v55 = vld [vmem:[#allocation2 + $0x32] sm:$0x3] }
 0x8fd   :  { %7515 = vst.msk [vmem:[#allocation2 + $0x2e] sm:$0x3] %vm563_vm0, %v7492_v23  ;;  %v7612_v45 = vadd.f32 %v7611_v43, %v7610_v59  ;;  %v7613_v12 = vsel %vm563_vm0, %v12921_v51, 0.0  ;;  %v12952_v33 = vadd.f32 %v12805_v50, %v7543_v55 }
 0x8fe   :  { %7516 = vst.msk [vmem:[#allocation2 + $0x30] sm:$0x3] %vm563_vm0, %v7493_v49  ;;  %v7615_v48 = vsel %vm563_vm0, %v12926_v29, 0.0 }
 0x8ff   :  { %v7614_v13 = vadd.f32 %v7613_v12, %v7612_v45  ;;  %v7625_v22 = vsel %vm563_vm0, %v12952_v33, 0.0 }
 0x901   :  { %v7616_v14 = vadd.f32 %v7615_v48, %v7614_v13 }
 0x903   :  { %v7540_v19 = vld [vmem:[#allocation2 + $0x2c] sm:$0x3]  ;;  %v7618_v8 = vadd.f32 %v7617_v2, %v7616_v14 }
 0x904   :  { %v12941_v21 = vadd.f32 %v12805_v50, %v7540_v19  ;;  %v7541_v34 = vld [vmem:[#allocation2 + $0x2e] sm:$0x3] }
 0x905   :  { %v12944_v31 = vadd.f32 %v12805_v50, %v7541_v34  ;;  %v7542_v41 = vld [vmem:[#allocation2 + $0x30] sm:$0x3] }
 0x906   :  { %v7619_v32 = vsel %vm563_vm0, %v12941_v21, 0.0  ;;  %v12949_v5 = vadd.f32 %v12805_v50, %v7542_v41 }
 0x907   :  { %v7620_v7 = vadd.f32 %v7619_v32, %v7618_v8  ;;  %v7621_v9 = vsel %vm563_vm0, %v12944_v31, 0.0 }
 0x908   :  { %v7623_v24 = vsel %vm563_vm0, %v12949_v5, 0.0 }
 0x909   :  { %v7622_v62 = vadd.f32 %v7621_v9, %v7620_v7 }
 0x90b   :  { %v7624_v28 = vadd.f32 %v7623_v24, %v7622_v62 }
 0x90d   :  { %v7626_v54 = vadd.f32 %v7625_v22, %v7624_v28 }
 0x90f   :  { %v7627_v35 = vsel %vm563_vm0, %v7626_v54, 0.0 }
 0x910   :  { %v7628_v16 = vrot.slane %v7627_v35, 4 }
 0x912   :  { %v7629_v11 = vadd.f32 %v7628_v16, %v7627_v35 }
 0x914   :  { %v7630_v30 = vrot.slane %v7629_v11, 2 }
 0x916   :  { %v7631_v20 = vadd.f32 %v7630_v30, %v7629_v11 }
 0x918   :  { %v7632_v50 = vrot.slane %v7631_v20, 1 }
 0x91a   :  { %v7633_v27 = vadd.f32 %v7632_v50, %v7631_v20 }
 0x91c   :  { %v12962_v59 = vmul.f32 %v7633_v27, %v13986_v1 }
 0x91e   :  { %v12966_v4 = vsub.f32 %v12814_v0, %v12962_v59  ;;  %v12970_v6 = vsub.f32 %v12809_v26, %v12962_v59  ;;  %v12974_v23 = vsub.f32 %v12818_v56, %v12962_v59  ;;  %v12978_v52 = vsub.f32 %v12827_v47, %v12962_v59 }
 0x91f   :  { %v12986_v0 = vsub.f32 %v12830_v37, %v12962_v59  ;;  %v12992_v56 = vsub.f32 %v12839_v44, %v12962_v59  ;;  %v13000_v45 = vsub.f32 %v12846_v18, %v12962_v59  ;;  %v13007_v44 = vsub.f32 %v12849_v10, %v12962_v59 }
 0x920   :  { %v7661_v3 = vmul.f32 %v12966_v4, %v12966_v4  ;;  %v7662_v61 = vmul.f32 %v12970_v6, %v12970_v6  ;;  %v7663_v26 = vmul.f32 %v12974_v23, %v12974_v23  ;;  %v7664_v47 = vmul.f32 %v12978_v52, %v12978_v52 }
 0x921   :  { %v7665_v37 = vmul.f32 %v12986_v0, %v12986_v0  ;;  %v7666_v48 = vmul.f32 %v12992_v56, %v12992_v56  ;;  %v13014_v18 = vsub.f32 %v12854_v63, %v12962_v59  ;;  %v7667_v19 = vmul.f32 %v13000_v45, %v13000_v45 }
 0x922   :  { %v7687_v39 = vsel %vm563_vm0, %v7661_v3, 0.0  ;;  %v7688_v49 = vsel %vm563_vm0, %v7662_v61, 0.0  ;;  %v7690_v12 = vsel %vm563_vm0, %v7663_v26, 0.0  ;;  %v7692_v14 = vsel %vm563_vm0, %v7664_v47, 0.0 }
 0x923   :  { %v7689_v43 = vadd.f32 %v7688_v49, %v7687_v39  ;;  %v7694_v8 = vsel %vm563_vm0, %v7665_v37, 0.0  ;;  %v13021_v10 = vsub.f32 %v12859_v17, %v12962_v59  ;;  %v7668_v55 = vmul.f32 %v13007_v44, %v13007_v44 }
 0x924   :  { %v7696_v41 = vsel %vm563_vm0, %v7666_v48, 0.0  ;;  %v13028_v63 = vsub.f32 %v12870_v53, %v12962_v59  ;;  %v7669_v7 = vmul.f32 %v13014_v18, %v13014_v18  ;;  %v7698_v9 = vsel %vm563_vm0, %v7667_v19, 0.0 }
 0x925   :  { %v7691_v13 = vadd.f32 %v7690_v12, %v7689_v43  ;;  %v13035_v17 = vsub.f32 %v12873_v40, %v12962_v59  ;;  %v7670_v24 = vmul.f32 %v13021_v10, %v13021_v10  ;;  %v7700_v28 = vsel %vm563_vm0, %v7668_v55, 0.0 }
 0x926   :  { %v13042_v53 = vsub.f32 %v12878_v25, %v12962_v59  ;;  %v7671_v54 = vmul.f32 %v13028_v63, %v13028_v63  ;;  %v7702_v35 = vsel %vm563_vm0, %v7669_v7, 0.0  ;;  %v13049_v40 = vsub.f32 %v12883_v36, %v12962_v59 }
 0x927   :  { %v7693_v2 = vadd.f32 %v7692_v14, %v7691_v13  ;;  %v7672_v11 = vmul.f32 %v13035_v17, %v13035_v17  ;;  %v7704_v30 = vsel %vm563_vm0, %v7670_v24, 0.0  ;;  %v13056_v25 = vsub.f32 %v12894_v57, %v12962_v59 }
 0x928   :  { %v7673_v50 = vmul.f32 %v13042_v53, %v13042_v53  ;;  %v7706_v27 = vsel %vm563_vm0, %v7671_v54, 0.0  ;;  %v13063_v36 = vsub.f32 %v12897_v60, %v12962_v59  ;;  %v7674_v61 = vmul.f32 %v13049_v40, %v13049_v40 }
 0x929   :  { %v7695_v34 = vadd.f32 %v7694_v8, %v7693_v2  ;;  %v7708_v26 = vsel %vm563_vm0, %v7672_v11, 0.0  ;;  %v13070_v57 = vsub.f32 %v12902_v38, %v12962_v59  ;;  %v7675_v39 = vmul.f32 %v13056_v25, %v13056_v25 }
 0x92a   :  { %v7710_v49 = vsel %vm563_vm0, %v7673_v50, 0.0  ;;  %v13077_v60 = vsub.f32 %v12907_v58, %v12962_v59  ;;  %v7676_v37 = vmul.f32 %v13063_v36, %v13063_v36  ;;  %v7712_v12 = vsel %vm563_vm0, %v7674_v61, 0.0 }
 0x92b   :  { %v7697_v32 = vadd.f32 %v7696_v41, %v7695_v34  ;;  %v13084_v38 = vsub.f32 %v12918_v42, %v12962_v59  ;;  %v7677_v48 = vmul.f32 %v13070_v57, %v13070_v57  ;;  %v7714_v14 = vsel %vm563_vm0, %v7675_v39, 0.0 }
 0x92c   :  { %v13091_v58 = vsub.f32 %v12921_v51, %v12962_v59  ;;  %v7678_v19 = vmul.f32 %v13077_v60, %v13077_v60  ;;  %v7716_v8 = vsel %vm563_vm0, %v7676_v37, 0.0  ;;  %v13098_v42 = vsub.f32 %v12926_v29, %v12962_v59 }
 0x92d   :  { %v7699_v62 = vadd.f32 %v7698_v9, %v7697_v32  ;;  %v7679_v55 = vmul.f32 %v13084_v38, %v13084_v38  ;;  %v7718_v41 = vsel %vm563_vm0, %v7677_v48, 0.0  ;;  %v13105_v51 = vsub.f32 %v12931_v15, %v12962_v59 }
 0x92e   :  { %v7680_v7 = vmul.f32 %v13091_v58, %v13091_v58  ;;  %v7720_v9 = vsel %vm563_vm0, %v7678_v19, 0.0  ;;  %v13112_v29 = vsub.f32 %v12941_v21, %v12962_v59  ;;  %v7681_v24 = vmul.f32 %v13098_v42, %v13098_v42 }
 0x92f   :  { %v7701_v22 = vadd.f32 %v7700_v28, %v7699_v62  ;;  %v7722_v28 = vsel %vm563_vm0, %v7679_v55, 0.0  ;;  %v13119_v15 = vsub.f32 %v12944_v31, %v12962_v59  ;;  %v7682_v54 = vmul.f32 %v13105_v51, %v13105_v51 }
 0x930   :  { %v13126_v21 = vsub.f32 %v12949_v5, %v12962_v59  ;;  %v7683_v11 = vmul.f32 %v13112_v29, %v13112_v29  ;;  %v13133_v31 = vsub.f32 %v12952_v33, %v12962_v59 }
 0x931   :  { %v7703_v16 = vadd.f32 %v7702_v35, %v7701_v22  ;;  %v7724_v35 = vsel %vm563_vm0, %v7680_v7, 0.0  ;;  %v7684_v50 = vmul.f32 %v13119_v15, %v13119_v15 }
 0x932   :  { %v7685_v5 = vmul.f32 %v13126_v21, %v13126_v21  ;;  %v7730_v61 = vsel %vm563_vm0, %v7683_v11, 0.0 }
 0x933   :  { %v7705_v20 = vadd.f32 %v7704_v30, %v7703_v16  ;;  %v7726_v30 = vsel %vm563_vm0, %v7681_v24, 0.0  ;;  %v7732_v39 = vsel %vm563_vm0, %v7684_v50, 0.0 }
 0x934   :  { %v7734_v33 = vsel %vm563_vm0, %v7685_v5, 0.0 }
 0x935   :  { %v7707_v3 = vadd.f32 %v7706_v27, %v7705_v20  ;;  %v7728_v27 = vsel %vm563_vm0, %v7682_v54, 0.0 }
 0x937   :  { %v7709_v47 = vadd.f32 %v7708_v26, %v7707_v3 }
 0x939   :  { %v7711_v43 = vadd.f32 %v7710_v49, %v7709_v47  ;;  %v7686_v47 = vmul.f32 %v13133_v31, %v13133_v31 }
 0x93b   :  { %v7713_v13 = vadd.f32 %v7712_v12, %v7711_v43  ;;  %v7736_v43 = vsel %vm563_vm0, %v7686_v47, 0.0 }
 0x93d   :  { %v7715_v2 = vadd.f32 %v7714_v14, %v7713_v13 }
 0x93f   :  { %v7717_v34 = vadd.f32 %v7716_v8, %v7715_v2 }
 0x941   :  { %v7719_v32 = vadd.f32 %v7718_v41, %v7717_v34 }
 0x943   :  { %v7721_v62 = vadd.f32 %v7720_v9, %v7719_v32 }
 0x945   :  { %v7723_v22 = vadd.f32 %v7722_v28, %v7721_v62  ;;  %v13149_v28 = vld [vmem:[%s12768_s23] ss:$0 sm:$0xff] }
 0x947   :  { %v7725_v16 = vadd.f32 %v7724_v35, %v7723_v22  ;;  %v13156_v35 = vld [vmem:[%s12773_s27] ss:$0 sm:$0xff] }
 0x949   :  { %v7727_v20 = vadd.f32 %v7726_v30, %v7725_v16 }
 0x94b   :  { %v7729_v3 = vadd.f32 %v7728_v27, %v7727_v20 }
 0x94d   :  { %v7731_v26 = vadd.f32 %v7730_v61, %v7729_v3 }
 0x94f   :  { %v7733_v49 = vadd.f32 %v7732_v39, %v7731_v26 }
 0x951   :  { %v7735_v59 = vadd.f32 %v7734_v33, %v7733_v49  ;;  %v13187_v33 = vld [vmem:[%s12778_s1] ss:$0 sm:$0xff] }
 0x953   :  { %v7737_v37 = vadd.f32 %v7736_v43, %v7735_v59 }
 0x955   :  { %v7738_v12 = vsel %vm563_vm0, %v7737_v37, 0.0 }
 0x956   :  { %v7739_v13 = vrot.slane %v7738_v12, 4 }
 0x958   :  { %v7740_v48 = vadd.f32 %v7739_v13, %v7738_v12 }
 0x95a   :  { %v7741_v14 = vrot.slane %v7740_v48, 2 }
 0x95c   :  { %v7742_v2 = vadd.f32 %v7741_v14, %v7740_v48 }
 0x95e   :  { %v7743_v19 = vrot.slane %v7742_v2, 1 }
 0x960   :  { %v7744_v8 = vadd.f32 %v7743_v19, %v7742_v2 }
 0x962   :  { %v7745_v34 = vmul.f32 %v7744_v8, %v13986_v1 }
 0x964   :  { %v7746_v55 = vadd.f32 1e-05, %v7745_v34 }
 0x966   :  { %9973 = vrsqrt.f32 %v7746_v55  ;;  %vm7753_vm2 = vweird.f32 %v7746_v55 }
 0x96c   :  { %v9974_v41 = vpop.eup %9973 }
 0x96d   :  { %v7748_v32 = vmul.f32 %v9974_v41, %v7746_v55  ;;  %vm7754_vm1 = vweird.f32 %v9974_v41 }
 0x96e   :  { %vm7755_vm3 = vmor %vm7753_vm2, %vm7754_vm1 }
 0x96f   :  { %v7749_v7 = vmul.f32 %v9974_v41, %v7748_v32 }
 0x971   :  { %v7750_v9 = vmul.f32 0.5, %v7749_v7 }
 0x973   :  { %v7751_v62 = vsub.f32 1.5, %v7750_v9 }
 0x975   :  { %v7752_v24 = vmul.f32 %v9974_v41, %v7751_v62 }
 0x977   :  { %v13151_v22 = vsel %vm7755_vm3, %v9974_v41, %v7752_v24 }
 0x978   :  { %v7759_v54 = vmul.f32 %v13151_v22, %v12974_v23  ;;  %v7758_v1 = vmul.f32 %v13151_v22, %v12970_v6  ;;  %v7757_v16 = vmul.f32 %v13151_v22, %v12966_v4  ;;  %v7763_v11 = vmul.f32 %v13151_v22, %v13000_v45 }
 0x979   :  { %v7762_v30 = vmul.f32 %v13151_v22, %v12992_v56  ;;  %v7760_v20 = vmul.f32 %v13151_v22, %v12978_v52  ;;  %v7766_v61 = vmul.f32 %v13151_v22, %v13021_v10  ;;  %v7765_v47 = vmul.f32 %v13151_v22, %v13014_v18 }
 0x97a   :  { %v7788_v50 = vmul.f32 %v13149_v28, %v7759_v54  ;;  %v7787_v23 = vmul.f32 %v13149_v28, %v7758_v1  ;;  %v7786_v27 = vmul.f32 %v13149_v28, %v7757_v16  ;;  %v7792_v6 = vmul.f32 %v13149_v28, %v7763_v11 }
 0x97b   :  { %v7791_v4 = vmul.f32 %v13149_v28, %v7762_v30  ;;  %v7789_v5 = vmul.f32 %v13149_v28, %v7760_v20  ;;  %v7761_v49 = vmul.f32 %v13151_v22, %v12986_v0  ;;  %v7795_v59 = vmul.f32 %v13149_v28, %v7766_v61 }
 0x97c   :  { %v7817_v3 = vadd.f32 %v13156_v35, %v7788_v50  ;;  %v7816_v45 = vadd.f32 %v13156_v35, %v7787_v23  ;;  %v7815_v56 = vadd.f32 %v13156_v35, %v7786_v27  ;;  %v7821_v52 = vadd.f32 %v13156_v35, %v7792_v6 }
 0x97d   :  { %v7820_v26 = vadd.f32 %v13156_v35, %v7791_v4  ;;  %v7818_v39 = vadd.f32 %v13156_v35, %v7789_v5  ;;  %v7794_v10 = vmul.f32 %v13149_v28, %v7765_v47  ;;  %v7790_v37 = vmul.f32 %v13149_v28, %v7761_v49 }
 0x97e   :  { %9975 = vtanh.f32 %v7817_v3  ;;  %v7824_v48 = vadd.f32 %v13156_v35, %v7795_v59  ;;  %v7769_v14 = vmul.f32 %v13151_v22, %v13042_v53  ;;  %v7768_v34 = vmul.f32 %v13151_v22, %v13035_v17 }
 0x97f   :  { %9977 = vtanh.f32 %v7816_v45  ;;  %v7823_v8 = vadd.f32 %v13156_v35, %v7794_v10  ;;  %v7819_v32 = vadd.f32 %v13156_v35, %v7790_v37  ;;  %v7764_v53 = vmul.f32 %v13151_v22, %v13007_v44 }
 0x980   :  { %9979 = vtanh.f32 %v7815_v56  ;;  %v7798_v17 = vmul.f32 %v13149_v28, %v7769_v14  ;;  %v7797_v54 = vmul.f32 %v13149_v28, %v7768_v34  ;;  %v7772_v30 = vmul.f32 %v13151_v22, %v13063_v36 }
 0x981   :  { %9981 = vtanh.f32 %v7821_v52  ;;  %v7793_v1 = vmul.f32 %v13149_v28, %v7764_v53  ;;  %v7771_v23 = vmul.f32 %v13151_v22, %v13056_v25  ;;  %v7767_v3 = vmul.f32 %v13151_v22, %v13028_v63 }
 0x982   :  { %9983 = vtanh.f32 %v7820_v26  ;;  %v7827_v11 = vadd.f32 %v13156_v35, %v7798_v17  ;;  %v7826_v50 = vadd.f32 %v13156_v35, %v7797_v54  ;;  %v7775_v56 = vmul.f32 %v13151_v22, %v13084_v38 }
 0x983   :  { %9985 = vtanh.f32 %v7818_v39  ;;  %v7822_v4 = vadd.f32 %v13156_v35, %v7793_v1  ;;  %v7801_v25 = vmul.f32 %v13149_v28, %v7772_v30  ;;  %v7781_v52 = vmul.f32 %v13151_v22, %v13126_v21 }
 0x984   :  { %v13191_v43 = vpop.eup %9975  ;;  %9987 = vtanh.f32 %v7824_v48  ;;  %v7800_v61 = vmul.f32 %v13149_v28, %v7771_v23  ;;  %v7796_v38 = vmul.f32 %v13149_v28, %v7767_v3  ;;  %v7804_v39 = vmul.f32 %v13149_v28, %v7775_v56 }
 0x985   :  { %v13194_v18 = vpop.eup %9977  ;;  %v7882_v12 = vmul.f32 %v13191_v43, %v13187_v33  ;;  %9989 = vtanh.f32 %v7823_v8  ;;  %v7777_v21 = vmul.f32 %v13151_v22, %v13098_v42  ;;  %v7830_v49 = vadd.f32 %v13156_v35, %v7801_v25 }
 0x986   :  { %v13198_v13 = vpop.eup %9979  ;;  %v7881_v0 = vmul.f32 %v13194_v18, %v13187_v33  ;;  %9991 = vtanh.f32 %v7819_v32  ;;  %v7810_v59 = vmul.f32 %v13149_v28, %v7781_v52  ;;  %v7780_v10 = vmul.f32 %v13151_v22, %v13119_v15 }
 0x987   :  { %v7912_v2 = vsel %vm563_vm0, %v7882_v12, 0.0  ;;  %v7880_v19 = vmul.f32 %v13198_v13, %v13187_v33  ;;  %v13211_v55 = vpop.eup %9981  ;;  %9993 = vtanh.f32 %v7827_v11  ;;  %v7829_v12 = vadd.f32 %v13156_v35, %v7800_v61 }
 0x988   :  { %7913 = vadd.xlane.f32.xlu1 %v7912_v2  ;;  %v7909_v41 = vsel %vm563_vm0, %v7881_v0, 0.0  ;;  %v13217_v7 = vpop.eup %9983  ;;  %v7886_v24 = vmul.f32 %v13211_v55, %v13187_v33  ;;  %9995 = vtanh.f32 %v7826_v50  ;;  %v7774_v0 = vmul.f32 %v13151_v22, %v13077_v60 }
 0x989   :  { %7910 = vadd.xlane.f32.xlu0 %v7909_v41  ;;  %v7906_v9 = vsel %vm563_vm0, %v7880_v19, 0.0  ;;  %v13220_v62 = vpop.eup %9985  ;;  %v7885_v44 = vmul.f32 %v13217_v7, %v13187_v33  ;;  %9997 = vtanh.f32 %v7822_v4  ;;  %v7825_v42 = vadd.f32 %v13156_v35, %v7796_v38 }
 0x98a   :  { %7907 = vadd.xlane.f32.xlu2 %v7906_v9  ;;  %v7883_v16 = vmul.f32 %v13220_v62, %v13187_v33  ;;  %v7924_v20 = vsel %vm563_vm0, %v7886_v24, 0.0  ;;  %v13238_v27 = vpop.eup %9987  ;;  %v7770_v2 = vmul.f32 %v13151_v22, %v13049_v40  ;;  %v7833_v8 = vadd.f32 %v13156_v35, %v7804_v39 }
 0x98b   :  { %v7921_v6 = vsel %vm563_vm0, %v7885_v44, 0.0  ;;  %v13244_v45 = vpop.eup %9989  ;;  %v7889_v63 = vmul.f32 %v13238_v27, %v13187_v33  ;;  %v7806_v34 = vmul.f32 %v13149_v28, %v7777_v21  ;;  %v7779_v60 = vmul.f32 %v13151_v22, %v13112_v29  ;;  %v13336_v21 = vld [vmem:[%s12778_s1 + $0x1] ss:$0 sm:$0xff] }
 0x98c   :  { %v7915_v36 = vsel %vm563_vm0, %v7883_v16, 0.0  ;;  %v13249_v5 = vpop.eup %9991  ;;  %v7888_v26 = vmul.f32 %v13244_v45, %v13187_v33  ;;  %9999 = vtanh.f32 %v7830_v49  ;;  %v7839_v32 = vadd.f32 %v13156_v35, %v7810_v59 }
 0x98d   :  { %v7884_v47 = vmul.f32 %v13249_v5, %v13187_v33  ;;  %v7933_v37 = vsel %vm563_vm0, %v7889_v63, 0.0  ;;  %v13273_v48 = vpop.eup %9993  ;;  %v7809_v40 = vmul.f32 %v13149_v28, %v7780_v10  ;;  %v7782_v53 = vmul.f32 %v13151_v22, %v13133_v31 }
 0x98e   :  { %v7930_v14 = vsel %vm563_vm0, %v7888_v26, 0.0  ;;  %v13279_v19 = vpop.eup %9995  ;;  %v7892_v9 = vmul.f32 %v13273_v48, %v13187_v33  ;;  %10001 = vtanh.f32 %v7829_v12  ;;  %v7803_v17 = vmul.f32 %v13149_v28, %v7774_v0 }
 0x98f   :  { %v7918_v15 = vsel %vm563_vm0, %v7884_v47, 0.0  ;;  %v13286_v41 = vpop.eup %9997  ;;  %v7808_v24 = vmul.f32 %v13149_v28, %v7779_v60  ;;  %v7891_v29 = vmul.f32 %v13279_v19, %v13187_v33  ;;  %10003 = vtanh.f32 %v7825_v42 }
 0x990   :  { %7925 = vadd.xlane.f32.xlu1 %v7924_v20  ;;  %v7799_v54 = vmul.f32 %v13149_v28, %v7770_v2  ;;  %v7811_v44 = vmul.f32 %v13149_v28, %v7782_v53  ;;  %v7887_v1 = vmul.f32 %v13286_v41, %v13187_v33  ;;  %10005 = vtanh.f32 %v7833_v8 }
 0x991   :  { %7922 = vadd.xlane.f32.xlu0 %v7921_v6  ;;  %v7835_v31 = vadd.f32 %v13156_v35, %v7806_v34  ;;  %v7837_v16 = vadd.f32 %v13156_v35, %v7808_v24  ;;  %v7778_v11 = vmul.f32 %v13151_v22, %v13105_v51  ;;  %10007 = vtanh.f32 %v7839_v32 }
 0x992   :  { %7916 = vadd.xlane.f32.xlu2 %v7915_v36  ;;  %v7838_v30 = vadd.f32 %v13156_v35, %v7809_v40  ;;  %v7840_v20 = vadd.f32 %v13156_v35, %v7811_v44  ;;  %v7942_v50 = vsel %vm563_vm0, %v7892_v9, 0.0  ;;  %v7832_v23 = vadd.f32 %v13156_v35, %v7803_v17  ;;  %v13310_v6 = vpop.eup %9999 }
 0x993   :  { %10009 = vtanh.f32 %v7837_v16  ;;  %v7939_v4 = vsel %vm563_vm0, %v7891_v29, 0.0  ;;  %v7828_v3 = vadd.f32 %v13156_v35, %v7799_v54  ;;  %v7773_v51 = vmul.f32 %v13151_v22, %v13070_v57 }
 0x994   :  { %10011 = vtanh.f32 %v7840_v20  ;;  %v13316_v36 = vpop.eup %10001  ;;  %v7927_v56 = vsel %vm563_vm0, %v7887_v1, 0.0  ;;  %v7807_v52 = vmul.f32 %v13149_v28, %v7778_v11  ;;  %v7895_v61 = vmul.f32 %v13310_v6, %v13187_v33  ;;  %v13397_v11 = vld [vmem:[%s12778_s1 + $0x2] ss:$0 sm:$0xff] }
 0x995   :  { %10013 = vtanh.f32 %v7835_v31  ;;  %v13319_v25 = vpop.eup %10003  ;;  %v7894_v26 = vmul.f32 %v13316_v36, %v13187_v33  ;;  %v7802_v38 = vmul.f32 %v13149_v28, %v7773_v51 }
 0x996   :  { %10015 = vtanh.f32 %v7838_v30  ;;  %v13322_v63 = vpop.eup %10005  ;;  %v7890_v39 = vmul.f32 %v13319_v25, %v13187_v33  ;;  %v7836_v59 = vadd.f32 %v13156_v35, %v7807_v52  ;;  %v7951_v12 = vsel %vm563_vm0, %v7895_v61, 0.0 }
 0x997   :  { %10017 = vtanh.f32 %v7832_v23  ;;  %v13326_v57 = vpop.eup %10007  ;;  %v7948_v42 = vsel %vm563_vm0, %v7894_v26, 0.0  ;;  %v7831_v2 = vadd.f32 %v13156_v35, %v7802_v38  ;;  %v13427_v38 = vld [vmem:[%s12778_s1 + $0x3] ss:$0 sm:$0xff] }
 0x998   :  { %7934 = vadd.xlane.f32.xlu1 %v7933_v37  ;;  %10019 = vtanh.f32 %v7828_v3  ;;  %v7936_v34 = vsel %vm563_vm0, %v7890_v39, 0.0  ;;  %v13367_v32 = vmul.f32 %v13326_v57, %v13336_v21  ;;  %v13416_v51 = vmul.f32 %v13326_v57, %v13397_v11 }
 0x999   :  { %7931 = vadd.xlane.f32.xlu0 %v7930_v14  ;;  %v13331_v47 = vpop.eup %10009  ;;  %10021 = vtanh.f32 %v7836_v59  ;;  %v7904_v52 = vmul.f32 %v13326_v57, %v13187_v33 }
 0x99a   :  { %7919 = vadd.xlane.f32.xlu2 %v7918_v15  ;;  %v13338_v49 = vpop.eup %10011  ;;  %v13343_v10 = vmul.f32 %v13331_v47, %v13187_v33  ;;  %v7776_v15 = vmul.f32 %v13151_v22, %v13091_v58  ;;  %v7898_v22 = vmul.f32 %v13322_v63, %v13187_v33  ;;  %10023 = vtanh.f32 %v7831_v2 }
 0x99b   :  { %v13345_v37 = vpop.eup %10013  ;;  %v13350_v0 = vmul.f32 %v13338_v49, %v13187_v33  ;;  %v13363_v60 = vmul.f32 %v13338_v49, %v13336_v21  ;;  %v7978_v39 = vsel %vm563_vm0, %v7904_v52, 0.0  ;;  %v8088_v2 = vmul.f32 %v13194_v18, %v13336_v21 }
 0x99c   :  { %v13352_v14 = vpop.eup %10015  ;;  %v13373_v58 = vmul.f32 %v13345_v37, %v13336_v21  ;;  %v7805_v17 = vmul.f32 %v13149_v28, %v7776_v15  ;;  %v7960_v29 = vsel %vm563_vm0, %v7898_v22, 0.0  ;;  %v7900_v30 = vmul.f32 %v13345_v37, %v13187_v33 }
 0x99d   :  { %v13358_v8 = vpop.eup %10017  ;;  %v13379_v53 = vmul.f32 %v13352_v14, %v13336_v21  ;;  %v7903_v61 = vmul.f32 %v13352_v14, %v13187_v33  ;;  %v13444_v15 = vmul.f32 %v13316_v36, %v13427_v38  ;;  %v13450_v22 = vmul.f32 %v13310_v6, %v13427_v38 }
 0x99e   :  { %v13369_v40 = vpop.eup %10019  ;;  %v7897_v9 = vmul.f32 %v13358_v8, %v13187_v33  ;;  %v7834_v1 = vadd.f32 %v13156_v35, %v7805_v17  ;;  %v8092_v52 = vmul.f32 %v13217_v7, %v13336_v21 }
 0x99f   :  { %v7893_v24 = vmul.f32 %v13369_v40, %v13187_v33  ;;  %v13387_v54 = vpop.eup %10021  ;;  %v7975_v59 = vsel %vm563_vm0, %v7903_v61, 0.0 }
 0x9a0   :  { %7943 = vadd.xlane.f32.xlu1 %v7942_v50  ;;  %v7957_v44 = vsel %vm563_vm0, %v7897_v9, 0.0  ;;  %v13392_v16 = vpop.eup %10023  ;;  %v7901_v28 = vmul.f32 %v13387_v54, %v13187_v33  ;;  %10025 = vtanh.f32 %v7834_v1  ;;  %v13406_v50 = vmul.f32 %v13338_v49, %v13397_v11 }
 0x9a1   :  { %7940 = vadd.xlane.f32.xlu0 %v7939_v4  ;;  %v7945_v31 = vsel %vm563_vm0, %v7893_v24, 0.0  ;;  %v7896_v20 = vmul.f32 %v13392_v16, %v13187_v33  ;;  %v13410_v23 = vmul.f32 %v13387_v54, %v13397_v11  ;;  %v7966_v4 = vsel %vm563_vm0, %v7900_v30, 0.0 }
 0x9a2   :  { %7928 = vadd.xlane.f32.xlu2 %v7927_v56  ;;  %v7969_v35 = vsel %vm563_vm0, %v7901_v28, 0.0  ;;  %v8116_v9 = vsel %vm563_vm0, %v8088_v2, 0.0  ;;  %v7972_v24 = vsel %vm563_vm0, %v13343_v10, 0.0  ;;  %v8094_v10 = vmul.f32 %v13286_v41, %v13336_v21 }
 0x9a3   :  { %v7954_v3 = vsel %vm563_vm0, %v7896_v20, 0.0  ;;  %v8093_v28 = vmul.f32 %v13211_v55, %v13336_v21  ;;  %v8089_v30 = vmul.f32 %v13191_v43, %v13336_v21  ;;  %v8095_v2 = vmul.f32 %v13244_v45, %v13336_v21 }
 0x9a4   :  { %v8134_v20 = vsel %vm563_vm0, %v8094_v10, 0.0 }
 0x9a6   :  { %v13418_v56 = vpop.eup %10025 }
 0x9a7   :  { %v7899_v26 = vmul.f32 %v13418_v56, %v13187_v33  ;;  %v13440_v33 = vmul.f32 %v13352_v14, %v13427_v38  ;;  %v8106_v10 = vmul.f32 %v13418_v56, %v13336_v21 }
 0x9a8   :  { %7952 = vadd.xlane.f32.xlu1 %v7951_v12 }
 0x9a9   :  { %7949 = vadd.xlane.f32.xlu0 %v7948_v42  ;;  %v7963_v12 = vsel %vm563_vm0, %v7899_v26, 0.0  ;;  %v13434_v42 = vmul.f32 %v13326_v57, %v13427_v38  ;;  %v13454_v57 = vmul.f32 %v13338_v49, %v13427_v38 }
 0x9aa   :  { %7937 = vadd.xlane.f32.xlu2 %v7936_v34  ;;  %v8087_v34 = vmul.f32 %v13198_v13, %v13336_v21 }
 0x9ac   :  { %v8113_v17 = vsel %vm563_vm0, %v8087_v34, 0.0 }
 0x9b0   :  { %7961 = vadd.xlane.f32.xlu1 %v7960_v29  ;;  %v8091_v29 = vmul.f32 %v13249_v5, %v13336_v21 }
 0x9b1   :  { %7958 = vadd.xlane.f32.xlu0 %v7957_v44  ;;  %v8090_v44 = vmul.f32 %v13220_v62, %v13336_v21 }
 0x9b2   :  { %7946 = vadd.xlane.f32.xlu2 %v7945_v31  ;;  %v8125_v1 = vsel %vm563_vm0, %v8091_v29, 0.0  ;;  %v7981_v31 = vsel %vm563_vm0, %v13350_v0, 0.0  ;;  %v8097_v0 = vmul.f32 %v13319_v25, %v13336_v21  ;;  %v8102_v29 = vmul.f32 %v13310_v6, %v13336_v21 }
 0x9b3   :  { %v8122_v49 = vsel %vm563_vm0, %v8090_v44, 0.0  ;;  %v8098_v44 = vmul.f32 %v13279_v19, %v13336_v21 }
 0x9b4   :  { %v8143_v61 = vsel %vm563_vm0, %v8097_v0, 0.0 }
 0x9b8   :  { %7970 = vadd.xlane.f32.xlu1 %v7969_v35  ;;  %v8131_v35 = vsel %vm563_vm0, %v8093_v28, 0.0  ;;  %v8105_v28 = vmul.f32 %v13322_v63, %v13336_v21 }
 0x9b9   :  { %7967 = vadd.xlane.f32.xlu0 %v7966_v4  ;;  %v8119_v4 = vsel %vm563_vm0, %v8089_v30, 0.0  ;;  %v8101_v30 = vmul.f32 %v13316_v36, %v13336_v21 }
 0x9ba   :  { %7955 = vadd.xlane.f32.xlu2 %v7954_v3  ;;  %v8096_v3 = vmul.f32 %v13238_v27, %v13336_v21 }
 0x9bc   :  { %v8140_v26 = vsel %vm563_vm0, %v8096_v3, 0.0  ;;  %v8109_v3 = vmul.f32 %v13331_v47, %v13336_v21 }
 0x9c0   :  { %7979 = vadd.xlane.f32.xlu1 %v7978_v39  ;;  %v8128_v39 = vsel %vm563_vm0, %v8092_v52, 0.0 }
 0x9c1   :  { %7976 = vadd.xlane.f32.xlu0 %v7975_v59  ;;  %v8100_v59 = vmul.f32 %v13369_v40, %v13336_v21 }
 0x9c2   :  { %7964 = vadd.xlane.f32.xlu2 %v7963_v12  ;;  %v8099_v12 = vmul.f32 %v13273_v48, %v13336_v21 }
 0x9c3   :  { %v8152_v34 = vsel %vm563_vm0, %v8100_v59, 0.0  ;;  %v8179_v59 = vsel %vm563_vm0, %v8109_v3, 0.0 }
 0x9c8   :  { %8117 = vadd.xlane.f32.xlu1 %v8116_v9  ;;  %v8149_v9 = vsel %vm563_vm0, %v8099_v12, 0.0  ;;  %v8014_v12 = vlaneseq }
 0x9c9   :  { %8114 = vadd.xlane.f32.xlu0 %v8113_v17  ;;  %v8137_v17 = vsel %vm563_vm0, %v8095_v2, 0.0 }
 0x9ca   :  { %7973 = vadd.xlane.f32.xlu2 %v7972_v24  ;;  %v8103_v24 = vmul.f32 %v13392_v16, %v13336_v21 }
 0x9d0   :  { %8126 = vadd.xlane.f32.xlu1 %v8125_v1  ;;  %v8161_v1 = vsel %vm563_vm0, %v8103_v24, 0.0 }
 0x9d1   :  { %8123 = vadd.xlane.f32.xlu0 %v8122_v49  ;;  %v8158_v49 = vsel %vm563_vm0, %v8102_v29, 0.0 }
 0x9d2   :  { %7982 = vadd.xlane.f32.xlu2 %v7981_v31  ;;  %v8146_v31 = vsel %vm563_vm0, %v8098_v44, 0.0  ;;  %v8188_v44 = vsel %vm563_vm0, %v13363_v60, 0.0  ;;  %v8286_v60 = vmul.f32 %v13191_v43, %v13397_v11 }
 0x9d4   :  { %v8316_v3 = vsel %vm563_vm0, %v8286_v60, 0.0 }
 0x9d8   :  { %8135 = vadd.xlane.f32.xlu1 %v8134_v20  ;;  %v8170_v20 = vsel %vm563_vm0, %v8106_v10, 0.0 }
 0x9d9   :  { %8132 = vadd.xlane.f32.xlu0 %v8131_v35  ;;  %v8167_v35 = vsel %vm563_vm0, %v8105_v28, 0.0 }
 0x9da   :  { %8120 = vadd.xlane.f32.xlu2 %v8119_v4  ;;  %v8155_v4 = vsel %vm563_vm0, %v8101_v30, 0.0 }
 0x9e0   :  { %8144 = vadd.xlane.f32.xlu1 %v8143_v61  ;;  %v8108_v61 = vmul.f32 %v13387_v54, %v13336_v21 }
 0x9e1   :  { %8141 = vadd.xlane.f32.xlu0 %v8140_v26 }
 0x9e2   :  { %8129 = vadd.xlane.f32.xlu2 %v8128_v39  ;;  %v8104_v39 = vmul.f32 %v13358_v8, %v13336_v21  ;;  %v8176_v2 = vsel %vm563_vm0, %v8108_v61, 0.0 }
 0x9e8   :  { %8153 = vadd.xlane.f32.xlu1 %v8152_v34  ;;  %v8164_v34 = vsel %vm563_vm0, %v8104_v39, 0.0  ;;  %v8182_v39 = vsel %vm563_vm0, %v13379_v53, 0.0  ;;  %v8284_v53 = vmul.f32 %v13198_v13, %v13397_v11 }
 0x9e9   :  { %8150 = vadd.xlane.f32.xlu0 %v8149_v9 }
 0x9ea   :  { %8138 = vadd.xlane.f32.xlu2 %v8137_v17  ;;  %v13536_v17 = vand.u32 127, %v8014_v12 }
 0x9f0   :  { %8162 = vadd.xlane.f32.xlu1 %v8161_v1 }
 0x9f1   :  { %8159 = vadd.xlane.f32.xlu0 %v8158_v49  ;;  %v8185_v49 = vsel %vm563_vm0, %v13367_v32, 0.0  ;;  %v8285_v32 = vmul.f32 %v13194_v18, %v13397_v11 }
 0x9f2   :  { %8147 = vadd.xlane.f32.xlu2 %v8146_v31  ;;  %v8173_v31 = vsel %vm563_vm0, %v13373_v58, 0.0 }
 0x9f3   :  { %v8313_v61 = vsel %vm563_vm0, %v8285_v32, 0.0 }
 0x9f8   :  { %8171 = vadd.xlane.f32.xlu1 %v8170_v20 }
 0x9f9   :  { %8168 = vadd.xlane.f32.xlu0 %v8167_v35 }
 0x9fa   :  { %8156 = vadd.xlane.f32.xlu2 %v8155_v4 }
 0x9fb   :  { %v7914_v0 = vpop.xlane.xlu1 %7913 }
 0x9fc   :  { %v7911_v52 = vpop.xlane.xlu0 %7910  ;;  %v8018_v10 = vperm.slane %v7914_v0, %v13536_v17 }
 0x9fd   :  { %v7908_v26 = vpop.xlane.xlu2 %7907  ;;  %v8017_v21 = vperm.slane %v7911_v52, %v13536_v17 }
 0x9fe   :  { %v8016_v1 = vperm.slane %v7908_v26, %v13536_v17 }
 0xa00   :  { %8180 = vadd.xlane.f32.xlu1 %v8179_v59  ;;  %v8043_v30 = vsel %vm8042_vm5, %v8017_v21, %v8016_v1 }
 0xa01   :  { %8177 = vadd.xlane.f32.xlu0 %v8176_v2  ;;  %v8045_v0 = vsel %vm8044_vm6, %v8018_v10, %v8043_v30  ;;  %v8289_v2 = vmul.f32 %v13217_v7, %v13397_v11 }
 0xa02   :  { %8165 = vadd.xlane.f32.xlu2 %v8164_v34 }
 0xa03   :  { %v7926_v9 = vpop.xlane.xlu1 %7925  ;;  %v8325_v10 = vsel %vm563_vm0, %v8289_v2, 0.0 }
 0xa04   :  { %v7923_v24 = vpop.xlane.xlu0 %7922  ;;  %v8022_v21 = vperm.slane %v7926_v9, %v13536_v17  ;;  %v8310_v9 = vsel %vm563_vm0, %v8284_v53, 0.0 }
 0xa05   :  { %v7917_v29 = vpop.xlane.xlu2 %7916  ;;  %v8021_v59 = vperm.slane %v7923_v24, %v13536_v17  ;;  %v7984_v24 = vld [vmem:[%s13504_s5] sm:$0xff] }
 0xa06   :  { %v8019_v20 = vperm.slane %v7917_v29, %v13536_v17 }
 0xa08   :  { %8189 = vadd.xlane.f32.xlu1 %v8188_v44  ;;  %v8047_v52 = vsel %vm8046_vm7, %v8019_v20, %v8045_v0  ;;  %v8288_v44 = vmul.f32 %v13249_v5, %v13397_v11 }
 0xa09   :  { %8186 = vadd.xlane.f32.xlu0 %v8185_v49 }
 0xa0a   :  { %8174 = vadd.xlane.f32.xlu2 %v8173_v31  ;;  %v8322_v30 = vsel %vm563_vm0, %v8288_v44, 0.0 }
 0xa0b   :  { %v7935_v28 = vpop.xlane.xlu1 %7934 }
 0xa0c   :  { %v7932_v35 = vpop.xlane.xlu0 %7931 }
 0xa0d   :  { %v7920_v4 = vpop.xlane.xlu2 %7919  ;;  %v8024_v0 = vperm.slane %v7932_v35, %v13536_v17 }
 0xa0e   :  { %v8020_v58 = vperm.slane %v7920_v4, %v13536_v17  ;;  %v8292_v4 = vmul.f32 %v13244_v45, %v13397_v11 }
 0xa10   :  { %8317 = vadd.xlane.f32.xlu1 %v8316_v3  ;;  %v8049_v26 = vsel %vm8048_vm8, %v8020_v58, %v8047_v52  ;;  %v8025_v58 = vperm.slane %v7935_v28, %v13536_v17  ;;  %v8291_v52 = vmul.f32 %v13286_v41, %v13397_v11 }
 0xa11   :  { %8314 = vadd.xlane.f32.xlu0 %v8313_v61  ;;  %v8051_v34 = vsel %vm8050_vm9, %v8021_v59, %v8049_v26  ;;  %v8287_v26 = vmul.f32 %v13220_v62, %v13397_v11  ;;  %v8334_v59 = vsel %vm563_vm0, %v8292_v4, 0.0 }
 0xa12   :  { %8183 = vadd.xlane.f32.xlu2 %v8182_v39  ;;  %v8053_v31 = vsel %vm8052_vm10, %v8022_v21, %v8051_v34  ;;  %v8056_v2 = vsel %vm8042_vm5, %v8025_v58, %v8024_v0  ;;  %v8331_v34 = vsel %vm563_vm0, %v8291_v52, 0.0 }
 0xa13   :  { %v7944_v12 = vpop.xlane.xlu1 %7943  ;;  %v8319_v35 = vsel %vm563_vm0, %v8287_v26, 0.0 }
 0xa14   :  { %v7941_v29 = vpop.xlane.xlu0 %7940 }
 0xa15   :  { %v7929_v1 = vpop.xlane.xlu2 %7928  ;;  %v8027_v44 = vperm.slane %v7941_v29, %v13536_v17 }
 0xa16   :  { %v8023_v49 = vperm.slane %v7929_v1, %v13536_v17  ;;  %v8295_v1 = vmul.f32 %v13279_v19, %v13397_v11 }
 0xa18   :  { %v8055_v60 = vsel %vm8054_vm11, %v8023_v49, %v8053_v31  ;;  %8326 = vadd.xlane.f32.xlu1 %v8325_v10  ;;  %v8294_v49 = vmul.f32 %v13319_v25, %v13397_v11  ;;  %v8028_v31 = vperm.slane %v7944_v12, %v13536_v17  ;;  %v7985_v12 = vld [vmem:[%s13504_s5 + $0x8] sm:$0xff] }
 0xa19   :  { %v8075_v20 = vadd.f32 %v8055_v60, %v7984_v24  ;;  %8323 = vadd.xlane.f32.xlu0 %v8322_v30  ;;  %v8290_v60 = vmul.f32 %v13211_v55, %v13397_v11 }
 0xa1a   :  { %8311 = vadd.xlane.f32.xlu2 %v8310_v9  ;;  %v8343_v9 = vsel %vm563_vm0, %v8295_v1, 0.0  ;;  %v8340_v0 = vsel %vm563_vm0, %v8294_v49, 0.0  ;;  %v8301_v49 = vmul.f32 %v13358_v8, %v13397_v11 }
 0xa1b   :  { %8079 = vst.msk [vmem:[%s13504_s5] sm:$0xff] %vm7871_vm4, %v8075_v20  ;;  %v7953_v32 = vpop.xlane.xlu1 %7952  ;;  %v8328_v46 = vsel %vm563_vm0, %v8290_v60, 0.0 }
 0xa1c   :  { %v7950_v3 = vpop.xlane.xlu0 %7949  ;;  %v8031_v4 = vperm.slane %v7953_v32, %v13536_v17 }
 0xa1d   :  { %v7938_v61 = vpop.xlane.xlu2 %7937  ;;  %v8030_v30 = vperm.slane %v7950_v3, %v13536_v17 }
 0xa1e   :  { %v8026_v39 = vperm.slane %v7938_v61, %v13536_v17 }
 0xa20   :  { %8335 = vadd.xlane.f32.xlu1 %v8334_v59  ;;  %v8057_v28 = vsel %vm8044_vm6, %v8026_v39, %v8056_v2  ;;  %v8298_v39 = vmul.f32 %v13316_v36, %v13397_v11  ;;  %v8297_v59 = vmul.f32 %v13369_v40, %v13397_v11 }
 0xa21   :  { %8332 = vadd.xlane.f32.xlu0 %v8331_v34  ;;  %v8058_v53 = vsel %vm8046_vm7, %v8027_v44, %v8057_v28  ;;  %v8293_v34 = vmul.f32 %v13238_v27, %v13397_v11 }
 0xa22   :  { %8320 = vadd.xlane.f32.xlu2 %v8319_v35  ;;  %v8059_v20 = vsel %vm8048_vm8, %v8028_v31, %v8058_v53  ;;  %v8352_v28 = vsel %vm563_vm0, %v8298_v39, 0.0  ;;  %v8349_v35 = vsel %vm563_vm0, %v8297_v59, 0.0  ;;  %v8303_v39 = vmul.f32 %v13418_v56, %v13397_v11 }
 0xa23   :  { %v7962_v21 = vpop.xlane.xlu1 %7961  ;;  %v8337_v36 = vsel %vm563_vm0, %v8293_v34, 0.0  ;;  %v8299_v34 = vmul.f32 %v13310_v6, %v13397_v11 }
 0xa24   :  { %v7959_v24 = vpop.xlane.xlu0 %7958 }
 0xa25   :  { %v7947_v10 = vpop.xlane.xlu2 %7946  ;;  %v8033_v1 = vperm.slane %v7959_v24, %v13536_v17  ;;  %v8361_v24 = vsel %vm563_vm0, %v8301_v49, 0.0  ;;  %v8355_v6 = vsel %vm563_vm0, %v8299_v34, 0.0 }
 0xa26   :  { %v8029_v29 = vperm.slane %v7947_v10, %v13536_v17  ;;  %v8300_v10 = vmul.f32 %v13392_v16, %v13397_v11 }
 0xa28   :  { %v8060_v58 = vsel %vm8050_vm9, %v8029_v29, %v8059_v20  ;;  %8344 = vadd.xlane.f32.xlu1 %v8343_v9  ;;  %v8034_v20 = vperm.slane %v7962_v21, %v13536_v17  ;;  %v8304_v21 = vmul.f32 %v13345_v37, %v13397_v11 }
 0xa29   :  { %v8061_v52 = vsel %vm8052_vm10, %v8030_v30, %v8060_v58  ;;  %8341 = vadd.xlane.f32.xlu0 %v8340_v0  ;;  %v8296_v30 = vmul.f32 %v13273_v48, %v13397_v11 }
 0xa2a   :  { %v8062_v3 = vsel %vm8054_vm11, %v8031_v4, %v8061_v52  ;;  %8329 = vadd.xlane.f32.xlu2 %v8328_v46 }
 0xa2b   :  { %v8076_v61 = vadd.f32 %v8062_v3, %v7985_v12  ;;  %v7971_v26 = vpop.xlane.xlu1 %7970  ;;  %v8358_v12 = vsel %vm563_vm0, %v8300_v10, 0.0  ;;  %v8346_v0 = vsel %vm563_vm0, %v8296_v30, 0.0  ;;  %v8306_v30 = vmul.f32 %v13331_v47, %v13397_v11 }
 0xa2c   :  { %v7968_v32 = vpop.xlane.xlu0 %7967  ;;  %v8037_v59 = vperm.slane %v7971_v26, %v13536_v17  ;;  %v8367_v26 = vsel %vm563_vm0, %v8303_v39, 0.0 }
 0xa2d   :  { %8080 = vst.msk [vmem:[%s13504_s5 + $0x8] sm:$0xff] %vm7871_vm4, %v8076_v61  ;;  %v7956_v2 = vpop.xlane.xlu2 %7955  ;;  %v8036_v52 = vperm.slane %v7968_v32, %v13536_v17 }
 0xa2e   :  { %v8032_v44 = vperm.slane %v7956_v2, %v13536_v17 }
 0xa30   :  { %8353 = vadd.xlane.f32.xlu1 %v8352_v28  ;;  %v8063_v60 = vsel %vm8042_vm5, %v8033_v1, %v8032_v44 }
 0xa31   :  { %8350 = vadd.xlane.f32.xlu0 %v8349_v35  ;;  %v8064_v4 = vsel %vm8044_vm6, %v8034_v20, %v8063_v60  ;;  %v7986_v35 = vld [vmem:[%s13504_s5 + $0x10] sm:$0xff] }
 0xa32   :  { %8338 = vadd.xlane.f32.xlu2 %v8337_v36  ;;  %v8370_v36 = vsel %vm563_vm0, %v8304_v21, 0.0 }
 0xa33   :  { %v7980_v53 = vpop.xlane.xlu1 %7979 }
 0xa34   :  { %v7977_v31 = vpop.xlane.xlu0 %7976 }
 0xa35   :  { %v7965_v29 = vpop.xlane.xlu2 %7964  ;;  %v8039_v28 = vperm.slane %v7977_v31, %v13536_v17  ;;  %v8307_v31 = vmul.f32 %v13352_v14, %v13397_v11 }
 0xa36   :  { %v8035_v9 = vperm.slane %v7965_v29, %v13536_v17 }
 0xa38   :  { %8362 = vadd.xlane.f32.xlu1 %v8361_v24  ;;  %v8065_v58 = vsel %vm8046_vm7, %v8035_v9, %v8064_v4  ;;  %v8302_v9 = vmul.f32 %v13322_v63, %v13397_v11  ;;  %v8040_v24 = vperm.slane %v7980_v53, %v13536_v17  ;;  %v7987_v4 = vld [vmem:[%s13504_s5 + $0x18] sm:$0x3]  ;;  %v8481_v53 = vmul.f32 %v13198_v13, %v13427_v38 }
 0xa39   :  { %8359 = vadd.xlane.f32.xlu0 %v8358_v12  ;;  %v8066_v3 = vsel %vm8048_vm8, %v8036_v52, %v8065_v58  ;;  %v8379_v58 = vsel %vm563_vm0, %v8307_v31, 0.0  ;;  %v8373_v13 = vsel %vm563_vm0, %v13410_v23, 0.0 }
 0xa3a   :  { %8347 = vadd.xlane.f32.xlu2 %v8346_v0  ;;  %v8067_v44 = vsel %vm8050_vm9, %v8037_v59, %v8066_v3  ;;  %v8376_v0 = vsel %vm563_vm0, %v8306_v30, 0.0  ;;  %v8364_v21 = vsel %vm563_vm0, %v8302_v9, 0.0  ;;  %v8191_v9 = vld [vmem:[%s13504_s5 + $0x1] sm:$0xff] }
 0xa3b   :  { %v8118_v46 = vpop.xlane.xlu1 %8117 }
 0xa3c   :  { %v8115_v61 = vpop.xlane.xlu0 %8114  ;;  %v8222_v3 = vperm.slane %v8118_v46, %v13536_v17 }
 0xa3d   :  { %v7974_v2 = vpop.xlane.xlu2 %7973  ;;  %v8221_v39 = vperm.slane %v8115_v61, %v13536_v17 }
 0xa3e   :  { %v8038_v32 = vperm.slane %v7974_v2, %v13536_v17 }
 0xa40   :  { %v8068_v1 = vsel %vm8052_vm10, %v8038_v32, %v8067_v44  ;;  %8371 = vadd.xlane.f32.xlu1 %v8370_v36  ;;  %v8507_v32 = vsel %vm563_vm0, %v8481_v53, 0.0  ;;  %v8490_v36 = vmul.f32 %v13238_v27, %v13427_v38 }
 0xa41   :  { %v8069_v49 = vsel %vm8054_vm11, %v8039_v28, %v8068_v1  ;;  %8368 = vadd.xlane.f32.xlu0 %v8367_v26  ;;  %v8247_v28 = vsel %vm8042_vm5, %v8222_v3, %v8221_v39  ;;  %v8484_v39 = vmul.f32 %v13220_v62, %v13427_v38 }
 0xa42   :  { %v8077_v10 = vadd.f32 %v8069_v49, %v7986_v35  ;;  %8356 = vadd.xlane.f32.xlu2 %v8355_v6  ;;  %v8385_v35 = vsel %vm563_vm0, %v13406_v50, 0.0  ;;  %v8489_v50 = vmul.f32 %v13244_v45, %v13427_v38 }
 0xa43   :  { %v8127_v60 = vpop.xlane.xlu1 %8126 }
 0xa44   :  { %8081 = vst.msk [vmem:[%s13504_s5 + $0x10] sm:$0xff] %vm7871_vm4, %v8077_v10  ;;  %v8124_v29 = vpop.xlane.xlu0 %8123  ;;  %v8225_v49 = vperm.slane %v8127_v60, %v13536_v17  ;;  %v8382_v60 = vsel %vm563_vm0, %v13416_v51, 0.0 }
 0xa45   :  { %v7983_v20 = vpop.xlane.xlu2 %7982  ;;  %v8224_v46 = vperm.slane %v8124_v29, %v13536_v17  ;;  %v8534_v29 = vsel %vm563_vm0, %v8490_v36, 0.0 }
 0xa46   :  { %v8041_v12 = vperm.slane %v7983_v20, %v13536_v17  ;;  %v8531_v20 = vsel %vm563_vm0, %v8489_v50, 0.0  ;;  %v8500_v50 = vmul.f32 %v13418_v56, %v13427_v38 }
 0xa48   :  { %v8070_v14 = vsel %vm8042_vm5, %v8041_v12, %v8040_v24  ;;  %8380 = vadd.xlane.f32.xlu1 %v8379_v58  ;;  %v8483_v58 = vmul.f32 %v13191_v43, %v13427_v38  ;;  %v8564_v56 = vsel %vm563_vm0, %v8500_v50, 0.0  ;;  %v8494_v50 = vmul.f32 %v13369_v40, %v13427_v38 }
 0xa49   :  { %v8078_v52 = vadd.f32 %v8070_v14, %v7987_v4  ;;  %8377 = vadd.xlane.f32.xlu0 %v8376_v0  ;;  %v8498_v0 = vmul.f32 %v13358_v8, %v13427_v38 }
 0xa4a   :  { %8365 = vadd.xlane.f32.xlu2 %v8364_v21  ;;  %v8482_v21 = vmul.f32 %v13194_v18, %v13427_v38  ;;  %v8513_v51 = vsel %vm563_vm0, %v8483_v58, 0.0  ;;  %v8499_v18 = vmul.f32 %v13322_v63, %v13427_v38  ;;  %v8492_v58 = vmul.f32 %v13279_v19, %v13427_v38 }
 0xa4b   :  { %8083 = vst.msk [vmem:[%s13504_s5 + $0x18] sm:$0x3] %vm8082_vm13, %v8078_v52  ;;  %v8136_v11 = vpop.xlane.xlu1 %8135  ;;  %v8487_v19 = vmul.f32 %v13211_v55, %v13427_v38 }
 0xa4c   :  { %v8133_v59 = vpop.xlane.xlu0 %8132  ;;  %v8228_v27 = vperm.slane %v8136_v11, %v13536_v17  ;;  %v8558_v11 = vsel %vm563_vm0, %v8498_v0, 0.0  ;;  %v8510_v43 = vsel %vm563_vm0, %v8482_v21, 0.0  ;;  %v8561_v62 = vsel %vm563_vm0, %v8499_v18, 0.0 }
 0xa4d   :  { %v8121_v2 = vpop.xlane.xlu2 %8120  ;;  %v8227_v23 = vperm.slane %v8133_v59, %v13536_v17  ;;  %v8493_v18 = vmul.f32 %v13273_v48, %v13427_v38 }
 0xa4e   :  { %v8223_v34 = vperm.slane %v8121_v2, %v13536_v17 }
 0xa4f   :  { %v8543_v48 = vsel %vm563_vm0, %v8493_v18, 0.0 }
 0xa50   :  { %8508 = vadd.xlane.f32.xlu1 %v8507_v32  ;;  %v8248_v44 = vsel %vm8044_vm6, %v8223_v34, %v8247_v28  ;;  %v8497_v32 = vmul.f32 %v13392_v16, %v13427_v38 }
 0xa51   :  { %8386 = vadd.xlane.f32.xlu0 %v8385_v35  ;;  %v8249_v1 = vsel %vm8046_vm7, %v8224_v46, %v8248_v44  ;;  %v8516_v44 = vsel %vm563_vm0, %v8484_v39, 0.0 }
 0xa52   :  { %8374 = vadd.xlane.f32.xlu2 %v8373_v13  ;;  %v8250_v31 = vsel %vm8048_vm8, %v8225_v49, %v8249_v1  ;;  %v8555_v63 = vsel %vm563_vm0, %v8497_v32, 0.0  ;;  %v8194_v55 = vld [vmem:[%s13504_s5 + $0x19] sm:$0x3] }
 0xa53   :  { %v8145_v61 = vpop.xlane.xlu1 %8144 }
 0xa54   :  { %v8142_v26 = vpop.xlane.xlu0 %8141  ;;  %v8231_v28 = vperm.slane %v8145_v61, %v13536_v17  ;;  %v8485_v61 = vmul.f32 %v13249_v5, %v13427_v38 }
 0xa55   :  { %v8130_v6 = vpop.xlane.xlu2 %8129  ;;  %v8230_v3 = vperm.slane %v8142_v26, %v13536_v17 }
 0xa56   :  { %v8226_v10 = vperm.slane %v8130_v6, %v13536_v17  ;;  %v8519_v5 = vsel %vm563_vm0, %v8485_v61, 0.0  ;;  %v8503_v61 = vmul.f32 %v13331_v47, %v13427_v38 }
 0xa58   :  { %v8251_v30 = vsel %vm8050_vm9, %v8226_v10, %v8250_v31  ;;  %8535 = vadd.xlane.f32.xlu1 %v8534_v29  ;;  %v8491_v10 = vmul.f32 %v13319_v25, %v13427_v38 }
 0xa59   :  { %v8252_v45 = vsel %vm8052_vm10, %v8227_v23, %v8251_v30  ;;  %8532 = vadd.xlane.f32.xlu0 %v8531_v20  ;;  %v8192_v30 = vld [vmem:[%s13504_s5 + $0x9] sm:$0xff] }
 0xa5a   :  { %v8253_v24 = vsel %vm8054_vm11, %v8228_v27, %v8252_v45  ;;  %8383 = vadd.xlane.f32.xlu2 %v8382_v60  ;;  %v8537_v25 = vsel %vm563_vm0, %v8491_v10, 0.0 }
 0xa5b   :  { %v8273_v4 = vadd.f32 %v8253_v24, %v8191_v9  ;;  %v8154_v12 = vpop.xlane.xlu1 %8153  ;;  %v8486_v9 = vmul.f32 %v13217_v7, %v13427_v38  ;;  %v8540_v7 = vsel %vm563_vm0, %v8492_v58, 0.0 }
 0xa5c   :  { %v8151_v14 = vpop.xlane.xlu0 %8150  ;;  %v8234_v49 = vperm.slane %v8154_v12, %v13536_v17 }
 0xa5d   :  { %8277 = vst.msk [vmem:[%s13504_s5 + $0x1] sm:$0xff] %vm7871_vm4, %v8273_v4  ;;  %v8139_v52 = vpop.xlane.xlu2 %8138  ;;  %v8233_v36 = vperm.slane %v8151_v14, %v13536_v17  ;;  %v8501_v4 = vmul.f32 %v13345_v37, %v13427_v38  ;;  %v8522_v0 = vsel %vm563_vm0, %v8486_v9, 0.0 }
 0xa5e   :  { %v8229_v53 = vperm.slane %v8139_v52, %v13536_v17 }
 0xa5f   :  { %v8567_v21 = vsel %vm563_vm0, %v8501_v4, 0.0 }
 0xa60   :  { %8514 = vadd.xlane.f32.xlu1 %v8513_v51  ;;  %v8254_v2 = vsel %vm8042_vm5, %v8230_v3, %v8229_v53  ;;  %v8502_v3 = vmul.f32 %v13387_v54, %v13427_v38 }
 0xa61   :  { %8559 = vadd.xlane.f32.xlu0 %v8558_v11  ;;  %v8255_v13 = vsel %vm8044_vm6, %v8231_v28, %v8254_v2  ;;  %v8525_v28 = vsel %vm563_vm0, %v8487_v19, 0.0 }
 0xa62   :  { %8511 = vadd.xlane.f32.xlu2 %v8510_v43 }
 0xa63   :  { %v8163_v8 = vpop.xlane.xlu1 %8162 }
 0xa64   :  { %v8160_v59 = vpop.xlane.xlu0 %8159  ;;  %v8237_v52 = vperm.slane %v8163_v8, %v13536_v17 }
 0xa65   :  { %v8148_v34 = vpop.xlane.xlu2 %8147  ;;  %v8236_v31 = vperm.slane %v8160_v59, %v13536_v17 }
 0xa66   :  { %v8232_v35 = vperm.slane %v8148_v34, %v13536_v17 }
 0xa68   :  { %8517 = vadd.xlane.f32.xlu1 %v8516_v44  ;;  %v8256_v46 = vsel %vm8046_vm7, %v8232_v35, %v8255_v13  ;;  %v8570_v44 = vsel %vm563_vm0, %v8502_v3, 0.0  ;;  %v8582_v3 = vsel %vm563_vm0, %v13454_v57, 0.0 }
 0xa69   :  { %8562 = vadd.xlane.f32.xlu0 %v8561_v62  ;;  %v8257_v1 = vsel %vm8048_vm8, %v8233_v36, %v8256_v46 }
 0xa6a   :  { %8556 = vadd.xlane.f32.xlu2 %v8555_v63  ;;  %v8258_v29 = vsel %vm8050_vm9, %v8234_v49, %v8257_v1  ;;  %v8488_v63 = vmul.f32 %v13286_v41, %v13427_v38  ;;  %v8193_v41 = vld [vmem:[%s13504_s5 + $0x11] sm:$0xff] }
 0xa6b   :  { %v8172_v16 = vpop.xlane.xlu1 %8171 }
 0xa6c   :  { %v8169_v26 = vpop.xlane.xlu0 %8168  ;;  %v8240_v2 = vperm.slane %v8172_v16, %v13536_v17  ;;  %v8528_v10 = vsel %vm563_vm0, %v8488_v63, 0.0 }
 0xa6d   :  { %v8157_v6 = vpop.xlane.xlu2 %8156  ;;  %v8239_v37 = vperm.slane %v8169_v26, %v13536_v17 }
 0xa6e   :  { %v8235_v23 = vperm.slane %v8157_v6, %v13536_v17 }
 0xa70   :  { %v8259_v27 = vsel %vm8052_vm10, %v8235_v23, %v8258_v29  ;;  %8520 = vadd.xlane.f32.xlu1 %v8519_v5  ;;  %v8546_v29 = vsel %vm563_vm0, %v8494_v50, 0.0  ;;  %v68_v5 = vstv %s8803_s9 }
 0xa71   :  { %v8260_v20 = vsel %vm8054_vm11, %v8236_v31, %v8259_v27  ;;  %8565 = vadd.xlane.f32.xlu0 %v8564_v56  ;;  %v8573_v31 = vsel %vm563_vm0, %v8503_v61, 0.0  ;;  %69 = vst [vmem:[#allocation3] sm:$0x1] %v68_v5  ;;  %v8579_v56 = vsel %vm563_vm0, %v13434_v42, 0.0 }
 0xa72   :  { %v8274_v45 = vadd.f32 %v8260_v20, %v8192_v30  ;;  %8538 = vadd.xlane.f32.xlu2 %v8537_v25  ;;  %v8576_v30 = vsel %vm563_vm0, %v13440_v33, 0.0  ;;  %v8549_v25 = vsel %vm563_vm0, %v13444_v15, 0.0  ;;  %v8552_v15 = vsel %vm563_vm0, %v13450_v22, 0.0 }
 0xa73   :  { %v8181_v60 = vpop.xlane.xlu1 %8180 }
 0xa74   :  { %8278 = vst.msk [vmem:[%s13504_s5 + $0x9] sm:$0xff] %vm7871_vm4, %v8274_v45  ;;  %v8178_v24 = vpop.xlane.xlu0 %8177  ;;  %v8243_v1 = vperm.slane %v8181_v60, %v13536_v17 }
 0xa75   :  { %v8166_v12 = vpop.xlane.xlu2 %8165  ;;  %v8242_v62 = vperm.slane %v8178_v24, %v13536_v17 }
 0xa76   :  { %v8238_v14 = vperm.slane %v8166_v12, %v13536_v17 }
 0xa78   :  { %8523 = vadd.xlane.f32.xlu1 %v8522_v0  ;;  %v8261_v51 = vsel %vm8042_vm5, %v8238_v14, %v8237_v52 }
 0xa79   :  { %8568 = vadd.xlane.f32.xlu0 %v8567_v21  ;;  %v8262_v8 = vsel %vm8044_vm6, %v8239_v37, %v8261_v51 }
 0xa7a   :  { %8541 = vadd.xlane.f32.xlu2 %v8540_v7  ;;  %v8263_v54 = vsel %vm8046_vm7, %v8240_v2, %v8262_v8  ;;  %v9820_v8 = vld [vmem:[#allocation3] ss:$0 sm:$0xff] }
 0xa7b   :  { %v8190_v11 = vpop.xlane.xlu1 %8189  ;;  %v8388_v22 = vld [vmem:[%s13504_s5 + $0x2] sm:$0xff] }
 0xa7c   :  { %v8246_v53 = vperm.slane %v8190_v11, %v13536_v17  ;;  %v8187_v43 = vpop.xlane.xlu0 %8186 }
 0xa7d   :  { %v8245_v39 = vperm.slane %v8187_v43, %v13536_v17  ;;  %v8175_v59 = vpop.xlane.xlu2 %8174 }
 0xa7e   :  { %v8241_v34 = vperm.slane %v8175_v59, %v13536_v17 }
 0xa7f   :  { %v8268_v32 = vsel %vm8042_vm5, %v8246_v53, %v8245_v39 }
 0xa80   :  { %v8276_v35 = vadd.f32 %v8268_v32, %v8194_v55  ;;  %8526 = vadd.xlane.f32.xlu1 %v8525_v28  ;;  %v8264_v13 = vsel %vm8048_vm8, %v8241_v34, %v8263_v54 }
 0xa81   :  { %8571 = vadd.xlane.f32.xlu0 %v8570_v44  ;;  %v8265_v36 = vsel %vm8050_vm9, %v8242_v62, %v8264_v13 }
 0xa82   :  { %8280 = vst.msk [vmem:[%s13504_s5 + $0x19] sm:$0x3] %vm8082_vm13, %v8276_v35  ;;  %8544 = vadd.xlane.f32.xlu2 %v8543_v48  ;;  %v8266_v6 = vsel %vm8052_vm10, %v8243_v1, %v8265_v36 }
 0xa83   :  { %v8318_v46 = vpop.xlane.xlu1 %8317 }
 0xa84   :  { %v8315_v16 = vpop.xlane.xlu0 %8314  ;;  %v8420_v42 = vperm.slane %v8318_v46, %v13536_v17 }
 0xa85   :  { %v8184_v26 = vpop.xlane.xlu2 %8183  ;;  %v8419_v45 = vperm.slane %v8315_v16, %v13536_v17 }
 0xa86   :  { %v8244_v49 = vperm.slane %v8184_v26, %v13536_v17 }
 0xa88   :  { %v8267_v23 = vsel %vm8054_vm11, %v8244_v49, %v8266_v6  ;;  %8529 = vadd.xlane.f32.xlu1 %v8528_v10 }
 0xa89   :  { %v8275_v47 = vadd.f32 %v8267_v23, %v8193_v41  ;;  %8574 = vadd.xlane.f32.xlu0 %v8573_v31 }
 0xa8a   :  { %8547 = vadd.xlane.f32.xlu2 %v8546_v29 }
 0xa8b   :  { %8279 = vst.msk [vmem:[%s13504_s5 + $0x11] sm:$0xff] %vm7871_vm4, %v8275_v47  ;;  %v8327_v40 = vpop.xlane.xlu1 %8326 }
 0xa8c   :  { %v8324_v38 = vpop.xlane.xlu0 %8323  ;;  %v8423_v7 = vperm.slane %v8327_v40, %v13536_v17 }
 0xa8d   :  { %v8312_v27 = vpop.xlane.xlu2 %8311  ;;  %v8422_v14 = vperm.slane %v8324_v38, %v13536_v17 }
 0xa8e   :  { %v8418_v20 = vperm.slane %v8312_v27, %v13536_v17 }
 0xa90   :  { %8580 = vadd.xlane.f32.xlu1 %v8579_v56  ;;  %v8444_v24 = vsel %vm8042_vm5, %v8419_v45, %v8418_v20 }
 0xa91   :  { %8577 = vadd.xlane.f32.xlu0 %v8576_v30  ;;  %v8445_v33 = vsel %vm8044_vm6, %v8420_v42, %v8444_v24 }
 0xa92   :  { %8550 = vadd.xlane.f32.xlu2 %v8549_v25  ;;  %v8389_v6 = vld [vmem:[%s13504_s5 + $0xa] sm:$0xff] }
 0xa93   :  { %v8336_v60 = vpop.xlane.xlu1 %8335 }
 0xa94   :  { %v8333_v9 = vpop.xlane.xlu0 %8332  ;;  %v8426_v55 = vperm.slane %v8336_v60, %v13536_v17 }
 0xa95   :  { %v8321_v4 = vpop.xlane.xlu2 %8320  ;;  %v8425_v11 = vperm.slane %v8333_v9, %v13536_v17 }
 0xa96   :  { %v8421_v12 = vperm.slane %v8321_v4, %v13536_v17 }
 0xa98   :  { %v8446_v58 = vsel %vm8046_vm7, %v8421_v12, %v8445_v33 }
 0xa99   :  { %v8447_v52 = vsel %vm8048_vm8, %v8422_v14, %v8446_v58  ;;  %v8390_v58 = vld [vmem:[%s13504_s5 + $0x12] sm:$0xff] }
 0xa9a   :  { %8553 = vadd.xlane.f32.xlu2 %v8552_v15  ;;  %v8448_v19 = vsel %vm8050_vm9, %v8423_v7, %v8447_v52 }
 0xa9b   :  { %v8345_v0 = vpop.xlane.xlu1 %8344 }
 0xa9c   :  { %v8342_v21 = vpop.xlane.xlu0 %8341  ;;  %v8429_v13 = vperm.slane %v8345_v0, %v13536_v17 }
 0xa9d   :  { %v8330_v51 = vpop.xlane.xlu2 %8329  ;;  %v8428_v28 = vperm.slane %v8342_v21, %v13536_v17 }
 0xa9e   :  { %v8424_v37 = vperm.slane %v8330_v51, %v13536_v17 }
 0xaa0   :  { %v8449_v53 = vsel %vm8052_vm10, %v8424_v37, %v8448_v19  ;;  %v8391_v37 = vld [vmem:[%s13504_s5 + $0x1a] sm:$0x3] }
 0xaa1   :  { %v8450_v43 = vsel %vm8054_vm11, %v8425_v11, %v8449_v53 }
 0xaa2   :  { %v8470_v39 = vadd.f32 %v8450_v43, %v8388_v22  ;;  %8583 = vadd.xlane.f32.xlu2 %v8582_v3 }
 0xaa3   :  { %v8354_v59 = vpop.xlane.xlu1 %8353 }
 0xaa4   :  { %8474 = vst.msk [vmem:[%s13504_s5 + $0x2] sm:$0xff] %vm7871_vm4, %v8470_v39  ;;  %v8351_v18 = vpop.xlane.xlu0 %8350  ;;  %v8432_v1 = vperm.slane %v8354_v59, %v13536_v17 }
 0xaa5   :  { %v8339_v2 = vpop.xlane.xlu2 %8338  ;;  %8683 = vperm.xlu0 %9770, %v9820_v8   ;;  %v8431_v63 = vperm.slane %v8351_v18, %v13536_v17 }
 0xaa6   :  { %v8427_v34 = vperm.slane %v8339_v2, %v13536_v17 }
 0xaa8   :  { %v8451_v32 = vsel %vm8042_vm5, %v8427_v34, %v8426_v55 }
 0xaa9   :  { %v8452_v54 = vsel %vm8044_vm6, %v8428_v28, %v8451_v32 }
 0xaaa   :  { %v8453_v62 = vsel %vm8046_vm7, %v8429_v13, %v8452_v54 }
 0xaab   :  { %v8363_v35 = vpop.xlane.xlu1 %8362 }
 0xaac   :  { %v8360_v57 = vpop.xlane.xlu0 %8359  ;;  %v8435_v31 = vperm.slane %v8363_v35, %v13536_v17 }
 0xaad   :  { %v8348_v44 = vpop.xlane.xlu2 %8347  ;;  %v8434_v47 = vperm.slane %v8360_v57, %v13536_v17 }
 0xaae   :  { %v8430_v48 = vperm.slane %v8348_v44, %v13536_v17 }
 0xaaf   :  { %v8458_v38 = vsel %vm8042_vm5, %v8435_v31, %v8434_v47 }
 0xab0   :  { %v8454_v46 = vsel %vm8048_vm8, %v8430_v48, %v8453_v62 }
 0xab1   :  { %v8455_v16 = vsel %vm8050_vm9, %v8431_v63, %v8454_v46 }
 0xab2   :  { %v8456_v49 = vsel %vm8052_vm10, %v8432_v1, %v8455_v16 }
 0xab3   :  { %v8372_v36 = vpop.xlane.xlu1 %8371 }
 0xab4   :  { %v8369_v61 = vpop.xlane.xlu0 %8368  ;;  %v8438_v45 = vperm.slane %v8372_v36, %v13536_v17 }
 0xab5   :  { %v8357_v26 = vpop.xlane.xlu2 %8356  ;;  %v8437_v56 = vperm.slane %v8369_v61, %v13536_v17 }
 0xab6   :  { %v8433_v50 = vperm.slane %v8357_v26, %v13536_v17 }
 0xab8   :  { %v8457_v10 = vsel %vm8054_vm11, %v8433_v50, %v8456_v49 }
 0xab9   :  { %v8471_v41 = vadd.f32 %v8457_v10, %v8389_v6 }
 0xabb   :  { %8475 = vst.msk [vmem:[%s13504_s5 + $0xa] sm:$0xff] %vm7871_vm4, %v8471_v41  ;;  %v8381_v23 = vpop.xlane.xlu1 %8380 }
 0xabc   :  { %v8378_v29 = vpop.xlane.xlu0 %8377  ;;  %v8441_v42 = vperm.slane %v8381_v23, %v13536_v17 }
 0xabd   :  { %v8366_v5 = vpop.xlane.xlu2 %8365  ;;  %v8440_v24 = vperm.slane %v8378_v29, %v13536_v17 }
 0xabe   :  { %v8436_v40 = vperm.slane %v8366_v5, %v13536_v17 }
 0xac0   :  { %v8459_v27 = vsel %vm8044_vm6, %v8436_v40, %v8458_v38 }
 0xac1   :  { %v8460_v20 = vsel %vm8046_vm7, %v8437_v56, %v8459_v27 }
 0xac2   :  { %v8461_v4 = vsel %vm8048_vm8, %v8438_v45, %v8460_v20  ;;  %v8585_v29 = vld [vmem:[%s13504_s5 + $0x3] sm:$0xff] }
 0xac3   :  { %v8509_v30 = vpop.xlane.xlu1 %8508 }
 0xac4   :  { %v8387_v25 = vpop.xlane.xlu0 %8386  ;;  %v8615_v57 = vperm.slane %v8509_v30, %v13536_v17 }
 0xac5   :  { %v8375_v60 = vpop.xlane.xlu2 %8374  ;;  %v8443_v7 = vperm.slane %v8387_v25, %v13536_v17 }
 0xac6   :  { %v8439_v9 = vperm.slane %v8375_v60, %v13536_v17 }
 0xac8   :  { %v8462_v12 = vsel %vm8050_vm9, %v8439_v9, %v8461_v4 }
 0xac9   :  { %v8463_v33 = vsel %vm8052_vm10, %v8440_v24, %v8462_v12 }
 0xaca   :  { %v8464_v15 = vsel %vm8054_vm11, %v8441_v42, %v8463_v33 }
 0xacb   :  { %v8472_v14 = vadd.f32 %v8464_v15, %v8390_v58  ;;  %v13872_v0 = vpop.xlane.xlu1 %8535 }
 0xacc   :  { %v13874_v52 = vpop.xlane.xlu0 %8532  ;;  %v8624_v12 = vperm.slane %v13872_v0, %v13536_v17 }
 0xacd   :  { %8476 = vst.msk [vmem:[%s13504_s5 + $0x12] sm:$0xff] %vm7871_vm4, %v8472_v14  ;;  %v8384_v21 = vpop.xlane.xlu2 %8383  ;;  %v8623_v33 = vperm.slane %v13874_v52, %v13536_v17 }
 0xace   :  { %v8442_v51 = vperm.slane %v8384_v21, %v13536_v17 }
 0xad0   :  { %v8465_v11 = vsel %vm8042_vm5, %v8443_v7, %v8442_v51 }
 0xad1   :  { %v8473_v19 = vadd.f32 %v8465_v11, %v8391_v37  ;;  %v8648_v11 = vsel %vm8042_vm5, %v8624_v12, %v8623_v33 }
 0xad3   :  { %8477 = vst.msk [vmem:[%s13504_s5 + $0x1a] sm:$0x3] %vm8082_vm13, %v8473_v19  ;;  %v8515_v53 = vpop.xlane.xlu1 %8514 }
 0xad4   :  { %v8560_v22 = vpop.xlane.xlu0 %8559  ;;  %v8617_v44 = vperm.slane %v8515_v53, %v13536_v17 }
 0xad5   :  { %v8512_v43 = vpop.xlane.xlu2 %8511  ;;  %v8632_v41 = vperm.slane %v8560_v22, %v13536_v17 }
 0xad6   :  { %v8616_v28 = vperm.slane %v8512_v43, %v13536_v17 }
 0xad8   :  { %v8641_v48 = vsel %vm8042_vm5, %v8616_v28, %v8615_v57 }
 0xad9   :  { %v8642_v36 = vsel %vm8044_vm6, %v8617_v44, %v8641_v48 }
 0xada   :  { %v8587_v14 = vld [vmem:[%s13504_s5 + $0x13] sm:$0xff] }
 0xadb   :  { %v8518_v3 = vpop.xlane.xlu1 %8517 }
 0xadc   :  { %v8563_v8 = vpop.xlane.xlu0 %8562  ;;  %v8618_v62 = vperm.slane %v8518_v3, %v13536_v17 }
 0xadd   :  { %v8557_v39 = vpop.xlane.xlu2 %8556  ;;  %v8633_v47 = vperm.slane %v8563_v8, %v13536_v17 }
 0xade   :  { %v8643_v61 = vsel %vm8046_vm7, %v8618_v62, %v8642_v36  ;;  %v8631_v1 = vperm.slane %v8557_v39, %v13536_v17 }
 0xae0   :  { %v8655_v40 = vsel %vm8042_vm5, %v8632_v41, %v8631_v1 }
 0xae1   :  { %v8656_v20 = vsel %vm8044_vm6, %v8633_v47, %v8655_v40 }
 0xae3   :  { %v8521_v59 = vpop.xlane.xlu1 %8520 }
 0xae4   :  { %v8566_v18 = vpop.xlane.xlu0 %8565  ;;  %v8619_v46 = vperm.slane %v8521_v59, %v13536_v17  ;;  %v8586_v59 = vld [vmem:[%s13504_s5 + $0xb] sm:$0xff] }
 0xae5   :  { %v8539_v2 = vpop.xlane.xlu2 %8538  ;;  %v8634_v38 = vperm.slane %v8566_v18, %v13536_v17 }
 0xae6   :  { %v8644_v26 = vsel %vm8048_vm8, %v8619_v46, %v8643_v61  ;;  %v8625_v15 = vperm.slane %v8539_v2, %v13536_v17 }
 0xae7   :  { %v8657_v45 = vsel %vm8046_vm7, %v8634_v38, %v8656_v20 }
 0xae8   :  { %v8649_v52 = vsel %vm8044_vm6, %v8625_v15, %v8648_v11 }
 0xaeb   :  { %v8524_v34 = vpop.xlane.xlu1 %8523 }
 0xaec   :  { %v8569_v55 = vpop.xlane.xlu0 %8568  ;;  %v8620_v63 = vperm.slane %v8524_v34, %v13536_v17 }
 0xaed   :  { %v8542_v32 = vpop.xlane.xlu2 %8541  ;;  %v8635_v56 = vperm.slane %v8569_v55, %v13536_v17 }
 0xaee   :  { %v8645_v49 = vsel %vm8050_vm9, %v8620_v63, %v8644_v26  ;;  %v8626_v7 = vperm.slane %v8542_v32, %v13536_v17 }
 0xaef   :  { %v8658_v60 = vsel %vm8048_vm8, %v8635_v56, %v8657_v45 }
 0xaf0   :  { %v8650_v53 = vsel %vm8046_vm7, %v8626_v7, %v8649_v52 }
 0xaf3   :  { %v8527_v35 = vpop.xlane.xlu1 %8526 }
 0xaf4   :  { %v8572_v54 = vpop.xlane.xlu0 %8571  ;;  %v8621_v16 = vperm.slane %v8527_v35, %v13536_v17 }
 0xaf5   :  { %v8545_v13 = vpop.xlane.xlu2 %8544  ;;  %v8636_v30 = vperm.slane %v8572_v54, %v13536_v17  ;;  %v8588_v54 = vld [vmem:[%s13504_s5 + $0x1b] sm:$0x3] }
 0xaf6   :  { %v8646_v23 = vsel %vm8052_vm10, %v8621_v16, %v8645_v49  ;;  %v8627_v37 = vperm.slane %v8545_v13, %v13536_v17 }
 0xaf7   :  { %v8659_v24 = vsel %vm8050_vm9, %v8636_v30, %v8658_v60 }
 0xaf8   :  { %v8651_v22 = vsel %vm8048_vm8, %v8627_v37, %v8650_v53 }
 0xafb   :  { %v8530_v50 = vpop.xlane.xlu1 %8529 }
 0xafc   :  { %v8622_v6 = vperm.slane %v8530_v50, %v13536_v17  ;;  %v8575_v10 = vpop.xlane.xlu0 %8574 }
 0xafd   :  { %v8548_v31 = vpop.xlane.xlu2 %8547  ;;  %v8637_v25 = vperm.slane %v8575_v10, %v13536_v17 }
 0xafe   :  { %v8647_v5 = vsel %vm8054_vm11, %v8622_v6, %v8646_v23  ;;  %v8628_v0 = vperm.slane %v8548_v31, %v13536_v17 }
 0xaff   :  { %v8667_v27 = vadd.f32 %v8647_v5, %v8585_v29  ;;  %v8660_v58 = vsel %vm8052_vm10, %v8637_v25, %v8659_v24 }
 0xb00   :  { %v8652_v3 = vsel %vm8050_vm9, %v8628_v0, %v8651_v22 }
 0xb01   :  { %8671 = vst.msk [vmem:[%s13504_s5 + $0x3] sm:$0xff] %vm7871_vm4, %v8667_v27 }
 0xb03   :  { %v8581_v34 = vpop.xlane.xlu1 %8580 }
 0xb04   :  { %v8578_v9 = vpop.xlane.xlu0 %8577  ;;  %v8639_v32 = vperm.slane %v8581_v34, %v13536_v17 }
 0xb05   :  { %v8638_v4 = vperm.slane %v8578_v9, %v13536_v17  ;;  %v8551_v42 = vpop.xlane.xlu2 %8550 }
 0xb06   :  { %v8629_v19 = vperm.slane %v8551_v42, %v13536_v17 }
 0xb07   :  { %v8661_v21 = vsel %vm8054_vm11, %v8638_v4, %v8660_v58 }
 0xb08   :  { %v8669_v51 = vadd.f32 %v8661_v21, %v8587_v14  ;;  %v8653_v39 = vsel %vm8052_vm10, %v8629_v19, %v8652_v3  ;;  %v8675_v57 = vld [vmem:[%s13504_s5] sm:$0xff] }
 0xb0a   :  { %8673 = vst.msk [vmem:[%s13504_s5 + $0x13] sm:$0xff] %vm7871_vm4, %v8669_v51 }
 0xb0d   :  { %v8554_v43 = vpop.xlane.xlu2 %8553 }
 0xb0e   :  { %v8630_v8 = vperm.slane %v8554_v43, %v13536_v17 }
 0xb10   :  { %v8654_v18 = vsel %vm8054_vm11, %v8630_v8, %v8653_v39 }
 0xb11   :  { %v8668_v2 = vadd.f32 %v8654_v18, %v8586_v59 }
 0xb13   :  { %8672 = vst.msk [vmem:[%s13504_s5 + $0xb] sm:$0xff] %vm7871_vm4, %v8668_v2 }
 0xb15   :  { %v8584_v55 = vpop.xlane.xlu2 %8583 }
 0xb16   :  { %v8640_v28 = vperm.slane %v8584_v55, %v13536_v17 }
 0xb17   :  { %v8684_v35 = vpop.permute.xlu0 %8683 }
 0xb18   :  { %v8662_v44 = vsel %vm8042_vm5, %v8640_v28, %v8639_v32  ;;  %v8686_v13 = vadd.f32 %v8684_v35, %v8675_v57 }
 0xb19   :  { %v8670_v48 = vadd.f32 %v8662_v44, %v8588_v54 }
 0xb1a   :  { %v8676_v62 = vld [vmem:[%s13504_s5 + $0x8] sm:$0xff]  ;;  %v8677_v46 = vld [vmem:[%s13504_s5 + $0x10] sm:$0xff]  ;;  %v9593_v63 = vmul.f32 -1.442695, %v8686_v13 }
 0xb1b   :  { %8674 = vst.msk [vmem:[%s13504_s5 + $0x1b] sm:$0x3] %vm8082_vm13, %v8670_v48  ;;  %v8687_v36 = vadd.f32 %v8684_v35, %v8676_v62  ;;  %v8688_v16 = vadd.f32 %v8684_v35, %v8677_v46 }
 0xb1c   :  { %10027 = vpow2.f32 %v9593_v63 }
 0xb1d   :  { %v9594_v61 = vmul.f32 -1.442695, %v8687_v36  ;;  %v9595_v1 = vmul.f32 -1.442695, %v8688_v16 }
 0xb1f   :  { %10029 = vpow2.f32 %v9594_v61 }
 0xb20   :  { %10031 = vpow2.f32 %v9595_v1 }
 0xb22   :  { %v10028_v17 = vpop.eup %10027  ;;  %v8678_v26 = vld [vmem:[%s13504_s5 + $0x18] sm:$0x1f] }
 0xb23   :  { %v8689_v50 = vadd.f32 %v8684_v35, %v8678_v26  ;;  %v8702_v49 = vadd.f32 1.0, %v10028_v17 }
 0xb25   :  { %v10030_v6 = vpop.eup %10029  ;;  %v9596_v10 = vmul.f32 -1.442695, %v8689_v50  ;;  %10033 = vrcp.f32 %v8702_v49  ;;  %v8715_v40 = vand.u32 2147483647, %v8702_v49  ;;  %v8717_v30 = vand.u32 2147483648, %v8702_v49 }
 0xb26   :  { %v10032_v41 = vpop.eup %10031  ;;  %v8703_v23 = vadd.f32 1.0, %v10030_v6  ;;  %vm8711_vm14 = vweird.f32 %v8702_v49 }
 0xb27   :  { %10035 = vpow2.f32 %v9596_v10  ;;  %v8704_v31 = vadd.f32 1.0, %v10032_v41  ;;  %vm8716_vm15 = vcmp.eq.f32.partialorder %v8715_v40, 8.507059e+37  ;;  %v8718_v4 = vor.u32 1.1754944e-38, %v8717_v30 }
 0xb28   :  { %10037 = vrcp.f32 %v8703_v23  ;;  %v8732_v42 = vand.u32 2147483648, %v8703_v23  ;;  %v8730_v58 = vand.u32 2147483647, %v8703_v23  ;;  %vm8726_vm5 = vweird.f32 %v8703_v23 }
 0xb29   :  { %10039 = vrcp.f32 %v8704_v31  ;;  %v8747_v15 = vand.u32 2147483648, %v8704_v31  ;;  %v8745_v7 = vand.u32 2147483647, %v8704_v31  ;;  %vm8741_vm7 = vweird.f32 %v8704_v31 }
 0xb2a   :  { %v8733_v0 = vor.u32 1.1754944e-38, %v8732_v42  ;;  %vm8731_vm8 = vcmp.eq.f32.partialorder %v8730_v58, 8.507059e+37 }
 0xb2b   :  { %v10034_v47 = vpop.eup %10033  ;;  %v8748_v53 = vor.u32 1.1754944e-38, %v8747_v15  ;;  %vm8746_vm10 = vcmp.eq.f32.partialorder %v8745_v7, 8.507059e+37 }
 0xb2c   :  { %v8707_v29 = vmul.f32 %v10034_v47, %v8702_v49  ;;  %vm8712_vm0 = vweird.f32 %v10034_v47 }
 0xb2d   :  { %v10036_v5 = vpop.eup %10035  ;;  %vm8713_vm1 = vmor %vm8711_vm14, %vm8712_vm0 }
 0xb2e   :  { %v10038_v38 = vpop.eup %10037  ;;  %v8705_v27 = vadd.f32 1.0, %v10036_v5  ;;  %v8708_v56 = vsub.f32 1.0, %v8707_v29 }
 0xb2f   :  { %v10040_v20 = vpop.eup %10039  ;;  %v8722_v25 = vmul.f32 %v10038_v38, %v8703_v23  ;;  %vm8727_vm2 = vweird.f32 %v10038_v38 }
 0xb30   :  { %v8709_v45 = vmul.f32 %v10034_v47, %v8708_v56  ;;  %v8737_v60 = vmul.f32 %v10040_v20, %v8704_v31  ;;  %10041 = vrcp.f32 %v8705_v27  ;;  %vm8742_vm3 = vweird.f32 %v10040_v20  ;;  %vm8728_vm6 = vmor %vm8726_vm5, %vm8727_vm2 }
 0xb31   :  { %v8723_v9 = vsub.f32 1.0, %v8722_v25  ;;  %vm8743_vm9 = vmor %vm8741_vm7, %vm8742_vm3  ;;  %v8762_v59 = vand.u32 2147483648, %v8705_v27  ;;  %v8760_v2 = vand.u32 2147483647, %v8705_v27  ;;  %vm8756_vm13 = vweird.f32 %v8705_v27 }
 0xb32   :  { %v8710_v24 = vadd.f32 %v10034_v47, %v8709_v45  ;;  %v8738_v12 = vsub.f32 1.0, %v8737_v60 }
 0xb33   :  { %v8724_v33 = vmul.f32 %v10038_v38, %v8723_v9  ;;  %v8763_v55 = vor.u32 1.1754944e-38, %v8762_v59  ;;  %vm8761_vm14 = vcmp.eq.f32.partialorder %v8760_v2, 8.507059e+37 }
 0xb34   :  { %v8714_v14 = vsel %vm8713_vm1, %v10034_v47, %v8710_v24  ;;  %v8739_v21 = vmul.f32 %v10040_v20, %v8738_v12 }
 0xb35   :  { %v8719_v51 = vsel %vm8716_vm15, %v8718_v4, %v8714_v14  ;;  %v8725_v37 = vadd.f32 %v10038_v38, %v8724_v33 }
 0xb36   :  { %v10042_v11 = vpop.eup %10041  ;;  %v8740_v52 = vadd.f32 %v10040_v20, %v8739_v21  ;;  %8766 = vst.msk [vmem:[%s13504_s5] sm:$0xff] %vm7871_vm4, %v8719_v51 }
 0xb37   :  { %v8729_v19 = vsel %vm8728_vm6, %v10038_v38, %v8725_v37  ;;  %v8752_v22 = vmul.f32 %v10042_v11, %v8705_v27  ;;  %vm8757_vm11 = vweird.f32 %v10042_v11 }
 0xb38   :  { %v8734_v43 = vsel %vm8731_vm8, %v8733_v0, %v8729_v19  ;;  %v8744_v3 = vsel %vm8743_vm9, %v10040_v20, %v8740_v52  ;;  %vm8758_vm0 = vmor %vm8756_vm13, %vm8757_vm11 }
 0xb39   :  { %v8749_v8 = vsel %vm8746_vm10, %v8748_v53, %v8744_v3  ;;  %v8753_v39 = vsub.f32 1.0, %v8752_v22  ;;  %8767 = vst.msk [vmem:[%s13504_s5 + $0x8] sm:$0xff] %vm7871_vm4, %v8734_v43 }
 0xb3a   :  { %8768 = vst.msk [vmem:[%s13504_s5 + $0x10] sm:$0xff] %vm7871_vm4, %v8749_v8 }
 0xb3b   :  { %v8754_v18 = vmul.f32 %v10042_v11, %v8753_v39 }
 0xb3d   :  { %v8755_v34 = vadd.f32 %v10042_v11, %v8754_v18 }
 0xb3f   :  { %v8759_v32 = vsel %vm8758_vm0, %v10042_v11, %v8755_v34 }
 0xb40   :  { %v8764_v28 = vsel %vm8761_vm14, %v8763_v55, %v8759_v32 }
 0xb41   :  { %8769 = vst.msk [vmem:[%s13504_s5 + $0x18] sm:$0x1f] %vm7875_vm12, %v8764_v28 }

</bundles_post_ra>
